<compile_context>
chip_gen: v6e
topology: v6e:2x2x1
jax: 0.10.0
libtpu: 0.0.40
codegen_flags: <defaults>
</compile_context>

<pallas_src>
import functools

import jax
import jax.numpy as jnp
from jax.experimental import pallas as pl
from jax.experimental.pallas import tpu as pltpu


# ----------------------------------------------------------------------------
# Kernel 1: generic row-tiled matmul used for the two separable resize passes.
#   x2d: (R, K)  w: (K, Ncol)   (K, Ncol are the tiny resize dims)
# ----------------------------------------------------------------------------
def _resize_kernel(x_ref, w_ref, o_ref):
    o_ref[...] = jnp.dot(x_ref[...], w_ref[...],
                         preferred_element_type=jnp.float32).astype(o_ref.dtype)


def resize_matmul(x2d, w, tr=512):
    R, K = x2d.shape
    _, Ncol = w.shape
    Rp = ((R + tr - 1) // tr) * tr          # pad rows to a tile multiple
    if Rp != R:
        x2d = jnp.pad(x2d, ((0, Rp - R), (0, 0)))
    out = pl.pallas_call(
        _resize_kernel,
        out_shape=jax.ShapeDtypeStruct((Rp, Ncol), jnp.float32),
        grid_spec=pltpu.PrefetchScalarGridSpec(
            num_scalar_prefetch=0,
            grid=(Rp // tr,),
            in_specs=[
                pl.BlockSpec((tr, K), lambda i: (i, 0)),
                pl.BlockSpec((K, Ncol), lambda i: (0, 0)),
            ],
            out_specs=pl.BlockSpec((tr, Ncol), lambda i: (i, 0)),
        ),
        compiler_params=pltpu.CompilerParams(dimension_semantics=("parallel",)),
    )(x2d, w)
    return out[:R]


# ----------------------------------------------------------------------------
# Kernel 2: fused main kernel (per batch image), channel-major layout.
#   skip_ref: (Cskip, S)   up_ref: (C, S)   w1_ref: (C, Cskip)
#   s1/b1/s3/b3: (C, 1)    w3_ref: (9, C, C)   mask_ref: (9, 1, S)
#   o_ref: (C, S)          ypad_ref (scratch): (C, S + 256)
# Computes:
#   y   = up + relu(bn1(w1 @ skip))
#   out = relu(bn3(sum_k w3[k] @ shift_k(y)))       (3x3 conv, pad=1)
# ----------------------------------------------------------------------------
def _fused_main_kernel(skip_ref, up_ref, w1_ref, s1_ref, b1_ref,
                       w3_ref, s3_ref, b3_ref, mask_ref,
                       o_ref, ypad_ref, *, ws):
    c, s = o_ref.shape

    # 1x1 bottleneck + folded BN + ReLU (channels on rows, spatial on lanes)
    skip_bn = jnp.dot(w1_ref[...], skip_ref[...],
                      preferred_element_type=jnp.float32)
    skip_bn = jnp.maximum(skip_bn * s1_ref[...] + b1_ref[...], 0.0)

    # add the bilinearly upsampled input (precomputed by the resize kernels)
    y = up_ref[...] + skip_bn                               # (C, S)

    # zero-margined halo buffer in VMEM; taps are static lane-offset slices
    ypad_ref[...] = jnp.zeros_like(ypad_ref)
    ypad_ref[:, pl.ds(128, s)] = y

    # 3x3 conv (pad=1): 9 shifted-view matmuls; all weight taps stay in VMEM.
    acc = jnp.zeros((c, s), jnp.float32)
    for k in range(9):                                      # static unroll
        dy = k // 3 - 1
        dx = k % 3 - 1
        d = dy * ws + dx                                    # lane shift
        ys = ypad_ref[:, pl.ds(128 + d, s)] * mask_ref[k]   # (C,S)*(1,S)
        acc = acc + jnp.dot(w3_ref[k], ys,
                            preferred_element_type=jnp.float32)

    # folded BN + ReLU epilogue in f32, cast only on the final store
    out = jnp.maximum(acc * s3_ref[...] + b3_ref[...], 0.0)
    o_ref[...] = out.astype(o_ref.dtype)


# ----------------------------------------------------------------------------
# Glue: bilinear weights (PyTorch align_corners=False), tap validity masks.
# (Static-shape jnp ops — constant-folded by XLA under jit.)
# ----------------------------------------------------------------------------
def bilinear_matrix(out_size, in_size):
    o = jnp.arange(out_size, dtype=jnp.float32)
    scale = in_size / out_size
    src = (o + 0.5) * scale - 0.5
    src = jnp.maximum(src, 0.0)
    i0 = jnp.minimum(jnp.floor(src).astype(jnp.int32), in_size - 1)
    i1 = jnp.minimum(i0 + 1, in_size - 1)
    l1 = src - i0.astype(jnp.float32)
    l0 = 1.0 - l1
    oh0 = jax.nn.one_hot(i0, in_size, dtype=jnp.float32)
    oh1 = jax.nn.one_hot(i1, in_size, dtype=jnp.float32)
    return l0[:, None] * oh0 + l1[:, None] * oh1            # (out, in)


def tap_masks(Hs, Ws):
    hh = jnp.arange(Hs)[:, None]
    ww = jnp.arange(Ws)[None, :]
    ms = []
    for dy in (-1, 0, 1):
        for dx in (-1, 0, 1):
            m = ((hh + dy >= 0) & (hh + dy < Hs) &
                 (ww + dx >= 0) & (ww + dx < Ws))
            ms.append(m.reshape(-1))
    return jnp.stack(ms).astype(jnp.float32).reshape(9, 1, Hs * Ws)


def upsample_forward(skip_nchw, x_nchw, params):
    N, Cskip, Hs, Ws = skip_nchw.shape
    _, C, Hx, Wx = x_nchw.shape
    S = Hs * Ws

    w1 = params["w1"]                                  # (C, Cskip)
    w3t = jnp.transpose(params["w3"], (2, 3, 0, 1)).reshape(9, C, C)
    s1 = params["s1"][:, None]
    b1 = params["b1"][:, None]
    s3 = params["s3"][:, None]
    b3 = params["b3"][:, None]

    # --- separable bilinear resize (H pass then W pass), channels kept on rows
    WhT = bilinear_matrix(Hs, Hx).T                    # (Hx, Hs)
    WwT = bilinear_matrix(Ws, Wx).T                    # (Wx, Ws)

    xh = jnp.transpose(x_nchw, (0, 1, 3, 2)).reshape(N * C * Wx, Hx)
    t = resize_matmul(xh, WhT)                         # (N*C*Wx, Hs)
    t = jnp.transpose(t.reshape(N * C, Wx, Hs), (0, 2, 1)).reshape(N * C * Hs, Wx)
    u = resize_matmul(t, WwT)                          # (N*C*Hs, Ws)
    up = u.reshape(N, C, S)                            # contiguous reshape

    skip2 = skip_nchw.reshape(N, Cskip, S)
    mask = tap_masks(Hs, Ws)                           # (9, 1, S)

    out = pl.pallas_call(
        functools.partial(_fused_main_kernel, ws=Ws),
        out_shape=jax.ShapeDtypeStruct((N, C, S), jnp.float32),
        grid_spec=pltpu.PrefetchScalarGridSpec(
            num_scalar_prefetch=0,
            grid=(N,),
            in_specs=[
                pl.BlockSpec((None, Cskip, S), lambda n: (n, 0, 0)),
                pl.BlockSpec((None, C, S), lambda n: (n, 0, 0)),
                pl.BlockSpec((C, Cskip), lambda n: (0, 0)),
                pl.BlockSpec((C, 1), lambda n: (0, 0)),
                pl.BlockSpec((C, 1), lambda n: (0, 0)),
                pl.BlockSpec((9, C, C), lambda n: (0, 0, 0)),
                pl.BlockSpec((C, 1), lambda n: (0, 0)),
                pl.BlockSpec((C, 1), lambda n: (0, 0)),
                pl.BlockSpec((9, 1, S), lambda n: (0, 0, 0)),
            ],
            out_specs=pl.BlockSpec((None, C, S), lambda n: (n, 0, 0)),
            scratch_shapes=[pltpu.VMEM((C, S + 256), jnp.float32)],
        ),
        compiler_params=pltpu.CompilerParams(dimension_semantics=("parallel",)),
    )(skip2, up, w1, s1, b1, w3t, s3, b3, mask)

    return out.reshape(N, C, Hs, Ws)


# ----------------------------------------------------------------------------
# Pure-JAX reference (NCHW, same math, default precision, no Pallas)
# ----------------------------------------------------------------------------
def ref_forward(skip, x, params):
    N, Cskip, Hs, Ws = skip.shape
    _, C, Hx, Wx = x.shape

    s = jnp.einsum("oc,nchw->nohw", params["w1"], skip)
    s = jnp.maximum(s * params["s1"][None, :, None, None]
                    + params["b1"][None, :, None, None], 0.0)

    Wh = bilinear_matrix(Hs, Hx)
    Ww = bilinear_matrix(Ws, Wx)
    xi = jnp.einsum("ah,nchw->ncaw", Wh, x)
    xi = jnp.einsum("bw,ncaw->ncab", Ww, xi)
    y = xi + s

    yp = jnp.pad(y, ((0, 0), (0, 0), (1, 1), (1, 1)))
    patches = jnp.stack([yp[:, :, dy:dy + Hs, dx:dx + Ws]
                         for dy in range(3) for dx in range(3)], axis=2)
    w3k = jnp.transpose(params["w3"], (2, 3, 0, 1)).reshape(9, C, C)
    z = jnp.einsum("koc,nckhw->nohw", w3k, patches)
    z = jnp.maximum(z * params["s3"][None, :, None, None]
                    + params["b3"][None, :, None, None], 0.0)
    return z


# ----------------------------------------------------------------------------
# Deterministic parameter init (eval-mode BatchNorm folded to scale/bias)
# ----------------------------------------------------------------------------
def init_params(key, Cskip, C):
    ks = jax.random.split(key, 10)
    eps = 1e-5
    w1 = jax.random.normal(ks[0], (C, Cskip), jnp.float32) * (2.0 / Cskip) ** 0.5
    w3 = jax.random.normal(ks[1], (C, C, 3, 3), jnp.float32) * (2.0 / (9 * C)) ** 0.5
    g1 = jax.random.uniform(ks[2], (C,), jnp.float32, 0.5, 1.5)
    be1 = jax.random.normal(ks[3], (C,), jnp.float32) * 0.1
    m1 = jax.random.normal(ks[4], (C,), jnp.float32) * 0.1
    v1 = jax.random.uniform(ks[5], (C,), jnp.float32, 0.5, 1.5)
    g3 = jax.random.uniform(ks[6], (C,), jnp.float32, 0.5, 1.5)
    be3 = jax.random.normal(ks[7], (C,), jnp.float32) * 0.1
    m3 = jax.random.normal(ks[8], (C,), jnp.float32) * 0.1
    v3 = jax.random.uniform(ks[9], (C,), jnp.float32, 0.5, 1.5)
    s1 = g1 / jnp.sqrt(v1 + eps)
    s3 = g3 / jnp.sqrt(v3 + eps)
    return dict(w1=w1, w3=w3, s1=s1, b1=be1 - m1 * s1, s3=s3, b3=be3 - m3 * s3)


if __name__ == "__main__":
    N, Cskip, Hs, Ws = 2, 32, 16, 16      # skip: (N, skip_planes, 16, 16)
    C, Hx, Wx = 128, 8, 8                 # x:    (N, out_planes=128, 8, 8)

    key = jax.random.PRNGKey(0)
    k_skip, k_x, k_p = jax.random.split(key, 3)
    skip = jax.random.normal(k_skip, (N, Cskip, Hs, Ws), jnp.float32)
    x = jax.random.normal(k_x, (N, C, Hx, Wx), jnp.float32)
    params = init_params(k_p, Cskip, C)

    fwd = jax.jit(functools.partial(upsample_forward, params=params))
    out = jax.block_until_ready(fwd(skip, x))

    assert out.shape == (N, C, Hs, Ws), out.shape
    ref = ref_forward(skip, x, params)
    max_err = float(jnp.max(jnp.abs(out - ref)))
    assert max_err < 2e-3, f"max abs error {max_err}"
    print("KERNEL_OK")
</pallas_src>

<mosaic_0001>
module attributes {stable_mosaic.version = 11 : i64} {
  func.func @_resize_kernel(%arg0: i32, %arg1: memref<512x8xf32, #tpu.memory_space<vmem>>, %arg2: memref<8x16xf32, #tpu.memory_space<vmem>>, %arg3: memref<512x16xf32, #tpu.memory_space<vmem>>) attributes {dimension_semantics = [#tpu.dimension_semantics<parallel>], iteration_bounds = array<i64: 4>, scalar_prefetch = 0 : i64, scratch_operands = 0 : i64, tpu.core_type = #tpu.core_type<tc>, window_params = [{transform_indices = @transform_0, window_bounds = array<i64: 512, 8>}, {pipeline_mode = #tpu.pipeline_mode<synchronous>, transform_indices = @transform_1, window_bounds = array<i64: 8, 16>}, {transform_indices = @transform_2, window_bounds = array<i64: 512, 16>}]} {
    %c0 = arith.constant 0 : index
    %c0_0 = arith.constant 0 : index
    %0 = vector.load %arg1[%c0, %c0_0] : memref<512x8xf32, #tpu.memory_space<vmem>>, vector<512x8xf32>
    %c0_1 = arith.constant 0 : index
    %c0_2 = arith.constant 0 : index
    %1 = vector.load %arg2[%c0_1, %c0_2] : memref<8x16xf32, #tpu.memory_space<vmem>>, vector<8x16xf32>
    %cst = arith.constant dense<0.000000e+00> : vector<512x16xf32>
    %2 = tpu.matmul %0, %1, %cst {dimension_numbers = #tpu.dot_dimension_numbers<[1], [0], [0], [1], [0, 0, 1, 1], [], []>} : vector<512x8xf32>, vector<8x16xf32>, vector<512x16xf32> -> vector<512x16xf32>
    %c0_3 = arith.constant 0 : index
    %c0_4 = arith.constant 0 : index
    %3 = vector.load %arg3[%c0_3, %c0_4] : memref<512x16xf32, #tpu.memory_space<vmem>>, vector<512x16xf32>
    tpu.vector_store %arg3[%c0_3, %c0_4], %2 {strides = array<i32>} : memref<512x16xf32, #tpu.memory_space<vmem>>, vector<512x16xf32>,
    return
  }
  func.func @transform_0(%arg0: i32) -> (i32, i32) {
    %c0_i32 = arith.constant 0 : i32
    %c0_i32_0 = arith.constant 0 : i32
    return %arg0, %c0_i32 : i32, i32
  }
  func.func @transform_1(%arg0: i32) -> (i32, i32) {
    %c0_i32 = arith.constant 0 : i32
    %c0_i32_0 = arith.constant 0 : i32
    %c0_i32_1 = arith.constant 0 : i32
    return %c0_i32, %c0_i32_0 : i32, i32
  }
  func.func @transform_2(%arg0: i32) -> (i32, i32) {
    %c0_i32 = arith.constant 0 : i32
    %c0_i32_0 = arith.constant 0 : i32
    return %arg0, %c0_i32 : i32, i32
  }
}

module attributes {stable_mosaic.version = 11 : i64} {
  func.func @_resize_kernel(%arg0: i32, %arg1: memref<512x8xf32, #tpu.memory_space<vmem>>, %arg2: memref<8x16xf32, #tpu.memory_space<vmem>>, %arg3: memref<512x16xf32, #tpu.memory_space<vmem>>) attributes {dimension_semantics = [#tpu.dimension_semantics<parallel>], iteration_bounds = array<i64: 8>, scalar_prefetch = 0 : i64, scratch_operands = 0 : i64, tpu.core_type = #tpu.core_type<tc>, window_params = [{transform_indices = @transform_0, window_bounds = array<i64: 512, 8>}, {pipeline_mode = #tpu.pipeline_mode<synchronous>, transform_indices = @transform_1, window_bounds = array<i64: 8, 16>}, {transform_indices = @transform_2, window_bounds = array<i64: 512, 16>}]} {
    %c0 = arith.constant 0 : index
    %c0_0 = arith.constant 0 : index
    %0 = vector.load %arg1[%c0, %c0_0] : memref<512x8xf32, #tpu.memory_space<vmem>>, vector<512x8xf32>
    %c0_1 = arith.constant 0 : index
    %c0_2 = arith.constant 0 : index
    %1 = vector.load %arg2[%c0_1, %c0_2] : memref<8x16xf32, #tpu.memory_space<vmem>>, vector<8x16xf32>
    %cst = arith.constant dense<0.000000e+00> : vector<512x16xf32>
    %2 = tpu.matmul %0, %1, %cst {dimension_numbers = #tpu.dot_dimension_numbers<[1], [0], [0], [1], [0, 0, 1, 1], [], []>} : vector<512x8xf32>, vector<8x16xf32>, vector<512x16xf32> -> vector<512x16xf32>
    %c0_3 = arith.constant 0 : index
    %c0_4 = arith.constant 0 : index
    %3 = vector.load %arg3[%c0_3, %c0_4] : memref<512x16xf32, #tpu.memory_space<vmem>>, vector<512x16xf32>
    tpu.vector_store %arg3[%c0_3, %c0_4], %2 {strides = array<i32>} : memref<512x16xf32, #tpu.memory_space<vmem>>, vector<512x16xf32>,
    return
  }
  func.func @transform_0(%arg0: i32) -> (i32, i32) {
    %c0_i32 = arith.constant 0 : i32
    %c0_i32_0 = arith.constant 0 : i32
    return %arg0, %c0_i32 : i32, i32
  }
  func.func @transform_1(%arg0: i32) -> (i32, i32) {
    %c0_i32 = arith.constant 0 : i32
    %c0_i32_0 = arith.constant 0 : i32
    %c0_i32_1 = arith.constant 0 : i32
    return %c0_i32, %c0_i32_0 : i32, i32
  }
  func.func @transform_2(%arg0: i32) -> (i32, i32) {
    %c0_i32 = arith.constant 0 : i32
    %c0_i32_0 = arith.constant 0 : i32
    return %arg0, %c0_i32 : i32, i32
  }
}

module attributes {stable_mosaic.version = 11 : i64} {
  func.func @_fused_main_kernel(%arg0: i32, %arg1: memref<1x32x256xf32, #tpu.memory_space<vmem>>, %arg2: memref<1x128x256xf32, #tpu.memory_space<vmem>>, %arg3: memref<128x32xf32, #tpu.memory_space<vmem>>, %arg4: memref<128x1xf32, #tpu.memory_space<vmem>>, %arg5: memref<128x1xf32, #tpu.memory_space<vmem>>, %arg6: memref<9x128x128xf32, #tpu.memory_space<vmem>>, %arg7: memref<128x1xf32, #tpu.memory_space<vmem>>, %arg8: memref<128x1xf32, #tpu.memory_space<vmem>>, %arg9: memref<9x1x256xf32, #tpu.memory_space<vmem>>, %arg10: memref<1x128x256xf32, #tpu.memory_space<vmem>>, %arg11: memref<128x512xf32, #tpu.memory_space<vmem>>) attributes {dimension_semantics = [#tpu.dimension_semantics<parallel>], iteration_bounds = array<i64: 2>, scalar_prefetch = 0 : i64, scratch_operands = 1 : i64, tpu.core_type = #tpu.core_type<tc>, window_params = [{transform_indices = @transform_0, window_bounds = array<i64: 1, 32, 256>}, {transform_indices = @transform_1, window_bounds = array<i64: 1, 128, 256>}, {pipeline_mode = #tpu.pipeline_mode<synchronous>, transform_indices = @transform_2, window_bounds = array<i64: 128, 32>}, {pipeline_mode = #tpu.pipeline_mode<synchronous>, transform_indices = @transform_3, window_bounds = array<i64: 128, 1>}, {pipeline_mode = #tpu.pipeline_mode<synchronous>, transform_indices = @transform_4, window_bounds = array<i64: 128, 1>}, {pipeline_mode = #tpu.pipeline_mode<synchronous>, transform_indices = @transform_5, window_bounds = array<i64: 9, 128, 128>}, {pipeline_mode = #tpu.pipeline_mode<synchronous>, transform_indices = @transform_6, window_bounds = array<i64: 128, 1>}, {pipeline_mode = #tpu.pipeline_mode<synchronous>, transform_indices = @transform_7, window_bounds = array<i64: 128, 1>}, {pipeline_mode = #tpu.pipeline_mode<synchronous>, transform_indices = @transform_8, window_bounds = array<i64: 9, 1, 256>}, {transform_indices = @transform_9, window_bounds = array<i64: 1, 128, 256>}]} {
    %c0 = arith.constant 0 : index
    %c0_0 = arith.constant 0 : index
    %0 = vector.load %arg3[%c0, %c0_0] : memref<128x32xf32, #tpu.memory_space<vmem>>, vector<128x32xf32>
    %c0_1 = arith.constant 0 : index
    %c0_2 = arith.constant 0 : index
    %c0_3 = arith.constant 0 : index
    %1 = vector.load %arg1[%c0_1, %c0_2, %c0_3] : memref<1x32x256xf32, #tpu.memory_space<vmem>>, vector<1x32x256xf32>
    %2 = vector.shape_cast %1 : vector<1x32x256xf32> to vector<32x256xf32>
    %cst = arith.constant dense<0.000000e+00> : vector<128x256xf32>
    %3 = tpu.matmul %0, %2, %cst {dimension_numbers = #tpu.dot_dimension_numbers<[1], [0], [0], [1], [0, 0, 1, 1], [], []>} : vector<128x32xf32>, vector<32x256xf32>, vector<128x256xf32> -> vector<128x256xf32>
    %c0_4 = arith.constant 0 : index
    %c0_5 = arith.constant 0 : index
    %4 = vector.load %arg4[%c0_4, %c0_5] : memref<128x1xf32, #tpu.memory_space<vmem>>, vector<128x1xf32>
    %5 = vector.broadcast %4 : vector<128x1xf32> to vector<128x256xf32>
    %6 = arith.mulf %3, %5 : vector<128x256xf32>
    %c0_6 = arith.constant 0 : index
    %c0_7 = arith.constant 0 : index
    %7 = vector.load %arg5[%c0_6, %c0_7] : memref<128x1xf32, #tpu.memory_space<vmem>>, vector<128x1xf32>
    %8 = vector.broadcast %7 : vector<128x1xf32> to vector<128x256xf32>
    %9 = arith.addf %6, %8 : vector<128x256xf32>
    %cst_8 = arith.constant 0.000000e+00 : f32
    %10 = vector.broadcast %cst_8 : f32 to vector<128x256xf32>
    %11 = arith.maximumf %9, %10 : vector<128x256xf32>
    %c0_9 = arith.constant 0 : index
    %c0_10 = arith.constant 0 : index
    %c0_11 = arith.constant 0 : index
    %12 = vector.load %arg2[%c0_9, %c0_10, %c0_11] : memref<1x128x256xf32, #tpu.memory_space<vmem>>, vector<1x128x256xf32>
    %13 = vector.shape_cast %12 : vector<1x128x256xf32> to vector<128x256xf32>
    %14 = arith.addf %13, %11 : vector<128x256xf32>
    %cst_12 = arith.constant 0.000000e+00 : f32
    %15 = vector.broadcast %cst_12 : f32 to vector<128x512xf32>
    %c0_13 = arith.constant 0 : index
    %c0_14 = arith.constant 0 : index
    %16 = vector.load %arg11[%c0_13, %c0_14] : memref<128x512xf32, #tpu.memory_space<vmem>>, vector<128x512xf32>
    tpu.vector_store %arg11[%c0_13, %c0_14], %15 {strides = array<i32>} : memref<128x512xf32, #tpu.memory_space<vmem>>, vector<128x512xf32>,
    %c0_15 = arith.constant 0 : index
    %c128 = arith.constant 128 : index
    %17 = vector.load %arg11[%c0_15, %c128] : memref<128x512xf32, #tpu.memory_space<vmem>>, vector<128x256xf32>
    tpu.vector_store %arg11[%c0_15, %c128], %14 {strides = array<i32>} : memref<128x512xf32, #tpu.memory_space<vmem>>, vector<128x256xf32>,
    %cst_16 = arith.constant 0.000000e+00 : f32
    %18 = vector.broadcast %cst_16 : f32 to vector<128x256xf32>
    %c0_17 = arith.constant 0 : index
    %c111 = arith.constant 111 : index
    %19 = vector.load %arg11[%c0_17, %c111] : memref<128x512xf32, #tpu.memory_space<vmem>>, vector<128x256xf32>
    %c0_18 = arith.constant 0 : index
    %c0_19 = arith.constant 0 : index
    %c0_20 = arith.constant 0 : index
    %20 = vector.load %arg9[%c0_18, %c0_19, %c0_20] : memref<9x1x256xf32, #tpu.memory_space<vmem>>, vector<1x1x256xf32>
    %21 = vector.shape_cast %20 : vector<1x1x256xf32> to vector<1x256xf32>
    %22 = vector.broadcast %21 : vector<1x256xf32> to vector<128x256xf32>
    %23 = arith.mulf %19, %22 : vector<128x256xf32>
    %c0_21 = arith.constant 0 : index
    %c0_22 = arith.constant 0 : index
    %c0_23 = arith.constant 0 : index
    %24 = vector.load %arg6[%c0_21, %c0_22, %c0_23] : memref<9x128x128xf32, #tpu.memory_space<vmem>>, vector<1x128x128xf32>
    %25 = vector.shape_cast %24 : vector<1x128x128xf32> to vector<128x128xf32>
    %cst_24 = arith.constant dense<0.000000e+00> : vector<128x256xf32>
    %26 = tpu.matmul %25, %23, %cst_24 {dimension_numbers = #tpu.dot_dimension_numbers<[1], [0], [0], [1], [0, 0, 1, 1], [], []>} : vector<128x128xf32>, vector<128x256xf32>, vector<128x256xf32> -> vector<128x256xf32>
    %27 = arith.addf %18, %26 : vector<128x256xf32>
    %c0_25 = arith.constant 0 : index
    %c112 = arith.constant 112 : index
    %28 = vector.load %arg11[%c0_25, %c112] : memref<128x512xf32, #tpu.memory_space<vmem>>, vector<128x256xf32>
    %c1 = arith.constant 1 : index
    %c0_26 = arith.constant 0 : index
    %c0_27 = arith.constant 0 : index
    %29 = vector.load %arg9[%c1, %c0_26, %c0_27] : memref<9x1x256xf32, #tpu.memory_space<vmem>>, vector<1x1x256xf32>
    %30 = vector.shape_cast %29 : vector<1x1x256xf32> to vector<1x256xf32>
    %31 = vector.broadcast %30 : vector<1x256xf32> to vector<128x256xf32>
    %32 = arith.mulf %28, %31 : vector<128x256xf32>
    %c1_28 = arith.constant 1 : index
    %c0_29 = arith.constant 0 : index
    %c0_30 = arith.constant 0 : index
    %33 = vector.load %arg6[%c1_28, %c0_29, %c0_30] : memref<9x128x128xf32, #tpu.memory_space<vmem>>, vector<1x128x128xf32>
    %34 = vector.shape_cast %33 : vector<1x128x128xf32> to vector<128x128xf32>
    %cst_31 = arith.constant dense<0.000000e+00> : vector<128x256xf32>
    %35 = tpu.matmul %34, %32, %cst_31 {dimension_numbers = #tpu.dot_dimension_numbers<[1], [0], [0], [1], [0, 0, 1, 1], [], []>} : vector<128x128xf32>, vector<128x256xf32>, vector<128x256xf32> -> vector<128x256xf32>
    %36 = arith.addf %27, %35 : vector<128x256xf32>
    %c0_32 = arith.constant 0 : index
    %c113 = arith.constant 113 : index
    %37 = vector.load %arg11[%c0_32, %c113] : memref<128x512xf32, #tpu.memory_space<vmem>>, vector<128x256xf32>
    %c2 = arith.constant 2 : index
    %c0_33 = arith.constant 0 : index
    %c0_34 = arith.constant 0 : index
    %38 = vector.load %arg9[%c2, %c0_33, %c0_34] : memref<9x1x256xf32, #tpu.memory_space<vmem>>, vector<1x1x256xf32>
    %39 = vector.shape_cast %38 : vector<1x1x256xf32> to vector<1x256xf32>
    %40 = vector.broadcast %39 : vector<1x256xf32> to vector<128x256xf32>
    %41 = arith.mulf %37, %40 : vector<128x256xf32>
    %c2_35 = arith.constant 2 : index
    %c0_36 = arith.constant 0 : index
    %c0_37 = arith.constant 0 : index
    %42 = vector.load %arg6[%c2_35, %c0_36, %c0_37] : memref<9x128x128xf32, #tpu.memory_space<vmem>>, vector<1x128x128xf32>
    %43 = vector.shape_cast %42 : vector<1x128x128xf32> to vector<128x128xf32>
    %cst_38 = arith.constant dense<0.000000e+00> : vector<128x256xf32>
    %44 = tpu.matmul %43, %41, %cst_38 {dimension_numbers = #tpu.dot_dimension_numbers<[1], [0], [0], [1], [0, 0, 1, 1], [], []>} : vector<128x128xf32>, vector<128x256xf32>, vector<128x256xf32> -> vector<128x256xf32>
    %45 = arith.addf %36, %44 : vector<128x256xf32>
    %c0_39 = arith.constant 0 : index
    %c127 = arith.constant 127 : index
    %46 = vector.load %arg11[%c0_39, %c127] : memref<128x512xf32, #tpu.memory_space<vmem>>, vector<128x256xf32>
    %c3 = arith.constant 3 : index
    %c0_40 = arith.constant 0 : index
    %c0_41 = arith.constant 0 : index
    %47 = vector.load %arg9[%c3, %c0_40, %c0_41] : memref<9x1x256xf32, #tpu.memory_space<vmem>>, vector<1x1x256xf32>
    %48 = vector.shape_cast %47 : vector<1x1x256xf32> to vector<1x256xf32>
    %49 = vector.broadcast %48 : vector<1x256xf32> to vector<128x256xf32>
    %50 = arith.mulf %46, %49 : vector<128x256xf32>
    %c3_42 = arith.constant 3 : index
    %c0_43 = arith.constant 0 : index
    %c0_44 = arith.constant 0 : index
    %51 = vector.load %arg6[%c3_42, %c0_43, %c0_44] : memref<9x128x128xf32, #tpu.memory_space<vmem>>, vector<1x128x128xf32>
    %52 = vector.shape_cast %51 : vector<1x128x128xf32> to vector<128x128xf32>
    %cst_45 = arith.constant dense<0.000000e+00> : vector<128x256xf32>
    %53 = tpu.matmul %52, %50, %cst_45 {dimension_numbers = #tpu.dot_dimension_numbers<[1], [0], [0], [1], [0, 0, 1, 1], [], []>} : vector<128x128xf32>, vector<128x256xf32>, vector<128x256xf32> -> vector<128x256xf32>
    %54 = arith.addf %45, %53 : vector<128x256xf32>
    %c0_46 = arith.constant 0 : index
    %c128_47 = arith.constant 128 : index
    %55 = vector.load %arg11[%c0_46, %c128_47] : memref<128x512xf32, #tpu.memory_space<vmem>>, vector<128x256xf32>
    %c4 = arith.constant 4 : index
    %c0_48 = arith.constant 0 : index
    %c0_49 = arith.constant 0 : index
    %56 = vector.load %arg9[%c4, %c0_48, %c0_49] : memref<9x1x256xf32, #tpu.memory_space<vmem>>, vector<1x1x256xf32>
    %57 = vector.shape_cast %56 : vector<1x1x256xf32> to vector<1x256xf32>
    %58 = vector.broadcast %57 : vector<1x256xf32> to vector<128x256xf32>
    %59 = arith.mulf %55, %58 : vector<128x256xf32>
    %c4_50 = arith.constant 4 : index
    %c0_51 = arith.constant 0 : index
    %c0_52 = arith.constant 0 : index
    %60 = vector.load %arg6[%c4_50, %c0_51, %c0_52] : memref<9x128x128xf32, #tpu.memory_space<vmem>>, vector<1x128x128xf32>
    %61 = vector.shape_cast %60 : vector<1x128x128xf32> to vector<128x128xf32>
    %cst_53 = arith.constant dense<0.000000e+00> : vector<128x256xf32>
    %62 = tpu.matmul %61, %59, %cst_53 {dimension_numbers = #tpu.dot_dimension_numbers<[1], [0], [0], [1], [0, 0, 1, 1], [], []>} : vector<128x128xf32>, vector<128x256xf32>, vector<128x256xf32> -> vector<128x256xf32>
    %63 = arith.addf %54, %62 : vector<128x256xf32>
    %c0_54 = arith.constant 0 : index
    %c129 = arith.constant 129 : index
    %64 = vector.load %arg11[%c0_54, %c129] : memref<128x512xf32, #tpu.memory_space<vmem>>, vector<128x256xf32>
    %c5 = arith.constant 5 : index
    %c0_55 = arith.constant 0 : index
    %c0_56 = arith.constant 0 : index
    %65 = vector.load %arg9[%c5, %c0_55, %c0_56] : memref<9x1x256xf32, #tpu.memory_space<vmem>>, vector<1x1x256xf32>
    %66 = vector.shape_cast %65 : vector<1x1x256xf32> to vector<1x256xf32>
    %67 = vector.broadcast %66 : vector<1x256xf32> to vector<128x256xf32>
    %68 = arith.mulf %64, %67 : vector<128x256xf32>
    %c5_57 = arith.constant 5 : index
    %c0_58 = arith.constant 0 : index
    %c0_59 = arith.constant 0 : index
    %69 = vector.load %arg6[%c5_57, %c0_58, %c0_59] : memref<9x128x128xf32, #tpu.memory_space<vmem>>, vector<1x128x128xf32>
    %70 = vector.shape_cast %69 : vector<1x128x128xf32> to vector<128x128xf32>
    %cst_60 = arith.constant dense<0.000000e+00> : vector<128x256xf32>
    %71 = tpu.matmul %70, %68, %cst_60 {dimension_numbers = #tpu.dot_dimension_numbers<[1], [0], [0], [1], [0, 0, 1, 1], [], []>} : vector<128x128xf32>, vector<128x256xf32>, vector<128x256xf32> -> vector<128x256xf32>
    %72 = arith.addf %63, %71 : vector<128x256xf32>
    %c0_61 = arith.constant 0 : index
    %c143 = arith.constant 143 : index
    %73 = vector.load %arg11[%c0_61, %c143] : memref<128x512xf32, #tpu.memory_space<vmem>>, vector<128x256xf32>
    %c6 = arith.constant 6 : index
    %c0_62 = arith.constant 0 : index
    %c0_63 = arith.constant 0 : index
    %74 = vector.load %arg9[%c6, %c0_62, %c0_63] : memref<9x1x256xf32, #tpu.memory_space<vmem>>, vector<1x1x256xf32>
    %75 = vector.shape_cast %74 : vector<1x1x256xf32> to vector<1x256xf32>
    %76 = vector.broadcast %75 : vector<1x256xf32> to vector<128x256xf32>
    %77 = arith.mulf %73, %76 : vector<128x256xf32>
    %c6_64 = arith.constant 6 : index
    %c0_65 = arith.constant 0 : index
    %c0_66 = arith.constant 0 : index
    %78 = vector.load %arg6[%c6_64, %c0_65, %c0_66] : memref<9x128x128xf32, #tpu.memory_space<vmem>>, vector<1x128x128xf32>
    %79 = vector.shape_cast %78 : vector<1x128x128xf32> to vector<128x128xf32>
    %cst_67 = arith.constant dense<0.000000e+00> : vector<128x256xf32>
    %80 = tpu.matmul %79, %77, %cst_67 {dimension_numbers = #tpu.dot_dimension_numbers<[1], [0], [0], [1], [0, 0, 1, 1], [], []>} : vector<128x128xf32>, vector<128x256xf32>, vector<128x256xf32> -> vector<128x256xf32>
    %81 = arith.addf %72, %80 : vector<128x256xf32>
    %c0_68 = arith.constant 0 : index
    %c144 = arith.constant 144 : index
    %82 = vector.load %arg11[%c0_68, %c144] : memref<128x512xf32, #tpu.memory_space<vmem>>, vector<128x256xf32>
    %c7 = arith.constant 7 : index
    %c0_69 = arith.constant 0 : index
    %c0_70 = arith.constant 0 : index
    %83 = vector.load %arg9[%c7, %c0_69, %c0_70] : memref<9x1x256xf32, #tpu.memory_space<vmem>>, vector<1x1x256xf32>
    %84 = vector.shape_cast %83 : vector<1x1x256xf32> to vector<1x256xf32>
    %85 = vector.broadcast %84 : vector<1x256xf32> to vector<128x256xf32>
    %86 = arith.mulf %82, %85 : vector<128x256xf32>
    %c7_71 = arith.constant 7 : index
    %c0_72 = arith.constant 0 : index
    %c0_73 = arith.constant 0 : index
    %87 = vector.load %arg6[%c7_71, %c0_72, %c0_73] : memref<9x128x128xf32, #tpu.memory_space<vmem>>, vector<1x128x128xf32>
    %88 = vector.shape_cast %87 : vector<1x128x128xf32> to vector<128x128xf32>
    %cst_74 = arith.constant dense<0.000000e+00> : vector<128x256xf32>
    %89 = tpu.matmul %88, %86, %cst_74 {dimension_numbers = #tpu.dot_dimension_numbers<[1], [0], [0], [1], [0, 0, 1, 1], [], []>} : vector<128x128xf32>, vector<128x256xf32>, vector<128x256xf32> -> vector<128x256xf32>
    %90 = arith.addf %81, %89 : vector<128x256xf32>
    %c0_75 = arith.constant 0 : index
    %c145 = arith.constant 145 : index
    %91 = vector.load %arg11[%c0_75, %c145] : memref<128x512xf32, #tpu.memory_space<vmem>>, vector<128x256xf32>
    %c8 = arith.constant 8 : index
    %c0_76 = arith.constant 0 : index
    %c0_77 = arith.constant 0 : index
    %92 = vector.load %arg9[%c8, %c0_76, %c0_77] : memref<9x1x256xf32, #tpu.memory_space<vmem>>, vector<1x1x256xf32>
    %93 = vector.shape_cast %92 : vector<1x1x256xf32> to vector<1x256xf32>
    %94 = vector.broadcast %93 : vector<1x256xf32> to vector<128x256xf32>
    %95 = arith.mulf %91, %94 : vector<128x256xf32>
    %c8_78 = arith.constant 8 : index
    %c0_79 = arith.constant 0 : index
    %c0_80 = arith.constant 0 : index
    %96 = vector.load %arg6[%c8_78, %c0_79, %c0_80] : memref<9x128x128xf32, #tpu.memory_space<vmem>>, vector<1x128x128xf32>
    %97 = vector.shape_cast %96 : vector<1x128x128xf32> to vector<128x128xf32>
    %cst_81 = arith.constant dense<0.000000e+00> : vector<128x256xf32>
    %98 = tpu.matmul %97, %95, %cst_81 {dimension_numbers = #tpu.dot_dimension_numbers<[1], [0], [0], [1], [0, 0, 1, 1], [], []>} : vector<128x128xf32>, vector<128x256xf32>, vector<128x256xf32> -> vector<128x256xf32>
    %99 = arith.addf %90, %98 : vector<128x256xf32>
    %c0_82 = arith.constant 0 : index
    %c0_83 = arith.constant 0 : index
    %100 = vector.load %arg7[%c0_82, %c0_83] : memref<128x1xf32, #tpu.memory_space<vmem>>, vector<128x1xf32>
    %101 = vector.broadcast %100 : vector<128x1xf32> to vector<128x256xf32>
    %102 = arith.mulf %99, %101 : vector<128x256xf32>
    %c0_84 = arith.constant 0 : index
    %c0_85 = arith.constant 0 : index
    %103 = vector.load %arg8[%c0_84, %c0_85] : memref<128x1xf32, #tpu.memory_space<vmem>>, vector<128x1xf32>
    %104 = vector.broadcast %103 : vector<128x1xf32> to vector<128x256xf32>
    %105 = arith.addf %102, %104 : vector<128x256xf32>
    %cst_86 = arith.constant 0.000000e+00 : f32
    %106 = vector.broadcast %cst_86 : f32 to vector<128x256xf32>
    %107 = arith.maximumf %105, %106 : vector<128x256xf32>
    %c0_87 = arith.constant 0 : index
    %c0_88 = arith.constant 0 : index
    %c0_89 = arith.constant 0 : index
    %108 = vector.load %arg10[%c0_87, %c0_88, %c0_89] : memref<1x128x256xf32, #tpu.memory_space<vmem>>, vector<1x128x256xf32>
    %109 = vector.shape_cast %108 : vector<1x128x256xf32> to vector<128x256xf32>
    %110 = vector.shape_cast %107 : vector<128x256xf32> to vector<1x128x256xf32>
    tpu.vector_store %arg10[%c0_87, %c0_88, %c0_89], %110 {strides = array<i32>} : memref<1x128x256xf32, #tpu.memory_space<vmem>>, vector<1x128x256xf32>,
    return
  }
  func.func @transform_0(%arg0: i32) -> (i32, i32, i32) {
    %c0_i32 = arith.constant 0 : i32
    %c0_i32_0 = arith.constant 0 : i32
    %c0_i32_1 = arith.constant 0 : i32
    return %arg0, %c0_i32, %c0_i32_0 : i32, i32, i32
  }
  func.func @transform_1(%arg0: i32) -> (i32, i32, i32) {
    %c0_i32 = arith.constant 0 : i32
    %c0_i32_0 = arith.constant 0 : i32
    %c0_i32_1 = arith.constant 0 : i32
    return %arg0, %c0_i32, %c0_i32_0 : i32, i32, i32
  }
  func.func @transform_2(%arg0: i32) -> (i32, i32) {
    %c0_i32 = arith.constant 0 : i32
    %c0_i32_0 = arith.constant 0 : i32
    %c0_i32_1 = arith.constant 0 : i32
    return %c0_i32, %c0_i32_0 : i32, i32
  }
  func.func @transform_3(%arg0: i32) -> (i32, i32) {
    %c0_i32 = arith.constant 0 : i32
    %c0_i32_0 = arith.constant 0 : i32
    %c0_i32_1 = arith.constant 0 : i32
    return %c0_i32, %c0_i32_0 : i32, i32
  }
  func.func @transform_4(%arg0: i32) -> (i32, i32) {
    %c0_i32 = arith.constant 0 : i32
    %c0_i32_0 = arith.constant 0 : i32
    %c0_i32_1 = arith.constant 0 : i32
    return %c0_i32, %c0_i32_0 : i32, i32
  }
  func.func @transform_5(%arg0: i32) -> (i32, i32, i32) {
    %c0_i32 = arith.constant 0 : i32
    %c0_i32_0 = arith.constant 0 : i32
    %c0_i32_1 = arith.constant 0 : i32
    %c0_i32_2 = arith.constant 0 : i32
    return %c0_i32, %c0_i32_0, %c0_i32_1 : i32, i32, i32
  }
  func.func @transform_6(%arg0: i32) -> (i32, i32) {
    %c0_i32 = arith.constant 0 : i32
    %c0_i32_0 = arith.constant 0 : i32
    %c0_i32_1 = arith.constant 0 : i32
    return %c0_i32, %c0_i32_0 : i32, i32
  }
  func.func @transform_7(%arg0: i32) -> (i32, i32) {
    %c0_i32 = arith.constant 0 : i32
    %c0_i32_0 = arith.constant 0 : i32
    %c0_i32_1 = arith.constant 0 : i32
    return %c0_i32, %c0_i32_0 : i32, i32
  }
  func.func @transform_8(%arg0: i32) -> (i32, i32, i32) {
    %c0_i32 = arith.constant 0 : i32
    %c0_i32_0 = arith.constant 0 : i32
    %c0_i32_1 = arith.constant 0 : i32
    %c0_i32_2 = arith.constant 0 : i32
    return %c0_i32, %c0_i32_0, %c0_i32_1 : i32, i32, i32
  }
  func.func @transform_9(%arg0: i32) -> (i32, i32, i32) {
    %c0_i32 = arith.constant 0 : i32
    %c0_i32_0 = arith.constant 0 : i32
    %c0_i32_1 = arith.constant 0 : i32
    return %arg0, %c0_i32, %c0_i32_0 : i32, i32, i32
  }
}

</mosaic_0001>

<bundles_post_ra>
// kernel: upsample_forward.3
= control target key start
LH: loop header
LB: loop body
LE: loop exit
PB: predicated region body
PF: predicated region fallthrough
CT: control target
= control target key end

     0   :  { %s1182_s9 = smov 0   ;;  %s1469_s0 = inlined_call_operand.vmem [shape: f32[2048,8], index: 0, kind: input, shape index: {}]   ;;  %s1470_s1 = inlined_call_operand.vmem [shape: f32[8,16], index: 1, kind: input, shape index: {}]   ;;  %s1471_s2 = inlined_call_operand.vmem [shape: f32[2048,16], index: 2, kind: output, shape index: {}]  }
   0x1 LB: > { %s911_s10 = sadd.s32 4294967295, %s1165_s9   ;;  %p915_p0 = scmp.ge.s32.totalorder %s1165_s9, 1  ;;  %s1165_s9 = sphi %s1182_s9, %s12_s9  }
   0x2   : > { %p113_p1 = scmp.lt.s32.totalorder %s1165_s9, 5 }
   0x4   : > { %p114_p2 = pnand %p915_p0, %p113_p1 }
   0x5   : > { %s916_s13 = sshll.u32 (!%p114_p2), %s911_s10, 6 }
   0x6   : > { %117 = sbr.rel (%p114_p2) target bundleno = 273 (0x111), region = 28  ;;  %p136_p3 = scmp.lt.s32.totalorder (!%p114_p2), %s916_s13, 255 }
   0xb   : > { %v211_v0 = vld [vmem:[%s1470_s1] sm:$0xff]  ;;  %s1473_s13 = smov (!%p136_p3, %s916_s13), 255  ;;  %vm212_vm0 = vcmask 64512   ;;  %vm790_vm1 = vcmask 130048  }
   0xc   : > { %1051 = vmatprep.subr.mxu0 %v211_v0  ;;  %1149 = vmatprep.subr.mxu1 %v211_v0  ;;  %s917_s14 = sshll.u32 %s1473_s13, 3 }
   0xd   : > { %1052 = vmatpush3.msra.mxu0 %v211_v0  ;;  %1150 = vmatpush3.msra.mxu1 %v211_v0  ;;  %s1201_s17 = scalar_lea.vmem %s1469_s0, %s917_s14  ;;  %s1336_s20 = scalar_lea.vmem %s1471_s2, %s917_s14 }
   0xe   : > { %v147_v1 = vld [vmem:[%s1201_s17] sm:$0xff]  ;;  %v148_v3 = vld [vmem:[%s1201_s17 + $0x8] sm:$0xff]  ;;  %v149_v5 = vld [vmem:[%s1201_s17 + $0x10] sm:$0xff] }
   0xf   : > { %v179_v2 = vld [vmem:[%s1201_s17 + $0x100] sm:$0xff]  ;;  %1053 = vmatprep.mubr.msk.f32.mxu0 %vm212_vm0, %v147_v1  ;;  %v180_v4 = vld [vmem:[%s1201_s17 + $0x108] sm:$0xff]  ;;  %v181_v6 = vld [vmem:[%s1201_s17 + $0x110] sm:$0xff] }
  0x10   : > { %1101 = vmatprep.mubr.msk.f32.mxu1 %vm212_vm0, %v179_v2  ;;  %1054 = vmatmul.mubr.msk.f32.vlgmr.msra.gmra.mxu0 %vm212_vm0, %v148_v3  ;;  %v150_v7 = vld [vmem:[%s1201_s17 + $0x18] sm:$0xff]  ;;  %v151_v9 = vld [vmem:[%s1201_s17 + $0x20] sm:$0xff]  ;;  %v152_v11 = vld [vmem:[%s1201_s17 + $0x28] sm:$0xff] }
  0x11   : > { %1102 = vmatmul.mubr.msk.f32.vlgmr.msra.gmra.mxu1 %vm212_vm0, %v180_v4  ;;  %1056 = vmatprep.mubr.msk.f32.mxu0 %vm212_vm0, %v149_v5  ;;  %v182_v8 = vld [vmem:[%s1201_s17 + $0x118] sm:$0xff]  ;;  %v183_v10 = vld [vmem:[%s1201_s17 + $0x120] sm:$0xff]  ;;  %v184_v12 = vld [vmem:[%s1201_s17 + $0x128] sm:$0xff] }
  0x12   : > { %1104 = vmatprep.mubr.msk.f32.mxu1 %vm212_vm0, %v181_v6  ;;  %v153_v13 = vld [vmem:[%s1201_s17 + $0x30] sm:$0xff]  ;;  %v154_v15 = vld [vmem:[%s1201_s17 + $0x38] sm:$0xff]  ;;  %v155_v17 = vld [vmem:[%s1201_s17 + $0x40] sm:$0xff] }
  0x13   : > { %v185_v14 = vld [vmem:[%s1201_s17 + $0x130] sm:$0xff]  ;;  %v186_v16 = vld [vmem:[%s1201_s17 + $0x138] sm:$0xff]  ;;  %v187_v18 = vld [vmem:[%s1201_s17 + $0x140] sm:$0xff] }
  0x14   : > { %1057 = vmatmul.mubr.msk.f32.gmra.mxu0 %vm212_vm0, %v150_v7  ;;  %v156_v19 = vld [vmem:[%s1201_s17 + $0x48] sm:$0xff]  ;;  %v157_v21 = vld [vmem:[%s1201_s17 + $0x50] sm:$0xff]  ;;  %v158_v23 = vld [vmem:[%s1201_s17 + $0x58] sm:$0xff] }
  0x15   : > { %1105 = vmatmul.mubr.msk.f32.gmra.mxu1 %vm212_vm0, %v182_v8  ;;  %1059 = vmatprep.mubr.msk.f32.mxu0 %vm212_vm0, %v151_v9  ;;  %v188_v20 = vld [vmem:[%s1201_s17 + $0x148] sm:$0xff]  ;;  %v189_v22 = vld [vmem:[%s1201_s17 + $0x150] sm:$0xff]  ;;  %v190_v24 = vld [vmem:[%s1201_s17 + $0x158] sm:$0xff] }
  0x16   : > { %1107 = vmatprep.mubr.msk.f32.mxu1 %vm212_vm0, %v183_v10  ;;  %v159_v25 = vld [vmem:[%s1201_s17 + $0x60] sm:$0xff]  ;;  %v160_v27 = vld [vmem:[%s1201_s17 + $0x68] sm:$0xff]  ;;  %v161_v29 = vld [vmem:[%s1201_s17 + $0x70] sm:$0xff] }
  0x17   : > { %v191_v26 = vld [vmem:[%s1201_s17 + $0x160] sm:$0xff]  ;;  %v192_v28 = vld [vmem:[%s1201_s17 + $0x168] sm:$0xff]  ;;  %v193_v30 = vld [vmem:[%s1201_s17 + $0x170] sm:$0xff] }
  0x18   : > { %1060 = vmatmul.mubr.msk.f32.gmra.mxu0 %vm212_vm0, %v152_v11  ;;  %v162_v31 = vld [vmem:[%s1201_s17 + $0x78] sm:$0xff]  ;;  %v163_v33 = vld [vmem:[%s1201_s17 + $0x80] sm:$0xff]  ;;  %v164_v35 = vld [vmem:[%s1201_s17 + $0x88] sm:$0xff] }
  0x19   : > { %1108 = vmatmul.mubr.msk.f32.gmra.mxu1 %vm212_vm0, %v184_v12  ;;  %1062 = vmatprep.mubr.msk.f32.mxu0 %vm212_vm0, %v153_v13  ;;  %v194_v32 = vld [vmem:[%s1201_s17 + $0x178] sm:$0xff]  ;;  %v195_v34 = vld [vmem:[%s1201_s17 + $0x180] sm:$0xff]  ;;  %v196_v36 = vld [vmem:[%s1201_s17 + $0x188] sm:$0xff] }
  0x1a   : > { %1110 = vmatprep.mubr.msk.f32.mxu1 %vm212_vm0, %v185_v14  ;;  %v165_v37 = vld [vmem:[%s1201_s17 + $0x90] sm:$0xff]  ;;  %v166_v39 = vld [vmem:[%s1201_s17 + $0x98] sm:$0xff]  ;;  %v167_v41 = vld [vmem:[%s1201_s17 + $0xa0] sm:$0xff] }
  0x1b   : > { %v197_v38 = vld [vmem:[%s1201_s17 + $0x190] sm:$0xff]  ;;  %v198_v40 = vld [vmem:[%s1201_s17 + $0x198] sm:$0xff]  ;;  %v199_v42 = vld [vmem:[%s1201_s17 + $0x1a0] sm:$0xff] }
  0x1c   : > { %1063 = vmatmul.mubr.msk.f32.gmra.mxu0 %vm212_vm0, %v154_v15  ;;  %v168_v43 = vld [vmem:[%s1201_s17 + $0xa8] sm:$0xff]  ;;  %v169_v45 = vld [vmem:[%s1201_s17 + $0xb0] sm:$0xff]  ;;  %v170_v47 = vld [vmem:[%s1201_s17 + $0xb8] sm:$0xff] }
  0x1d   : > { %1111 = vmatmul.mubr.msk.f32.gmra.mxu1 %vm212_vm0, %v186_v16  ;;  %1065 = vmatprep.mubr.msk.f32.mxu0 %vm212_vm0, %v155_v17  ;;  %v200_v44 = vld [vmem:[%s1201_s17 + $0x1a8] sm:$0xff]  ;;  %v201_v46 = vld [vmem:[%s1201_s17 + $0x1b0] sm:$0xff]  ;;  %v202_v48 = vld [vmem:[%s1201_s17 + $0x1b8] sm:$0xff] }
  0x1e   : > { %1113 = vmatprep.mubr.msk.f32.mxu1 %vm212_vm0, %v187_v18  ;;  %v171_v49 = vld [vmem:[%s1201_s17 + $0xc0] sm:$0xff]  ;;  %v172_v51 = vld [vmem:[%s1201_s17 + $0xc8] sm:$0xff]  ;;  %v173_v53 = vld [vmem:[%s1201_s17 + $0xd0] sm:$0xff] }
  0x1f   : > { %v203_v50 = vld [vmem:[%s1201_s17 + $0x1c0] sm:$0xff]  ;;  %v204_v52 = vld [vmem:[%s1201_s17 + $0x1c8] sm:$0xff]  ;;  %v205_v54 = vld [vmem:[%s1201_s17 + $0x1d0] sm:$0xff] }
  0x20   : > { %1066 = vmatmul.mubr.msk.f32.gmra.mxu0 %vm212_vm0, %v156_v19  ;;  %v174_v55 = vld [vmem:[%s1201_s17 + $0xd8] sm:$0xff]  ;;  %v175_v57 = vld [vmem:[%s1201_s17 + $0xe0] sm:$0xff]  ;;  %v176_v59 = vld [vmem:[%s1201_s17 + $0xe8] sm:$0xff] }
  0x21   : > { %1114 = vmatmul.mubr.msk.f32.gmra.mxu1 %vm212_vm0, %v188_v20  ;;  %1068 = vmatprep.mubr.msk.f32.mxu0 %vm212_vm0, %v157_v21  ;;  %v206_v56 = vld [vmem:[%s1201_s17 + $0x1d8] sm:$0xff]  ;;  %v207_v58 = vld [vmem:[%s1201_s17 + $0x1e0] sm:$0xff]  ;;  %v208_v60 = vld [vmem:[%s1201_s17 + $0x1e8] sm:$0xff] }
  0x22   : > { %1116 = vmatprep.mubr.msk.f32.mxu1 %vm212_vm0, %v189_v22  ;;  %v177_v61 = vld [vmem:[%s1201_s17 + $0xf0] sm:$0xff]  ;;  %v178_v63 = vld [vmem:[%s1201_s17 + $0xf8] sm:$0xff] }
  0x23   : > { %v209_v62 = vld [vmem:[%s1201_s17 + $0x1f0] sm:$0xff]  ;;  %v210_v0 = vld [vmem:[%s1201_s17 + $0x1f8] sm:$0xff] }
  0x24   : > { %1069 = vmatmul.mubr.msk.f32.gmra.mxu0 %vm212_vm0, %v158_v23 }
  0x25   : > { %1117 = vmatmul.mubr.msk.f32.gmra.mxu1 %vm212_vm0, %v190_v24  ;;  %1071 = vmatprep.mubr.msk.f32.mxu0 %vm212_vm0, %v159_v25 }
  0x26   : > { %1119 = vmatprep.mubr.msk.f32.mxu1 %vm212_vm0, %v191_v26 }
  0x28   : > { %1072 = vmatmul.mubr.msk.f32.gmra.mxu0 %vm212_vm0, %v160_v27 }
  0x29   : > { %1120 = vmatmul.mubr.msk.f32.gmra.mxu1 %vm212_vm0, %v192_v28  ;;  %1074 = vmatprep.mubr.msk.f32.mxu0 %vm212_vm0, %v161_v29 }
  0x2a   : > { %1122 = vmatprep.mubr.msk.f32.mxu1 %vm212_vm0, %v193_v30 }
  0x2c   : > { %1075 = vmatmul.mubr.msk.f32.gmra.mxu0 %vm212_vm0, %v162_v31 }
  0x2d   : > { %1123 = vmatmul.mubr.msk.f32.gmra.mxu1 %vm212_vm0, %v194_v32  ;;  %1077 = vmatprep.mubr.msk.f32.mxu0 %vm212_vm0, %v163_v33 }
  0x2e   : > { %1125 = vmatprep.mubr.msk.f32.mxu1 %vm212_vm0, %v195_v34 }
  0x30   : > { %1078 = vmatmul.mubr.msk.f32.gmra.mxu0 %vm212_vm0, %v164_v35 }
  0x31   : > { %1126 = vmatmul.mubr.msk.f32.gmra.mxu1 %vm212_vm0, %v196_v36  ;;  %1080 = vmatprep.mubr.msk.f32.mxu0 %vm212_vm0, %v165_v37 }
  0x32   : > { %1128 = vmatprep.mubr.msk.f32.mxu1 %vm212_vm0, %v197_v38 }
  0x34   : > { %1081 = vmatmul.mubr.msk.f32.gmra.mxu0 %vm212_vm0, %v166_v39 }
  0x35   : > { %1129 = vmatmul.mubr.msk.f32.gmra.mxu1 %vm212_vm0, %v198_v40  ;;  %1083 = vmatprep.mubr.msk.f32.mxu0 %vm212_vm0, %v167_v41 }
  0x36   : > { %1131 = vmatprep.mubr.msk.f32.mxu1 %vm212_vm0, %v199_v42 }
  0x38   : > { %1084 = vmatmul.mubr.msk.f32.gmra.mxu0 %vm212_vm0, %v168_v43 }
  0x39   : > { %1132 = vmatmul.mubr.msk.f32.gmra.mxu1 %vm212_vm0, %v200_v44  ;;  %1086 = vmatprep.mubr.msk.f32.mxu0 %vm212_vm0, %v169_v45 }
  0x3a   : > { %1134 = vmatprep.mubr.msk.f32.mxu1 %vm212_vm0, %v201_v46 }
  0x3c   : > { %1087 = vmatmul.mubr.msk.f32.gmra.mxu0 %vm212_vm0, %v170_v47 }
  0x3d   : > { %1135 = vmatmul.mubr.msk.f32.gmra.mxu1 %vm212_vm0, %v202_v48  ;;  %1089 = vmatprep.mubr.msk.f32.mxu0 %vm212_vm0, %v171_v49 }
  0x3e   : > { %1137 = vmatprep.mubr.msk.f32.mxu1 %vm212_vm0, %v203_v50 }
  0x40   : > { %1090 = vmatmul.mubr.msk.f32.gmra.mxu0 %vm212_vm0, %v172_v51 }
  0x41   : > { %1138 = vmatmul.mubr.msk.f32.gmra.mxu1 %vm212_vm0, %v204_v52  ;;  %1092 = vmatprep.mubr.msk.f32.mxu0 %vm212_vm0, %v173_v53 }
  0x42   : > { %1140 = vmatprep.mubr.msk.f32.mxu1 %vm212_vm0, %v205_v54 }
  0x44   : > { %1093 = vmatmul.mubr.msk.f32.gmra.mxu0 %vm212_vm0, %v174_v55 }
  0x45   : > { %1141 = vmatmul.mubr.msk.f32.gmra.mxu1 %vm212_vm0, %v206_v56  ;;  %1095 = vmatprep.mubr.msk.f32.mxu0 %vm212_vm0, %v175_v57 }
  0x46   : > { %1143 = vmatprep.mubr.msk.f32.mxu1 %vm212_vm0, %v207_v58 }
  0x48   : > { %1096 = vmatmul.mubr.msk.f32.gmra.mxu0 %vm212_vm0, %v176_v59 }
  0x49   : > { %1144 = vmatmul.mubr.msk.f32.gmra.mxu1 %vm212_vm0, %v208_v60  ;;  %1098 = vmatprep.mubr.msk.f32.mxu0 %vm212_vm0, %v177_v61 }
  0x4a   : > { %1146 = vmatprep.mubr.msk.f32.mxu1 %vm212_vm0, %v209_v62 }
  0x4c   : > { %1099 = vmatmul.mubr.msk.f32.gmra.mxu0 %vm212_vm0, %v178_v63 }
  0x4d   : > { %1147 = vmatmul.mubr.msk.f32.gmra.mxu1 %vm212_vm0, %v210_v0 }
  0xd0   : > { %v1055_v1 = vpop.f32.mrf.mxu0 }
  0xd1   : > { %v1103_v2 = vpop.f32.mrf.mxu1  ;;  %792 = vst.msk [vmem:[%s1336_s20 + $0x8] sm:$0xff] %vm790_vm1, %v1055_v1 }
  0xd2   : > { %824 = vst.msk [vmem:[%s1336_s20 + $0x108] sm:$0xff] %vm790_vm1, %v1103_v2  ;;  %v471_v3 = vpop.f32.mrf.mxu0 }
  0xd3   : > { %v631_v4 = vpop.f32.mrf.mxu1  ;;  %791 = vst.msk [vmem:[%s1336_s20] sm:$0xff] %vm790_vm1, %v471_v3 }
  0xd4   : > { %823 = vst.msk [vmem:[%s1336_s20 + $0x100] sm:$0xff] %vm790_vm1, %v631_v4  ;;  %v1058_v5 = vpop.f32.mrf.mxu0 }
  0xd5   : > { %v1106_v6 = vpop.f32.mrf.mxu1  ;;  %794 = vst.msk [vmem:[%s1336_s20 + $0x18] sm:$0xff] %vm790_vm1, %v1058_v5 }
  0xd6   : > { %826 = vst.msk [vmem:[%s1336_s20 + $0x118] sm:$0xff] %vm790_vm1, %v1106_v6  ;;  %v481_v7 = vpop.f32.mrf.mxu0 }
  0xd7   : > { %v641_v8 = vpop.f32.mrf.mxu1  ;;  %793 = vst.msk [vmem:[%s1336_s20 + $0x10] sm:$0xff] %vm790_vm1, %v481_v7 }
  0xd8   : > { %825 = vst.msk [vmem:[%s1336_s20 + $0x110] sm:$0xff] %vm790_vm1, %v641_v8  ;;  %v1061_v9 = vpop.f32.mrf.mxu0 }
  0xd9   : > { %v1109_v10 = vpop.f32.mrf.mxu1  ;;  %796 = vst.msk [vmem:[%s1336_s20 + $0x28] sm:$0xff] %vm790_vm1, %v1061_v9 }
  0xda   : > { %828 = vst.msk [vmem:[%s1336_s20 + $0x128] sm:$0xff] %vm790_vm1, %v1109_v10  ;;  %v491_v11 = vpop.f32.mrf.mxu0 }
  0xdb   : > { %v651_v12 = vpop.f32.mrf.mxu1  ;;  %795 = vst.msk [vmem:[%s1336_s20 + $0x20] sm:$0xff] %vm790_vm1, %v491_v11 }
  0xdc   : > { %827 = vst.msk [vmem:[%s1336_s20 + $0x120] sm:$0xff] %vm790_vm1, %v651_v12  ;;  %v1064_v13 = vpop.f32.mrf.mxu0 }
  0xdd   : > { %v1112_v14 = vpop.f32.mrf.mxu1  ;;  %798 = vst.msk [vmem:[%s1336_s20 + $0x38] sm:$0xff] %vm790_vm1, %v1064_v13 }
  0xde   : > { %830 = vst.msk [vmem:[%s1336_s20 + $0x138] sm:$0xff] %vm790_vm1, %v1112_v14  ;;  %v501_v15 = vpop.f32.mrf.mxu0 }
  0xdf   : > { %v661_v16 = vpop.f32.mrf.mxu1  ;;  %797 = vst.msk [vmem:[%s1336_s20 + $0x30] sm:$0xff] %vm790_vm1, %v501_v15 }
  0xe0   : > { %829 = vst.msk [vmem:[%s1336_s20 + $0x130] sm:$0xff] %vm790_vm1, %v661_v16  ;;  %v1067_v17 = vpop.f32.mrf.mxu0 }
  0xe1   : > { %v1115_v18 = vpop.f32.mrf.mxu1  ;;  %800 = vst.msk [vmem:[%s1336_s20 + $0x48] sm:$0xff] %vm790_vm1, %v1067_v17 }
  0xe2   : > { %832 = vst.msk [vmem:[%s1336_s20 + $0x148] sm:$0xff] %vm790_vm1, %v1115_v18  ;;  %v511_v19 = vpop.f32.mrf.mxu0 }
  0xe3   : > { %v671_v20 = vpop.f32.mrf.mxu1  ;;  %799 = vst.msk [vmem:[%s1336_s20 + $0x40] sm:$0xff] %vm790_vm1, %v511_v19 }
  0xe4   : > { %831 = vst.msk [vmem:[%s1336_s20 + $0x140] sm:$0xff] %vm790_vm1, %v671_v20  ;;  %v1070_v21 = vpop.f32.mrf.mxu0 }
  0xe5   : > { %v1118_v22 = vpop.f32.mrf.mxu1  ;;  %802 = vst.msk [vmem:[%s1336_s20 + $0x58] sm:$0xff] %vm790_vm1, %v1070_v21 }
  0xe6   : > { %834 = vst.msk [vmem:[%s1336_s20 + $0x158] sm:$0xff] %vm790_vm1, %v1118_v22  ;;  %v521_v23 = vpop.f32.mrf.mxu0 }
  0xe7   : > { %v681_v24 = vpop.f32.mrf.mxu1  ;;  %801 = vst.msk [vmem:[%s1336_s20 + $0x50] sm:$0xff] %vm790_vm1, %v521_v23 }
  0xe8   : > { %833 = vst.msk [vmem:[%s1336_s20 + $0x150] sm:$0xff] %vm790_vm1, %v681_v24  ;;  %v1073_v25 = vpop.f32.mrf.mxu0 }
  0xe9   : > { %v1121_v26 = vpop.f32.mrf.mxu1  ;;  %804 = vst.msk [vmem:[%s1336_s20 + $0x68] sm:$0xff] %vm790_vm1, %v1073_v25 }
  0xea   : > { %836 = vst.msk [vmem:[%s1336_s20 + $0x168] sm:$0xff] %vm790_vm1, %v1121_v26  ;;  %v531_v27 = vpop.f32.mrf.mxu0 }
  0xeb   : > { %v691_v28 = vpop.f32.mrf.mxu1  ;;  %803 = vst.msk [vmem:[%s1336_s20 + $0x60] sm:$0xff] %vm790_vm1, %v531_v27 }
  0xec   : > { %835 = vst.msk [vmem:[%s1336_s20 + $0x160] sm:$0xff] %vm790_vm1, %v691_v28  ;;  %v1076_v29 = vpop.f32.mrf.mxu0 }
  0xed   : > { %v1124_v30 = vpop.f32.mrf.mxu1  ;;  %806 = vst.msk [vmem:[%s1336_s20 + $0x78] sm:$0xff] %vm790_vm1, %v1076_v29 }
  0xee   : > { %838 = vst.msk [vmem:[%s1336_s20 + $0x178] sm:$0xff] %vm790_vm1, %v1124_v30  ;;  %v541_v31 = vpop.f32.mrf.mxu0 }
  0xef   : > { %v701_v32 = vpop.f32.mrf.mxu1  ;;  %805 = vst.msk [vmem:[%s1336_s20 + $0x70] sm:$0xff] %vm790_vm1, %v541_v31 }
  0xf0   : > { %837 = vst.msk [vmem:[%s1336_s20 + $0x170] sm:$0xff] %vm790_vm1, %v701_v32  ;;  %v1079_v33 = vpop.f32.mrf.mxu0 }
  0xf1   : > { %v1127_v34 = vpop.f32.mrf.mxu1  ;;  %808 = vst.msk [vmem:[%s1336_s20 + $0x88] sm:$0xff] %vm790_vm1, %v1079_v33 }
  0xf2   : > { %840 = vst.msk [vmem:[%s1336_s20 + $0x188] sm:$0xff] %vm790_vm1, %v1127_v34  ;;  %v551_v35 = vpop.f32.mrf.mxu0 }
  0xf3   : > { %v711_v36 = vpop.f32.mrf.mxu1  ;;  %807 = vst.msk [vmem:[%s1336_s20 + $0x80] sm:$0xff] %vm790_vm1, %v551_v35 }
  0xf4   : > { %839 = vst.msk [vmem:[%s1336_s20 + $0x180] sm:$0xff] %vm790_vm1, %v711_v36  ;;  %v1082_v37 = vpop.f32.mrf.mxu0 }
  0xf5   : > { %v1130_v38 = vpop.f32.mrf.mxu1  ;;  %810 = vst.msk [vmem:[%s1336_s20 + $0x98] sm:$0xff] %vm790_vm1, %v1082_v37 }
  0xf6   : > { %842 = vst.msk [vmem:[%s1336_s20 + $0x198] sm:$0xff] %vm790_vm1, %v1130_v38  ;;  %v561_v39 = vpop.f32.mrf.mxu0 }
  0xf7   : > { %v721_v40 = vpop.f32.mrf.mxu1  ;;  %809 = vst.msk [vmem:[%s1336_s20 + $0x90] sm:$0xff] %vm790_vm1, %v561_v39 }
  0xf8   : > { %841 = vst.msk [vmem:[%s1336_s20 + $0x190] sm:$0xff] %vm790_vm1, %v721_v40  ;;  %v1085_v41 = vpop.f32.mrf.mxu0 }
  0xf9   : > { %v1133_v42 = vpop.f32.mrf.mxu1  ;;  %812 = vst.msk [vmem:[%s1336_s20 + $0xa8] sm:$0xff] %vm790_vm1, %v1085_v41 }
  0xfa   : > { %844 = vst.msk [vmem:[%s1336_s20 + $0x1a8] sm:$0xff] %vm790_vm1, %v1133_v42  ;;  %v571_v43 = vpop.f32.mrf.mxu0 }
  0xfb   : > { %v731_v44 = vpop.f32.mrf.mxu1  ;;  %811 = vst.msk [vmem:[%s1336_s20 + $0xa0] sm:$0xff] %vm790_vm1, %v571_v43 }
  0xfc   : > { %843 = vst.msk [vmem:[%s1336_s20 + $0x1a0] sm:$0xff] %vm790_vm1, %v731_v44  ;;  %v1088_v45 = vpop.f32.mrf.mxu0 }
  0xfd   : > { %v1136_v46 = vpop.f32.mrf.mxu1  ;;  %814 = vst.msk [vmem:[%s1336_s20 + $0xb8] sm:$0xff] %vm790_vm1, %v1088_v45 }
  0xfe   : > { %846 = vst.msk [vmem:[%s1336_s20 + $0x1b8] sm:$0xff] %vm790_vm1, %v1136_v46  ;;  %v581_v47 = vpop.f32.mrf.mxu0 }
  0xff   : > { %v741_v48 = vpop.f32.mrf.mxu1  ;;  %813 = vst.msk [vmem:[%s1336_s20 + $0xb0] sm:$0xff] %vm790_vm1, %v581_v47 }
 0x100   : > { %845 = vst.msk [vmem:[%s1336_s20 + $0x1b0] sm:$0xff] %vm790_vm1, %v741_v48  ;;  %v1091_v49 = vpop.f32.mrf.mxu0 }
 0x101   : > { %v1139_v50 = vpop.f32.mrf.mxu1  ;;  %816 = vst.msk [vmem:[%s1336_s20 + $0xc8] sm:$0xff] %vm790_vm1, %v1091_v49 }
 0x102   : > { %848 = vst.msk [vmem:[%s1336_s20 + $0x1c8] sm:$0xff] %vm790_vm1, %v1139_v50  ;;  %v591_v51 = vpop.f32.mrf.mxu0 }
 0x103   : > { %v751_v52 = vpop.f32.mrf.mxu1  ;;  %815 = vst.msk [vmem:[%s1336_s20 + $0xc0] sm:$0xff] %vm790_vm1, %v591_v51 }
 0x104   : > { %847 = vst.msk [vmem:[%s1336_s20 + $0x1c0] sm:$0xff] %vm790_vm1, %v751_v52  ;;  %v1094_v53 = vpop.f32.mrf.mxu0 }
 0x105   : > { %v1142_v54 = vpop.f32.mrf.mxu1  ;;  %818 = vst.msk [vmem:[%s1336_s20 + $0xd8] sm:$0xff] %vm790_vm1, %v1094_v53 }
 0x106   : > { %850 = vst.msk [vmem:[%s1336_s20 + $0x1d8] sm:$0xff] %vm790_vm1, %v1142_v54  ;;  %v601_v55 = vpop.f32.mrf.mxu0 }
 0x107   : > { %v761_v56 = vpop.f32.mrf.mxu1  ;;  %817 = vst.msk [vmem:[%s1336_s20 + $0xd0] sm:$0xff] %vm790_vm1, %v601_v55 }
 0x108   : > { %849 = vst.msk [vmem:[%s1336_s20 + $0x1d0] sm:$0xff] %vm790_vm1, %v761_v56  ;;  %v1097_v57 = vpop.f32.mrf.mxu0 }
 0x109   : > { %v1145_v58 = vpop.f32.mrf.mxu1  ;;  %820 = vst.msk [vmem:[%s1336_s20 + $0xe8] sm:$0xff] %vm790_vm1, %v1097_v57 }
 0x10a   : > { %852 = vst.msk [vmem:[%s1336_s20 + $0x1e8] sm:$0xff] %vm790_vm1, %v1145_v58  ;;  %v611_v59 = vpop.f32.mrf.mxu0 }
 0x10b   : > { %v771_v60 = vpop.f32.mrf.mxu1  ;;  %819 = vst.msk [vmem:[%s1336_s20 + $0xe0] sm:$0xff] %vm790_vm1, %v611_v59 }
 0x10c   : > { %851 = vst.msk [vmem:[%s1336_s20 + $0x1e0] sm:$0xff] %vm790_vm1, %v771_v60  ;;  %v1100_v61 = vpop.f32.mrf.mxu0 }
 0x10d   : > { %v1148_v62 = vpop.f32.mrf.mxu1  ;;  %822 = vst.msk [vmem:[%s1336_s20 + $0xf8] sm:$0xff] %vm790_vm1, %v1100_v61 }
 0x10e   : > { %854 = vst.msk [vmem:[%s1336_s20 + $0x1f8] sm:$0xff] %vm790_vm1, %v1148_v62  ;;  %v621_v63 = vpop.f32.mrf.mxu0 }
 0x10f   : > { %v781_v0 = vpop.f32.mrf.mxu1  ;;  %821 = vst.msk [vmem:[%s1336_s20 + $0xf0] sm:$0xff] %vm790_vm1, %v621_v63 }
 0x110   : > { %853 = vst.msk [vmem:[%s1336_s20 + $0x1f0] sm:$0xff] %vm790_vm1, %v781_v0 }
 0x111 PF: > { %s12_s9 = sadd.s32 1, %s1165_s9  }
 0x112   : > { %p9_p4 = scmp.ge.s32.totalorder %s12_s9, 6  }
 0x114   :  { %11 = sbr.rel (!%p9_p4) target bundleno = 1 (0x1), region = 58 }

// kernel: upsample_forward.4
= control target key start
LH: loop header
LB: loop body
LE: loop exit
PB: predicated region body
PF: predicated region fallthrough
CT: control target
= control target key end

     0   :  { %s1182_s9 = smov 0   ;;  %s1469_s0 = inlined_call_operand.vmem [shape: f32[4096,8], index: 0, kind: input, shape index: {}]   ;;  %s1470_s1 = inlined_call_operand.vmem [shape: f32[8,16], index: 1, kind: input, shape index: {}]   ;;  %s1471_s2 = inlined_call_operand.vmem [shape: f32[4096,16], index: 2, kind: output, shape index: {}]  }
   0x1 LB: > { %s911_s10 = sadd.s32 4294967295, %s1165_s9   ;;  %p915_p0 = scmp.ge.s32.totalorder %s1165_s9, 1  ;;  %s1165_s9 = sphi %s1182_s9, %s12_s9  }
   0x2   : > { %p113_p1 = scmp.lt.s32.totalorder %s1165_s9, 9 }
   0x4   : > { %p114_p2 = pnand %p915_p0, %p113_p1 }
   0x5   : > { %s916_s13 = sshll.u32 (!%p114_p2), %s911_s10, 6 }
   0x6   : > { %117 = sbr.rel (%p114_p2) target bundleno = 273 (0x111), region = 28  ;;  %p136_p3 = scmp.lt.s32.totalorder (!%p114_p2), %s916_s13, 511 }
   0xb   : > { %v211_v0 = vld [vmem:[%s1470_s1] sm:$0xff]  ;;  %s1473_s13 = smov (!%p136_p3, %s916_s13), 511  ;;  %vm212_vm0 = vcmask 64512   ;;  %vm790_vm1 = vcmask 130048  }
   0xc   : > { %1051 = vmatprep.subr.mxu0 %v211_v0  ;;  %1149 = vmatprep.subr.mxu1 %v211_v0  ;;  %s917_s14 = sshll.u32 %s1473_s13, 3 }
   0xd   : > { %1052 = vmatpush3.msra.mxu0 %v211_v0  ;;  %1150 = vmatpush3.msra.mxu1 %v211_v0  ;;  %s1201_s17 = scalar_lea.vmem %s1469_s0, %s917_s14  ;;  %s1336_s20 = scalar_lea.vmem %s1471_s2, %s917_s14 }
   0xe   : > { %v147_v1 = vld [vmem:[%s1201_s17] sm:$0xff]  ;;  %v148_v3 = vld [vmem:[%s1201_s17 + $0x8] sm:$0xff]  ;;  %v149_v5 = vld [vmem:[%s1201_s17 + $0x10] sm:$0xff] }
   0xf   : > { %v179_v2 = vld [vmem:[%s1201_s17 + $0x100] sm:$0xff]  ;;  %1053 = vmatprep.mubr.msk.f32.mxu0 %vm212_vm0, %v147_v1  ;;  %v180_v4 = vld [vmem:[%s1201_s17 + $0x108] sm:$0xff]  ;;  %v181_v6 = vld [vmem:[%s1201_s17 + $0x110] sm:$0xff] }
  0x10   : > { %1101 = vmatprep.mubr.msk.f32.mxu1 %vm212_vm0, %v179_v2  ;;  %1054 = vmatmul.mubr.msk.f32.vlgmr.msra.gmra.mxu0 %vm212_vm0, %v148_v3  ;;  %v150_v7 = vld [vmem:[%s1201_s17 + $0x18] sm:$0xff]  ;;  %v151_v9 = vld [vmem:[%s1201_s17 + $0x20] sm:$0xff]  ;;  %v152_v11 = vld [vmem:[%s1201_s17 + $0x28] sm:$0xff] }
  0x11   : > { %1102 = vmatmul.mubr.msk.f32.vlgmr.msra.gmra.mxu1 %vm212_vm0, %v180_v4  ;;  %1056 = vmatprep.mubr.msk.f32.mxu0 %vm212_vm0, %v149_v5  ;;  %v182_v8 = vld [vmem:[%s1201_s17 + $0x118] sm:$0xff]  ;;  %v183_v10 = vld [vmem:[%s1201_s17 + $0x120] sm:$0xff]  ;;  %v184_v12 = vld [vmem:[%s1201_s17 + $0x128] sm:$0xff] }
  0x12   : > { %1104 = vmatprep.mubr.msk.f32.mxu1 %vm212_vm0, %v181_v6  ;;  %v153_v13 = vld [vmem:[%s1201_s17 + $0x30] sm:$0xff]  ;;  %v154_v15 = vld [vmem:[%s1201_s17 + $0x38] sm:$0xff]  ;;  %v155_v17 = vld [vmem:[%s1201_s17 + $0x40] sm:$0xff] }
  0x13   : > { %v185_v14 = vld [vmem:[%s1201_s17 + $0x130] sm:$0xff]  ;;  %v186_v16 = vld [vmem:[%s1201_s17 + $0x138] sm:$0xff]  ;;  %v187_v18 = vld [vmem:[%s1201_s17 + $0x140] sm:$0xff] }
  0x14   : > { %1057 = vmatmul.mubr.msk.f32.gmra.mxu0 %vm212_vm0, %v150_v7  ;;  %v156_v19 = vld [vmem:[%s1201_s17 + $0x48] sm:$0xff]  ;;  %v157_v21 = vld [vmem:[%s1201_s17 + $0x50] sm:$0xff]  ;;  %v158_v23 = vld [vmem:[%s1201_s17 + $0x58] sm:$0xff] }
  0x15   : > { %1105 = vmatmul.mubr.msk.f32.gmra.mxu1 %vm212_vm0, %v182_v8  ;;  %1059 = vmatprep.mubr.msk.f32.mxu0 %vm212_vm0, %v151_v9  ;;  %v188_v20 = vld [vmem:[%s1201_s17 + $0x148] sm:$0xff]  ;;  %v189_v22 = vld [vmem:[%s1201_s17 + $0x150] sm:$0xff]  ;;  %v190_v24 = vld [vmem:[%s1201_s17 + $0x158] sm:$0xff] }
  0x16   : > { %1107 = vmatprep.mubr.msk.f32.mxu1 %vm212_vm0, %v183_v10  ;;  %v159_v25 = vld [vmem:[%s1201_s17 + $0x60] sm:$0xff]  ;;  %v160_v27 = vld [vmem:[%s1201_s17 + $0x68] sm:$0xff]  ;;  %v161_v29 = vld [vmem:[%s1201_s17 + $0x70] sm:$0xff] }
  0x17   : > { %v191_v26 = vld [vmem:[%s1201_s17 + $0x160] sm:$0xff]  ;;  %v192_v28 = vld [vmem:[%s1201_s17 + $0x168] sm:$0xff]  ;;  %v193_v30 = vld [vmem:[%s1201_s17 + $0x170] sm:$0xff] }
  0x18   : > { %1060 = vmatmul.mubr.msk.f32.gmra.mxu0 %vm212_vm0, %v152_v11  ;;  %v162_v31 = vld [vmem:[%s1201_s17 + $0x78] sm:$0xff]  ;;  %v163_v33 = vld [vmem:[%s1201_s17 + $0x80] sm:$0xff]  ;;  %v164_v35 = vld [vmem:[%s1201_s17 + $0x88] sm:$0xff] }
  0x19   : > { %1108 = vmatmul.mubr.msk.f32.gmra.mxu1 %vm212_vm0, %v184_v12  ;;  %1062 = vmatprep.mubr.msk.f32.mxu0 %vm212_vm0, %v153_v13  ;;  %v194_v32 = vld [vmem:[%s1201_s17 + $0x178] sm:$0xff]  ;;  %v195_v34 = vld [vmem:[%s1201_s17 + $0x180] sm:$0xff]  ;;  %v196_v36 = vld [vmem:[%s1201_s17 + $0x188] sm:$0xff] }
  0x1a   : > { %1110 = vmatprep.mubr.msk.f32.mxu1 %vm212_vm0, %v185_v14  ;;  %v165_v37 = vld [vmem:[%s1201_s17 + $0x90] sm:$0xff]  ;;  %v166_v39 = vld [vmem:[%s1201_s17 + $0x98] sm:$0xff]  ;;  %v167_v41 = vld [vmem:[%s1201_s17 + $0xa0] sm:$0xff] }
  0x1b   : > { %v197_v38 = vld [vmem:[%s1201_s17 + $0x190] sm:$0xff]  ;;  %v198_v40 = vld [vmem:[%s1201_s17 + $0x198] sm:$0xff]  ;;  %v199_v42 = vld [vmem:[%s1201_s17 + $0x1a0] sm:$0xff] }
  0x1c   : > { %1063 = vmatmul.mubr.msk.f32.gmra.mxu0 %vm212_vm0, %v154_v15  ;;  %v168_v43 = vld [vmem:[%s1201_s17 + $0xa8] sm:$0xff]  ;;  %v169_v45 = vld [vmem:[%s1201_s17 + $0xb0] sm:$0xff]  ;;  %v170_v47 = vld [vmem:[%s1201_s17 + $0xb8] sm:$0xff] }
  0x1d   : > { %1111 = vmatmul.mubr.msk.f32.gmra.mxu1 %vm212_vm0, %v186_v16  ;;  %1065 = vmatprep.mubr.msk.f32.mxu0 %vm212_vm0, %v155_v17  ;;  %v200_v44 = vld [vmem:[%s1201_s17 + $0x1a8] sm:$0xff]  ;;  %v201_v46 = vld [vmem:[%s1201_s17 + $0x1b0] sm:$0xff]  ;;  %v202_v48 = vld [vmem:[%s1201_s17 + $0x1b8] sm:$0xff] }
  0x1e   : > { %1113 = vmatprep.mubr.msk.f32.mxu1 %vm212_vm0, %v187_v18  ;;  %v171_v49 = vld [vmem:[%s1201_s17 + $0xc0] sm:$0xff]  ;;  %v172_v51 = vld [vmem:[%s1201_s17 + $0xc8] sm:$0xff]  ;;  %v173_v53 = vld [vmem:[%s1201_s17 + $0xd0] sm:$0xff] }
  0x1f   : > { %v203_v50 = vld [vmem:[%s1201_s17 + $0x1c0] sm:$0xff]  ;;  %v204_v52 = vld [vmem:[%s1201_s17 + $0x1c8] sm:$0xff]  ;;  %v205_v54 = vld [vmem:[%s1201_s17 + $0x1d0] sm:$0xff] }
  0x20   : > { %1066 = vmatmul.mubr.msk.f32.gmra.mxu0 %vm212_vm0, %v156_v19  ;;  %v174_v55 = vld [vmem:[%s1201_s17 + $0xd8] sm:$0xff]  ;;  %v175_v57 = vld [vmem:[%s1201_s17 + $0xe0] sm:$0xff]  ;;  %v176_v59 = vld [vmem:[%s1201_s17 + $0xe8] sm:$0xff] }
  0x21   : > { %1114 = vmatmul.mubr.msk.f32.gmra.mxu1 %vm212_vm0, %v188_v20  ;;  %1068 = vmatprep.mubr.msk.f32.mxu0 %vm212_vm0, %v157_v21  ;;  %v206_v56 = vld [vmem:[%s1201_s17 + $0x1d8] sm:$0xff]  ;;  %v207_v58 = vld [vmem:[%s1201_s17 + $0x1e0] sm:$0xff]  ;;  %v208_v60 = vld [vmem:[%s1201_s17 + $0x1e8] sm:$0xff] }
  0x22   : > { %1116 = vmatprep.mubr.msk.f32.mxu1 %vm212_vm0, %v189_v22  ;;  %v177_v61 = vld [vmem:[%s1201_s17 + $0xf0] sm:$0xff]  ;;  %v178_v63 = vld [vmem:[%s1201_s17 + $0xf8] sm:$0xff] }
  0x23   : > { %v209_v62 = vld [vmem:[%s1201_s17 + $0x1f0] sm:$0xff]  ;;  %v210_v0 = vld [vmem:[%s1201_s17 + $0x1f8] sm:$0xff] }
  0x24   : > { %1069 = vmatmul.mubr.msk.f32.gmra.mxu0 %vm212_vm0, %v158_v23 }
  0x25   : > { %1117 = vmatmul.mubr.msk.f32.gmra.mxu1 %vm212_vm0, %v190_v24  ;;  %1071 = vmatprep.mubr.msk.f32.mxu0 %vm212_vm0, %v159_v25 }
  0x26   : > { %1119 = vmatprep.mubr.msk.f32.mxu1 %vm212_vm0, %v191_v26 }
  0x28   : > { %1072 = vmatmul.mubr.msk.f32.gmra.mxu0 %vm212_vm0, %v160_v27 }
  0x29   : > { %1120 = vmatmul.mubr.msk.f32.gmra.mxu1 %vm212_vm0, %v192_v28  ;;  %1074 = vmatprep.mubr.msk.f32.mxu0 %vm212_vm0, %v161_v29 }
  0x2a   : > { %1122 = vmatprep.mubr.msk.f32.mxu1 %vm212_vm0, %v193_v30 }
  0x2c   : > { %1075 = vmatmul.mubr.msk.f32.gmra.mxu0 %vm212_vm0, %v162_v31 }
  0x2d   : > { %1123 = vmatmul.mubr.msk.f32.gmra.mxu1 %vm212_vm0, %v194_v32  ;;  %1077 = vmatprep.mubr.msk.f32.mxu0 %vm212_vm0, %v163_v33 }
  0x2e   : > { %1125 = vmatprep.mubr.msk.f32.mxu1 %vm212_vm0, %v195_v34 }
  0x30   : > { %1078 = vmatmul.mubr.msk.f32.gmra.mxu0 %vm212_vm0, %v164_v35 }
  0x31   : > { %1126 = vmatmul.mubr.msk.f32.gmra.mxu1 %vm212_vm0, %v196_v36  ;;  %1080 = vmatprep.mubr.msk.f32.mxu0 %vm212_vm0, %v165_v37 }
  0x32   : > { %1128 = vmatprep.mubr.msk.f32.mxu1 %vm212_vm0, %v197_v38 }
  0x34   : > { %1081 = vmatmul.mubr.msk.f32.gmra.mxu0 %vm212_vm0, %v166_v39 }
  0x35   : > { %1129 = vmatmul.mubr.msk.f32.gmra.mxu1 %vm212_vm0, %v198_v40  ;;  %1083 = vmatprep.mubr.msk.f32.mxu0 %vm212_vm0, %v167_v41 }
  0x36   : > { %1131 = vmatprep.mubr.msk.f32.mxu1 %vm212_vm0, %v199_v42 }
  0x38   : > { %1084 = vmatmul.mubr.msk.f32.gmra.mxu0 %vm212_vm0, %v168_v43 }
  0x39   : > { %1132 = vmatmul.mubr.msk.f32.gmra.mxu1 %vm212_vm0, %v200_v44  ;;  %1086 = vmatprep.mubr.msk.f32.mxu0 %vm212_vm0, %v169_v45 }
  0x3a   : > { %1134 = vmatprep.mubr.msk.f32.mxu1 %vm212_vm0, %v201_v46 }
  0x3c   : > { %1087 = vmatmul.mubr.msk.f32.gmra.mxu0 %vm212_vm0, %v170_v47 }
  0x3d   : > { %1135 = vmatmul.mubr.msk.f32.gmra.mxu1 %vm212_vm0, %v202_v48  ;;  %1089 = vmatprep.mubr.msk.f32.mxu0 %vm212_vm0, %v171_v49 }
  0x3e   : > { %1137 = vmatprep.mubr.msk.f32.mxu1 %vm212_vm0, %v203_v50 }
  0x40   : > { %1090 = vmatmul.mubr.msk.f32.gmra.mxu0 %vm212_vm0, %v172_v51 }
  0x41   : > { %1138 = vmatmul.mubr.msk.f32.gmra.mxu1 %vm212_vm0, %v204_v52  ;;  %1092 = vmatprep.mubr.msk.f32.mxu0 %vm212_vm0, %v173_v53 }
  0x42   : > { %1140 = vmatprep.mubr.msk.f32.mxu1 %vm212_vm0, %v205_v54 }
  0x44   : > { %1093 = vmatmul.mubr.msk.f32.gmra.mxu0 %vm212_vm0, %v174_v55 }
  0x45   : > { %1141 = vmatmul.mubr.msk.f32.gmra.mxu1 %vm212_vm0, %v206_v56  ;;  %1095 = vmatprep.mubr.msk.f32.mxu0 %vm212_vm0, %v175_v57 }
  0x46   : > { %1143 = vmatprep.mubr.msk.f32.mxu1 %vm212_vm0, %v207_v58 }
  0x48   : > { %1096 = vmatmul.mubr.msk.f32.gmra.mxu0 %vm212_vm0, %v176_v59 }
  0x49   : > { %1144 = vmatmul.mubr.msk.f32.gmra.mxu1 %vm212_vm0, %v208_v60  ;;  %1098 = vmatprep.mubr.msk.f32.mxu0 %vm212_vm0, %v177_v61 }
  0x4a   : > { %1146 = vmatprep.mubr.msk.f32.mxu1 %vm212_vm0, %v209_v62 }
  0x4c   : > { %1099 = vmatmul.mubr.msk.f32.gmra.mxu0 %vm212_vm0, %v178_v63 }
  0x4d   : > { %1147 = vmatmul.mubr.msk.f32.gmra.mxu1 %vm212_vm0, %v210_v0 }
  0xd0   : > { %v1055_v1 = vpop.f32.mrf.mxu0 }
  0xd1   : > { %v1103_v2 = vpop.f32.mrf.mxu1  ;;  %792 = vst.msk [vmem:[%s1336_s20 + $0x8] sm:$0xff] %vm790_vm1, %v1055_v1 }
  0xd2   : > { %824 = vst.msk [vmem:[%s1336_s20 + $0x108] sm:$0xff] %vm790_vm1, %v1103_v2  ;;  %v471_v3 = vpop.f32.mrf.mxu0 }
  0xd3   : > { %v631_v4 = vpop.f32.mrf.mxu1  ;;  %791 = vst.msk [vmem:[%s1336_s20] sm:$0xff] %vm790_vm1, %v471_v3 }
  0xd4   : > { %823 = vst.msk [vmem:[%s1336_s20 + $0x100] sm:$0xff] %vm790_vm1, %v631_v4  ;;  %v1058_v5 = vpop.f32.mrf.mxu0 }
  0xd5   : > { %v1106_v6 = vpop.f32.mrf.mxu1  ;;  %794 = vst.msk [vmem:[%s1336_s20 + $0x18] sm:$0xff] %vm790_vm1, %v1058_v5 }
  0xd6   : > { %826 = vst.msk [vmem:[%s1336_s20 + $0x118] sm:$0xff] %vm790_vm1, %v1106_v6  ;;  %v481_v7 = vpop.f32.mrf.mxu0 }
  0xd7   : > { %v641_v8 = vpop.f32.mrf.mxu1  ;;  %793 = vst.msk [vmem:[%s1336_s20 + $0x10] sm:$0xff] %vm790_vm1, %v481_v7 }
  0xd8   : > { %825 = vst.msk [vmem:[%s1336_s20 + $0x110] sm:$0xff] %vm790_vm1, %v641_v8  ;;  %v1061_v9 = vpop.f32.mrf.mxu0 }
  0xd9   : > { %v1109_v10 = vpop.f32.mrf.mxu1  ;;  %796 = vst.msk [vmem:[%s1336_s20 + $0x28] sm:$0xff] %vm790_vm1, %v1061_v9 }
  0xda   : > { %828 = vst.msk [vmem:[%s1336_s20 + $0x128] sm:$0xff] %vm790_vm1, %v1109_v10  ;;  %v491_v11 = vpop.f32.mrf.mxu0 }
  0xdb   : > { %v651_v12 = vpop.f32.mrf.mxu1  ;;  %795 = vst.msk [vmem:[%s1336_s20 + $0x20] sm:$0xff] %vm790_vm1, %v491_v11 }
  0xdc   : > { %827 = vst.msk [vmem:[%s1336_s20 + $0x120] sm:$0xff] %vm790_vm1, %v651_v12  ;;  %v1064_v13 = vpop.f32.mrf.mxu0 }
  0xdd   : > { %v1112_v14 = vpop.f32.mrf.mxu1  ;;  %798 = vst.msk [vmem:[%s1336_s20 + $0x38] sm:$0xff] %vm790_vm1, %v1064_v13 }
  0xde   : > { %830 = vst.msk [vmem:[%s1336_s20 + $0x138] sm:$0xff] %vm790_vm1, %v1112_v14  ;;  %v501_v15 = vpop.f32.mrf.mxu0 }
  0xdf   : > { %v661_v16 = vpop.f32.mrf.mxu1  ;;  %797 = vst.msk [vmem:[%s1336_s20 + $0x30] sm:$0xff] %vm790_vm1, %v501_v15 }
  0xe0   : > { %829 = vst.msk [vmem:[%s1336_s20 + $0x130] sm:$0xff] %vm790_vm1, %v661_v16  ;;  %v1067_v17 = vpop.f32.mrf.mxu0 }
  0xe1   : > { %v1115_v18 = vpop.f32.mrf.mxu1  ;;  %800 = vst.msk [vmem:[%s1336_s20 + $0x48] sm:$0xff] %vm790_vm1, %v1067_v17 }
  0xe2   : > { %832 = vst.msk [vmem:[%s1336_s20 + $0x148] sm:$0xff] %vm790_vm1, %v1115_v18  ;;  %v511_v19 = vpop.f32.mrf.mxu0 }
  0xe3   : > { %v671_v20 = vpop.f32.mrf.mxu1  ;;  %799 = vst.msk [vmem:[%s1336_s20 + $0x40] sm:$0xff] %vm790_vm1, %v511_v19 }
  0xe4   : > { %831 = vst.msk [vmem:[%s1336_s20 + $0x140] sm:$0xff] %vm790_vm1, %v671_v20  ;;  %v1070_v21 = vpop.f32.mrf.mxu0 }
  0xe5   : > { %v1118_v22 = vpop.f32.mrf.mxu1  ;;  %802 = vst.msk [vmem:[%s1336_s20 + $0x58] sm:$0xff] %vm790_vm1, %v1070_v21 }
  0xe6   : > { %834 = vst.msk [vmem:[%s1336_s20 + $0x158] sm:$0xff] %vm790_vm1, %v1118_v22  ;;  %v521_v23 = vpop.f32.mrf.mxu0 }
  0xe7   : > { %v681_v24 = vpop.f32.mrf.mxu1  ;;  %801 = vst.msk [vmem:[%s1336_s20 + $0x50] sm:$0xff] %vm790_vm1, %v521_v23 }
  0xe8   : > { %833 = vst.msk [vmem:[%s1336_s20 + $0x150] sm:$0xff] %vm790_vm1, %v681_v24  ;;  %v1073_v25 = vpop.f32.mrf.mxu0 }
  0xe9   : > { %v1121_v26 = vpop.f32.mrf.mxu1  ;;  %804 = vst.msk [vmem:[%s1336_s20 + $0x68] sm:$0xff] %vm790_vm1, %v1073_v25 }
  0xea   : > { %836 = vst.msk [vmem:[%s1336_s20 + $0x168] sm:$0xff] %vm790_vm1, %v1121_v26  ;;  %v531_v27 = vpop.f32.mrf.mxu0 }
  0xeb   : > { %v691_v28 = vpop.f32.mrf.mxu1  ;;  %803 = vst.msk [vmem:[%s1336_s20 + $0x60] sm:$0xff] %vm790_vm1, %v531_v27 }
  0xec   : > { %835 = vst.msk [vmem:[%s1336_s20 + $0x160] sm:$0xff] %vm790_vm1, %v691_v28  ;;  %v1076_v29 = vpop.f32.mrf.mxu0 }
  0xed   : > { %v1124_v30 = vpop.f32.mrf.mxu1  ;;  %806 = vst.msk [vmem:[%s1336_s20 + $0x78] sm:$0xff] %vm790_vm1, %v1076_v29 }
  0xee   : > { %838 = vst.msk [vmem:[%s1336_s20 + $0x178] sm:$0xff] %vm790_vm1, %v1124_v30  ;;  %v541_v31 = vpop.f32.mrf.mxu0 }
  0xef   : > { %v701_v32 = vpop.f32.mrf.mxu1  ;;  %805 = vst.msk [vmem:[%s1336_s20 + $0x70] sm:$0xff] %vm790_vm1, %v541_v31 }
  0xf0   : > { %837 = vst.msk [vmem:[%s1336_s20 + $0x170] sm:$0xff] %vm790_vm1, %v701_v32  ;;  %v1079_v33 = vpop.f32.mrf.mxu0 }
  0xf1   : > { %v1127_v34 = vpop.f32.mrf.mxu1  ;;  %808 = vst.msk [vmem:[%s1336_s20 + $0x88] sm:$0xff] %vm790_vm1, %v1079_v33 }
  0xf2   : > { %840 = vst.msk [vmem:[%s1336_s20 + $0x188] sm:$0xff] %vm790_vm1, %v1127_v34  ;;  %v551_v35 = vpop.f32.mrf.mxu0 }
  0xf3   : > { %v711_v36 = vpop.f32.mrf.mxu1  ;;  %807 = vst.msk [vmem:[%s1336_s20 + $0x80] sm:$0xff] %vm790_vm1, %v551_v35 }
  0xf4   : > { %839 = vst.msk [vmem:[%s1336_s20 + $0x180] sm:$0xff] %vm790_vm1, %v711_v36  ;;  %v1082_v37 = vpop.f32.mrf.mxu0 }
  0xf5   : > { %v1130_v38 = vpop.f32.mrf.mxu1  ;;  %810 = vst.msk [vmem:[%s1336_s20 + $0x98] sm:$0xff] %vm790_vm1, %v1082_v37 }
  0xf6   : > { %842 = vst.msk [vmem:[%s1336_s20 + $0x198] sm:$0xff] %vm790_vm1, %v1130_v38  ;;  %v561_v39 = vpop.f32.mrf.mxu0 }
  0xf7   : > { %v721_v40 = vpop.f32.mrf.mxu1  ;;  %809 = vst.msk [vmem:[%s1336_s20 + $0x90] sm:$0xff] %vm790_vm1, %v561_v39 }
  0xf8   : > { %841 = vst.msk [vmem:[%s1336_s20 + $0x190] sm:$0xff] %vm790_vm1, %v721_v40  ;;  %v1085_v41 = vpop.f32.mrf.mxu0 }
  0xf9   : > { %v1133_v42 = vpop.f32.mrf.mxu1  ;;  %812 = vst.msk [vmem:[%s1336_s20 + $0xa8] sm:$0xff] %vm790_vm1, %v1085_v41 }
  0xfa   : > { %844 = vst.msk [vmem:[%s1336_s20 + $0x1a8] sm:$0xff] %vm790_vm1, %v1133_v42  ;;  %v571_v43 = vpop.f32.mrf.mxu0 }
  0xfb   : > { %v731_v44 = vpop.f32.mrf.mxu1  ;;  %811 = vst.msk [vmem:[%s1336_s20 + $0xa0] sm:$0xff] %vm790_vm1, %v571_v43 }
  0xfc   : > { %843 = vst.msk [vmem:[%s1336_s20 + $0x1a0] sm:$0xff] %vm790_vm1, %v731_v44  ;;  %v1088_v45 = vpop.f32.mrf.mxu0 }
  0xfd   : > { %v1136_v46 = vpop.f32.mrf.mxu1  ;;  %814 = vst.msk [vmem:[%s1336_s20 + $0xb8] sm:$0xff] %vm790_vm1, %v1088_v45 }
  0xfe   : > { %846 = vst.msk [vmem:[%s1336_s20 + $0x1b8] sm:$0xff] %vm790_vm1, %v1136_v46  ;;  %v581_v47 = vpop.f32.mrf.mxu0 }
  0xff   : > { %v741_v48 = vpop.f32.mrf.mxu1  ;;  %813 = vst.msk [vmem:[%s1336_s20 + $0xb0] sm:$0xff] %vm790_vm1, %v581_v47 }
 0x100   : > { %845 = vst.msk [vmem:[%s1336_s20 + $0x1b0] sm:$0xff] %vm790_vm1, %v741_v48  ;;  %v1091_v49 = vpop.f32.mrf.mxu0 }
 0x101   : > { %v1139_v50 = vpop.f32.mrf.mxu1  ;;  %816 = vst.msk [vmem:[%s1336_s20 + $0xc8] sm:$0xff] %vm790_vm1, %v1091_v49 }
 0x102   : > { %848 = vst.msk [vmem:[%s1336_s20 + $0x1c8] sm:$0xff] %vm790_vm1, %v1139_v50  ;;  %v591_v51 = vpop.f32.mrf.mxu0 }
 0x103   : > { %v751_v52 = vpop.f32.mrf.mxu1  ;;  %815 = vst.msk [vmem:[%s1336_s20 + $0xc0] sm:$0xff] %vm790_vm1, %v591_v51 }
 0x104   : > { %847 = vst.msk [vmem:[%s1336_s20 + $0x1c0] sm:$0xff] %vm790_vm1, %v751_v52  ;;  %v1094_v53 = vpop.f32.mrf.mxu0 }
 0x105   : > { %v1142_v54 = vpop.f32.mrf.mxu1  ;;  %818 = vst.msk [vmem:[%s1336_s20 + $0xd8] sm:$0xff] %vm790_vm1, %v1094_v53 }
 0x106   : > { %850 = vst.msk [vmem:[%s1336_s20 + $0x1d8] sm:$0xff] %vm790_vm1, %v1142_v54  ;;  %v601_v55 = vpop.f32.mrf.mxu0 }
 0x107   : > { %v761_v56 = vpop.f32.mrf.mxu1  ;;  %817 = vst.msk [vmem:[%s1336_s20 + $0xd0] sm:$0xff] %vm790_vm1, %v601_v55 }
 0x108   : > { %849 = vst.msk [vmem:[%s1336_s20 + $0x1d0] sm:$0xff] %vm790_vm1, %v761_v56  ;;  %v1097_v57 = vpop.f32.mrf.mxu0 }
 0x109   : > { %v1145_v58 = vpop.f32.mrf.mxu1  ;;  %820 = vst.msk [vmem:[%s1336_s20 + $0xe8] sm:$0xff] %vm790_vm1, %v1097_v57 }
 0x10a   : > { %852 = vst.msk [vmem:[%s1336_s20 + $0x1e8] sm:$0xff] %vm790_vm1, %v1145_v58  ;;  %v611_v59 = vpop.f32.mrf.mxu0 }
 0x10b   : > { %v771_v60 = vpop.f32.mrf.mxu1  ;;  %819 = vst.msk [vmem:[%s1336_s20 + $0xe0] sm:$0xff] %vm790_vm1, %v611_v59 }
 0x10c   : > { %851 = vst.msk [vmem:[%s1336_s20 + $0x1e0] sm:$0xff] %vm790_vm1, %v771_v60  ;;  %v1100_v61 = vpop.f32.mrf.mxu0 }
 0x10d   : > { %v1148_v62 = vpop.f32.mrf.mxu1  ;;  %822 = vst.msk [vmem:[%s1336_s20 + $0xf8] sm:$0xff] %vm790_vm1, %v1100_v61 }
 0x10e   : > { %854 = vst.msk [vmem:[%s1336_s20 + $0x1f8] sm:$0xff] %vm790_vm1, %v1148_v62  ;;  %v621_v63 = vpop.f32.mrf.mxu0 }
 0x10f   : > { %v781_v0 = vpop.f32.mrf.mxu1  ;;  %821 = vst.msk [vmem:[%s1336_s20 + $0xf0] sm:$0xff] %vm790_vm1, %v621_v63 }
 0x110   : > { %853 = vst.msk [vmem:[%s1336_s20 + $0x1f0] sm:$0xff] %vm790_vm1, %v781_v0 }
 0x111 PF: > { %s12_s9 = sadd.s32 1, %s1165_s9  }
 0x112   : > { %p9_p4 = scmp.ge.s32.totalorder %s12_s9, 10  }
 0x114   :  { %11 = sbr.rel (!%p9_p4) target bundleno = 1 (0x1), region = 58 }

// kernel: upsample_forward.5
= control target key start
LH: loop header
LB: loop body
LE: loop exit
PB: predicated region body
PF: predicated region fallthrough
CT: control target
= control target key end

     0   :  { %s5883_s30 = smov 0   ;;  %s9829_s0 = inlined_call_operand.vmem [shape: f32[2,32,256], index: 0, kind: input, shape index: {}]   ;;  %s9830_s1 = inlined_call_operand.vmem [shape: f32[2,128,256], index: 1, kind: input, shape index: {}]   ;;  %s9831_s2 = inlined_call_operand.vmem [shape: f32[128,32], index: 2, kind: input, shape index: {}]   ;;  %s9832_s3 = inlined_call_operand.vmem [shape: f32[128,1], index: 3, kind: input, shape index: {}]   ;;  %s9833_s4 = inlined_call_operand.vmem [shape: f32[128,1], index: 4, kind: input, shape index: {}]   ;;  %s9834_s5 = inlined_call_operand.vmem [shape: f32[9,128,128], index: 5, kind: input, shape index: {}]   ;;  %s9835_s6 = inlined_call_operand.vmem [shape: f32[128,1], index: 6, kind: input, shape index: {}]   ;;  %s9836_s7 = inlined_call_operand.vmem [shape: f32[128,1], index: 7, kind: input, shape index: {}]   ;;  %s9837_s8 = inlined_call_operand.vmem [shape: f32[9,1,256], index: 8, kind: input, shape index: {}]   ;;  %s9838_s9 = inlined_call_operand.vmem [shape: f32[2,128,256], index: 9, kind: output, shape index: {}]  }
   0x1 LB: > { %s5595_s10 = sadd.s32 4294967295, %s5821_s30   ;;  %p5599_p0 = scmp.ge.s32.totalorder %s5821_s30, 1  ;;  %s5821_s30 = sphi %s5883_s30, %s19_s30  }
   0x2   : > { %p297_p1 = scmp.lt.s32.totalorder %s5821_s30, 3 }
   0x4   : > { %p298_p2 = pnand %p5599_p0, %p297_p1 }
   0x6   : > { %301 = sbr.rel (%p298_p2) target bundleno = 1778 (0x6f2), region = 56 }
   0xb   : > { %v589_v0 = vld [vmem:[%s9832_s3 + $0x10] sm:$0xff]  ;;  %v587_v1 = vld [vmem:[%s9832_s3] sm:$0xff]  ;;  %p338_p3 = scmp.lt.s32.totalorder %s5595_s10, 1  ;;  %v5823_v2 = vmov 0   ;;  %v590_v3 = vld [vmem:[%s9832_s3 + $0x18] sm:$0xff]  ;;  %v9839_v5 = vmov 0.0   ;;  %v1085_v46 = vlaneseq }
   0xc   : > { %5814 = vset.pattern.permute.xlu1 %v5823_v2  ;;  %5813 = vset.pattern.permute.xlu0 %v5823_v2  ;;  %v588_v4 = vld [vmem:[%s9832_s3 + $0x8] sm:$0xff]  ;;  %v591_v10 = vld [vmem:[%s9832_s3 + $0x20] sm:$0xff]  ;;  %v594_v15 = vld [vmem:[%s9832_s3 + $0x38] sm:$0xff]  ;;  %vm377_vm0 = vcmask 261120   ;;  %s5825_s16 = smov 111   ;;  %s5828_s23 = smov 17  }
   0xd   : > { %615 = vperm.xlu1 %5814, %v589_v0   ;;  %605 = vperm.xlu0 %5813, %v587_v1   ;;  %s10396_s10 = smov (!%p338_p3, %s5595_s10), 1  ;;  %v592_v9 = vld [vmem:[%s9832_s3 + $0x28] sm:$0xff]  ;;  %v593_v16 = vld [vmem:[%s9832_s3 + $0x30] sm:$0xff]  ;;  %v353_v18 = vld [vmem:[%s9831_s2] sm:$0xff]  ;;  %v1086_v50 = vshrl.u32 %v1085_v46, 7  ;;  %s5829_s26 = smov 113  }
   0xe   : > { %490 = vmatprep.mubr.f32.mxu0 %v9839_v5  ;;  %1524 = vmatprep.mubr.f32.mxu1 %v9839_v5  ;;  %s5760_s19 = sshll.u32 %s10396_s10, 6  ;;  %v596_v19 = vld [vmem:[%s9832_s3 + $0x48] sm:$0xff]  ;;  %v595_v20 = vld [vmem:[%s9832_s3 + $0x40] sm:$0xff]  ;;  %v598_v22 = vld [vmem:[%s9832_s3 + $0x58] sm:$0xff]  ;;  %s5761_s27 = sshll.u32 %s10396_s10, 8  ;;  %vm1181_vm1 = vcmask 916480  }
   0xf   : > { %s342_s22 = scalar_lea.vmem %s9829_s0, %s5760_s19  ;;  %v354_v21 = vld [vmem:[%s9831_s2 + $0x8] sm:$0xff]  ;;  %v597_v23 = vld [vmem:[%s9832_s3 + $0x50] sm:$0xff]  ;;  %v599_v26 = vld [vmem:[%s9832_s3 + $0x60] sm:$0xff]  ;;  %v6047_v54 = vsub.s32 1, %v1086_v50  ;;  %v6055_v57 = vsub.s32 0, %v1086_v50  ;;  %s5826_s19 = smov 112  }
  0x10   : > { %v376_v6 = vld [vmem:[%s342_s22 + $0x38] sm:$0xff]  ;;  %v375_v7 = vld [vmem:[%s342_s22 + $0x30] sm:$0xff]  ;;  %v374_v8 = vld [vmem:[%s342_s22 + $0x28] sm:$0xff]  ;;  %s6274_s11 = scalar_lea.vmem %s9830_s1, %s5761_s27  ;;  %s5830_s12 = smov 15   ;;  %vm1097_vm2 = vcmask 908288   ;;  %vm2006_vm3 = vcmask 924672  }
  0x11   : > { %620 = vperm.xlu1 %5814, %v590_v3   ;;  %610 = vperm.xlu0 %5813, %v588_v4   ;;  %v373_v11 = vld [vmem:[%s342_s22 + $0x20] sm:$0xff]  ;;  %v372_v12 = vld [vmem:[%s342_s22 + $0x18] sm:$0xff]  ;;  %v371_v13 = vld [vmem:[%s342_s22 + $0x10] sm:$0xff]  ;;  %9995 = vst [vmem:[#allocation3_spill] sm:$0xff] %v6047_v54  ;;  %s5831_s15 = smov 127   ;;  %vm1395_vm4 = vcmask 130048  }
  0x12   : > { %450 = vmatprep.subr.mxu0 %v376_v6  ;;  %v370_v14 = vld [vmem:[%s342_s22 + $0x8] sm:$0xff]  ;;  %v369_v17 = vld [vmem:[%s342_s22] sm:$0xff]  ;;  %v355_v24 = vld [vmem:[%s9831_s2 + $0x10] sm:$0xff]  ;;  %9996 = vst [vmem:[#allocation4_spill] sm:$0xff] %v6055_v57  ;;  %s5827_s22 = smov 16   ;;  %vm1765_vm5 = vcmask 138240  }
  0x13   : > { %451 = vmatpush1.msra.mxu0 %v375_v7  ;;  %v600_v25 = vld [vmem:[%s9832_s3 + $0x68] sm:$0xff]  ;;  %v356_v27 = vld [vmem:[%s9831_s2 + $0x18] sm:$0xff]  ;;  %v601_v29 = vld [vmem:[%s9832_s3 + $0x70] sm:$0xff]  ;;  %vm2220_vm6 = vcmask 121856   ;;  %vm2493_vm7 = vcmask 1039360   ;;  %s5832_s28 = smov 1  }
  0x14   : > { %452 = vmatprep.subr.mxu0 %v374_v8  ;;  %v602_v28 = vld [vmem:[%s9832_s3 + $0x78] sm:$0xff]  ;;  %v357_v30 = vld [vmem:[%s9831_s2 + $0x20] sm:$0xff]  ;;  %v716_v31 = vld [vmem:[%s9833_s4 + $0x8] sm:$0xff]  ;;  %vm2707_vm8 = vcmask 7168  }
  0x15   : > { %630 = vperm.xlu1 %5814, %v592_v9   ;;  %625 = vperm.xlu0 %5813, %v591_v10   ;;  %v715_v32 = vld [vmem:[%s9833_s4] sm:$0xff]  ;;  %v358_v33 = vld [vmem:[%s9831_s2 + $0x28] sm:$0xff]  ;;  %v718_v34 = vld [vmem:[%s9833_s4 + $0x18] sm:$0xff] }
  0x16   : > { %453 = vmatpush1.msra.mxu0 %v373_v11  ;;  %v717_v35 = vld [vmem:[%s9833_s4 + $0x10] sm:$0xff]  ;;  %v720_v37 = vld [vmem:[%s9833_s4 + $0x28] sm:$0xff]  ;;  %v719_v38 = vld [vmem:[%s9833_s4 + $0x20] sm:$0xff] }
  0x17   : > { %454 = vmatprep.subr.mxu0 %v372_v12  ;;  %v359_v36 = vld [vmem:[%s9831_s2 + $0x30] sm:$0xff]  ;;  %v360_v39 = vld [vmem:[%s9831_s2 + $0x38] sm:$0xff]  ;;  %v361_v42 = vld [vmem:[%s9831_s2 + $0x40] sm:$0xff] }
  0x18   : > { %455 = vmatpush1.msra.mxu0 %v371_v13  ;;  %v722_v40 = vld [vmem:[%s9833_s4 + $0x38] sm:$0xff]  ;;  %v721_v41 = vld [vmem:[%s9833_s4 + $0x30] sm:$0xff]  ;;  %v724_v43 = vld [vmem:[%s9833_s4 + $0x48] sm:$0xff] }
  0x19   : > { %456 = vmatprep.subr.mxu0 %v370_v14  ;;  %640 = vperm.xlu1 %5814, %v594_v15   ;;  %v723_v44 = vld [vmem:[%s9833_s4 + $0x40] sm:$0xff]  ;;  %v362_v45 = vld [vmem:[%s9831_s2 + $0x48] sm:$0xff]  ;;  %v726_v47 = vld [vmem:[%s9833_s4 + $0x58] sm:$0xff] }
  0x1a   : > { %635 = vperm.xlu0 %5813, %v593_v16   ;;  %457 = vmatpush1.msra.mxu0 %v369_v17  ;;  %v725_v48 = vld [vmem:[%s9833_s4 + $0x50] sm:$0xff]  ;;  %v728_v51 = vld [vmem:[%s9833_s4 + $0x68] sm:$0xff]  ;;  %v727_v52 = vld [vmem:[%s9833_s4 + $0x60] sm:$0xff] }
  0x1b   : > { %5606 = vmatmul.mubr.msk.f32.vlgmr.msra.gmra.mxu0 %vm377_vm0, %v353_v18  ;;  %v363_v49 = vld [vmem:[%s9831_s2 + $0x50] sm:$0xff]  ;;  %v364_v53 = vld [vmem:[%s9831_s2 + $0x58] sm:$0xff]  ;;  %v1083_v56 = vld [vmem:[%s9837_s8] sm:$0x3] }
  0x1c   : > { %496 = vmatprep.mubr.f32.mxu0 %v9839_v5  ;;  %v730_v55 = vld [vmem:[%s9833_s4 + $0x78] sm:$0xff]  ;;  %v729_v58 = vld [vmem:[%s9833_s4 + $0x70] sm:$0xff]  ;;  %v365_v59 = vld [vmem:[%s9831_s2 + $0x60] sm:$0xff]  ;;  %v1092_v60 = vrot.slane %v1083_v56, %v6047_v54  ;;  %v1088_v61 = vrot.slane %v1083_v56, %v6055_v57 }
  0x1d   : > { %650 = vperm.xlu1 %5814, %v596_v19   ;;  %v5622_v62 = vld [vmem:[%s9837_s8 + $0x2] sm:$0x3]  ;;  %v366_v63 = vld [vmem:[%s9831_s2 + $0x68] sm:$0xff]  ;;  %v367_v2 = vld [vmem:[%s9831_s2 + $0x70] sm:$0xff] }
  0x1e   : > { %645 = vperm.xlu0 %5813, %v595_v20   ;;  %v1176_v0 = vrot.slane %v5622_v62, %v6047_v54  ;;  %v1172_v1 = vrot.slane %v5622_v62, %v6055_v57  ;;  %v368_v3 = vld [vmem:[%s9831_s2 + $0x78] sm:$0xff] }
  0x1f   : > { %5607 = vmatmul.mubr.msk.f32.gmra.mxu0 %vm377_vm0, %v354_v21 }
  0x20   : > { %502 = vmatprep.mubr.f32.mxu0 %v9839_v5 }
  0x21   : > { %660 = vperm.xlu1 %5814, %v598_v22  }
  0x22   : > { %655 = vperm.xlu0 %5813, %v597_v23  }
  0x23   : > { %5608 = vmatmul.mubr.msk.f32.gmra.mxu0 %vm377_vm0, %v355_v24 }
  0x24   : > { %508 = vmatprep.mubr.f32.mxu0 %v9839_v5 }
  0x25   : > { %670 = vperm.xlu1 %5814, %v600_v25  }
  0x26   : > { %665 = vperm.xlu0 %5813, %v599_v26  }
  0x27   : > { %5609 = vmatmul.mubr.msk.f32.gmra.mxu0 %vm377_vm0, %v356_v27 }
  0x28   : > { %514 = vmatprep.mubr.f32.mxu0 %v9839_v5 }
  0x29   : > { %680 = vperm.xlu1 %5814, %v602_v28  }
  0x2a   : > { %675 = vperm.xlu0 %5813, %v601_v29  }
  0x2b   : > { %5610 = vmatmul.mubr.msk.f32.gmra.mxu0 %vm377_vm0, %v357_v30 }
  0x2c   : > { %520 = vmatprep.mubr.f32.mxu0 %v9839_v5 }
  0x2d   : > { %738 = vperm.xlu1 %5814, %v716_v31  }
  0x2e   : > { %733 = vperm.xlu0 %5813, %v715_v32  }
  0x2f   : > { %5611 = vmatmul.mubr.msk.f32.gmra.mxu0 %vm377_vm0, %v358_v33 }
  0x30   : > { %526 = vmatprep.mubr.f32.mxu0 %v9839_v5 }
  0x31   : > { %748 = vperm.xlu1 %5814, %v718_v34   ;;  %v5639_v34 = vld [vmem:[%s9837_s8 + $0x4] sm:$0x3] }
  0x32   : > { %743 = vperm.xlu0 %5813, %v717_v35   ;;  %v2001_v35 = vrot.slane %v5639_v34, %v6047_v54 }
  0x33   : > { %5612 = vmatmul.mubr.msk.f32.gmra.mxu0 %vm377_vm0, %v359_v36  ;;  %v1997_v36 = vrot.slane %v5639_v34, %v6055_v57 }
  0x34   : > { %532 = vmatprep.mubr.f32.mxu0 %v9839_v5 }
  0x35   : > { %758 = vperm.xlu1 %5814, %v720_v37  }
  0x36   : > { %753 = vperm.xlu0 %5813, %v719_v38  }
  0x37   : > { %5613 = vmatmul.mubr.msk.f32.gmra.mxu0 %vm377_vm0, %v360_v39 }
  0x38   : > { %538 = vmatprep.mubr.f32.mxu0 %v9839_v5 }
  0x39   : > { %768 = vperm.xlu1 %5814, %v722_v40  }
  0x3a   : > { %763 = vperm.xlu0 %5813, %v721_v41  }
  0x3b   : > { %5614 = vmatmul.mubr.msk.f32.gmra.mxu0 %vm377_vm0, %v361_v42 }
  0x3c   : > { %544 = vmatprep.mubr.f32.mxu0 %v9839_v5 }
  0x3d   : > { %778 = vperm.xlu1 %5814, %v724_v43  }
  0x3e   : > { %773 = vperm.xlu0 %5813, %v723_v44  }
  0x3f   : > { %5615 = vmatmul.mubr.msk.f32.gmra.mxu0 %vm377_vm0, %v362_v45 }
  0x40   : > { %550 = vmatprep.mubr.f32.mxu0 %v9839_v5 }
  0x41   : > { %788 = vperm.xlu1 %5814, %v726_v47  }
  0x42   : > { %783 = vperm.xlu0 %5813, %v725_v48  }
  0x43   : > { %5616 = vmatmul.mubr.msk.f32.gmra.mxu0 %vm377_vm0, %v363_v49 }
  0x44   : > { %556 = vmatprep.mubr.f32.mxu0 %v9839_v5 }
  0x45   : > { %798 = vperm.xlu1 %5814, %v728_v51  }
  0x46   : > { %793 = vperm.xlu0 %5813, %v727_v52  }
  0x47   : > { %5617 = vmatmul.mubr.msk.f32.gmra.mxu0 %vm377_vm0, %v364_v53 }
  0x48   : > { %562 = vmatprep.mubr.f32.mxu0 %v9839_v5 }
  0x49   : > { %808 = vperm.xlu1 %5814, %v730_v55  }
  0x4a   : > { %803 = vperm.xlu0 %5813, %v729_v58  }
  0x4b   : > { %5618 = vmatmul.mubr.msk.f32.gmra.mxu0 %vm377_vm0, %v365_v59 }
  0x4c   : > { %568 = vmatprep.mubr.f32.mxu0 %v9839_v5 }
  0x4d   : > { %1095 = vrot.lane.b32.xlu1 %v1092_v60, %s5825_s16 }
  0x4e   : > { %1093 = vrot.lane.b32.xlu0 %v1088_v61, %s5825_s16 }
  0x4f   : > { %5619 = vmatmul.mubr.msk.f32.gmra.mxu0 %vm377_vm0, %v366_v63 }
  0x50   : > { %574 = vmatprep.mubr.f32.mxu0 %v9839_v5 }
  0x51   : > { %1179 = vrot.lane.b32.xlu1 %v1176_v0, %s5826_s19 }
  0x52   : > { %1177 = vrot.lane.b32.xlu0 %v1172_v1, %s5826_s19 }
  0x53   : > { %5620 = vmatmul.mubr.msk.f32.gmra.mxu0 %vm377_vm0, %v367_v2 }
  0x54   : > { %580 = vmatprep.mubr.f32.mxu0 %v9839_v5 }
  0x57   : > { %5621 = vmatmul.mubr.msk.f32.gmra.mxu0 %vm377_vm0, %v368_v3 }
  0x58   : > { %1894 = vmatprep.mubr.f32.mxu0 %v9839_v5 }
  0x88   : > { %v6093_v4 = vpop.permute.xlu0 %605  ;;  %v6134_v24 = vpop.permute.xlu1 %615 }
  0x8c   : > { %v6095_v6 = vpop.permute.xlu0 %610  ;;  %v6140_v25 = vpop.permute.xlu1 %620 }
  0x90   : > { %v6097_v7 = vpop.permute.xlu0 %625  ;;  %v6144_v26 = vpop.permute.xlu1 %630 }
  0x94   : > { %v6150_v27 = vpop.permute.xlu1 %640 }
  0x95   : > { %v6099_v8 = vpop.permute.xlu0 %635 }
  0x98   : > { %v6155_v29 = vpop.permute.xlu1 %650 }
  0x99   : > { %v6101_v9 = vpop.permute.xlu0 %645 }
  0x9c   : > { %v6161_v30 = vpop.permute.xlu1 %660 }
  0x9d   : > { %v6103_v10 = vpop.permute.xlu0 %655 }
  0xa0   : > { %v6165_v31 = vpop.permute.xlu1 %670 }
  0xa1   : > { %v6105_v11 = vpop.permute.xlu0 %665 }
  0xa4   : > { %v6171_v32 = vpop.permute.xlu1 %680 }
  0xa5   : > { %v6107_v12 = vpop.permute.xlu0 %675 }
  0xa8   : > { %v6175_v33 = vpop.permute.xlu1 %738 }
  0xa9   : > { %v6109_v13 = vpop.permute.xlu0 %733 }
  0xac   : > { %v6186_v37 = vpop.permute.xlu1 %748 }
  0xad   : > { %v6111_v14 = vpop.permute.xlu0 %743 }
  0xb0   : > { %v6190_v38 = vpop.permute.xlu1 %758 }
  0xb1   : > { %v6113_v15 = vpop.permute.xlu0 %753 }
  0xb4   : > { %v6192_v39 = vpop.permute.xlu1 %768 }
  0xb5   : > { %v6115_v16 = vpop.permute.xlu0 %763 }
  0xb8   : > { %v6194_v40 = vpop.permute.xlu1 %778 }
  0xb9   : > { %v6117_v17 = vpop.permute.xlu0 %773 }
  0xbc   : > { %v6196_v41 = vpop.permute.xlu1 %788 }
  0xbd   : > { %v6119_v18 = vpop.permute.xlu0 %783 }
  0xc0   : > { %v6198_v42 = vpop.permute.xlu1 %798 }
  0xc1   : > { %v6121_v19 = vpop.permute.xlu0 %793 }
  0xc4   : > { %v6200_v43 = vpop.permute.xlu1 %808 }
  0xc5   : > { %v6123_v20 = vpop.permute.xlu0 %803 }
  0xc8   : > { %v6202_v44 = vpop.permute.xlu1 %1095 }
  0xc9   : > { %v6125_v21 = vpop.permute.xlu0 %1093 }
  0xca   : > { %v1102_v28 = vmul.f32 0.0, %v6125_v21 }
  0xcc   : > { %v6204_v45 = vpop.permute.xlu1 %1179 }
  0xcd   : > { %v6127_v22 = vpop.permute.xlu0 %1177 }
  0xce   : > { %v1186_v23 = vmul.f32 0.0, %v6127_v22 }
  0xd0   : > { %1305 = vrot.lane.b32.xlu1 %v1186_v23, %s5827_s22  ;;  %1299 = vrot.lane.b32.xlu0 %v1186_v23, %s5827_s22 }
  0xd4   : > { %1317 = vrot.lane.b32.xlu1 %v1186_v23, %s5827_s22  ;;  %1311 = vrot.lane.b32.xlu0 %v1186_v23, %s5827_s22 }
  0xd8   : > { %1329 = vrot.lane.b32.xlu1 %v1186_v23, %s5827_s22  ;;  %1323 = vrot.lane.b32.xlu0 %v1186_v23, %s5827_s22 }
  0xdc   : > { %1341 = vrot.lane.b32.xlu1 %v1186_v23, %s5827_s22  ;;  %1335 = vrot.lane.b32.xlu0 %v1186_v23, %s5827_s22 }
  0xe0   : > { %1353 = vrot.lane.b32.xlu1 %v1186_v23, %s5827_s22  ;;  %1347 = vrot.lane.b32.xlu0 %v1186_v23, %s5827_s22 }
  0xe4   : > { %1365 = vrot.lane.b32.xlu1 %v1186_v23, %s5827_s22  ;;  %1359 = vrot.lane.b32.xlu0 %v1186_v23, %s5827_s22 }
  0xe8   : > { %1377 = vrot.lane.b32.xlu1 %v1186_v23, %s5827_s22  ;;  %1371 = vrot.lane.b32.xlu0 %v1186_v23, %s5827_s22 }
  0xec   : > { %1389 = vrot.lane.b32.xlu1 %v1186_v23, %s5827_s22  ;;  %1383 = vrot.lane.b32.xlu0 %v1186_v23, %s5827_s22 }
  0xf0   : > { %1675 = vrot.lane.b32.xlu1 %v1102_v28, %s5828_s23  ;;  %1669 = vrot.lane.b32.xlu0 %v1102_v28, %s5828_s23 }
  0xf4   : > { %1687 = vrot.lane.b32.xlu1 %v1102_v28, %s5828_s23  ;;  %1681 = vrot.lane.b32.xlu0 %v1102_v28, %s5828_s23 }
  0xf8   : > { %1699 = vrot.lane.b32.xlu1 %v1102_v28, %s5828_s23  ;;  %1693 = vrot.lane.b32.xlu0 %v1102_v28, %s5828_s23 }
  0xfc   : > { %1711 = vrot.lane.b32.xlu1 %v1102_v28, %s5828_s23  ;;  %1705 = vrot.lane.b32.xlu0 %v1102_v28, %s5828_s23 }
 0x100   : > { %1723 = vrot.lane.b32.xlu1 %v1102_v28, %s5828_s23  ;;  %1717 = vrot.lane.b32.xlu0 %v1102_v28, %s5828_s23 }
 0x104   : > { %1735 = vrot.lane.b32.xlu1 %v1102_v28, %s5828_s23  ;;  %1729 = vrot.lane.b32.xlu0 %v1102_v28, %s5828_s23 }
 0x108   : > { %1747 = vrot.lane.b32.xlu1 %v1102_v28, %s5828_s23  ;;  %1741 = vrot.lane.b32.xlu0 %v1102_v28, %s5828_s23 }
 0x10c   : > { %1759 = vrot.lane.b32.xlu1 %v1102_v28, %s5828_s23  ;;  %1753 = vrot.lane.b32.xlu0 %v1102_v28, %s5828_s23 }
 0x110   : > { %2004 = vrot.lane.b32.xlu1 %v2001_v35, %s5829_s26  ;;  %2002 = vrot.lane.b32.xlu0 %v1997_v36, %s5829_s26  ;;  %v492_v36 = vpop.f32.mrf.mxu0 }
 0x142   : > { %v6206_v46 = vpop.permute.xlu1 %1305  ;;  %v6208_v47 = vpop.permute.xlu0 %1299 }
 0x143   : > { %9997 = vst [vmem:[#allocation5_spill] sm:$0xff] %v6206_v46  ;;  %9998 = vst [vmem:[#allocation6_spill] sm:$0xff] %v6208_v47  ;;  %v494_v47 = vpop.f32.mrf.mxu0 }
 0x146   : > { %v6210_v48 = vpop.permute.xlu1 %1317  ;;  %v6212_v49 = vpop.permute.xlu0 %1311 }
 0x147   : > { %9999 = vst [vmem:[#allocation7_spill] sm:$0xff] %v6210_v48  ;;  %10000 = vst [vmem:[#allocation8_spill] sm:$0xff] %v6212_v49  ;;  %v498_v48 = vpop.f32.mrf.mxu0 }
 0x14a   : > { %v6214_v50 = vpop.permute.xlu1 %1329  ;;  %v6216_v51 = vpop.permute.xlu0 %1323 }
 0x14b   : > { %10001 = vst [vmem:[#allocation9_spill] sm:$0xff] %v6214_v50  ;;  %10002 = vst [vmem:[#allocation10_spill] sm:$0xff] %v6216_v51  ;;  %v875_v51 = vld [vmem:[%s6274_s11] sm:$0xff] }
 0x14e   : > { %v6218_v52 = vpop.permute.xlu1 %1341  ;;  %v6220_v53 = vpop.permute.xlu0 %1335 }
 0x14f   : > { %10003 = vst [vmem:[#allocation11_spill] sm:$0xff] %v6218_v52  ;;  %10004 = vst [vmem:[#allocation12_spill] sm:$0xff] %v6220_v53 }
 0x152   : > { %v6222_v55 = vpop.permute.xlu1 %1353  ;;  %v6224_v56 = vpop.permute.xlu0 %1347 }
 0x153   : > { %10005 = vst [vmem:[#allocation13_spill] sm:$0xff] %v6222_v55  ;;  %10006 = vst [vmem:[#allocation14_spill] sm:$0xff] %v6224_v56 }
 0x156   : > { %v6226_v58 = vpop.permute.xlu1 %1365  ;;  %v6228_v59 = vpop.permute.xlu0 %1359 }
 0x15a   : > { %v6230_v60 = vpop.permute.xlu1 %1377  ;;  %v6232_v61 = vpop.permute.xlu0 %1371 }
 0x15e   : > { %v6234_v62 = vpop.permute.xlu1 %1389  ;;  %v6236_v63 = vpop.permute.xlu0 %1383 }
 0x162   : > { %v6238_v0 = vpop.permute.xlu1 %1675  ;;  %v6240_v1 = vpop.permute.xlu0 %1669 }
 0x163   : > { %10007 = vst [vmem:[#allocation15_spill] sm:$0xff] %v6238_v0  ;;  %10008 = vst [vmem:[#allocation16_spill] sm:$0xff] %v6240_v1 }
 0x166   : > { %v6242_v2 = vpop.permute.xlu1 %1687  ;;  %v6244_v3 = vpop.permute.xlu0 %1681 }
 0x167   : > { %10009 = vst [vmem:[#allocation17_spill] sm:$0xff] %v6242_v2  ;;  %10010 = vst [vmem:[#allocation18_spill] sm:$0xff] %v6244_v3  ;;  %v683_v2 = vmul.f32 %v6093_v4, %v492_v36  ;;  %v684_v3 = vmul.f32 %v6093_v4, %v494_v47 }
 0x169   : > { %v811_v49 = vadd.f32 %v6109_v13, %v683_v2  ;;  %v500_v2 = vpop.f32.mrf.mxu0 }
 0x16a   : > { %v6246_v23 = vpop.permute.xlu1 %1699  ;;  %v6248_v28 = vpop.permute.xlu0 %1693  ;;  %v686_v53 = vmul.f32 %v6095_v6, %v500_v2 }
 0x16b   : > { %10011 = vst [vmem:[#allocation19_spill] sm:$0xff] %v6246_v23  ;;  %10012 = vst [vmem:[#allocation20_spill] sm:$0xff] %v6248_v28  ;;  %v812_v23 = vadd.f32 %v6109_v13, %v684_v3  ;;  %v843_v47 = vmax.f32 %v811_v49, 0.0  ;;  %v685_v13 = vmul.f32 %v6095_v6, %v498_v48  ;;  %v6299_v48 = vsel %vm1181_vm1, %v6127_v22, %v6204_v45 }
 0x16c   : > { %v814_v6 = vadd.f32 %v6175_v33, %v686_v53  ;;  %v6314_v22 = vsel %vm1097_vm2, %v6125_v21, %v6202_v44  ;;  %v877_v53 = vld [vmem:[%s6274_s11 + $0x10] sm:$0xff] }
 0x16d   : > { %v6283_v50 = vadd.f32 %v875_v51, %v843_v47  ;;  %v813_v49 = vadd.f32 %v6175_v33, %v685_v13 }
 0x16e   : > { %v6250_v34 = vpop.permute.xlu1 %1711  ;;  %v6252_v35 = vpop.permute.xlu0 %1705  ;;  %v846_v47 = vmax.f32 %v814_v6, 0.0 }
 0x16f   : > { %10013 = vst [vmem:[#allocation21_spill] sm:$0xff] %v6250_v34  ;;  %10014 = vst [vmem:[#allocation22_spill] sm:$0xff] %v6252_v35  ;;  %v844_v35 = vmax.f32 %v812_v23, 0.0  ;;  %v876_v34 = vld [vmem:[%s6274_s11 + $0x8] sm:$0xff]  ;;  %v1187_v51 = vmul.f32 %v6299_v48, %v6283_v50  ;;  %v845_v33 = vmax.f32 %v813_v49, 0.0  ;;  %v1103_v2 = vmul.f32 %v6314_v22, %v6283_v50 }
 0x170   : > { %10019 = vst [vmem:[#allocation27_spill] sm:$0xff] %v6283_v50 }
 0x171   : > { %v6328_v21 = vadd.f32 %v877_v53, %v845_v33 }
 0x172   : > { %v6254_v5 = vpop.permute.xlu1 %1723  ;;  %v6256_v0 = vpop.permute.xlu0 %1717 }
 0x173   : > { %10015 = vst [vmem:[#allocation23_spill] sm:$0xff] %v6254_v5  ;;  %10016 = vst [vmem:[#allocation24_spill] sm:$0xff] %v6256_v0  ;;  %v6285_v0 = vadd.f32 %v876_v34, %v844_v35  ;;  %v504_v34 = vpop.f32.mrf.mxu0 }
 0x174   : > { %10021 = vst [vmem:[#allocation29_spill] sm:$0xff] %v6328_v21  ;;  %v687_v49 = vmul.f32 %v6134_v24, %v504_v34  ;;  %v1190_v34 = vmul.f32 %v6299_v48, %v6328_v21 }
 0x175   : > { %10020 = vst [vmem:[#allocation28_spill] sm:$0xff] %v6285_v0  ;;  %v1188_v23 = vmul.f32 %v6204_v45, %v6285_v0  ;;  %v1104_v13 = vmul.f32 %v6202_v44, %v6285_v0  ;;  %v506_v56 = vpop.f32.mrf.mxu0 }
 0x176   : > { %v6258_v1 = vpop.permute.xlu0 %1729  ;;  %v6262_v46 = vpop.permute.xlu1 %1735  ;;  %v815_v33 = vadd.f32 %v6111_v14, %v687_v49 }
 0x177   : > { %10017 = vst [vmem:[#allocation25_spill] sm:$0xff] %v6258_v1  ;;  %10018 = vst [vmem:[#allocation26_spill] sm:$0xff] %v6262_v46  ;;  %v878_v1 = vld [vmem:[%s6274_s11 + $0x18] sm:$0xff]  ;;  %v510_v55 = vpop.f32.mrf.mxu0 }
 0x178   : > { %v6331_v6 = vadd.f32 %v878_v1, %v846_v47  ;;  %v847_v53 = vmax.f32 %v815_v33, 0.0  ;;  %v879_v47 = vld [vmem:[%s6274_s11 + $0x20] sm:$0xff] }
 0x17a   : > { %v6265_v28 = vpop.permute.xlu0 %1741  ;;  %v6276_v36 = vpop.permute.xlu1 %1747  ;;  %10022 = vst [vmem:[#allocation30_spill] sm:$0xff] %v6331_v6  ;;  %v1107_v49 = vmul.f32 %v6202_v44, %v6331_v6  ;;  %v6358_v33 = vadd.f32 %v879_v47, %v847_v53 }
 0x17c   : > { %10023 = vst [vmem:[#allocation31_spill] sm:$0xff] %v6358_v33 }
 0x17e   : > { %v6278_v4 = vpop.permute.xlu0 %1753  ;;  %v6288_v5 = vpop.permute.xlu1 %1759 }
 0x182   : > { %v2003_v3 = vpop.permute.xlu0 %2002  ;;  %v6307_v35 = vpop.permute.xlu1 %2004 }
 0x183   : > { %v6290_v52 = vmul.f32 0.0, %v2003_v3 }
 0x185   : > { %2130 = vrot.lane.b32.xlu1 %v6290_v52, %s5830_s12  ;;  %2124 = vrot.lane.b32.xlu0 %v6290_v52, %s5830_s12 }
 0x189   : > { %1301 = vrot.lane.b32.xlu1 %v1187_v51, %s5827_s22  ;;  %1303 = vrot.lane.b32.xlu0 %v1188_v23, %s5827_s22  ;;  %v6324_v51 = vsel %vm2006_vm3, %v2003_v3, %v6307_v35  ;;  %v688_v23 = vmul.f32 %v6134_v24, %v506_v56  ;;  %v2013_v3 = vmul.f32 %v6307_v35, %v6285_v0  ;;  %v512_v56 = vpop.f32.mrf.mxu0 }
 0x18a   : > { %v2012_v46 = vmul.f32 %v6324_v51, %v6283_v50  ;;  %v1191_v24 = vmul.f32 %v6204_v45, %v6331_v6 }
 0x18b   : > { %v816_v1 = vadd.f32 %v6111_v14, %v688_v23  ;;  %v1106_v14 = vmul.f32 %v6314_v22, %v6328_v21  ;;  %v880_v23 = vld [vmem:[%s6274_s11 + $0x28] sm:$0xff] }
 0x18d   : > { %1671 = vrot.lane.b32.xlu1 %v1103_v2, %s5828_s23  ;;  %1673 = vrot.lane.b32.xlu0 %v1104_v13, %s5828_s23  ;;  %v848_v2 = vmax.f32 %v816_v1, 0.0  ;;  %v690_v13 = vmul.f32 %v6140_v25, %v512_v56 }
 0x18f   : > { %v6361_v1 = vadd.f32 %v880_v23, %v848_v2 }
 0x191   : > { %2126 = vrot.lane.b32.xlu1 %v2012_v46, %s5830_s12  ;;  %2128 = vrot.lane.b32.xlu0 %v2013_v3, %s5830_s12  ;;  %v689_v46 = vmul.f32 %v6140_v25, %v510_v55  ;;  %v516_v3 = vpop.f32.mrf.mxu0  ;;  %10024 = vst [vmem:[#allocation32_spill] sm:$0xff] %v6361_v1  ;;  %v818_v25 = vadd.f32 %v6186_v37, %v690_v13  ;;  %v881_v13 = vld [vmem:[%s6274_s11 + $0x30] sm:$0xff] }
 0x192   : > { %v691_v47 = vmul.f32 %v6097_v7, %v516_v3  ;;  %v1194_v2 = vmul.f32 %v6204_v45, %v6361_v1 }
 0x193   : > { %v817_v55 = vadd.f32 %v6186_v37, %v689_v46  ;;  %v518_v56 = vpop.f32.mrf.mxu0  ;;  %v1193_v37 = vmul.f32 %v6299_v48, %v6358_v33 }
 0x194   : > { %v692_v46 = vmul.f32 %v6097_v7, %v518_v56  ;;  %v1109_v7 = vmul.f32 %v6314_v22, %v6358_v33 }
 0x195   : > { %1307 = vrot.lane.b32.xlu0 %v1190_v34, %s5827_s22  ;;  %1309 = vrot.lane.b32.xlu1 %v1191_v24, %s5827_s22  ;;  %v2015_v34 = vmul.f32 %v6324_v51, %v6328_v21  ;;  %v2016_v24 = vmul.f32 %v6307_v35, %v6331_v6  ;;  %v849_v53 = vmax.f32 %v817_v55, 0.0  ;;  %v522_v23 = vpop.f32.mrf.mxu0  ;;  %v819_v55 = vadd.f32 %v6113_v15, %v691_v47 }
 0x196   : > { %v693_v47 = vmul.f32 %v6144_v26, %v522_v23 }
 0x197   : > { %v6383_v3 = vadd.f32 %v881_v13, %v849_v53  ;;  %v524_v56 = vpop.f32.mrf.mxu0 }
 0x198   : > { %v694_v6 = vmul.f32 %v6144_v26, %v524_v56 }
 0x199   : > { %1677 = vrot.lane.b32.xlu0 %v1106_v14, %s5828_s23  ;;  %1679 = vrot.lane.b32.xlu1 %v1107_v49, %s5828_s23  ;;  %v850_v14 = vmax.f32 %v818_v25, 0.0  ;;  %v882_v49 = vld [vmem:[%s6274_s11 + $0x38] sm:$0xff]  ;;  %10025 = vst [vmem:[#allocation33_spill] sm:$0xff] %v6383_v3  ;;  %v1196_v53 = vmul.f32 %v6299_v48, %v6383_v3  ;;  %v528_v13 = vpop.f32.mrf.mxu0  ;;  %v1112_v26 = vmul.f32 %v6314_v22, %v6383_v3 }
 0x19b   : > { %v6385_v25 = vadd.f32 %v882_v49, %v850_v14  ;;  %v883_v14 = vld [vmem:[%s6274_s11 + $0x40] sm:$0xff]  ;;  %v821_v49 = vadd.f32 %v6190_v38, %v693_v47  ;;  %v695_v47 = vmul.f32 %v6099_v8, %v528_v13 }
 0x19d   : > { %2132 = vrot.lane.b32.xlu0 %v2015_v34, %s5830_s12  ;;  %2134 = vrot.lane.b32.xlu1 %v2016_v24, %s5830_s12  ;;  %10026 = vst [vmem:[#allocation34_spill] sm:$0xff] %v6385_v25  ;;  %v820_v34 = vadd.f32 %v6113_v15, %v692_v46  ;;  %v1110_v24 = vmul.f32 %v6202_v44, %v6361_v1  ;;  %v884_v46 = vld [vmem:[%s6274_s11 + $0x48] sm:$0xff]  ;;  %v853_v56 = vmax.f32 %v821_v49, 0.0 }
 0x19e   : > { %v1197_v15 = vmul.f32 %v6204_v45, %v6385_v25 }
 0x1a1   : > { %1313 = vrot.lane.b32.xlu1 %v1193_v37, %s5827_s22  ;;  %1315 = vrot.lane.b32.xlu0 %v1194_v2, %s5827_s22  ;;  %v851_v37 = vmax.f32 %v819_v55, 0.0  ;;  %v852_v2 = vmax.f32 %v820_v34, 0.0  ;;  %v1113_v34 = vmul.f32 %v6202_v44, %v6385_v25 }
 0x1a3   : > { %v6405_v23 = vadd.f32 %v883_v14, %v851_v37  ;;  %v6407_v55 = vadd.f32 %v884_v46, %v852_v2  ;;  %v886_v2 = vld [vmem:[%s6274_s11 + $0x58] sm:$0xff]  ;;  %v823_v46 = vadd.f32 %v6115_v16, %v695_v47 }
 0x1a5   : > { %1683 = vrot.lane.b32.xlu1 %v1109_v7, %s5828_s23  ;;  %1685 = vrot.lane.b32.xlu0 %v1110_v24, %s5828_s23  ;;  %10027 = vst [vmem:[#allocation35_spill] sm:$0xff] %v6405_v23  ;;  %10028 = vst [vmem:[#allocation36_spill] sm:$0xff] %v6407_v55  ;;  %v822_v7 = vadd.f32 %v6190_v38, %v694_v6  ;;  %v530_v24 = vpop.f32.mrf.mxu0  ;;  %v1199_v37 = vmul.f32 %v6299_v48, %v6405_v23  ;;  %v885_v6 = vld [vmem:[%s6274_s11 + $0x50] sm:$0xff] }
 0x1a6   : > { %v1200_v38 = vmul.f32 %v6204_v45, %v6407_v55  ;;  %v6427_v13 = vadd.f32 %v885_v6, %v853_v56 }
 0x1a7   : > { %v534_v14 = vpop.f32.mrf.mxu0 }
 0x1a8   : > { %10029 = vst [vmem:[#allocation37_spill] sm:$0xff] %v6427_v13  ;;  %v697_v47 = vmul.f32 %v6150_v27, %v534_v14  ;;  %v1202_v56 = vmul.f32 %v6299_v48, %v6427_v13 }
 0x1a9   : > { %1319 = vrot.lane.b32.xlu0 %v1196_v53, %s5827_s22  ;;  %1321 = vrot.lane.b32.xlu1 %v1197_v15, %s5827_s22  ;;  %v854_v53 = vmax.f32 %v822_v7, 0.0  ;;  %v696_v15 = vmul.f32 %v6099_v8, %v530_v24  ;;  %v1115_v8 = vmul.f32 %v6314_v22, %v6405_v23  ;;  %v1116_v7 = vmul.f32 %v6202_v44, %v6407_v55 }
 0x1aa   : > { %v855_v24 = vmax.f32 %v823_v46, 0.0 }
 0x1ab   : > { %v6429_v49 = vadd.f32 %v886_v2, %v854_v53  ;;  %v887_v53 = vld [vmem:[%s6274_s11 + $0x60] sm:$0xff]  ;;  %v825_v2 = vadd.f32 %v6192_v39, %v697_v47 }
 0x1ac   : > { %v6449_v14 = vadd.f32 %v887_v53, %v855_v24 }
 0x1ad   : > { %1689 = vrot.lane.b32.xlu0 %v1112_v26, %s5828_s23  ;;  %1691 = vrot.lane.b32.xlu1 %v1113_v34, %s5828_s23  ;;  %10030 = vst [vmem:[#allocation38_spill] sm:$0xff] %v6429_v49  ;;  %v824_v26 = vadd.f32 %v6115_v16, %v696_v15  ;;  %v536_v34 = vpop.f32.mrf.mxu0  ;;  %v1203_v16 = vmul.f32 %v6204_v45, %v6429_v49  ;;  %v888_v15 = vld [vmem:[%s6274_s11 + $0x68] sm:$0xff] }
 0x1ae   : > { %10031 = vst [vmem:[#allocation39_spill] sm:$0xff] %v6449_v14  ;;  %v1205_v24 = vmul.f32 %v6299_v48, %v6449_v14 }
 0x1af   : > { %v540_v6 = vpop.f32.mrf.mxu0 }
 0x1b0   : > { %v699_v47 = vmul.f32 %v6101_v9, %v540_v6 }
 0x1b1   : > { %1325 = vrot.lane.b32.xlu1 %v1199_v37, %s5827_s22  ;;  %1327 = vrot.lane.b32.xlu0 %v1200_v38, %s5827_s22  ;;  %v856_v37 = vmax.f32 %v824_v26, 0.0  ;;  %v698_v38 = vmul.f32 %v6150_v27, %v536_v34  ;;  %v1118_v27 = vmul.f32 %v6314_v22, %v6427_v13  ;;  %v1119_v26 = vmul.f32 %v6202_v44, %v6429_v49 }
 0x1b2   : > { %v857_v34 = vmax.f32 %v825_v2, 0.0 }
 0x1b3   : > { %v6451_v46 = vadd.f32 %v888_v15, %v856_v37  ;;  %v889_v37 = vld [vmem:[%s6274_s11 + $0x70] sm:$0xff]  ;;  %v827_v15 = vadd.f32 %v6117_v17, %v699_v47 }
 0x1b4   : > { %v6471_v6 = vadd.f32 %v889_v37, %v857_v34 }
 0x1b5   : > { %1695 = vrot.lane.b32.xlu1 %v1115_v8, %s5828_s23  ;;  %1697 = vrot.lane.b32.xlu0 %v1116_v7, %s5828_s23  ;;  %10032 = vst [vmem:[#allocation40_spill] sm:$0xff] %v6451_v46  ;;  %v826_v8 = vadd.f32 %v6192_v39, %v698_v38  ;;  %v542_v7 = vpop.f32.mrf.mxu0  ;;  %v1206_v39 = vmul.f32 %v6204_v45, %v6451_v46  ;;  %v890_v38 = vld [vmem:[%s6274_s11 + $0x78] sm:$0xff] }
 0x1b6   : > { %10033 = vst [vmem:[#allocation41_spill] sm:$0xff] %v6471_v6  ;;  %v1208_v34 = vmul.f32 %v6299_v48, %v6471_v6 }
 0x1b7   : > { %v546_v53 = vpop.f32.mrf.mxu0 }
 0x1b8   : > { %v701_v47 = vmul.f32 %v6155_v29, %v546_v53 }
 0x1b9   : > { %1331 = vrot.lane.b32.xlu0 %v1202_v56, %s5827_s22  ;;  %1333 = vrot.lane.b32.xlu1 %v1203_v16, %s5827_s22  ;;  %v858_v56 = vmax.f32 %v826_v8, 0.0  ;;  %v700_v16 = vmul.f32 %v6101_v9, %v542_v7  ;;  %v1121_v9 = vmul.f32 %v6314_v22, %v6449_v14  ;;  %v1122_v8 = vmul.f32 %v6202_v44, %v6451_v46 }
 0x1ba   : > { %v859_v7 = vmax.f32 %v827_v15, 0.0 }
 0x1bb   : > { %v6473_v2 = vadd.f32 %v890_v38, %v858_v56  ;;  %v891_v56 = vld [vmem:[%s6274_s11 + $0x80] sm:$0xff]  ;;  %v829_v38 = vadd.f32 %v6194_v40, %v701_v47 }
 0x1bc   : > { %v6493_v53 = vadd.f32 %v891_v56, %v859_v7 }
 0x1bd   : > { %1701 = vrot.lane.b32.xlu0 %v1118_v27, %s5828_s23  ;;  %1703 = vrot.lane.b32.xlu1 %v1119_v26, %s5828_s23  ;;  %10034 = vst [vmem:[#allocation42_spill] sm:$0xff] %v6473_v2  ;;  %v828_v27 = vadd.f32 %v6117_v17, %v700_v16  ;;  %v548_v26 = vpop.f32.mrf.mxu0  ;;  %v1209_v17 = vmul.f32 %v6204_v45, %v6473_v2  ;;  %v892_v16 = vld [vmem:[%s6274_s11 + $0x88] sm:$0xff] }
 0x1be   : > { %10035 = vst [vmem:[#allocation43_spill] sm:$0xff] %v6493_v53  ;;  %v1211_v7 = vmul.f32 %v6299_v48, %v6493_v53  ;;  %v2036_v21 = vmul.f32 %v6324_v51, %v6493_v53 }
 0x1bf   : > { %v552_v37 = vpop.f32.mrf.mxu0 }
 0x1c0   : > { %v703_v47 = vmul.f32 %v6103_v10, %v552_v37 }
 0x1c1   : > { %1337 = vrot.lane.b32.xlu1 %v1205_v24, %s5827_s22  ;;  %1339 = vrot.lane.b32.xlu0 %v1206_v39, %s5827_s22  ;;  %v860_v24 = vmax.f32 %v828_v27, 0.0  ;;  %v702_v39 = vmul.f32 %v6155_v29, %v548_v26  ;;  %v1124_v29 = vmul.f32 %v6314_v22, %v6471_v6  ;;  %v1125_v27 = vmul.f32 %v6202_v44, %v6473_v2 }
 0x1c2   : > { %v861_v26 = vmax.f32 %v829_v38, 0.0 }
 0x1c3   : > { %v6495_v15 = vadd.f32 %v892_v16, %v860_v24  ;;  %v893_v24 = vld [vmem:[%s6274_s11 + $0x90] sm:$0xff]  ;;  %v831_v16 = vadd.f32 %v6119_v18, %v703_v47 }
 0x1c4   : > { %v6515_v37 = vadd.f32 %v893_v24, %v861_v26 }
 0x1c5   : > { %1707 = vrot.lane.b32.xlu1 %v1121_v9, %s5828_s23  ;;  %1709 = vrot.lane.b32.xlu0 %v1122_v8, %s5828_s23  ;;  %10036 = vst [vmem:[#allocation44_spill] sm:$0xff] %v6495_v15  ;;  %v830_v9 = vadd.f32 %v6194_v40, %v702_v39  ;;  %v554_v8 = vpop.f32.mrf.mxu0  ;;  %v1212_v40 = vmul.f32 %v6204_v45, %v6495_v15  ;;  %v894_v39 = vld [vmem:[%s6274_s11 + $0x98] sm:$0xff] }
 0x1c6   : > { %10037 = vst [vmem:[#allocation45_spill] sm:$0xff] %v6515_v37  ;;  %v1214_v26 = vmul.f32 %v6299_v48, %v6515_v37 }
 0x1c7   : > { %v558_v56 = vpop.f32.mrf.mxu0 }
 0x1c8   : > { %v705_v47 = vmul.f32 %v6161_v30, %v558_v56 }
 0x1c9   : > { %1343 = vrot.lane.b32.xlu0 %v1208_v34, %s5827_s22  ;;  %1345 = vrot.lane.b32.xlu1 %v1209_v17, %s5827_s22  ;;  %v862_v34 = vmax.f32 %v830_v9, 0.0  ;;  %v704_v17 = vmul.f32 %v6103_v10, %v554_v8  ;;  %v1127_v10 = vmul.f32 %v6314_v22, %v6493_v53  ;;  %v1128_v9 = vmul.f32 %v6202_v44, %v6495_v15 }
 0x1ca   : > { %v863_v8 = vmax.f32 %v831_v16, 0.0  ;;  %v2039_v53 = vmul.f32 %v6324_v51, %v6515_v37 }
 0x1cb   : > { %v6517_v38 = vadd.f32 %v894_v39, %v862_v34  ;;  %v895_v34 = vld [vmem:[%s6274_s11 + $0xa0] sm:$0xff]  ;;  %v833_v39 = vadd.f32 %v6196_v41, %v705_v47 }
 0x1cc   : > { %v6537_v56 = vadd.f32 %v895_v34, %v863_v8 }
 0x1cd   : > { %1713 = vrot.lane.b32.xlu0 %v1124_v29, %s5828_s23  ;;  %1715 = vrot.lane.b32.xlu1 %v1125_v27, %s5828_s23  ;;  %10038 = vst [vmem:[#allocation46_spill] sm:$0xff] %v6517_v38  ;;  %v832_v29 = vadd.f32 %v6119_v18, %v704_v17  ;;  %v560_v27 = vpop.f32.mrf.mxu0  ;;  %v1215_v18 = vmul.f32 %v6204_v45, %v6517_v38  ;;  %v896_v17 = vld [vmem:[%s6274_s11 + $0xa8] sm:$0xff] }
 0x1ce   : > { %10039 = vst [vmem:[#allocation47_spill] sm:$0xff] %v6537_v56  ;;  %v1217_v8 = vmul.f32 %v6299_v48, %v6537_v56  ;;  %v2042_v50 = vmul.f32 %v6324_v51, %v6537_v56 }
 0x1cf   : > { %v564_v24 = vpop.f32.mrf.mxu0 }
 0x1d0   : > { %v707_v47 = vmul.f32 %v6105_v11, %v564_v24 }
 0x1d1   : > { %1349 = vrot.lane.b32.xlu1 %v1211_v7, %s5827_s22  ;;  %1351 = vrot.lane.b32.xlu0 %v1212_v40, %s5827_s22  ;;  %v864_v7 = vmax.f32 %v832_v29, 0.0  ;;  %v706_v40 = vmul.f32 %v6161_v30, %v560_v27  ;;  %v1130_v30 = vmul.f32 %v6314_v22, %v6515_v37  ;;  %v1131_v29 = vmul.f32 %v6202_v44, %v6517_v38 }
 0x1d2   : > { %v865_v27 = vmax.f32 %v833_v39, 0.0 }
 0x1d3   : > { %v6539_v16 = vadd.f32 %v896_v17, %v864_v7  ;;  %v897_v7 = vld [vmem:[%s6274_s11 + $0xb0] sm:$0xff]  ;;  %v835_v17 = vadd.f32 %v6121_v19, %v707_v47 }
 0x1d4   : > { %v6559_v24 = vadd.f32 %v897_v7, %v865_v27 }
 0x1d5   : > { %1719 = vrot.lane.b32.xlu1 %v1127_v10, %s5828_s23  ;;  %1721 = vrot.lane.b32.xlu0 %v1128_v9, %s5828_s23  ;;  %10040 = vst [vmem:[#allocation48_spill] sm:$0xff] %v6539_v16  ;;  %v834_v10 = vadd.f32 %v6196_v41, %v706_v40  ;;  %v566_v9 = vpop.f32.mrf.mxu0  ;;  %v1218_v41 = vmul.f32 %v6204_v45, %v6539_v16  ;;  %v898_v40 = vld [vmem:[%s6274_s11 + $0xb8] sm:$0xff] }
 0x1d6   : > { %10041 = vst [vmem:[#allocation49_spill] sm:$0xff] %v6559_v24  ;;  %v1220_v27 = vmul.f32 %v6299_v48, %v6559_v24 }
 0x1d7   : > { %v570_v34 = vpop.f32.mrf.mxu0 }
 0x1d8   : > { %v709_v47 = vmul.f32 %v6165_v31, %v570_v34 }
 0x1d9   : > { %1355 = vrot.lane.b32.xlu0 %v1214_v26, %s5827_s22  ;;  %1357 = vrot.lane.b32.xlu1 %v1215_v18, %s5827_s22  ;;  %v866_v26 = vmax.f32 %v834_v10, 0.0  ;;  %v708_v18 = vmul.f32 %v6105_v11, %v566_v9  ;;  %v1133_v11 = vmul.f32 %v6314_v22, %v6537_v56  ;;  %v1134_v10 = vmul.f32 %v6202_v44, %v6539_v16 }
 0x1da   : > { %v867_v9 = vmax.f32 %v835_v17, 0.0  ;;  %v2045_v56 = vmul.f32 %v6324_v51, %v6559_v24 }
 0x1db   : > { %v6561_v39 = vadd.f32 %v898_v40, %v866_v26  ;;  %v899_v26 = vld [vmem:[%s6274_s11 + $0xc0] sm:$0xff]  ;;  %v837_v40 = vadd.f32 %v6198_v42, %v709_v47 }
 0x1dc   : > { %v6581_v34 = vadd.f32 %v899_v26, %v867_v9 }
 0x1dd   : > { %1725 = vrot.lane.b32.xlu0 %v1130_v30, %s5828_s23  ;;  %1727 = vrot.lane.b32.xlu1 %v1131_v29, %s5828_s23  ;;  %10042 = vst [vmem:[#allocation50_spill] sm:$0xff] %v6561_v39  ;;  %v836_v30 = vadd.f32 %v6121_v19, %v708_v18  ;;  %v572_v29 = vpop.f32.mrf.mxu0  ;;  %v1221_v19 = vmul.f32 %v6204_v45, %v6561_v39  ;;  %v900_v18 = vld [vmem:[%s6274_s11 + $0xc8] sm:$0xff] }
 0x1de   : > { %10043 = vst [vmem:[#allocation51_spill] sm:$0xff] %v6581_v34  ;;  %v1223_v9 = vmul.f32 %v6299_v48, %v6581_v34 }
 0x1df   : > { %v576_v7 = vpop.f32.mrf.mxu0 }
 0x1e0   : > { %v711_v47 = vmul.f32 %v6107_v12, %v576_v7 }
 0x1e1   : > { %1361 = vrot.lane.b32.xlu1 %v1217_v8, %s5827_s22  ;;  %1363 = vrot.lane.b32.xlu0 %v1218_v41, %s5827_s22  ;;  %v868_v8 = vmax.f32 %v836_v30, 0.0  ;;  %v710_v41 = vmul.f32 %v6165_v31, %v572_v29  ;;  %v1136_v31 = vmul.f32 %v6314_v22, %v6559_v24  ;;  %v1137_v30 = vmul.f32 %v6202_v44, %v6561_v39 }
 0x1e2   : > { %v869_v29 = vmax.f32 %v837_v40, 0.0  ;;  %v839_v26 = vadd.f32 %v6123_v20, %v711_v47 }
 0x1e3   : > { %v6583_v17 = vadd.f32 %v900_v18, %v868_v8  ;;  %v901_v8 = vld [vmem:[%s6274_s11 + $0xd0] sm:$0xff]  ;;  %v1139_v18 = vmul.f32 %v6314_v22, %v6581_v34 }
 0x1e5   : > { %1731 = vrot.lane.b32.xlu1 %v1133_v11, %s5828_s23  ;;  %1733 = vrot.lane.b32.xlu0 %v1134_v10, %s5828_s23  ;;  %10044 = vst [vmem:[#allocation52_spill] sm:$0xff] %v6583_v17  ;;  %v838_v11 = vadd.f32 %v6198_v42, %v710_v41  ;;  %v578_v10 = vpop.f32.mrf.mxu0  ;;  %v1224_v42 = vmul.f32 %v6204_v45, %v6583_v17  ;;  %v902_v41 = vld [vmem:[%s6274_s11 + $0xd8] sm:$0xff] }
 0x1e9   : > { %1367 = vrot.lane.b32.xlu0 %v1220_v27, %s5827_s22  ;;  %1369 = vrot.lane.b32.xlu1 %v1221_v19, %s5827_s22  ;;  %v870_v27 = vmax.f32 %v838_v11, 0.0  ;;  %v712_v19 = vmul.f32 %v6107_v12, %v578_v10  ;;  %v6603_v12 = vadd.f32 %v901_v8, %v869_v29  ;;  %v582_v11 = vpop.f32.mrf.mxu0  ;;  %v903_v10 = vld [vmem:[%s6274_s11 + $0xe0] sm:$0xff] }
 0x1eb   : > { %10045 = vst [vmem:[#allocation53_spill] sm:$0xff] %v6603_v12  ;;  %v6605_v7 = vadd.f32 %v902_v41, %v870_v27  ;;  %v840_v40 = vadd.f32 %v6123_v20, %v712_v19  ;;  %v1226_v20 = vmul.f32 %v6299_v48, %v6603_v12  ;;  %v904_v19 = vld [vmem:[%s6274_s11 + $0xe8] sm:$0xff]  ;;  %v584_v8 = vpop.f32.mrf.mxu0 }
 0x1ed   : > { %1737 = vrot.lane.b32.xlu0 %v1136_v31, %s5828_s23  ;;  %1739 = vrot.lane.b32.xlu1 %v1137_v30, %s5828_s23  ;;  %10046 = vst [vmem:[#allocation54_spill] sm:$0xff] %v6605_v7  ;;  %v1140_v31 = vmul.f32 %v6202_v44, %v6583_v17  ;;  %v871_v30 = vmax.f32 %v839_v26, 0.0  ;;  %v872_v47 = vmax.f32 %v840_v40, 0.0  ;;  %v1227_v27 = vmul.f32 %v6204_v45, %v6605_v7 }
 0x1ee   : > { %v1142_v26 = vmul.f32 %v6314_v22, %v6603_v12 }
 0x1ef   : > { %v6625_v41 = vadd.f32 %v903_v10, %v871_v30 }
 0x1f1   : > { %1373 = vrot.lane.b32.xlu1 %v1223_v9, %s5827_s22  ;;  %1375 = vrot.lane.b32.xlu0 %v1224_v42, %s5827_s22  ;;  %v713_v9 = vmul.f32 %v6171_v32, %v582_v11  ;;  %10049 = vst [vmem:[#allocation57_spill] sm:$0xff] %v6625_v41 }
 0x1f3   : > { %v841_v40 = vadd.f32 %v6200_v43, %v713_v9 }
 0x1f5   : > { %1743 = vrot.lane.b32.xlu1 %v1139_v18, %s5828_s23  ;;  %1745 = vrot.lane.b32.xlu0 %v1140_v31, %s5828_s23  ;;  %v6629_v18 = vadd.f32 %v904_v19, %v872_v47  ;;  %v714_v31 = vmul.f32 %v6171_v32, %v584_v8  ;;  %v873_v30 = vmax.f32 %v841_v40, 0.0  ;;  %v1229_v32 = vmul.f32 %v6299_v48, %v6625_v41  ;;  %v905_v19 = vld [vmem:[%s6274_s11 + $0xf0] sm:$0xff] }
 0x1f7   : > { %v6614_v42 = vpop.permute.xlu1 %2130  ;;  %v6616_v29 = vpop.permute.xlu0 %2124  ;;  %10050 = vst [vmem:[#allocation58_spill] sm:$0xff] %v6629_v18  ;;  %v842_v10 = vadd.f32 %v6200_v43, %v714_v31  ;;  %v6653_v8 = vadd.f32 %v905_v19, %v873_v30  ;;  %v1145_v31 = vmul.f32 %v6314_v22, %v6625_v41 }
 0x1f8   : > { %10047 = vst [vmem:[#allocation55_spill] sm:$0xff] %v6614_v42  ;;  %10048 = vst [vmem:[#allocation56_spill] sm:$0xff] %v6616_v29  ;;  %v906_v42 = vld [vmem:[%s6274_s11 + $0xf8] sm:$0xff] }
 0x1f9   : > { %1379 = vrot.lane.b32.xlu0 %v1226_v20, %s5827_s22  ;;  %1381 = vrot.lane.b32.xlu1 %v1227_v27, %s5827_s22  ;;  %v1143_v20 = vmul.f32 %v6202_v44, %v6605_v7  ;;  %v1230_v27 = vmul.f32 %v6204_v45, %v6629_v18  ;;  %10055 = vst [vmem:[#allocation63_spill] sm:$0xff] %v6653_v8 }
 0x1fa   : > { %v1232_v19 = vmul.f32 %v6299_v48, %v6653_v8 }
 0x1fb   : > { %v6633_v11 = vpop.permute.xlu1 %1301  ;;  %v6635_v29 = vpop.permute.xlu0 %1303 }
 0x1fc   : > { %10051 = vst [vmem:[#allocation59_spill] sm:$0xff] %v6633_v11  ;;  %10052 = vst [vmem:[#allocation60_spill] sm:$0xff] %v6635_v29 }
 0x1fd   : > { %1749 = vrot.lane.b32.xlu0 %v1142_v26, %s5828_s23  ;;  %1751 = vrot.lane.b32.xlu1 %v1143_v20, %s5828_s23  ;;  %v874_v26 = vmax.f32 %v842_v10, 0.0  ;;  %v1146_v20 = vmul.f32 %v6202_v44, %v6629_v18 }
 0x1ff   : > { %v6642_v47 = vpop.permute.xlu1 %1671  ;;  %v6644_v9 = vpop.permute.xlu0 %1673 }
 0x200   : > { %10053 = vst [vmem:[#allocation61_spill] sm:$0xff] %v6642_v47  ;;  %10054 = vst [vmem:[#allocation62_spill] sm:$0xff] %v6644_v9  ;;  %v2048_v9 = vmul.f32 %v6324_v51, %v6581_v34  ;;  %v2051_v34 = vmul.f32 %v6324_v51, %v6603_v12 }
 0x201   : > { %1385 = vrot.lane.b32.xlu1 %v1229_v32, %s5827_s22  ;;  %1387 = vrot.lane.b32.xlu0 %v1230_v27, %s5827_s22  ;;  %v6666_v32 = vadd.f32 %v906_v42, %v874_v26  ;;  %v2018_v27 = vmul.f32 %v6324_v51, %v6358_v33  ;;  %v1148_v42 = vmul.f32 %v6314_v22, %v6653_v8 }
 0x203   : > { %v6655_v40 = vpop.permute.xlu1 %2126  ;;  %v6657_v43 = vpop.permute.xlu0 %2128  ;;  %10058 = vst [vmem:[#allocation66_spill] sm:$0xff] %v6666_v32  ;;  %v1233_v26 = vmul.f32 %v6204_v45, %v6666_v32  ;;  %v2019_v45 = vmul.f32 %v6307_v35, %v6361_v1  ;;  %v2030_v1 = vmul.f32 %v6324_v51, %v6449_v14 }
 0x204   : > { %10056 = vst [vmem:[#allocation64_spill] sm:$0xff] %v6655_v40  ;;  %10057 = vst [vmem:[#allocation65_spill] sm:$0xff] %v6657_v43 }
 0x205   : > { %1755 = vrot.lane.b32.xlu1 %v1145_v31, %s5828_s23  ;;  %1757 = vrot.lane.b32.xlu0 %v1146_v20, %s5828_s23 }
 0x207   : > { %v6668_v30 = vpop.permute.xlu0 %1307  ;;  %v6670_v10 = vpop.permute.xlu1 %1309 }
 0x208   : > { %10059 = vst [vmem:[#allocation67_spill] sm:$0xff] %v6668_v30  ;;  %10060 = vst [vmem:[#allocation68_spill] sm:$0xff] %v6670_v10 }
 0x209   : > { %2138 = vrot.lane.b32.xlu1 %v2018_v27, %s5830_s12  ;;  %1391 = vrot.lane.b32.xlu0 %v1232_v19, %s5827_s22  ;;  %v1149_v27 = vmul.f32 %v6202_v44, %v6666_v32 }
 0x20b   : > { %v6678_v40 = vpop.permute.xlu0 %1677  ;;  %v6680_v31 = vpop.permute.xlu1 %1679 }
 0x20c   : > { %10061 = vst [vmem:[#allocation69_spill] sm:$0xff] %v6678_v40  ;;  %10062 = vst [vmem:[#allocation70_spill] sm:$0xff] %v6680_v31  ;;  %v2054_v31 = vmul.f32 %v6324_v51, %v6625_v41 }
 0x20d   : > { %1761 = vrot.lane.b32.xlu0 %v1148_v42, %s5828_s23  ;;  %1393 = vrot.lane.b32.xlu1 %v1233_v26, %s5827_s22  ;;  %v2021_v26 = vmul.f32 %v6324_v51, %v6383_v3 }
 0x20f   : > { %v6688_v20 = vpop.permute.xlu0 %2132  ;;  %v6690_v48 = vpop.permute.xlu1 %2134 }
 0x210   : > { %10063 = vst [vmem:[#allocation71_spill] sm:$0xff] %v6688_v20  ;;  %10064 = vst [vmem:[#allocation72_spill] sm:$0xff] %v6690_v48  ;;  %v2024_v20 = vmul.f32 %v6324_v51, %v6405_v23 }
 0x211   : > { %2136 = vrot.lane.b32.xlu0 %v6290_v52, %s5830_s12  ;;  %1763 = vrot.lane.b32.xlu1 %v1149_v27, %s5828_s23  ;;  %v2022_v27 = vmul.f32 %v6307_v35, %v6385_v25  ;;  %v2027_v25 = vmul.f32 %v6324_v51, %v6427_v13 }
 0x213   : > { %v6697_v22 = vpop.permute.xlu1 %1313  ;;  %v6699_v19 = vpop.permute.xlu0 %1315 }
 0x214   : > { %10065 = vst [vmem:[#allocation73_spill] sm:$0xff] %v6697_v22  ;;  %10066 = vst [vmem:[#allocation74_spill] sm:$0xff] %v6699_v19 }
 0x215   : > { %2140 = vrot.lane.b32.xlu0 %v2019_v45, %s5830_s12  ;;  %2142 = vrot.lane.b32.xlu1 %v6290_v52, %s5830_s12 }
 0x217   : > { %v6706_v42 = vpop.permute.xlu1 %1683  ;;  %v6708_v44 = vpop.permute.xlu0 %1685 }
 0x218   : > { %10067 = vst [vmem:[#allocation75_spill] sm:$0xff] %v6706_v42  ;;  %10068 = vst [vmem:[#allocation76_spill] sm:$0xff] %v6708_v44  ;;  %v2058_v44 = vmul.f32 %v6307_v35, %v6666_v32 }
 0x219   : > { %2144 = vrot.lane.b32.xlu0 %v2021_v26, %s5830_s12  ;;  %2146 = vrot.lane.b32.xlu1 %v2022_v27, %s5830_s12  ;;  %v2025_v26 = vmul.f32 %v6307_v35, %v6407_v55 }
 0x21b   : > { %v6716_v43 = vpop.permute.xlu0 %1319  ;;  %v6718_v45 = vpop.permute.xlu1 %1321 }
 0x21d   : > { %2148 = vrot.lane.b32.xlu0 %v6290_v52, %s5830_s12  ;;  %2150 = vrot.lane.b32.xlu1 %v2024_v20, %s5830_s12  ;;  %v2028_v20 = vmul.f32 %v6307_v35, %v6429_v49  ;;  %v2033_v49 = vmul.f32 %v6324_v51, %v6471_v6 }
 0x21f   : > { %v6725_v48 = vpop.permute.xlu0 %1689  ;;  %v6727_v3 = vpop.permute.xlu1 %1691 }
 0x220   : > { %10069 = vst [vmem:[#allocation77_spill] sm:$0xff] %v6725_v48  ;;  %10070 = vst [vmem:[#allocation78_spill] sm:$0xff] %v6727_v3 }
 0x221   : > { %2152 = vrot.lane.b32.xlu0 %v2025_v26, %s5830_s12  ;;  %2154 = vrot.lane.b32.xlu1 %v6290_v52, %s5830_s12 }
 0x223   : > { %v6734_v27 = vpop.permute.xlu1 %1325  ;;  %v6736_v23 = vpop.permute.xlu0 %1327 }
 0x225   : > { %2156 = vrot.lane.b32.xlu0 %v2027_v25, %s5830_s12  ;;  %2158 = vrot.lane.b32.xlu1 %v2028_v20, %s5830_s12  ;;  %v2031_v25 = vmul.f32 %v6307_v35, %v6451_v46 }
 0x227   : > { %v6744_v55 = vpop.permute.xlu1 %1695  ;;  %v6746_v26 = vpop.permute.xlu0 %1697 }
 0x228   : > { %10071 = vst [vmem:[#allocation79_spill] sm:$0xff] %v6744_v55  ;;  %10072 = vst [vmem:[#allocation80_spill] sm:$0xff] %v6746_v26 }
 0x229   : > { %2160 = vrot.lane.b32.xlu0 %v6290_v52, %s5830_s12  ;;  %2162 = vrot.lane.b32.xlu1 %v2030_v1, %s5830_s12  ;;  %v2034_v1 = vmul.f32 %v6307_v35, %v6473_v2 }
 0x22b   : > { %v6753_v13 = vpop.permute.xlu0 %1331  ;;  %v6755_v33 = vpop.permute.xlu1 %1333 }
 0x22d   : > { %2164 = vrot.lane.b32.xlu0 %v2031_v25, %s5830_s12  ;;  %2166 = vrot.lane.b32.xlu1 %v6290_v52, %s5830_s12 }
 0x22f   : > { %v6762_v20 = vpop.permute.xlu0 %1701  ;;  %v6764_v14 = vpop.permute.xlu1 %1703 }
 0x231   : > { %2168 = vrot.lane.b32.xlu0 %v2033_v49, %s5830_s12  ;;  %2170 = vrot.lane.b32.xlu1 %v2034_v1, %s5830_s12  ;;  %v2037_v49 = vmul.f32 %v6307_v35, %v6495_v15 }
 0x233   : > { %v6772_v46 = vpop.permute.xlu1 %1337  ;;  %v6774_v25 = vpop.permute.xlu0 %1339 }
 0x235   : > { %2172 = vrot.lane.b32.xlu0 %v6290_v52, %s5830_s12  ;;  %2174 = vrot.lane.b32.xlu1 %v2036_v21, %s5830_s12  ;;  %v2040_v21 = vmul.f32 %v6307_v35, %v6517_v38 }
 0x237   : > { %v6781_v6 = vpop.permute.xlu1 %1707  ;;  %v6783_v0 = vpop.permute.xlu0 %1709 }
 0x239   : > { %2176 = vrot.lane.b32.xlu0 %v2037_v49, %s5830_s12  ;;  %2178 = vrot.lane.b32.xlu1 %v6290_v52, %s5830_s12 }
 0x23b   : > { %v6790_v1 = vpop.permute.xlu0 %1343  ;;  %v6792_v2 = vpop.permute.xlu1 %1345 }
 0x23d   : > { %2180 = vrot.lane.b32.xlu0 %v2039_v53, %s5830_s12  ;;  %2182 = vrot.lane.b32.xlu1 %v2040_v21, %s5830_s12  ;;  %v2043_v53 = vmul.f32 %v6307_v35, %v6539_v16 }
 0x23f   : > { %v6800_v15 = vpop.permute.xlu0 %1713  ;;  %v6802_v49 = vpop.permute.xlu1 %1715 }
 0x241   : > { %2184 = vrot.lane.b32.xlu0 %v6290_v52, %s5830_s12  ;;  %2186 = vrot.lane.b32.xlu1 %v2042_v50, %s5830_s12  ;;  %v2046_v50 = vmul.f32 %v6307_v35, %v6561_v39 }
 0x243   : > { %v6809_v37 = vpop.permute.xlu1 %1349  ;;  %v6811_v47 = vpop.permute.xlu0 %1351 }
 0x245   : > { %2188 = vrot.lane.b32.xlu0 %v2043_v53, %s5830_s12  ;;  %2190 = vrot.lane.b32.xlu1 %v6290_v52, %s5830_s12 }
 0x247   : > { %v6818_v21 = vpop.permute.xlu1 %1719  ;;  %v6820_v38 = vpop.permute.xlu0 %1721 }
 0x249   : > { %2192 = vrot.lane.b32.xlu0 %v2045_v56, %s5830_s12  ;;  %2194 = vrot.lane.b32.xlu1 %v2046_v50, %s5830_s12  ;;  %v2049_v56 = vmul.f32 %v6307_v35, %v6583_v17 }
 0x24b   : > { %v6828_v16 = vpop.permute.xlu0 %1355  ;;  %v6830_v53 = vpop.permute.xlu1 %1357 }
 0x24d   : > { %2196 = vrot.lane.b32.xlu0 %v6290_v52, %s5830_s12  ;;  %2198 = vrot.lane.b32.xlu1 %v2048_v9, %s5830_s12  ;;  %v2052_v9 = vmul.f32 %v6307_v35, %v6605_v7 }
 0x24f   : > { %v6837_v24 = vpop.permute.xlu0 %1725  ;;  %v6839_v40 = vpop.permute.xlu1 %1727 }
 0x251   : > { %2200 = vrot.lane.b32.xlu0 %v2049_v56, %s5830_s12  ;;  %2202 = vrot.lane.b32.xlu1 %v6290_v52, %s5830_s12 }
 0x253   : > { %v6846_v50 = vpop.permute.xlu1 %1361  ;;  %v6848_v39 = vpop.permute.xlu0 %1363 }
 0x255   : > { %2204 = vrot.lane.b32.xlu0 %v2051_v34, %s5830_s12  ;;  %2206 = vrot.lane.b32.xlu1 %v2052_v9, %s5830_s12  ;;  %v2055_v34 = vmul.f32 %v6307_v35, %v6629_v18  ;;  %v5656_v9 = vld [vmem:[%s9837_s8 + $0x6] sm:$0x3] }
 0x257   : > { %v6856_v17 = vpop.permute.xlu1 %1731  ;;  %v6858_v56 = vpop.permute.xlu0 %1733 }
 0x259   : > { %2208 = vrot.lane.b32.xlu0 %v6290_v52, %s5830_s12  ;;  %2210 = vrot.lane.b32.xlu1 %v2054_v31, %s5830_s12  ;;  %v2057_v31 = vmul.f32 %v6324_v51, %v6653_v8 }
 0x25b   : > { %v6865_v12 = vpop.permute.xlu0 %1367  ;;  %v6867_v42 = vpop.permute.xlu1 %1369 }
 0x25d   : > { %2212 = vrot.lane.b32.xlu0 %v2055_v34, %s5830_s12  ;;  %2214 = vrot.lane.b32.xlu1 %v6290_v52, %s5830_s12  ;;  %v2484_v52 = vrot.slane %v5656_v9, %v6055_v57  ;;  %v2488_v34 = vrot.slane %v5656_v9, %v6047_v54 }
 0x25f   : > { %v6877_v7 = vpop.permute.xlu0 %1737  ;;  %v6879_v41 = vpop.permute.xlu1 %1739 }
 0x261   : > { %2216 = vrot.lane.b32.xlu0 %v2057_v31, %s5830_s12  ;;  %2218 = vrot.lane.b32.xlu1 %v2058_v44, %s5830_s12 }
 0x263   : > { %v1374_v18 = vpop.permute.xlu1 %1373  ;;  %v1376_v11 = vpop.permute.xlu0 %1375 }
 0x265   : > { %2489 = vrot.lane.b32.xlu0 %v2484_v52, %s5831_s15  ;;  %2491 = vrot.lane.b32.xlu1 %v2488_v34, %s5831_s15 }
 0x267   : > { %v1744_v29 = vpop.permute.xlu1 %1743  ;;  %v1746_v51 = vpop.permute.xlu0 %1745 }
 0x26b   : > { %v1380_v8 = vpop.permute.xlu0 %1379  ;;  %v1382_v48 = vpop.permute.xlu1 %1381 }
 0x26c   : > { %v1423_v19 = vsel %vm1395_vm4, %v1380_v8, %v1382_v48  ;;  %v1420_v48 = vsel %vm1395_vm4, %v6232_v61, %v1374_v18 }
 0x26f   : > { %v1750_v35 = vpop.permute.xlu0 %1749  ;;  %v1752_v32 = vpop.permute.xlu1 %1751 }
 0x270   : > { %v1792_v61 = vsel %vm1765_vm5, %v6276_v36, %v1750_v35  ;;  %v1790_v36 = vsel %vm1765_vm5, %v6265_v28, %v1744_v29 }
 0x273   : > { %v1386_v31 = vpop.permute.xlu1 %1385  ;;  %v1388_v3 = vpop.permute.xlu0 %1387 }
 0x274   : > { %v1425_v55 = vsel %vm1395_vm4, %v1386_v31, %v1388_v3 }
 0x277   : > { %v1756_v44 = vpop.permute.xlu1 %1755  ;;  %v1758_v30 = vpop.permute.xlu0 %1757 }
 0x27b   : > { %v6891_v57 = vpop.permute.xlu1 %2138  ;;  %v1392_v9 = vpop.permute.xlu0 %1391 }
 0x27c   : > { %10073 = vst [vmem:[#allocation81_spill] sm:$0xff] %v6891_v57  ;;  %v1426_v34 = vsel %vm1395_vm4, %v6234_v62, %v1392_v9  ;;  %v1424_v57 = vsel %vm1395_vm4, %v6236_v63, %v1386_v31  ;;  %v1422_v62 = vsel %vm1395_vm4, %v6230_v60, %v1380_v8  ;;  %v1795_v63 = vsel %vm1765_vm5, %v1756_v44, %v1758_v30  ;;  %v10074_v30 = vld [vmem:[#allocation13_spill] sm:$0xff] }
 0x27d   : > { %v1794_v60 = vsel %vm1765_vm5, %v6278_v4, %v1756_v44  ;;  %v1417_v4 = vsel %vm1395_vm4, %v6846_v50, %v6848_v39  ;;  %v1415_v39 = vsel %vm1395_vm4, %v6828_v16, %v6830_v53  ;;  %v10077_v53 = vld [vmem:[#allocation25_spill] sm:$0xff] }
 0x27f   : > { %v1762_v54 = vpop.permute.xlu0 %1761  ;;  %v1394_v10 = vpop.permute.xlu1 %1393 }
 0x280   : > { %v1427_v52 = vsel %vm1395_vm4, %v1392_v9, %v1394_v10  ;;  %v1796_v3 = vsel %vm1765_vm5, %v6288_v5, %v1762_v54  ;;  %v1419_v5 = vsel %vm1395_vm4, %v6865_v12, %v6867_v42 }
 0x281   : > { %1460 = vmatprep.subr.mxu1 %v1427_v52  ;;  %v10081_v52 = vld [vmem:[#allocation24_spill] sm:$0xff] }
 0x282   : > { %1461 = vmatpush1.msra.mxu1 %v1426_v34  ;;  %v1782_v34 = vsel %vm1765_vm5, %v10081_v52, %v6818_v21  ;;  %v10105_v52 = vld [vmem:[#allocation18_spill] sm:$0xff] }
 0x283   : > { %v6897_v26 = vpop.permute.xlu0 %2136  ;;  %1462 = vmatprep.subr.mxu1 %v1425_v55  ;;  %v1764_v22 = vpop.permute.xlu1 %1763  ;;  %v1421_v55 = vsel %vm1395_vm4, %v1374_v18, %v1376_v11  ;;  %v1418_v11 = vsel %vm1395_vm4, %v6226_v58, %v6865_v12  ;;  %v1791_v18 = vsel %vm1765_vm5, %v1744_v29, %v1746_v51  ;;  %v1416_v58 = vsel %vm1395_vm4, %v6228_v59, %v6846_v50  ;;  %v10075_v59 = vld [vmem:[#allocation26_spill] sm:$0xff]  ;;  %v10078_v51 = vld [vmem:[#allocation11_spill] sm:$0xff] }
 0x284   : > { %1463 = vmatpush1.msra.mxu1 %v1424_v57  ;;  %v1797_v10 = vsel %vm1765_vm5, %v1762_v54, %v1764_v22  ;;  %v1793_v54 = vsel %vm1765_vm5, %v1750_v35, %v1752_v32  ;;  %v1789_v12 = vsel %vm1765_vm5, %v6877_v7, %v6879_v41  ;;  %v1414_v22 = vsel %vm1395_vm4, %v10074_v30, %v6828_v16  ;;  %v10076_v16 = vld [vmem:[#allocation14_spill] sm:$0xff]  ;;  %v10079_v35 = vld [vmem:[#allocation23_spill] sm:$0xff] }
 0x285   : > { %1464 = vmatprep.subr.mxu1 %v1423_v19  ;;  %1830 = vmatprep.subr.mxu0 %v1797_v10  ;;  %v1788_v28 = vsel %vm1765_vm5, %v10075_v59, %v6877_v7  ;;  %v1413_v29 = vsel %vm1395_vm4, %v6809_v37, %v6811_v47  ;;  %v1787_v41 = vsel %vm1765_vm5, %v6856_v17, %v6858_v56  ;;  %v10082_v10 = vld [vmem:[#allocation9_spill] sm:$0xff]  ;;  %v10095_v30 = vld [vmem:[#allocation67_spill] sm:$0xff]  ;;  %v10096_v59 = vld [vmem:[#allocation78_spill] sm:$0xff] }
 0x286   : > { %1465 = vmatpush1.msra.mxu1 %v1422_v62  ;;  %1831 = vmatpush1.msra.mxu0 %v1796_v3  ;;  %v1412_v7 = vsel %vm1395_vm4, %v10076_v16, %v6809_v37  ;;  %v1786_v50 = vsel %vm1765_vm5, %v10077_v53, %v6856_v17  ;;  %v1411_v47 = vsel %vm1395_vm4, %v6790_v1, %v6792_v2  ;;  %v10083_v62 = vld [vmem:[#allocation21_spill] sm:$0xff] }
 0x287   : > { %v6909_v31 = vpop.permute.xlu0 %2140  ;;  %1466 = vmatprep.subr.mxu1 %v1421_v55  ;;  %1832 = vmatprep.subr.mxu0 %v1795_v63  ;;  %v6911_v57 = vpop.permute.xlu1 %2142  ;;  %v1785_v56 = vsel %vm1765_vm5, %v6837_v24, %v6839_v40  ;;  %v1410_v37 = vsel %vm1395_vm4, %v10078_v51, %v6790_v1  ;;  %v1784_v17 = vsel %vm1765_vm5, %v10079_v35, %v6837_v24  ;;  %v10080_v1 = vld [vmem:[#allocation12_spill] sm:$0xff]  ;;  %v10085_v63 = vld [vmem:[#allocation22_spill] sm:$0xff] }
 0x288   : > { %1467 = vmatpush1.msra.mxu1 %v1420_v48  ;;  %1833 = vmatpush1.msra.mxu0 %v1794_v60  ;;  %v1409_v2 = vsel %vm1395_vm4, %v6772_v46, %v6774_v25  ;;  %v1783_v40 = vsel %vm1765_vm5, %v6818_v21, %v6820_v38  ;;  %v1408_v24 = vsel %vm1395_vm4, %v10080_v1, %v6772_v46  ;;  %v10086_v60 = vld [vmem:[#allocation7_spill] sm:$0xff]  ;;  %v10102_v51 = vld [vmem:[#allocation76_spill] sm:$0xff]  ;;  %v10104_v1 = vld [vmem:[#allocation6_spill] sm:$0xff] }
 0x289   : > { %1468 = vmatprep.subr.mxu1 %v1419_v5  ;;  %1834 = vmatprep.subr.mxu0 %v1793_v54  ;;  %v1407_v38 = vsel %vm1395_vm4, %v6753_v13, %v6755_v33  ;;  %v1781_v25 = vsel %vm1765_vm5, %v6800_v15, %v6802_v49  ;;  %v1406_v46 = vsel %vm1395_vm4, %v10082_v10, %v6753_v13  ;;  %v10084_v13 = vld [vmem:[#allocation10_spill] sm:$0xff]  ;;  %v10087_v5 = vld [vmem:[#allocation19_spill] sm:$0xff] }
 0x28a   : > { %1469 = vmatpush1.msra.mxu1 %v1418_v11  ;;  %1835 = vmatpush1.msra.mxu0 %v1792_v61  ;;  %v1780_v21 = vsel %vm1765_vm5, %v10083_v62, %v6800_v15  ;;  %v1405_v33 = vsel %vm1395_vm4, %v6734_v27, %v6736_v23  ;;  %v1779_v49 = vsel %vm1765_vm5, %v6781_v6, %v6783_v0  ;;  %v10088_v54 = vld [vmem:[#allocation74_spill] sm:$0xff]  ;;  %v10089_v11 = vld [vmem:[#allocation73_spill] sm:$0xff]  ;;  %v10090_v61 = vld [vmem:[#allocation80_spill] sm:$0xff] }
 0x28b   : > { %v6930_v8 = vpop.permute.xlu0 %2144  ;;  %1470 = vmatprep.subr.mxu1 %v1417_v4  ;;  %1836 = vmatprep.subr.mxu0 %v1791_v18  ;;  %v6932_v32 = vpop.permute.xlu1 %2146  ;;  %v1404_v15 = vsel %vm1395_vm4, %v10084_v13, %v6734_v27  ;;  %v1778_v48 = vsel %vm1765_vm5, %v10085_v63, %v6781_v6  ;;  %v1403_v0 = vsel %vm1395_vm4, %v6716_v43, %v6718_v45  ;;  %v10091_v4 = vld [vmem:[#allocation79_spill] sm:$0xff]  ;;  %v10111_v13 = vmov 0.0  }
 0x28c   : > { %1471 = vmatpush1.msra.mxu1 %v1416_v58  ;;  %1837 = vmatpush1.msra.mxu0 %v1790_v36  ;;  %v1777_v23 = vsel %vm1765_vm5, %v6762_v20, %v6764_v14  ;;  %v1402_v27 = vsel %vm1395_vm4, %v10086_v60, %v6716_v43  ;;  %v1776_v6 = vsel %vm1765_vm5, %v10087_v5, %v6762_v20  ;;  %v10092_v43 = vld [vmem:[#allocation8_spill] sm:$0xff]  ;;  %v5625_v60 = vld [vmem:[%s9834_s5 + $0x90] sm:$0xff] }
 0x28d   : > { %1472 = vmatprep.subr.mxu1 %v1415_v39  ;;  %1838 = vmatprep.subr.mxu0 %v1789_v12  ;;  %v1401_v45 = vsel %vm1395_vm4, %v10089_v11, %v10088_v54  ;;  %v1775_v14 = vsel %vm1765_vm5, %v10091_v4, %v10090_v61  ;;  %v1400_v20 = vsel %vm1395_vm4, %v10092_v43, %v10089_v11  ;;  %v10093_v36 = vld [vmem:[#allocation20_spill] sm:$0xff] }
 0x28e   : > { %1473 = vmatpush1.msra.mxu1 %v1414_v22  ;;  %1839 = vmatpush1.msra.mxu0 %v1788_v28  ;;  %v1774_v39 = vsel %vm1765_vm5, %v10093_v36, %v10091_v4  ;;  %v10094_v12 = vld [vmem:[#allocation68_spill] sm:$0xff]  ;;  %v10097_v28 = vld [vmem:[#allocation77_spill] sm:$0xff] }
 0x28f   : > { %v6957_v19 = vpop.permute.xlu0 %2148  ;;  %1474 = vmatprep.subr.mxu1 %v1413_v29  ;;  %1840 = vmatprep.subr.mxu0 %v1787_v41  ;;  %v6959_v42 = vpop.permute.xlu1 %2150  ;;  %v1399_v22 = vsel %vm1395_vm4, %v10095_v30, %v10094_v12  ;;  %v1773_v29 = vsel %vm1765_vm5, %v10097_v28, %v10096_v59  ;;  %v10098_v41 = vld [vmem:[#allocation5_spill] sm:$0xff] }
 0x290   : > { %1475 = vmatpush1.msra.mxu1 %v1412_v7  ;;  %1841 = vmatpush1.msra.mxu0 %v1786_v50  ;;  %v1398_v16 = vsel %vm1395_vm4, %v10098_v41, %v10095_v30  ;;  %v10099_v7 = vld [vmem:[#allocation17_spill] sm:$0xff]  ;;  %v10100_v50 = vld [vmem:[#allocation60_spill] sm:$0xff]  ;;  %v5630_v30 = vld [vmem:[%s9834_s5 + $0xb8] sm:$0xff] }
 0x291   : > { %1476 = vmatprep.subr.mxu1 %v1411_v47  ;;  %1842 = vmatprep.subr.mxu0 %v1785_v56  ;;  %v1772_v53 = vsel %vm1765_vm5, %v10099_v7, %v10097_v28  ;;  %v10101_v47 = vld [vmem:[#allocation59_spill] sm:$0xff]  ;;  %v5629_v36 = vld [vmem:[%s9834_s5 + $0xb0] sm:$0xff] }
 0x292   : > { %1477 = vmatpush1.msra.mxu1 %v1410_v37  ;;  %1843 = vmatpush1.msra.mxu0 %v1784_v17  ;;  %v1397_v56 = vsel %vm1395_vm4, %v10101_v47, %v10100_v50  ;;  %v10103_v37 = vld [vmem:[#allocation75_spill] sm:$0xff]  ;;  %v5633_v50 = vld [vmem:[%s9834_s5 + $0xd0] sm:$0xff] }
 0x293   : > { %v6985_v44 = vpop.permute.xlu0 %2152  ;;  %1478 = vmatprep.subr.mxu1 %v1409_v2  ;;  %1844 = vmatprep.subr.mxu0 %v1783_v40  ;;  %v6987_v9 = vpop.permute.xlu1 %2154  ;;  %v1771_v35 = vsel %vm1765_vm5, %v10103_v37, %v10102_v51  ;;  %v5623_v17 = vld [vmem:[%s9834_s5 + $0x80] sm:$0xff]  ;;  %v5634_v51 = vld [vmem:[%s9834_s5 + $0xd8] sm:$0xff] }
 0x294   : > { %1479 = vmatpush1.msra.mxu1 %v1408_v24  ;;  %1845 = vmatpush1.msra.mxu0 %v1782_v34  ;;  %v1396_v24 = vsel %vm1395_vm4, %v10104_v1, %v10101_v47  ;;  %v1770_v34 = vsel %vm1765_vm5, %v10105_v52, %v10103_v37  ;;  %v5631_v28 = vld [vmem:[%s9834_s5 + $0xc0] sm:$0xff]  ;;  %v5636_v52 = vld [vmem:[%s9834_s5 + $0xe8] sm:$0xff] }
 0x295   : > { %1480 = vmatprep.subr.mxu1 %v1407_v38  ;;  %1846 = vmatprep.subr.mxu0 %v1781_v25  ;;  %v10106_v38 = vld [vmem:[#allocation70_spill] sm:$0xff]  ;;  %v10107_v25 = vld [vmem:[#allocation69_spill] sm:$0xff] }
 0x296   : > { %1481 = vmatpush1.msra.mxu1 %v1406_v46  ;;  %1847 = vmatpush1.msra.mxu0 %v1780_v21  ;;  %v1769_v10 = vsel %vm1765_vm5, %v10107_v25, %v10106_v38  ;;  %v10108_v46 = vld [vmem:[#allocation15_spill] sm:$0xff]  ;;  %v10109_v21 = vld [vmem:[#allocation62_spill] sm:$0xff] }
 0x297   : > { %v7013_v3 = vpop.permute.xlu0 %2156  ;;  %1482 = vmatprep.subr.mxu1 %v1405_v33  ;;  %1848 = vmatprep.subr.mxu0 %v1779_v49  ;;  %v7015_v55 = vpop.permute.xlu1 %2158  ;;  %v1768_v62 = vsel %vm1765_vm5, %v10108_v46, %v10107_v25  ;;  %v10110_v33 = vld [vmem:[#allocation61_spill] sm:$0xff] }
 0x298   : > { %1483 = vmatpush1.msra.mxu1 %v1404_v15  ;;  %1849 = vmatpush1.msra.mxu0 %v1778_v48  ;;  %v1767_v49 = vsel %vm1765_vm5, %v10110_v33, %v10109_v21  ;;  %v5624_v15 = vld [vmem:[%s9834_s5 + $0x88] sm:$0xff] }
 0x299   : > { %1484 = vmatprep.subr.mxu1 %v1403_v0  ;;  %1850 = vmatprep.subr.mxu0 %v1777_v23  ;;  %v10112_v0 = vld [vmem:[#allocation16_spill] sm:$0xff] }
 0x29a   : > { %1485 = vmatpush1.msra.mxu1 %v1402_v27  ;;  %1851 = vmatpush1.msra.mxu0 %v1776_v6  ;;  %v1766_v23 = vsel %vm1765_vm5, %v10112_v0, %v10110_v33  ;;  %v5626_v6 = vld [vmem:[%s9834_s5 + $0x98] sm:$0xff] }
 0x29b   : > { %v7041_v18 = vpop.permute.xlu0 %2160  ;;  %1486 = vmatprep.subr.mxu1 %v1401_v45  ;;  %1852 = vmatprep.subr.mxu0 %v1775_v14  ;;  %v7043_v58 = vpop.permute.xlu1 %2162  ;;  %v5627_v45 = vld [vmem:[%s9834_s5 + $0xa0] sm:$0xff]  ;;  %v5628_v14 = vld [vmem:[%s9834_s5 + $0xa8] sm:$0xff] }
 0x29c   : > { %1487 = vmatpush1.msra.mxu1 %v1400_v20  ;;  %1853 = vmatpush1.msra.mxu0 %v1774_v39 }
 0x29d   : > { %1488 = vmatprep.subr.mxu1 %v1399_v22  ;;  %1854 = vmatprep.subr.mxu0 %v1773_v29 }
 0x29e   : > { %1489 = vmatpush1.msra.mxu1 %v1398_v16  ;;  %1855 = vmatpush1.msra.mxu0 %v1772_v53  ;;  %v5632_v16 = vld [vmem:[%s9834_s5 + $0xc8] sm:$0xff] }
 0x29f   : > { %v7072_v2 = vpop.permute.xlu0 %2164  ;;  %1490 = vmatprep.subr.mxu1 %v1397_v56  ;;  %1856 = vmatprep.subr.mxu0 %v1771_v35  ;;  %v7074_v40 = vpop.permute.xlu1 %2166 }
 0x2a0   : > { %1491 = vmatpush1.msra.mxu1 %v1396_v24  ;;  %1857 = vmatpush1.msra.mxu0 %v1770_v34 }
 0x2a1   : > { %1858 = vmatprep.subr.mxu0 %v1769_v10  ;;  %1525 = vmatmul.mubr.f32.vlgmr.msra.gmra.mxu1 %v5623_v17  ;;  %v5635_v17 = vld [vmem:[%s9834_s5 + $0xe0] sm:$0xff] }
 0x2a2   : > { %1859 = vmatpush1.msra.mxu0 %v1768_v62  ;;  %1530 = vmatprep.mubr.f32.mxu1 %v10111_v13 }
 0x2a3   : > { %v7095_v63 = vpop.permute.xlu0 %2168  ;;  %1860 = vmatprep.subr.mxu0 %v1767_v49  ;;  %v7097_v48 = vpop.permute.xlu1 %2170 }
 0x2a4   : > { %1861 = vmatpush1.msra.mxu0 %v1766_v23 }
 0x2a5   : > { %1531 = vmatmul.mubr.f32.gmra.mxu1 %v5624_v15 }
 0x2a6   : > { %1536 = vmatprep.mubr.f32.mxu1 %v10111_v13 }
 0x2a7   : > { %v7106_v27 = vpop.permute.xlu0 %2172  ;;  %v7108_v5 = vpop.permute.xlu1 %2174 }
 0x2a9   : > { %1537 = vmatmul.mubr.f32.gmra.mxu1 %v5625_v60  ;;  %v10113_v60 = vld [vmem:[#allocation27_spill] sm:$0xff] }
 0x2aa   : > { %1542 = vmatprep.mubr.f32.mxu1 %v10111_v13 }
 0x2ab   : > { %v7114_v54 = vpop.permute.xlu0 %2176  ;;  %v7116_v11 = vpop.permute.xlu1 %2178 }
 0x2ad   : > { %1543 = vmatmul.mubr.f32.gmra.mxu1 %v5626_v6 }
 0x2ae   : > { %1548 = vmatprep.mubr.f32.mxu1 %v10111_v13 }
 0x2af   : > { %v7122_v61 = vpop.permute.xlu0 %2180  ;;  %v7124_v4 = vpop.permute.xlu1 %2182 }
 0x2b1   : > { %1549 = vmatmul.mubr.f32.gmra.mxu1 %v5627_v45 }
 0x2b2   : > { %1554 = vmatprep.mubr.f32.mxu1 %v10111_v13 }
 0x2b3   : > { %v7130_v43 = vpop.permute.xlu0 %2184  ;;  %v7132_v20 = vpop.permute.xlu1 %2186 }
 0x2b5   : > { %1555 = vmatmul.mubr.f32.gmra.mxu1 %v5628_v14  ;;  %v5637_v14 = vld [vmem:[%s9834_s5 + $0xf0] sm:$0xff] }
 0x2b6   : > { %1560 = vmatprep.mubr.f32.mxu1 %v10111_v13 }
 0x2b7   : > { %v7138_v39 = vpop.permute.xlu0 %2188  ;;  %v7140_v12 = vpop.permute.xlu1 %2190 }
 0x2b9   : > { %1561 = vmatmul.mubr.f32.gmra.mxu1 %v5629_v36 }
 0x2ba   : > { %1566 = vmatprep.mubr.f32.mxu1 %v10111_v13 }
 0x2bb   : > { %v7146_v22 = vpop.permute.xlu0 %2192  ;;  %v2195_v59 = vpop.permute.xlu1 %2194 }
 0x2bd   : > { %1567 = vmatmul.mubr.f32.gmra.mxu1 %v5630_v30  ;;  %v2244_v30 = vsel %vm2220_vm6, %v7146_v22, %v2195_v59  ;;  %v5638_v59 = vld [vmem:[%s9834_s5 + $0xf8] sm:$0xff] }
 0x2be   : > { %1572 = vmatprep.mubr.f32.mxu1 %v10111_v13 }
 0x2bf   : > { %v2197_v29 = vpop.permute.xlu0 %2196  ;;  %v2199_v41 = vpop.permute.xlu1 %2198 }
 0x2c0   : > { %v2245_v36 = vsel %vm2220_vm6, %v2197_v29, %v2199_v41  ;;  %v2242_v29 = vsel %vm2220_vm6, %v7132_v20, %v7138_v39 }
 0x2c1   : > { %1573 = vmatmul.mubr.f32.gmra.mxu1 %v5631_v28  ;;  %v10114_v28 = vld [vmem:[#allocation28_spill] sm:$0xff] }
 0x2c2   : > { %1578 = vmatprep.mubr.f32.mxu1 %v10111_v13 }
 0x2c3   : > { %v2201_v7 = vpop.permute.xlu0 %2200  ;;  %v2203_v53 = vpop.permute.xlu1 %2202 }
 0x2c4   : > { %v2246_v45 = vsel %vm2220_vm6, %v2199_v41, %v2201_v7  ;;  %v2243_v7 = vsel %vm2220_vm6, %v7140_v12, %v7146_v22  ;;  %v2241_v12 = vsel %vm2220_vm6, %v7130_v43, %v7132_v20  ;;  %v2240_v22 = vsel %vm2220_vm6, %v7122_v61, %v7124_v4  ;;  %v10115_v41 = vld [vmem:[#allocation29_spill] sm:$0xff] }
 0x2c5   : > { %1579 = vmatmul.mubr.f32.gmra.mxu1 %v5632_v16  ;;  %v2238_v4 = vsel %vm2220_vm6, %v7108_v5, %v7114_v54  ;;  %v2237_v43 = vsel %vm2220_vm6, %v7106_v27, %v7108_v5  ;;  %v10117_v54 = vld [vmem:[#allocation31_spill] sm:$0xff]  ;;  %v2234_v27 = vsel %vm2220_vm6, %v7043_v58, %v7072_v2  ;;  %v2231_v2 = vsel %vm2220_vm6, %v6987_v9, %v7013_v3 }
 0x2c6   : > { %1584 = vmatprep.mubr.f32.mxu1 %v10111_v13  ;;  %v2228_v9 = vsel %vm2220_vm6, %v6930_v8, %v6932_v32  ;;  %v5673_v32 = vld [vmem:[%s9837_s8 + $0x8] sm:$0x3] }
 0x2c7   : > { %v2205_v47 = vpop.permute.xlu0 %2204  ;;  %v2207_v56 = vpop.permute.xlu1 %2206 }
 0x2c8   : > { %v2248_v15 = vsel %vm2220_vm6, %v2205_v47, %v2207_v56  ;;  %v2247_v23 = vsel %vm2220_vm6, %v2203_v53, %v2205_v47  ;;  %v2239_v53 = vsel %vm2220_vm6, %v7116_v11, %v7122_v61  ;;  %v2236_v11 = vsel %vm2220_vm6, %v7095_v63, %v7097_v48  ;;  %v10120_v56 = vld [vmem:[#allocation34_spill] sm:$0xff] }
 0x2c9   : > { %1585 = vmatmul.mubr.f32.gmra.mxu1 %v5633_v50  ;;  %v10116_v50 = vld [vmem:[#allocation30_spill] sm:$0xff]  ;;  %v2235_v61 = vsel %vm2220_vm6, %v7074_v40, %v7095_v63  ;;  %v2233_v48 = vsel %vm2220_vm6, %v7041_v18, %v7043_v58  ;;  %v2232_v40 = vsel %vm2220_vm6, %v7013_v3, %v7015_v55  ;;  %v10118_v63 = vld [vmem:[#allocation32_spill] sm:$0xff]  ;;  %v2230_v18 = vsel %vm2220_vm6, %v6959_v42, %v6985_v44  ;;  %v10119_v3 = vld [vmem:[#allocation33_spill] sm:$0xff] }
 0x2ca   : > { %1590 = vmatprep.mubr.f32.mxu1 %v10111_v13  ;;  %v2229_v55 = vsel %vm2220_vm6, %v6957_v19, %v6959_v42  ;;  %v2227_v44 = vsel %vm2220_vm6, %v6911_v57, %v6930_v8  ;;  %v10121_v19 = vld [vmem:[#allocation81_spill] sm:$0xff]  ;;  %v10122_v57 = vld [vmem:[#allocation72_spill] sm:$0xff]  ;;  %v10123_v8 = vld [vmem:[#allocation71_spill] sm:$0xff] }
 0x2cb   : > { %v2209_v37 = vpop.permute.xlu0 %2208  ;;  %v2211_v35 = vpop.permute.xlu1 %2210  ;;  %v2226_v42 = vsel %vm2220_vm6, %v10121_v19, %v6909_v31  ;;  %v10125_v31 = vld [vmem:[#allocation55_spill] sm:$0xff] }
 0x2cc   : > { %v2249_v33 = vsel %vm2220_vm6, %v2209_v37, %v2211_v35  ;;  %v2225_v37 = vsel %vm2220_vm6, %v6897_v26, %v10121_v19  ;;  %v10127_v26 = vld [vmem:[#allocation4_spill] sm:$0xff] }
 0x2cd   : > { %1591 = vmatmul.mubr.f32.gmra.mxu1 %v5634_v51 }
 0x2ce   : > { %1596 = vmatprep.mubr.f32.mxu1 %v10111_v13 }
 0x2cf   : > { %v2213_v1 = vpop.permute.xlu0 %2212  ;;  %v2215_v24 = vpop.permute.xlu1 %2214 }
 0x2d0   : > { %v2250_v46 = vsel %vm2220_vm6, %v2211_v35, %v2213_v1  ;;  %v2224_v35 = vsel %vm2220_vm6, %v10123_v8, %v10122_v57 }
 0x2d1   : > { %1597 = vmatmul.mubr.f32.gmra.mxu1 %v5635_v17  ;;  %v10124_v17 = vld [vmem:[#allocation3_spill] sm:$0xff] }
 0x2d2   : > { %1602 = vmatprep.mubr.f32.mxu1 %v10111_v13  ;;  %v7295_v1 = vrot.slane %v5673_v32, %v10124_v17 }
 0x2d3   : > { %v2217_v34 = vpop.permute.xlu0 %2216  ;;  %v2219_v38 = vpop.permute.xlu1 %2218 }
 0x2d4   : > { %v2252_v25 = vsel %vm2220_vm6, %v2217_v34, %v2219_v38  ;;  %v2251_v10 = vsel %vm2220_vm6, %v2215_v24, %v2217_v34  ;;  %v2223_v24 = vsel %vm2220_vm6, %v10125_v31, %v10123_v8  ;;  %v7303_v38 = vrot.slane %v5673_v32, %v10127_v26  ;;  %v10149_v8 = vld [vmem:[#allocation40_spill] sm:$0xff] }
 0x2d5   : > { %2285 = vmatprep.subr.mxu1 %v2252_v25  ;;  %1603 = vmatmul.mubr.f32.gmra.mxu1 %v5636_v52  ;;  %v10126_v52 = vld [vmem:[#allocation35_spill] sm:$0xff]  ;;  %v10128_v25 = vld [vmem:[#allocation65_spill] sm:$0xff]  ;;  %v10150_v31 = vld [vmem:[#allocation44_spill] sm:$0xff] }
 0x2d6   : > { %2286 = vmatpush1.msra.mxu1 %v2251_v10  ;;  %1608 = vmatprep.mubr.f32.mxu1 %v10111_v13  ;;  %v10129_v10 = vld [vmem:[#allocation64_spill] sm:$0xff] }
 0x2d7   : > { %v2490_v62 = vpop.permute.xlu0 %2489  ;;  %2287 = vmatprep.subr.mxu1 %v2250_v46  ;;  %v7176_v21 = vpop.permute.xlu1 %2491  ;;  %v2222_v46 = vsel %vm2220_vm6, %v10129_v10, %v10128_v25 }
 0x2d8   : > { %v7179_v49 = vmul.f32 0.0, %v2490_v62  ;;  %2288 = vmatpush1.msra.mxu1 %v2249_v33  ;;  %v7184_v0 = vsel %vm2493_vm7, %v2490_v62, %v7176_v21  ;;  %v2500_v16 = vmul.f32 %v7176_v21, %v10114_v28  ;;  %v2503_v47 = vmul.f32 %v7176_v21, %v10116_v50  ;;  %v5640_v62 = vld [vmem:[%s9834_s5 + $0x100] sm:$0xff]  ;;  %v10130_v33 = vld [vmem:[#allocation56_spill] sm:$0xff] }
 0x2d9   : > { %2289 = vmatprep.subr.mxu1 %v2248_v15  ;;  %v2499_v6 = vmul.f32 %v7184_v0, %v10113_v60  ;;  %1609 = vmatmul.mubr.f32.gmra.mxu1 %v5637_v14  ;;  %v2502_v39 = vmul.f32 %v7184_v0, %v10115_v41  ;;  %v2505_v20 = vmul.f32 %v7184_v0, %v10117_v54 }
 0x2da   : > { %2611 = vrot.lane.b32.xlu0 %v7179_v49, %s5832_s28  ;;  %2290 = vmatpush1.msra.mxu1 %v2247_v23  ;;  %v2506_v5 = vmul.f32 %v7176_v21, %v10118_v63  ;;  %v2508_v58 = vmul.f32 %v7184_v0, %v10119_v3  ;;  %v2509_v51 = vmul.f32 %v7176_v21, %v10120_v56  ;;  %v10131_v23 = vld [vmem:[#allocation66_spill] sm:$0xff] }
 0x2db   : > { %2291 = vmatprep.subr.mxu1 %v2246_v45  ;;  %2613 = vrot.lane.b32.xlu1 %v2499_v6, %s5832_s28  ;;  %v2511_v34 = vmul.f32 %v7184_v0, %v10126_v52  ;;  %v2221_v15 = vsel %vm2220_vm6, %v10130_v33, %v10129_v10  ;;  %v3009_v6 = vmul.f32 %v7295_v1, %v10131_v23  ;;  %v10132_v45 = vld [vmem:[#allocation63_spill] sm:$0xff]  ;;  %v10152_v10 = vld [vmem:[#allocation42_spill] sm:$0xff] }
 0x2dc   : > { %2292 = vmatpush1.msra.mxu1 %v2245_v36  ;;  %1614 = vmatprep.mubr.f32.mxu1 %v10111_v13  ;;  %v3008_v14 = vmul.f32 %v7303_v38, %v10132_v45  ;;  %v10133_v36 = vld [vmem:[#allocation36_spill] sm:$0xff] }
 0x2dd   : > { %2293 = vmatprep.subr.mxu1 %v2244_v30  ;;  %1615 = vmatmul.mubr.f32.gmra.mxu1 %v5638_v59  ;;  %v2512_v30 = vmul.f32 %v7176_v21, %v10133_v36 }
 0x2de   : > { %2294 = vmatpush1.msra.mxu1 %v2243_v7  ;;  %2615 = vrot.lane.b32.xlu0 %v2500_v16, %s5832_s28  ;;  %v10134_v16 = vld [vmem:[#allocation58_spill] sm:$0xff] }
 0x2df   : > { %2295 = vmatprep.subr.mxu1 %v2242_v29  ;;  %2617 = vrot.lane.b32.xlu1 %v7179_v49, %s5832_s28  ;;  %v3007_v7 = vmul.f32 %v7295_v1, %v10134_v16  ;;  %v10135_v29 = vld [vmem:[#allocation57_spill] sm:$0xff] }
 0x2e0   : > { %2296 = vmatpush1.msra.mxu1 %v2241_v12  ;;  %2349 = vmatprep.mubr.f32.mxu1 %v10111_v13  ;;  %v3006_v59 = vmul.f32 %v7303_v38, %v10135_v29  ;;  %v10136_v12 = vld [vmem:[#allocation54_spill] sm:$0xff] }
 0x2e1   : > { %2297 = vmatprep.subr.mxu1 %v2240_v22  ;;  %v3005_v22 = vmul.f32 %v7295_v1, %v10136_v12 }
 0x2e2   : > { %2298 = vmatpush1.msra.mxu1 %v2239_v53  ;;  %2619 = vrot.lane.b32.xlu0 %v2502_v39, %s5832_s28  ;;  %v10137_v39 = vld [vmem:[#allocation53_spill] sm:$0xff] }
 0x2e3   : > { %2299 = vmatprep.subr.mxu1 %v2238_v4  ;;  %2621 = vrot.lane.b32.xlu1 %v2503_v47, %s5832_s28  ;;  %v3004_v53 = vmul.f32 %v7303_v38, %v10137_v39  ;;  %v10138_v47 = vld [vmem:[#allocation37_spill] sm:$0xff] }
 0x2e4   : > { %2300 = vmatpush1.msra.mxu1 %v2237_v43  ;;  %v2514_v4 = vmul.f32 %v7184_v0, %v10138_v47  ;;  %v10139_v43 = vld [vmem:[#allocation52_spill] sm:$0xff] }
 0x2e5   : > { %2301 = vmatprep.subr.mxu1 %v2236_v11  ;;  %v3003_v11 = vmul.f32 %v7295_v1, %v10139_v43 }
 0x2e6   : > { %2302 = vmatpush1.msra.mxu1 %v2235_v61  ;;  %2623 = vrot.lane.b32.xlu0 %v7179_v49, %s5832_s28  ;;  %v10140_v61 = vld [vmem:[#allocation38_spill] sm:$0xff] }
 0x2e7   : > { %2303 = vmatprep.subr.mxu1 %v2234_v27  ;;  %2625 = vrot.lane.b32.xlu1 %v2505_v20, %s5832_s28  ;;  %v2515_v20 = vmul.f32 %v7176_v21, %v10140_v61  ;;  %v10141_v27 = vld [vmem:[#allocation51_spill] sm:$0xff] }
 0x2e8   : > { %2304 = vmatpush1.msra.mxu1 %v2233_v48  ;;  %v3002_v48 = vmul.f32 %v7303_v38, %v10141_v27 }
 0x2e9   : > { %2305 = vmatprep.subr.mxu1 %v2232_v40  ;;  %v10142_v40 = vld [vmem:[#allocation50_spill] sm:$0xff] }
 0x2ea   : > { %2306 = vmatpush1.msra.mxu1 %v2231_v2  ;;  %2627 = vrot.lane.b32.xlu0 %v2506_v5, %s5832_s28  ;;  %v3001_v5 = vmul.f32 %v7295_v1, %v10142_v40  ;;  %v10143_v2 = vld [vmem:[#allocation49_spill] sm:$0xff] }
 0x2eb   : > { %2307 = vmatprep.subr.mxu1 %v2230_v18  ;;  %2629 = vrot.lane.b32.xlu1 %v7179_v49, %s5832_s28  ;;  %v3000_v18 = vmul.f32 %v7303_v38, %v10143_v2 }
 0x2ec   : > { %2308 = vmatpush1.msra.mxu1 %v2229_v55  ;;  %v10144_v55 = vld [vmem:[#allocation48_spill] sm:$0xff] }
 0x2ed   : > { %2309 = vmatprep.subr.mxu1 %v2228_v9  ;;  %v2999_v9 = vmul.f32 %v7295_v1, %v10144_v55 }
 0x2ee   : > { %2310 = vmatpush1.msra.mxu1 %v2227_v44  ;;  %2631 = vrot.lane.b32.xlu0 %v2508_v58, %s5832_s28  ;;  %v10145_v58 = vld [vmem:[#allocation39_spill] sm:$0xff] }
 0x2ef   : > { %2311 = vmatprep.subr.mxu1 %v2226_v42  ;;  %2633 = vrot.lane.b32.xlu1 %v2509_v51, %s5832_s28  ;;  %v2517_v44 = vmul.f32 %v7184_v0, %v10145_v58  ;;  %v10146_v51 = vld [vmem:[#allocation47_spill] sm:$0xff]  ;;  %v10147_v42 = vld [vmem:[#allocation46_spill] sm:$0xff] }
 0x2f0   : > { %2312 = vmatpush1.msra.mxu1 %v2225_v37  ;;  %v2998_v19 = vmul.f32 %v7303_v38, %v10146_v51  ;;  %v2997_v32 = vmul.f32 %v7295_v1, %v10147_v42  ;;  %v10148_v37 = vld [vmem:[#allocation45_spill] sm:$0xff] }
 0x2f1   : > { %2313 = vmatprep.subr.mxu1 %v2224_v35  ;;  %v2996_v57 = vmul.f32 %v7303_v38, %v10148_v37  ;;  %v2518_v35 = vmul.f32 %v7176_v21, %v10149_v8 }
 0x2f2   : > { %2314 = vmatpush1.msra.mxu1 %v2223_v24  ;;  %2635 = vrot.lane.b32.xlu0 %v7179_v49, %s5832_s28  ;;  %v2995_v24 = vmul.f32 %v7295_v1, %v10150_v31 }
 0x2f3   : > { %2315 = vmatprep.subr.mxu1 %v2222_v46  ;;  %2637 = vrot.lane.b32.xlu1 %v2511_v34, %s5832_s28  ;;  %v10151_v34 = vld [vmem:[#allocation43_spill] sm:$0xff]  ;;  %v2993_v46 = vmul.f32 %v7295_v1, %v10152_v10 }
 0x2f4   : > { %2316 = vmatpush1.msra.mxu1 %v2221_v15  ;;  %v2994_v25 = vmul.f32 %v7303_v38, %v10151_v34 }
 0x2f5   : > { %3027 = vmatprep.subr.mxu1 %v3009_v6  ;;  %2350 = vmatmul.mubr.f32.vlgmr.msra.gmra.mxu1 %v5640_v62  ;;  %v10153_v62 = vld [vmem:[#allocation41_spill] sm:$0xff]  ;;  %v2991_v6 = vmul.f32 %v7295_v1, %v10149_v8 }
 0x2f6   : > { %3028 = vmatpush1.msra.mxu1 %v3008_v14  ;;  %2639 = vrot.lane.b32.xlu0 %v2512_v30, %s5832_s28  ;;  %v2992_v33 = vmul.f32 %v7303_v38, %v10153_v62  ;;  %v2520_v15 = vmul.f32 %v7184_v0, %v10153_v62  ;;  %v2521_v14 = vmul.f32 %v7176_v21, %v10152_v10 }
 0x2f7   : > { %3029 = vmatprep.subr.mxu1 %v3007_v7  ;;  %2641 = vrot.lane.b32.xlu1 %v7179_v49, %s5832_s28  ;;  %v2990_v30 = vmul.f32 %v7303_v38, %v10145_v58  ;;  %v2989_v7 = vmul.f32 %v7295_v1, %v10140_v61 }
 0x2f8   : > { %3030 = vmatpush1.msra.mxu1 %v3006_v59  ;;  %2355 = vmatprep.mubr.f32.mxu1 %v10111_v13  ;;  %v2988_v59 = vmul.f32 %v7303_v38, %v10138_v47 }
 0x2f9   : > { %3031 = vmatprep.subr.mxu1 %v3005_v22  ;;  %v2987_v22 = vmul.f32 %v7295_v1, %v10133_v36 }
 0x2fa   : > { %3032 = vmatpush1.msra.mxu1 %v3004_v53  ;;  %2643 = vrot.lane.b32.xlu0 %v2514_v4, %s5832_s28  ;;  %v2523_v53 = vmul.f32 %v7184_v0, %v10151_v34  ;;  %v2986_v4 = vmul.f32 %v7303_v38, %v10126_v52 }
 0x2fb   : > { %3033 = vmatprep.subr.mxu1 %v3003_v11  ;;  %2645 = vrot.lane.b32.xlu1 %v2515_v20, %s5832_s28  ;;  %v2985_v11 = vmul.f32 %v7295_v1, %v10120_v56  ;;  %v2984_v20 = vmul.f32 %v7303_v38, %v10119_v3 }
 0x2fc   : > { %3034 = vmatpush1.msra.mxu1 %v3002_v48  ;;  %v2524_v48 = vmul.f32 %v7176_v21, %v10150_v31 }
 0x2fd   : > { %3035 = vmatprep.subr.mxu1 %v3001_v5  ;;  %v2983_v5 = vmul.f32 %v7295_v1, %v10118_v63 }
 0x2fe   : > { %3036 = vmatpush1.msra.mxu1 %v3000_v18  ;;  %2647 = vrot.lane.b32.xlu0 %v7179_v49, %s5832_s28  ;;  %v2982_v18 = vmul.f32 %v7303_v38, %v10117_v54 }
 0x2ff   : > { %3037 = vmatprep.subr.mxu1 %v2999_v9  ;;  %2649 = vrot.lane.b32.xlu1 %v2517_v44, %s5832_s28  ;;  %v2981_v9 = vmul.f32 %v7295_v1, %v10116_v50  ;;  %v2980_v44 = vmul.f32 %v7303_v38, %v10115_v41 }
 0x300   : > { %3038 = vmatpush1.msra.mxu1 %v2998_v19  ;;  %v2526_v19 = vmul.f32 %v7184_v0, %v10148_v37 }
 0x301   : > { %3039 = vmatprep.subr.mxu1 %v2997_v32  ;;  %v2979_v32 = vmul.f32 %v7295_v1, %v10114_v28  ;;  %v2530_v1 = vmul.f32 %v7176_v21, %v10144_v55 }
 0x302   : > { %3040 = vmatpush1.msra.mxu1 %v2996_v57  ;;  %2651 = vrot.lane.b32.xlu0 %v2518_v35, %s5832_s28  ;;  %v2527_v57 = vmul.f32 %v7176_v21, %v10147_v42  ;;  %v2978_v35 = vmul.f32 %v7303_v38, %v10113_v60  ;;  %v2532_v38 = vmul.f32 %v7184_v0, %v10143_v2 }
 0x303   : > { %3041 = vmatprep.subr.mxu1 %v2995_v24  ;;  %2653 = vrot.lane.b32.xlu1 %v7179_v49, %s5832_s28  ;;  %v2529_v24 = vmul.f32 %v7184_v0, %v10146_v51 }
 0x304   : > { %3042 = vmatpush1.msra.mxu1 %v2994_v25  ;;  %v2533_v25 = vmul.f32 %v7176_v21, %v10142_v40 }
 0x305   : > { %3043 = vmatprep.subr.mxu1 %v2993_v46  ;;  %v2535_v46 = vmul.f32 %v7184_v0, %v10141_v27 }
 0x306   : > { %3044 = vmatpush1.msra.mxu1 %v2992_v33  ;;  %2655 = vrot.lane.b32.xlu0 %v2520_v15, %s5832_s28  ;;  %v2536_v33 = vmul.f32 %v7176_v21, %v10139_v43  ;;  %v2538_v15 = vmul.f32 %v7184_v0, %v10137_v39 }
 0x307   : > { %3045 = vmatprep.subr.mxu1 %v2991_v6  ;;  %2657 = vrot.lane.b32.xlu1 %v2521_v14, %s5832_s28  ;;  %v2539_v6 = vmul.f32 %v7176_v21, %v10136_v12  ;;  %v1150_v14 = vld [vmem:[%s9834_s5] sm:$0xff] }
 0x308   : > { %3046 = vmatpush1.msra.mxu1 %v2990_v30  ;;  %1895 = vmatmul.mubr.f32.vlgmr.msra.gmra.mxu0 %v1150_v14  ;;  %v2541_v30 = vmul.f32 %v7184_v0, %v10135_v29 }
 0x309   : > { %3047 = vmatprep.subr.mxu1 %v2989_v7  ;;  %1900 = vmatprep.mubr.f32.mxu0 %v10111_v13  ;;  %v2542_v7 = vmul.f32 %v7176_v21, %v10134_v16 }
 0x30a   : > { %3048 = vmatpush1.msra.mxu1 %v2988_v59  ;;  %2659 = vrot.lane.b32.xlu0 %v7179_v49, %s5832_s28  ;;  %v5690_v59 = vld [vmem:[%s9837_s8 + $0xa] sm:$0x3] }
 0x30b   : > { %3049 = vmatprep.subr.mxu1 %v2987_v22  ;;  %2661 = vrot.lane.b32.xlu1 %v2523_v53, %s5832_s28  ;;  %v2544_v22 = vmul.f32 %v7184_v0, %v10132_v45  ;;  %v2545_v53 = vmul.f32 %v7176_v21, %v10131_v23 }
 0x30c   : > { %3050 = vmatpush1.msra.mxu1 %v2986_v4  ;;  %v3274_v4 = vrot.slane %v5690_v59, %v10127_v26 }
 0x30d   : > { %3051 = vmatprep.subr.mxu1 %v2985_v11  ;;  %v3278_v11 = vrot.slane %v5690_v59, %v10124_v17 }
 0x30e   : > { %3052 = vmatpush1.msra.mxu1 %v2984_v20  ;;  %2663 = vrot.lane.b32.xlu0 %v2524_v48, %s5832_s28 }
 0x30f   : > { %3053 = vmatprep.subr.mxu1 %v2983_v5  ;;  %2665 = vrot.lane.b32.xlu1 %v7179_v49, %s5832_s28 }
 0x310   : > { %3054 = vmatpush1.msra.mxu1 %v2982_v18 }
 0x311   : > { %3055 = vmatprep.subr.mxu1 %v2981_v9 }
 0x312   : > { %3056 = vmatpush1.msra.mxu1 %v2980_v44  ;;  %2667 = vrot.lane.b32.xlu0 %v2526_v19, %s5832_s28 }
 0x313   : > { %3057 = vmatprep.subr.mxu1 %v2979_v32  ;;  %2669 = vrot.lane.b32.xlu1 %v2527_v57, %s5832_s28 }
 0x314   : > { %3058 = vmatpush1.msra.mxu1 %v2978_v35 }
 0x316   : > { %2671 = vrot.lane.b32.xlu0 %v7179_v49, %s5832_s28 }
 0x317   : > { %2673 = vrot.lane.b32.xlu1 %v2529_v24, %s5832_s28 }
 0x31a   : > { %2675 = vrot.lane.b32.xlu0 %v2530_v1, %s5832_s28 }
 0x31b   : > { %2677 = vrot.lane.b32.xlu1 %v7179_v49, %s5832_s28 }
 0x31e   : > { %2679 = vrot.lane.b32.xlu0 %v2532_v38, %s5832_s28 }
 0x31f   : > { %2681 = vrot.lane.b32.xlu1 %v2533_v25, %s5832_s28 }
 0x322   : > { %2683 = vrot.lane.b32.xlu0 %v7179_v49, %s5832_s28 }
 0x323   : > { %2685 = vrot.lane.b32.xlu1 %v2535_v46, %s5832_s28 }
 0x326   : > { %2687 = vrot.lane.b32.xlu0 %v2536_v33, %s5832_s28 }
 0x327   : > { %2689 = vrot.lane.b32.xlu1 %v7179_v49, %s5832_s28 }
 0x32a   : > { %2691 = vrot.lane.b32.xlu0 %v2538_v15, %s5832_s28 }
 0x32b   : > { %2693 = vrot.lane.b32.xlu1 %v2539_v6, %s5832_s28 }
 0x32e   : > { %2695 = vrot.lane.b32.xlu0 %v7179_v49, %s5832_s28 }
 0x32f   : > { %2697 = vrot.lane.b32.xlu1 %v2541_v30, %s5832_s28 }
 0x332   : > { %2699 = vrot.lane.b32.xlu0 %v2542_v7, %s5832_s28 }
 0x333   : > { %2701 = vrot.lane.b32.xlu1 %v7179_v49, %s5832_s28 }
 0x336   : > { %2703 = vrot.lane.b32.xlu0 %v2544_v22, %s5832_s28 }
 0x337   : > { %2705 = vrot.lane.b32.xlu1 %v2545_v53, %s5832_s28 }
 0x33a   : > { %3279 = vrot.lane.b32.xlu0 %v3274_v4, %s5832_s28 }
 0x33b   : > { %3281 = vrot.lane.b32.xlu1 %v3278_v11, %s5832_s28 }
 0x34c   : > { %v7484_v49 = vpop.permute.xlu0 %2611 }
 0x34d   : > { %10154 = vst [vmem:[#allocation13_spill] sm:$0xff] %v7484_v49  ;;  %v7486_v20 = vpop.permute.xlu1 %2613 }
 0x34e   : > { %10155 = vst [vmem:[#allocation26_spill] sm:$0xff] %v7486_v20 }
 0x350   : > { %v7488_v0 = vpop.permute.xlu0 %2615 }
 0x351   : > { %v7490_v48 = vpop.permute.xlu1 %2617 }
 0x354   : > { %v7492_v21 = vpop.permute.xlu0 %2619 }
 0x355   : > { %v7494_v5 = vpop.permute.xlu1 %2621 }
 0x358   : > { %v7496_v18 = vpop.permute.xlu0 %2623 }
 0x359   : > { %v7498_v9 = vpop.permute.xlu1 %2625 }
 0x35c   : > { %v7500_v44 = vpop.permute.xlu0 %2627 }
 0x35d   : > { %v7502_v19 = vpop.permute.xlu1 %2629 }
 0x360   : > { %v7504_v32 = vpop.permute.xlu0 %2631 }
 0x361   : > { %v7506_v57 = vpop.permute.xlu1 %2633 }
 0x364   : > { %v7508_v35 = vpop.permute.xlu0 %2635 }
 0x365   : > { %v7510_v24 = vpop.permute.xlu1 %2637 }
 0x368   : > { %v7512_v1 = vpop.permute.xlu0 %2639 }
 0x369   : > { %v7514_v38 = vpop.permute.xlu1 %2641 }
 0x36c   : > { %v7516_v25 = vpop.permute.xlu0 %2643 }
 0x36d   : > { %v7518_v46 = vpop.permute.xlu1 %2645 }
 0x370   : > { %v7520_v33 = vpop.permute.xlu0 %2647 }
 0x371   : > { %v7522_v15 = vpop.permute.xlu1 %2649 }
 0x374   : > { %v7524_v6 = vpop.permute.xlu0 %2651 }
 0x375   : > { %v7526_v14 = vpop.permute.xlu1 %2653 }
 0x378   : > { %v7528_v30 = vpop.permute.xlu0 %2655 }
 0x379   : > { %v7530_v7 = vpop.permute.xlu1 %2657 }
 0x37c   : > { %v7532_v59 = vpop.permute.xlu0 %2659 }
 0x37d   : > { %v7534_v22 = vpop.permute.xlu1 %2661 }
 0x380   : > { %v7536_v53 = vpop.permute.xlu0 %2663 }
 0x381   : > { %v2666_v4 = vpop.permute.xlu1 %2665 }
 0x384   : > { %v2668_v11 = vpop.permute.xlu0 %2667 }
 0x385   : > { %v2670_v45 = vpop.permute.xlu1 %2669 }
 0x388   : > { %v2672_v23 = vpop.permute.xlu0 %2671 }
 0x389   : > { %v2674_v16 = vpop.permute.xlu1 %2673 }
 0x38c   : > { %v2676_v29 = vpop.permute.xlu0 %2675 }
 0x38d   : > { %v2678_v12 = vpop.permute.xlu1 %2677 }
 0x390   : > { %v2680_v39 = vpop.permute.xlu0 %2679 }
 0x391   : > { %v2682_v43 = vpop.permute.xlu1 %2681 }
 0x394   : > { %v2684_v27 = vpop.permute.xlu0 %2683 }
 0x395   : > { %v2686_v40 = vpop.permute.xlu1 %2685 }
 0x398   : > { %v2688_v2 = vpop.permute.xlu0 %2687 }
 0x399   : > { %v2690_v55 = vpop.permute.xlu1 %2689 }
 0x39c   : > { %v2692_v51 = vpop.permute.xlu0 %2691 }
 0x39d   : > { %v2694_v17 = vpop.permute.xlu1 %2693 }
 0x3a0   : > { %v2696_v26 = vpop.permute.xlu0 %2695 }
 0x3a1   : > { %v2698_v42 = vpop.permute.xlu1 %2697 }
 0x3a2   : > { %v2736_v47 = vsel %vm2707_vm8, %v2696_v26, %v2698_v42 }
 0x3a4   : > { %v2700_v37 = vpop.permute.xlu0 %2699 }
 0x3a5   : > { %v2702_v31 = vpop.permute.xlu1 %2701  ;;  %v2737_v61 = vsel %vm2707_vm8, %v2698_v42, %v2700_v37  ;;  %v2733_v42 = vsel %vm2707_vm8, %v2686_v40, %v2688_v2  ;;  %v2729_v2 = vsel %vm2707_vm8, %v2674_v16, %v2676_v29  ;;  %v2725_v29 = vsel %vm2707_vm8, %v7534_v22, %v7536_v53 }
 0x3a6   : > { %v2721_v37 = vsel %vm2707_vm8, %v7522_v15, %v7524_v6 }
 0x3a8   : > { %v2704_v34 = vpop.permute.xlu0 %2703 }
 0x3a9   : > { %v2706_v10 = vpop.permute.xlu1 %2705  ;;  %v2738_v8 = vsel %vm2707_vm8, %v2702_v31, %v2704_v34 }
 0x3aa   : > { %v2739_v62 = vsel %vm2707_vm8, %v2704_v34, %v2706_v10  ;;  %v2735_v10 = vsel %vm2707_vm8, %v2692_v51, %v2694_v17  ;;  %v2730_v17 = vsel %vm2707_vm8, %v2678_v12, %v2680_v39  ;;  %v2726_v12 = vsel %vm2707_vm8, %v2666_v4, %v2668_v11  ;;  %v10162_v4 = vld [vmem:[#allocation40_spill] sm:$0xff] }
 0x3ab   : > { %2772 = vmatprep.subr.mxu0 %v2739_v62  ;;  %v2719_v34 = vsel %vm2707_vm8, %v7516_v25, %v7518_v46  ;;  %v2718_v62 = vsel %vm2707_vm8, %v7514_v38, %v7516_v25  ;;  %v2716_v46 = vsel %vm2707_vm8, %v7508_v35, %v7510_v24  ;;  %v2715_v38 = vsel %vm2707_vm8, %v7504_v32, %v7506_v57  ;;  %v1151_v25 = vld [vmem:[%s9834_s5 + $0x8] sm:$0xff] }
 0x3ac   : > { %v7540_v58 = vpop.permute.xlu0 %3279  ;;  %2773 = vmatpush1.msra.mxu0 %v2738_v8  ;;  %v2720_v8 = vsel %vm2707_vm8, %v7520_v33, %v7522_v15  ;;  %v2717_v33 = vsel %vm2707_vm8, %v7510_v24, %v7512_v1  ;;  %v2714_v1 = vsel %vm2707_vm8, %v7502_v19, %v7504_v32  ;;  %v2713_v35 = vsel %vm2707_vm8, %v7498_v9, %v7500_v44 }
 0x3ad   : > { %2774 = vmatprep.subr.mxu0 %v2737_v61  ;;  %v3282_v13 = vpop.permute.xlu1 %3281  ;;  %v3287_v49 = vmul.f32 %v7540_v58, %v10113_v60  ;;  %v2734_v61 = vsel %vm2707_vm8, %v2690_v55, %v2692_v51  ;;  %v3290_v55 = vmul.f32 %v7540_v58, %v10115_v41  ;;  %v2712_v57 = vsel %vm2707_vm8, %v7496_v18, %v7498_v9  ;;  %v10156_v18 = vld [vmem:[#allocation26_spill] sm:$0xff] }
 0x3ae   : > { %v7548_v20 = vsel %vm2707_vm8, %v7540_v58, %v3282_v13  ;;  %2775 = vmatpush1.msra.mxu0 %v2736_v47  ;;  %v7551_v31 = vmul.f32 0.0, %v3282_v13  ;;  %v2732_v47 = vsel %vm2707_vm8, %v2684_v27, %v2686_v40  ;;  %v2731_v13 = vsel %vm2707_vm8, %v2680_v39, %v2682_v43 }
 0x3af   : > { %3400 = vrot.lane.b32.xlu0 %v3287_v49, %s5831_s15  ;;  %2776 = vmatprep.subr.mxu0 %v2735_v10  ;;  %v3288_v26 = vmul.f32 %v7548_v20, %v10114_v28  ;;  %v2728_v27 = vsel %vm2707_vm8, %v2672_v23, %v2674_v16  ;;  %v3291_v43 = vmul.f32 %v7548_v20, %v10116_v50  ;;  %v1154_v10 = vld [vmem:[%s9834_s5 + $0x20] sm:$0xff] }
 0x3b0   : > { %2777 = vmatpush1.msra.mxu0 %v2734_v61  ;;  %v2727_v40 = vsel %vm2707_vm8, %v2668_v11, %v2670_v45  ;;  %v2724_v23 = vsel %vm2707_vm8, %v7532_v59, %v7534_v22  ;;  %v3293_v45 = vmul.f32 %v7540_v58, %v10117_v54  ;;  %v2723_v16 = vsel %vm2707_vm8, %v7528_v30, %v7530_v7  ;;  %v1153_v59 = vld [vmem:[%s9834_s5 + $0x18] sm:$0xff]  ;;  %v10161_v22 = vld [vmem:[#allocation39_spill] sm:$0xff]  ;;  %v10163_v61 = vld [vmem:[#allocation41_spill] sm:$0xff] }
 0x3b1   : > { %2778 = vmatprep.subr.mxu0 %v2733_v42  ;;  %3402 = vrot.lane.b32.xlu1 %v3288_v26, %s5831_s15  ;;  %v2722_v39 = vsel %vm2707_vm8, %v7526_v14, %v7528_v30  ;;  %v3294_v51 = vmul.f32 %v7548_v20, %v10118_v63  ;;  %v3296_v49 = vmul.f32 %v7540_v58, %v10119_v3  ;;  %v1152_v14 = vld [vmem:[%s9834_s5 + $0x10] sm:$0xff]  ;;  %v10160_v30 = vld [vmem:[#allocation38_spill] sm:$0xff]  ;;  %v1155_v42 = vld [vmem:[%s9834_s5 + $0x28] sm:$0xff] }
 0x3b2   : > { %2779 = vmatpush1.msra.mxu0 %v2732_v47  ;;  %v3297_v15 = vmul.f32 %v7548_v20, %v10120_v56  ;;  %v3299_v24 = vmul.f32 %v7540_v58, %v10126_v52  ;;  %v2711_v19 = vsel %vm2707_vm8, %v7492_v21, %v7494_v5  ;;  %v2710_v44 = vsel %vm2707_vm8, %v7490_v48, %v7492_v21  ;;  %v10157_v5 = vld [vmem:[#allocation13_spill] sm:$0xff]  ;;  %v10164_v47 = vld [vmem:[#allocation42_spill] sm:$0xff] }
 0x3b3   : > { %2780 = vmatprep.subr.mxu0 %v2731_v13  ;;  %3404 = vrot.lane.b32.xlu0 %v7551_v31, %s5831_s15  ;;  %v3300_v32 = vmul.f32 %v7548_v20, %v10133_v36  ;;  %v2709_v9 = vsel %vm2707_vm8, %v10156_v18, %v7488_v0  ;;  %v2708_v6 = vsel %vm2707_vm8, %v10157_v5, %v10156_v18  ;;  %v10158_v48 = vld [vmem:[#allocation37_spill] sm:$0xff]  ;;  %v10159_v0 = vmov 0.0   ;;  %v10175_v18 = vld [vmem:[#allocation51_spill] sm:$0xff] }
 0x3b4   : > { %2781 = vmatpush1.msra.mxu0 %v2730_v17  ;;  %v3302_v21 = vmul.f32 %v7540_v58, %v10158_v48  ;;  %v3303_v7 = vmul.f32 %v7548_v20, %v10160_v30  ;;  %v3305_v53 = vmul.f32 %v7540_v58, %v10161_v22  ;;  %v3306_v11 = vmul.f32 %v7548_v20, %v10162_v4  ;;  %v1156_v17 = vld [vmem:[%s9834_s5 + $0x30] sm:$0xff] }
 0x3b5   : > { %2782 = vmatprep.subr.mxu0 %v2729_v2  ;;  %3406 = vrot.lane.b32.xlu1 %v3290_v55, %s5831_s15  ;;  %v3308_v26 = vmul.f32 %v7540_v58, %v10163_v61  ;;  %v3309_v13 = vmul.f32 %v7548_v20, %v10164_v47  ;;  %v10165_v55 = vld [vmem:[#allocation43_spill] sm:$0xff]  ;;  %v5654_v36 = vld [vmem:[%s9834_s5 + $0x170] sm:$0xff] }
 0x3b6   : > { %2783 = vmatpush1.msra.mxu0 %v2728_v27  ;;  %v3311_v2 = vmul.f32 %v7540_v58, %v10165_v55  ;;  %v10166_v27 = vld [vmem:[#allocation44_spill] sm:$0xff] }
 0x3b7   : > { %2784 = vmatprep.subr.mxu0 %v2727_v40  ;;  %3408 = vrot.lane.b32.xlu0 %v3291_v43, %s5831_s15  ;;  %v3312_v43 = vmul.f32 %v7548_v20, %v10166_v27  ;;  %v1157_v40 = vld [vmem:[%s9834_s5 + $0x38] sm:$0xff] }
 0x3b8   : > { %2785 = vmatpush1.msra.mxu0 %v2726_v12  ;;  %v5707_v12 = vld [vmem:[%s9837_s8 + $0xc] sm:$0x3] }
 0x3b9   : > { %2786 = vmatprep.subr.mxu0 %v2725_v29  ;;  %3410 = vrot.lane.b32.xlu1 %v7551_v31, %s5831_s15  ;;  %v10167_v29 = vld [vmem:[#allocation45_spill] sm:$0xff] }
 0x3ba   : > { %2787 = vmatpush1.msra.mxu0 %v2724_v23  ;;  %v3314_v23 = vmul.f32 %v7540_v58, %v10167_v29 }
 0x3bb   : > { %2788 = vmatprep.subr.mxu0 %v2723_v16  ;;  %3412 = vrot.lane.b32.xlu0 %v3293_v45, %s5831_s15  ;;  %v1158_v45 = vld [vmem:[%s9834_s5 + $0x40] sm:$0xff]  ;;  %v10168_v16 = vld [vmem:[#allocation46_spill] sm:$0xff] }
 0x3bc   : > { %2789 = vmatpush1.msra.mxu0 %v2722_v39  ;;  %v3315_v39 = vmul.f32 %v7548_v20, %v10168_v16 }
 0x3bd   : > { %2790 = vmatprep.subr.mxu0 %v2721_v37  ;;  %3414 = vrot.lane.b32.xlu1 %v3294_v51, %s5831_s15  ;;  %v10169_v51 = vld [vmem:[#allocation4_spill] sm:$0xff] }
 0x3be   : > { %2791 = vmatpush1.msra.mxu0 %v2720_v8  ;;  %v3759_v37 = vrot.slane %v5707_v12, %v10169_v51  ;;  %v10170_v8 = vld [vmem:[#allocation3_spill] sm:$0xff] }
 0x3bf   : > { %2792 = vmatprep.subr.mxu0 %v2719_v34  ;;  %3416 = vrot.lane.b32.xlu0 %v7551_v31, %s5831_s15  ;;  %v3763_v34 = vrot.slane %v5707_v12, %v10170_v8 }
 0x3c0   : > { %2793 = vmatpush1.msra.mxu0 %v2718_v62  ;;  %v1159_v62 = vld [vmem:[%s9834_s5 + $0x48] sm:$0xff] }
 0x3c1   : > { %2794 = vmatprep.subr.mxu0 %v2717_v33  ;;  %3418 = vrot.lane.b32.xlu1 %v3296_v49, %s5831_s15  ;;  %v1160_v49 = vld [vmem:[%s9834_s5 + $0x50] sm:$0xff]  ;;  %v10171_v33 = vld [vmem:[#allocation47_spill] sm:$0xff] }
 0x3c2   : > { %2795 = vmatpush1.msra.mxu0 %v2716_v46  ;;  %v3317_v46 = vmul.f32 %v7540_v58, %v10171_v33 }
 0x3c3   : > { %2796 = vmatprep.subr.mxu0 %v2715_v38  ;;  %3420 = vrot.lane.b32.xlu0 %v3297_v15, %s5831_s15  ;;  %v10172_v15 = vld [vmem:[#allocation48_spill] sm:$0xff] }
 0x3c4   : > { %2797 = vmatpush1.msra.mxu0 %v2714_v1  ;;  %v3318_v38 = vmul.f32 %v7548_v20, %v10172_v15  ;;  %v1161_v1 = vld [vmem:[%s9834_s5 + $0x58] sm:$0xff] }
 0x3c5   : > { %2798 = vmatprep.subr.mxu0 %v2713_v35  ;;  %3422 = vrot.lane.b32.xlu1 %v7551_v31, %s5831_s15  ;;  %v10173_v35 = vld [vmem:[#allocation49_spill] sm:$0xff] }
 0x3c6   : > { %2799 = vmatpush1.msra.mxu0 %v2712_v57  ;;  %v3320_v57 = vmul.f32 %v7540_v58, %v10173_v35 }
 0x3c7   : > { %2800 = vmatprep.subr.mxu0 %v2711_v19  ;;  %3424 = vrot.lane.b32.xlu0 %v3299_v24, %s5831_s15  ;;  %v1162_v24 = vld [vmem:[%s9834_s5 + $0x60] sm:$0xff]  ;;  %v10174_v19 = vld [vmem:[#allocation50_spill] sm:$0xff] }
 0x3c8   : > { %2801 = vmatpush1.msra.mxu0 %v2710_v44  ;;  %v3321_v44 = vmul.f32 %v7548_v20, %v10174_v19 }
 0x3c9   : > { %2802 = vmatprep.subr.mxu0 %v2709_v9  ;;  %3426 = vrot.lane.b32.xlu1 %v3300_v32, %s5831_s15  ;;  %v1163_v32 = vld [vmem:[%s9834_s5 + $0x68] sm:$0xff]  ;;  %v3323_v9 = vmul.f32 %v7540_v58, %v10175_v18 }
 0x3ca   : > { %2803 = vmatpush1.msra.mxu0 %v2708_v6  ;;  %v1164_v6 = vld [vmem:[%s9834_s5 + $0x70] sm:$0xff] }
 0x3cb   : > { %3428 = vrot.lane.b32.xlu0 %v7551_v31, %s5831_s15  ;;  %1901 = vmatmul.mubr.f32.gmra.mxu0 %v1151_v25  ;;  %v10176_v25 = vld [vmem:[#allocation52_spill] sm:$0xff] }
 0x3cc   : > { %1906 = vmatprep.mubr.f32.mxu0 %v10159_v0  ;;  %v3324_v5 = vmul.f32 %v7548_v20, %v10176_v25 }
 0x3cd   : > { %3430 = vrot.lane.b32.xlu1 %v3302_v21, %s5831_s15  ;;  %v10177_v21 = vld [vmem:[#allocation53_spill] sm:$0xff] }
 0x3cf   : > { %3432 = vrot.lane.b32.xlu0 %v3303_v7, %s5831_s15  ;;  %1907 = vmatmul.mubr.f32.gmra.mxu0 %v1152_v14  ;;  %v3326_v14 = vmul.f32 %v7540_v58, %v10177_v21  ;;  %v1165_v7 = vld [vmem:[%s9834_s5 + $0x78] sm:$0xff] }
 0x3d0   : > { %1912 = vmatprep.mubr.f32.mxu0 %v10159_v0 }
 0x3d1   : > { %3434 = vrot.lane.b32.xlu1 %v7551_v31, %s5831_s15 }
 0x3d3   : > { %3436 = vrot.lane.b32.xlu0 %v3305_v53, %s5831_s15  ;;  %1913 = vmatmul.mubr.f32.gmra.mxu0 %v1153_v59  ;;  %v10178_v59 = vld [vmem:[#allocation54_spill] sm:$0xff] }
 0x3d4   : > { %1918 = vmatprep.mubr.f32.mxu0 %v10159_v0  ;;  %v3327_v53 = vmul.f32 %v7548_v20, %v10178_v59 }
 0x3d5   : > { %3438 = vrot.lane.b32.xlu1 %v3306_v11, %s5831_s15  ;;  %v5657_v11 = vld [vmem:[%s9834_s5 + $0x180] sm:$0xff] }
 0x3d7   : > { %3440 = vrot.lane.b32.xlu0 %v7551_v31, %s5831_s15  ;;  %1919 = vmatmul.mubr.f32.gmra.mxu0 %v1154_v10  ;;  %v10179_v10 = vld [vmem:[#allocation57_spill] sm:$0xff] }
 0x3d8   : > { %1924 = vmatprep.mubr.f32.mxu0 %v10159_v0 }
 0x3d9   : > { %3442 = vrot.lane.b32.xlu1 %v3308_v26, %s5831_s15  ;;  %v3329_v26 = vmul.f32 %v7540_v58, %v10179_v10 }
 0x3db   : > { %3444 = vrot.lane.b32.xlu0 %v3309_v13, %s5831_s15  ;;  %1925 = vmatmul.mubr.f32.gmra.mxu0 %v1155_v42  ;;  %v10180_v42 = vld [vmem:[#allocation58_spill] sm:$0xff] }
 0x3dc   : > { %1930 = vmatprep.mubr.f32.mxu0 %v10159_v0  ;;  %v3330_v13 = vmul.f32 %v7548_v20, %v10180_v42 }
 0x3dd   : > { %3446 = vrot.lane.b32.xlu1 %v7551_v31, %s5831_s15 }
 0x3df   : > { %3448 = vrot.lane.b32.xlu0 %v3311_v2, %s5831_s15  ;;  %1931 = vmatmul.mubr.f32.gmra.mxu0 %v1156_v17  ;;  %v10181_v17 = vld [vmem:[#allocation66_spill] sm:$0xff] }
 0x3e0   : > { %1936 = vmatprep.mubr.f32.mxu0 %v10159_v0  ;;  %v3333_v2 = vmul.f32 %v7548_v20, %v10181_v17 }
 0x3e1   : > { %3450 = vrot.lane.b32.xlu1 %v3312_v43, %s5831_s15  ;;  %v5724_v43 = vld [vmem:[%s9837_s8 + $0xe] sm:$0x3] }
 0x3e3   : > { %3452 = vrot.lane.b32.xlu0 %v7551_v31, %s5831_s15  ;;  %1937 = vmatmul.mubr.f32.gmra.mxu0 %v1157_v40  ;;  %v10182_v40 = vld [vmem:[#allocation63_spill] sm:$0xff] }
 0x3e4   : > { %1942 = vmatprep.mubr.f32.mxu0 %v10159_v0  ;;  %v3332_v12 = vmul.f32 %v7540_v58, %v10182_v40  ;;  %v5641_v58 = vld [vmem:[%s9834_s5 + $0x108] sm:$0xff] }
 0x3e5   : > { %3454 = vrot.lane.b32.xlu1 %v3314_v23, %s5831_s15  ;;  %v4244_v23 = vrot.slane %v5724_v43, %v10169_v51  ;;  %2356 = vmatmul.mubr.f32.gmra.mxu1 %v5641_v58  ;;  %v5649_v58 = vld [vmem:[%s9834_s5 + $0x148] sm:$0xff] }
 0x3e6   : > { %2361 = vmatprep.mubr.f32.mxu1 %v10159_v0 }
 0x3e7   : > { %3456 = vrot.lane.b32.xlu0 %v3315_v39, %s5831_s15  ;;  %1943 = vmatmul.mubr.f32.gmra.mxu0 %v1158_v45  ;;  %v4248_v45 = vrot.slane %v5724_v43, %v10170_v8  ;;  %v5648_v43 = vld [vmem:[%s9834_s5 + $0x140] sm:$0xff] }
 0x3e8   : > { %1948 = vmatprep.mubr.f32.mxu0 %v10159_v0 }
 0x3e9   : > { %3764 = vrot.lane.b32.xlu1 %v3759_v37, %s5830_s12 }
 0x3eb   : > { %3766 = vrot.lane.b32.xlu0 %v3763_v34, %s5830_s12  ;;  %1949 = vmatmul.mubr.f32.gmra.mxu0 %v1159_v62  ;;  %v5642_v62 = vld [vmem:[%s9834_s5 + $0x110] sm:$0xff] }
 0x3ec   : > { %1954 = vmatprep.mubr.f32.mxu0 %v10159_v0  ;;  %2362 = vmatmul.mubr.f32.gmra.mxu1 %v5642_v62 }
 0x3ed   : > { %3458 = vrot.lane.b32.xlu1 %v7551_v31, %s5831_s15  ;;  %2367 = vmatprep.mubr.f32.mxu1 %v10159_v0 }
 0x3ef   : > { %3460 = vrot.lane.b32.xlu0 %v3317_v46, %s5831_s15  ;;  %1955 = vmatmul.mubr.f32.gmra.mxu0 %v1160_v49 }
 0x3f0   : > { %1960 = vmatprep.mubr.f32.mxu0 %v10159_v0 }
 0x3f1   : > { %3462 = vrot.lane.b32.xlu1 %v3318_v38, %s5831_s15  ;;  %v5643_v38 = vld [vmem:[%s9834_s5 + $0x118] sm:$0xff] }
 0x3f2   : > { %2368 = vmatmul.mubr.f32.gmra.mxu1 %v5643_v38 }
 0x3f3   : > { %3464 = vrot.lane.b32.xlu0 %v7551_v31, %s5831_s15  ;;  %1961 = vmatmul.mubr.f32.gmra.mxu0 %v1161_v1 }
 0x3f4   : > { %1966 = vmatprep.mubr.f32.mxu0 %v10159_v0  ;;  %2373 = vmatprep.mubr.f32.mxu1 %v10159_v0 }
 0x3f5   : > { %3466 = vrot.lane.b32.xlu1 %v3320_v57, %s5831_s15 }
 0x3f7   : > { %3468 = vrot.lane.b32.xlu0 %v3321_v44, %s5831_s15  ;;  %1967 = vmatmul.mubr.f32.gmra.mxu0 %v1162_v24  ;;  %v5644_v24 = vld [vmem:[%s9834_s5 + $0x120] sm:$0xff] }
 0x3f8   : > { %1972 = vmatprep.mubr.f32.mxu0 %v10159_v0  ;;  %2374 = vmatmul.mubr.f32.gmra.mxu1 %v5644_v24  ;;  %v5660_v24 = vld [vmem:[%s9834_s5 + $0x198] sm:$0xff] }
 0x3f9   : > { %3470 = vrot.lane.b32.xlu1 %v7551_v31, %s5831_s15  ;;  %2379 = vmatprep.mubr.f32.mxu1 %v10159_v0 }
 0x3fb   : > { %3472 = vrot.lane.b32.xlu0 %v3323_v9, %s5831_s15  ;;  %1973 = vmatmul.mubr.f32.gmra.mxu0 %v1163_v32  ;;  %v5645_v9 = vld [vmem:[%s9834_s5 + $0x128] sm:$0xff] }
 0x3fc   : > { %1978 = vmatprep.mubr.f32.mxu0 %v10159_v0  ;;  %2380 = vmatmul.mubr.f32.gmra.mxu1 %v5645_v9  ;;  %v5650_v9 = vld [vmem:[%s9834_s5 + $0x150] sm:$0xff] }
 0x3fd   : > { %3474 = vrot.lane.b32.xlu1 %v3324_v5, %s5831_s15  ;;  %2385 = vmatprep.mubr.f32.mxu1 %v10159_v0 }
 0x3ff   : > { %3476 = vrot.lane.b32.xlu0 %v7551_v31, %s5831_s15  ;;  %1979 = vmatmul.mubr.f32.gmra.mxu0 %v1164_v6 }
 0x400   : > { %1984 = vmatprep.mubr.f32.mxu0 %v10159_v0 }
 0x401   : > { %3478 = vrot.lane.b32.xlu1 %v3326_v14, %s5831_s15  ;;  %v5646_v14 = vld [vmem:[%s9834_s5 + $0x130] sm:$0xff] }
 0x402   : > { %2386 = vmatmul.mubr.f32.gmra.mxu1 %v5646_v14 }
 0x403   : > { %3480 = vrot.lane.b32.xlu0 %v3327_v53, %s5831_s15  ;;  %1985 = vmatmul.mubr.f32.gmra.mxu0 %v1165_v7 }
 0x404   : > { %2836 = vmatprep.mubr.f32.mxu0 %v10159_v0  ;;  %2391 = vmatprep.mubr.f32.mxu1 %v10159_v0 }
 0x405   : > { %3482 = vrot.lane.b32.xlu1 %v7551_v31, %s5831_s15 }
 0x407   : > { %3484 = vrot.lane.b32.xlu0 %v3329_v26, %s5831_s15  ;;  %2837 = vmatmul.mubr.f32.vlgmr.msra.gmra.mxu0 %v5657_v11  ;;  %v5647_v11 = vld [vmem:[%s9834_s5 + $0x138] sm:$0xff] }
 0x408   : > { %2842 = vmatprep.mubr.f32.mxu0 %v10159_v0  ;;  %2392 = vmatmul.mubr.f32.gmra.mxu1 %v5647_v11 }
 0x409   : > { %3486 = vrot.lane.b32.xlu1 %v3330_v13, %s5831_s15  ;;  %2397 = vmatprep.mubr.f32.mxu1 %v10159_v0 }
 0x40b   : > { %3488 = vrot.lane.b32.xlu0 %v7551_v31, %s5831_s15 }
 0x40c   : > { %2398 = vmatmul.mubr.f32.gmra.mxu1 %v5648_v43 }
 0x40d   : > { %3492 = vrot.lane.b32.xlu1 %v3333_v2, %s5831_s15  ;;  %v5658_v2 = vld [vmem:[%s9834_s5 + $0x188] sm:$0xff]  ;;  %2403 = vmatprep.mubr.f32.mxu1 %v10159_v0 }
 0x40e   : > { %2843 = vmatmul.mubr.f32.gmra.mxu0 %v5658_v2  ;;  %v5661_v2 = vld [vmem:[%s9834_s5 + $0x1a0] sm:$0xff] }
 0x40f   : > { %3494 = vrot.lane.b32.xlu0 %v7551_v31, %s5831_s15  ;;  %2848 = vmatprep.mubr.f32.mxu0 %v10159_v0 }
 0x410   : > { %2404 = vmatmul.mubr.f32.gmra.mxu1 %v5649_v58 }
 0x411   : > { %3490 = vrot.lane.b32.xlu1 %v3332_v12, %s5831_s15  ;;  %2409 = vmatprep.mubr.f32.mxu1 %v10159_v0 }
 0x413   : > { %4249 = vrot.lane.b32.xlu0 %v4244_v23, %s5827_s22 }
 0x414   : > { %2410 = vmatmul.mubr.f32.gmra.mxu1 %v5650_v9 }
 0x415   : > { %4251 = vrot.lane.b32.xlu1 %v4248_v45, %s5827_s22  ;;  %v5659_v45 = vld [vmem:[%s9834_s5 + $0x190] sm:$0xff]  ;;  %2415 = vmatprep.mubr.f32.mxu1 %v10159_v0 }
 0x416   : > { %2849 = vmatmul.mubr.f32.gmra.mxu0 %v5659_v45  ;;  %v5651_v45 = vld [vmem:[%s9834_s5 + $0x158] sm:$0xff] }
 0x417   : > { %2854 = vmatprep.mubr.f32.mxu0 %v10159_v0 }
 0x418   : > { %2416 = vmatmul.mubr.f32.gmra.mxu1 %v5651_v45  ;;  %v5663_v45 = vld [vmem:[%s9834_s5 + $0x1b0] sm:$0xff] }
 0x419   : > { %2421 = vmatprep.mubr.f32.mxu1 %v10159_v0 }
 0x41a   : > { %2855 = vmatmul.mubr.f32.gmra.mxu0 %v5660_v24  ;;  %v5662_v24 = vld [vmem:[%s9834_s5 + $0x1a8] sm:$0xff] }
 0x41b   : > { %2860 = vmatprep.mubr.f32.mxu0 %v10159_v0 }
 0x41e   : > { %2861 = vmatmul.mubr.f32.gmra.mxu0 %v5661_v2  ;;  %v5652_v2 = vld [vmem:[%s9834_s5 + $0x160] sm:$0xff] }
 0x41f   : > { %2866 = vmatprep.mubr.f32.mxu0 %v10159_v0  ;;  %2422 = vmatmul.mubr.f32.gmra.mxu1 %v5652_v2  ;;  %v5664_v2 = vld [vmem:[%s9834_s5 + $0x1b8] sm:$0xff] }
 0x420   : > { %2427 = vmatprep.mubr.f32.mxu1 %v10159_v0 }
 0x421   : > { %v7820_v20 = vpop.permute.xlu0 %3400 }
 0x422   : > { %10183 = vst [vmem:[#allocation14_spill] sm:$0xff] %v7820_v20  ;;  %2867 = vmatmul.mubr.f32.gmra.mxu0 %v5662_v24  ;;  %v5653_v24 = vld [vmem:[%s9834_s5 + $0x168] sm:$0xff] }
 0x423   : > { %v7822_v39 = vpop.permute.xlu1 %3402  ;;  %2872 = vmatprep.mubr.f32.mxu0 %v10159_v0  ;;  %2428 = vmatmul.mubr.f32.gmra.mxu1 %v5653_v24 }
 0x424   : > { %10184 = vst [vmem:[#allocation25_spill] sm:$0xff] %v7822_v39  ;;  %2433 = vmatprep.mubr.f32.mxu1 %v10159_v0 }
 0x425   : > { %v7824_v37 = vpop.permute.xlu0 %3404 }
 0x426   : > { %10185 = vst [vmem:[#allocation11_spill] sm:$0xff] %v7824_v37  ;;  %2873 = vmatmul.mubr.f32.gmra.mxu0 %v5663_v45  ;;  %v5671_v37 = vld [vmem:[%s9834_s5 + $0x1f0] sm:$0xff] }
 0x427   : > { %v7829_v31 = vpop.permute.xlu1 %3406  ;;  %2878 = vmatprep.mubr.f32.mxu0 %v10159_v0  ;;  %2434 = vmatmul.mubr.f32.gmra.mxu1 %v5654_v36  ;;  %v5655_v36 = vld [vmem:[%s9834_s5 + $0x178] sm:$0xff] }
 0x428   : > { %10186 = vst [vmem:[#allocation23_spill] sm:$0xff] %v7829_v31  ;;  %2439 = vmatprep.mubr.f32.mxu1 %v10159_v0 }
 0x429   : > { %v7832_v34 = vpop.permute.xlu0 %3408 }
 0x42a   : > { %2879 = vmatmul.mubr.f32.gmra.mxu0 %v5664_v2  ;;  %v5665_v2 = vld [vmem:[%s9834_s5 + $0x1c0] sm:$0xff] }
 0x42b   : > { %v7837_v49 = vpop.permute.xlu1 %3410  ;;  %2884 = vmatprep.mubr.f32.mxu0 %v10159_v0  ;;  %2440 = vmatmul.mubr.f32.gmra.mxu1 %v5655_v36  ;;  %v5667_v36 = vld [vmem:[%s9834_s5 + $0x1d0] sm:$0xff] }
 0x42c   : > { %3091 = vmatprep.mubr.f32.mxu1 %v10159_v0 }
 0x42d   : > { %v7840_v46 = vpop.permute.xlu0 %3412 }
 0x42e   : > { %2885 = vmatmul.mubr.f32.gmra.mxu0 %v5665_v2 }
 0x42f   : > { %v7845_v1 = vpop.permute.xlu1 %3414  ;;  %2890 = vmatprep.mubr.f32.mxu0 %v10159_v0 }
 0x431   : > { %v7848_v57 = vpop.permute.xlu0 %3416 }
 0x433   : > { %v7853_v44 = vpop.permute.xlu1 %3418 }
 0x435   : > { %v7856_v32 = vpop.permute.xlu0 %3420 }
 0x437   : > { %v7861_v5 = vpop.permute.xlu1 %3422 }
 0x439   : > { %v7864_v6 = vpop.permute.xlu0 %3424 }
 0x43b   : > { %v7869_v7 = vpop.permute.xlu1 %3426 }
 0x43d   : > { %v7872_v53 = vpop.permute.xlu0 %3428 }
 0x43f   : > { %v7877_v26 = vpop.permute.xlu1 %3430 }
 0x441   : > { %v7880_v13 = vpop.permute.xlu0 %3432 }
 0x443   : > { %v7888_v12 = vpop.permute.xlu1 %3434 }
 0x445   : > { %v7892_v23 = vpop.permute.xlu0 %3436 }
 0x447   : > { %v7900_v62 = vpop.permute.xlu1 %3438 }
 0x449   : > { %v7904_v38 = vpop.permute.xlu0 %3440 }
 0x44b   : > { %v7912_v14 = vpop.permute.xlu1 %3442 }
 0x44d   : > { %v7916_v11 = vpop.permute.xlu0 %3444 }
 0x44f   : > { %v7921_v43 = vpop.permute.xlu1 %3446 }
 0x451   : > { %v7927_v58 = vpop.permute.xlu0 %3448 }
 0x453   : > { %v7933_v9 = vpop.permute.xlu1 %3450 }
 0x455   : > { %v7939_v63 = vpop.permute.xlu0 %3452 }
 0x457   : > { %v7945_v3 = vpop.permute.xlu1 %3454 }
 0x459   : > { %v7951_v56 = vpop.permute.xlu0 %3456 }
 0x45b   : > { %v7957_v52 = vpop.permute.xlu1 %3764 }
 0x45c   : > { %v3772_v45 = vmul.f32 %v7957_v52, %v10113_v60  ;;  %v3817_v20 = vmul.f32 %v7957_v52, %v10182_v40  ;;  %v5670_v40 = vld [vmem:[%s9834_s5 + $0x1e8] sm:$0xff] }
 0x45d   : > { %v3767_v48 = vpop.permute.xlu0 %3766 }
 0x45e   : > { %v7967_v24 = vsel %vm2220_vm6, %v7957_v52, %v3767_v48  ;;  %3885 = vrot.lane.b32.xlu0 %v3772_v45, %s5829_s26  ;;  %v7978_v22 = vmul.f32 0.0, %v3767_v48  ;;  %v3775_v48 = vmul.f32 %v7957_v52, %v10115_v41 }
 0x45f   : > { %v7974_v60 = vpop.permute.xlu1 %3458  ;;  %v3773_v30 = vmul.f32 %v7967_v24, %v10114_v28  ;;  %v5666_v28 = vld [vmem:[%s9834_s5 + $0x1c8] sm:$0xff]  ;;  %v3776_v4 = vmul.f32 %v7967_v24, %v10116_v50 }
 0x460   : > { %2891 = vmatmul.mubr.f32.gmra.mxu0 %v5666_v28  ;;  %v3778_v28 = vmul.f32 %v7957_v52, %v10117_v54 }
 0x461   : > { %v7984_v45 = vpop.permute.xlu0 %3460  ;;  %3887 = vrot.lane.b32.xlu1 %v3773_v30, %s5829_s26  ;;  %v5674_v30 = vld [vmem:[%s9834_s5 + $0x200] sm:$0xff]  ;;  %2896 = vmatprep.mubr.f32.mxu0 %v10159_v0 }
 0x462   : > { %3889 = vrot.lane.b32.xlu0 %v7978_v22, %s5829_s26  ;;  %3092 = vmatmul.mubr.f32.vlgmr.msra.gmra.mxu1 %v5674_v30 }
 0x463   : > { %v7992_v2 = vpop.permute.xlu1 %3462  ;;  %3097 = vmatprep.mubr.f32.mxu1 %v10159_v0 }
 0x464   : > { %2897 = vmatmul.mubr.f32.gmra.mxu0 %v5667_v36  ;;  %v3818_v36 = vmul.f32 %v7967_v24, %v10181_v17 }
 0x465   : > { %v8001_v61 = vpop.permute.xlu0 %3464  ;;  %3891 = vrot.lane.b32.xlu1 %v3775_v48, %s5829_s26  ;;  %2902 = vmatprep.mubr.f32.mxu0 %v10159_v0 }
 0x466   : > { %3893 = vrot.lane.b32.xlu0 %v3776_v4, %s5829_s26  ;;  %v5668_v4 = vld [vmem:[%s9834_s5 + $0x1d8] sm:$0xff] }
 0x467   : > { %v8010_v41 = vpop.permute.xlu1 %3466 }
 0x468   : > { %2903 = vmatmul.mubr.f32.gmra.mxu0 %v5668_v4  ;;  %v3815_v4 = vmul.f32 %v7967_v24, %v10180_v42 }
 0x469   : > { %v8015_v48 = vpop.permute.xlu0 %3468  ;;  %3895 = vrot.lane.b32.xlu1 %v7978_v22, %s5829_s26  ;;  %2908 = vmatprep.mubr.f32.mxu0 %v10159_v0 }
 0x46a   : > { %3897 = vrot.lane.b32.xlu0 %v3778_v28, %s5829_s26  ;;  %v5669_v28 = vld [vmem:[%s9834_s5 + $0x1e0] sm:$0xff] }
 0x46b   : > { %v8024_v30 = vpop.permute.xlu1 %3470 }
 0x46c   : > { %2909 = vmatmul.mubr.f32.gmra.mxu0 %v5669_v28  ;;  %v3814_v28 = vmul.f32 %v7957_v52, %v10179_v10 }
 0x46d   : > { %v8028_v50 = vpop.permute.xlu0 %3472  ;;  %3977 = vrot.lane.b32.xlu1 %v3818_v36, %s5829_s26  ;;  %2914 = vmatprep.mubr.f32.mxu0 %v10159_v0  ;;  %v5741_v36 = vld [vmem:[%s9837_s8 + $0x10] sm:$0x3] }
 0x46e   : > { %3979 = vrot.lane.b32.xlu0 %v7978_v22, %s5829_s26 }
 0x46f   : > { %v8037_v54 = vpop.permute.xlu1 %3474 }
 0x470   : > { %2915 = vmatmul.mubr.f32.gmra.mxu0 %v5670_v40 }
 0x471   : > { %v8043_v17 = vpop.permute.xlu0 %3476  ;;  %3975 = vrot.lane.b32.xlu1 %v3817_v20, %s5829_s26  ;;  %v4729_v20 = vrot.slane %v5741_v36, %v10169_v51  ;;  %2920 = vmatprep.mubr.f32.mxu0 %v10159_v0  ;;  %v5672_v51 = vld [vmem:[%s9834_s5 + $0x1f8] sm:$0xff] }
 0x472   : > { %3971 = vrot.lane.b32.xlu0 %v3815_v4, %s5829_s26  ;;  %v4733_v4 = vrot.slane %v5741_v36, %v10170_v8  ;;  %v3812_v8 = vmul.f32 %v7967_v24, %v10178_v59  ;;  %v5676_v59 = vld [vmem:[%s9834_s5 + $0x210] sm:$0xff] }
 0x473   : > { %v3479_v39 = vpop.permute.xlu1 %3478 }
 0x474   : > { %2921 = vmatmul.mubr.f32.gmra.mxu0 %v5671_v37  ;;  %v5675_v37 = vld [vmem:[%s9834_s5 + $0x208] sm:$0xff] }
 0x475   : > { %v3481_v42 = vpop.permute.xlu0 %3480  ;;  %3973 = vrot.lane.b32.xlu1 %v7978_v22, %s5829_s26  ;;  %2926 = vmatprep.mubr.f32.mxu0 %v10159_v0 }
 0x476   : > { %3969 = vrot.lane.b32.xlu0 %v3814_v28, %s5829_s26  ;;  %3098 = vmatmul.mubr.f32.gmra.mxu1 %v5675_v37 }
 0x477   : > { %v3483_v31 = vpop.permute.xlu1 %3482  ;;  %3103 = vmatprep.mubr.f32.mxu1 %v10159_v0 }
 0x478   : > { %2927 = vmatmul.mubr.f32.gmra.mxu0 %v5672_v51 }
 0x479   : > { %v3485_v10 = vpop.permute.xlu0 %3484  ;;  %4734 = vrot.lane.b32.xlu1 %v4729_v20, %s5828_s23  ;;  %3624 = vmatprep.mubr.f32.mxu0 %v10159_v0  ;;  %v3811_v20 = vmul.f32 %v7957_v52, %v10177_v21 }
 0x47a   : > { %4736 = vrot.lane.b32.xlu0 %v4733_v4, %s5828_s23  ;;  %v3809_v4 = vmul.f32 %v7967_v24, %v10176_v25  ;;  %3104 = vmatmul.mubr.f32.gmra.mxu1 %v5676_v59  ;;  %v3808_v25 = vmul.f32 %v7957_v52, %v10175_v18  ;;  %v3523_v59 = vsel %vm2493_vm7, %v3481_v42, %v3483_v31  ;;  %s9704_s23 = scalar_lea.vmem %s9838_s9, %s5761_s27 }
 0x47b   : > { %v3487_v40 = vpop.permute.xlu1 %3486  ;;  %3109 = vmatprep.mubr.f32.mxu1 %v10159_v0  ;;  %v3803_v31 = vmul.f32 %v7967_v24, %v10172_v15 }
 0x47d   : > { %v3489_v36 = vpop.permute.xlu0 %3488  ;;  %3965 = vrot.lane.b32.xlu1 %v3812_v8, %s5829_s26 }
 0x47e   : > { %3967 = vrot.lane.b32.xlu0 %v7978_v22, %s5829_s26 }
 0x47f   : > { %v3493_v28 = vpop.permute.xlu1 %3492 }
 0x481   : > { %v3495_v51 = vpop.permute.xlu0 %3494  ;;  %3963 = vrot.lane.b32.xlu1 %v3811_v20, %s5829_s26  ;;  %v3525_v20 = vsel %vm2493_vm7, %v3487_v40, %v3489_v36 }
 0x482   : > { %3959 = vrot.lane.b32.xlu0 %v3809_v4, %s5829_s26  ;;  %v3527_v8 = vsel %vm2493_vm7, %v3493_v28, %v3495_v51  ;;  %v3524_v4 = vsel %vm2493_vm7, %v3485_v10, %v3487_v40  ;;  %v3522_v51 = vsel %vm2493_vm7, %v3479_v39, %v3481_v42  ;;  %v3520_v10 = vsel %vm2493_vm7, %v8028_v50, %v8037_v54 }
 0x483   : > { %3560 = vmatprep.subr.mxu0 %v3527_v8  ;;  %v3491_v47 = vpop.permute.xlu1 %3490  ;;  %v3519_v42 = vsel %vm2493_vm7, %v8015_v48, %v8024_v30  ;;  %v3805_v39 = vmul.f32 %v7957_v52, %v10173_v35  ;;  %v3517_v50 = vsel %vm2493_vm7, %v7992_v2, %v8001_v61  ;;  %v3514_v61 = vsel %vm2493_vm7, %v7945_v3, %v7951_v56 }
 0x484   : > { %v3526_v37 = vsel %vm2493_vm7, %v3491_v47, %v3493_v28  ;;  %v5677_v47 = vld [vmem:[%s9834_s5 + $0x218] sm:$0xff]  ;;  %v3806_v28 = vmul.f32 %v7967_v24, %v10174_v19  ;;  %v3802_v30 = vmul.f32 %v7957_v52, %v10171_v33  ;;  %v3512_v3 = vsel %vm2493_vm7, %v7927_v58, %v7933_v9 }
 0x485   : > { %3961 = vrot.lane.b32.xlu1 %v7978_v22, %s5829_s26  ;;  %3561 = vmatpush1.msra.mxu0 %v3526_v37  ;;  %v3509_v58 = vsel %vm2493_vm7, %v7900_v62, %v7904_v38  ;;  %v3799_v38 = vmul.f32 %v7957_v52, %v10167_v29  ;;  %v3797_v40 = vmul.f32 %v7967_v24, %v10166_v27 }
 0x486   : > { %3957 = vrot.lane.b32.xlu0 %v3808_v25, %s5829_s26  ;;  %3562 = vmatprep.subr.mxu0 %v3525_v20  ;;  %v3521_v25 = vsel %vm2493_vm7, %v8037_v54, %v8043_v17  ;;  %v3518_v17 = vsel %vm2493_vm7, %v8010_v41, %v8015_v48  ;;  %v5678_v54 = vld [vmem:[%s9834_s5 + $0x220] sm:$0xff]  ;;  %v3516_v41 = vsel %vm2493_vm7, %v7984_v45, %v7992_v2  ;;  %v5683_v20 = vld [vmem:[%s9834_s5 + $0x248] sm:$0xff] }
 0x487   : > { %3563 = vmatpush1.msra.mxu0 %v3524_v4  ;;  %3110 = vmatmul.mubr.f32.gmra.mxu1 %v5677_v47  ;;  %v3515_v48 = vsel %vm2493_vm7, %v7951_v56, %v7974_v60  ;;  %v3513_v45 = vsel %vm2493_vm7, %v7933_v9, %v7939_v63  ;;  %v5679_v60 = vld [vmem:[%s9834_s5 + $0x228] sm:$0xff]  ;;  %v3511_v56 = vsel %vm2493_vm7, %v7916_v11, %v7921_v43  ;;  %v5680_v43 = vld [vmem:[%s9834_s5 + $0x230] sm:$0xff] }
 0x488   : > { %3564 = vmatprep.subr.mxu0 %v3523_v59  ;;  %3115 = vmatprep.mubr.f32.mxu1 %v10159_v0  ;;  %v3800_v2 = vmul.f32 %v7967_v24, %v10168_v16  ;;  %v3510_v63 = vsel %vm2493_vm7, %v7912_v14, %v7916_v11  ;;  %v3508_v14 = vsel %vm2493_vm7, %v7892_v23, %v7900_v62  ;;  %v5681_v23 = vld [vmem:[%s9834_s5 + $0x238] sm:$0xff]  ;;  %v10192_v47 = vld [vmem:[#allocation41_spill] sm:$0xff] }
 0x489   : > { %3953 = vrot.lane.b32.xlu1 %v3806_v28, %s5829_s26  ;;  %3565 = vmatpush1.msra.mxu0 %v3522_v51  ;;  %v3507_v11 = vsel %vm2493_vm7, %v7880_v13, %v7888_v12  ;;  %v3506_v9 = vsel %vm2493_vm7, %v7877_v26, %v7880_v13  ;;  %v3505_v12 = vsel %vm2493_vm7, %v7869_v7, %v7872_v53  ;;  %v10193_v28 = vld [vmem:[#allocation40_spill] sm:$0xff] }
 0x48a   : > { %3955 = vrot.lane.b32.xlu0 %v7978_v22, %s5829_s26  ;;  %3566 = vmatprep.subr.mxu0 %v3521_v25  ;;  %v3504_v26 = vsel %vm2493_vm7, %v7864_v6, %v7869_v7  ;;  %v3503_v13 = vsel %vm2493_vm7, %v7856_v32, %v7861_v5  ;;  %v3502_v53 = vsel %vm2493_vm7, %v7853_v44, %v7856_v32  ;;  %v5682_v5 = vld [vmem:[%s9834_s5 + $0x240] sm:$0xff]  ;;  %v10187_v7 = vld [vmem:[#allocation42_spill] sm:$0xff]  ;;  %v5692_v25 = vld [vmem:[%s9834_s5 + $0x288] sm:$0xff] }
 0x48b   : > { %3567 = vmatpush1.msra.mxu0 %v3520_v10  ;;  %3116 = vmatmul.mubr.f32.gmra.mxu1 %v5678_v54  ;;  %v3796_v62 = vmul.f32 %v7957_v52, %v10165_v55  ;;  %v3501_v6 = vsel %vm2493_vm7, %v7845_v1, %v7848_v57  ;;  %v3500_v44 = vsel %vm2493_vm7, %v7840_v46, %v7845_v1  ;;  %v10188_v57 = vld [vmem:[#allocation23_spill] sm:$0xff]  ;;  %v10190_v1 = vld [vmem:[#allocation25_spill] sm:$0xff] }
 0x48c   : > { %3568 = vmatprep.subr.mxu0 %v3519_v42  ;;  %3121 = vmatprep.mubr.f32.mxu1 %v10159_v0  ;;  %v3499_v32 = vsel %vm2493_vm7, %v7832_v34, %v7837_v49  ;;  %v3794_v36 = vmul.f32 %v7967_v24, %v10187_v7  ;;  %v3498_v8 = vsel %vm2493_vm7, %v10188_v57, %v7832_v34  ;;  %v10189_v46 = vld [vmem:[#allocation11_spill] sm:$0xff]  ;;  %v10191_v34 = vld [vmem:[#allocation14_spill] sm:$0xff]  ;;  %v5684_v10 = vld [vmem:[%s9834_s5 + $0x250] sm:$0xff] }
 0x48d   : > { %3951 = vrot.lane.b32.xlu1 %v3805_v39, %s5829_s26  ;;  %3569 = vmatpush1.msra.mxu0 %v3518_v17  ;;  %v3497_v37 = vsel %vm2493_vm7, %v10190_v1, %v10189_v46  ;;  %v5691_v49 = vld [vmem:[%s9834_s5 + $0x280] sm:$0xff]  ;;  %v3496_v4 = vsel %vm2493_vm7, %v10191_v34, %v10190_v1  ;;  %v3793_v59 = vmul.f32 %v7957_v52, %v10192_v47  ;;  %v5693_v17 = vld [vmem:[%s9834_s5 + $0x290] sm:$0xff] }
 0x48e   : > { %3947 = vrot.lane.b32.xlu0 %v3803_v31, %s5829_s26  ;;  %3570 = vmatprep.subr.mxu0 %v3517_v50  ;;  %v3791_v51 = vmul.f32 %v7967_v24, %v10193_v28  ;;  %v10194_v42 = vld [vmem:[#allocation39_spill] sm:$0xff]  ;;  %v5685_v31 = vld [vmem:[%s9834_s5 + $0x258] sm:$0xff] }
 0x48f   : > { %3571 = vmatpush1.msra.mxu0 %v3516_v41  ;;  %3122 = vmatmul.mubr.f32.gmra.mxu1 %v5679_v60  ;;  %v3790_v39 = vmul.f32 %v7957_v52, %v10194_v42  ;;  %v10195_v50 = vld [vmem:[#allocation38_spill] sm:$0xff]  ;;  %v5699_v46 = vld [vmem:[%s9834_s5 + $0x2c0] sm:$0xff] }
 0x490   : > { %3572 = vmatprep.subr.mxu0 %v3515_v48  ;;  %3127 = vmatprep.mubr.f32.mxu1 %v10159_v0  ;;  %v3788_v54 = vmul.f32 %v7967_v24, %v10195_v50  ;;  %v5694_v41 = vld [vmem:[%s9834_s5 + $0x298] sm:$0xff]  ;;  %v5686_v48 = vld [vmem:[%s9834_s5 + $0x260] sm:$0xff] }
 0x491   : > { %3949 = vrot.lane.b32.xlu1 %v7978_v22, %s5829_s26  ;;  %3573 = vmatpush1.msra.mxu0 %v3514_v61  ;;  %v10196_v61 = vld [vmem:[#allocation37_spill] sm:$0xff] }
 0x492   : > { %3945 = vrot.lane.b32.xlu0 %v3802_v30, %s5829_s26  ;;  %3574 = vmatprep.subr.mxu0 %v3513_v45  ;;  %v3787_v30 = vmul.f32 %v7957_v52, %v10196_v61  ;;  %v10197_v45 = vld [vmem:[#allocation36_spill] sm:$0xff] }
 0x493   : > { %3575 = vmatpush1.msra.mxu0 %v3512_v3  ;;  %3128 = vmatmul.mubr.f32.gmra.mxu1 %v5680_v43  ;;  %v3785_v60 = vmul.f32 %v7967_v24, %v10197_v45  ;;  %v5695_v3 = vld [vmem:[%s9834_s5 + $0x2a0] sm:$0xff]  ;;  %v5688_v43 = vld [vmem:[%s9834_s5 + $0x270] sm:$0xff] }
 0x494   : > { %3576 = vmatprep.subr.mxu0 %v3511_v56  ;;  %3133 = vmatprep.mubr.f32.mxu1 %v10159_v0  ;;  %v5687_v56 = vld [vmem:[%s9834_s5 + $0x268] sm:$0xff] }
 0x495   : > { %3941 = vrot.lane.b32.xlu1 %v3800_v2, %s5829_s26  ;;  %3577 = vmatpush1.msra.mxu0 %v3510_v63  ;;  %v10198_v2 = vld [vmem:[#allocation35_spill] sm:$0xff] }
 0x496   : > { %3943 = vrot.lane.b32.xlu0 %v7978_v22, %s5829_s26  ;;  %3578 = vmatprep.subr.mxu0 %v3509_v58  ;;  %v3784_v63 = vmul.f32 %v7957_v52, %v10198_v2  ;;  %v5696_v58 = vld [vmem:[%s9834_s5 + $0x2a8] sm:$0xff] }
 0x497   : > { %3579 = vmatpush1.msra.mxu0 %v3508_v14  ;;  %3134 = vmatmul.mubr.f32.gmra.mxu1 %v5681_v23  ;;  %v10199_v14 = vld [vmem:[#allocation34_spill] sm:$0xff] }
 0x498   : > { %3580 = vmatprep.subr.mxu0 %v3507_v11  ;;  %3139 = vmatprep.mubr.f32.mxu1 %v10159_v0  ;;  %v3782_v11 = vmul.f32 %v7967_v24, %v10199_v14 }
 0x499   : > { %3939 = vrot.lane.b32.xlu1 %v3799_v38, %s5829_s26  ;;  %3581 = vmatpush1.msra.mxu0 %v3506_v9  ;;  %v5697_v38 = vld [vmem:[%s9834_s5 + $0x2b0] sm:$0xff]  ;;  %v5689_v9 = vld [vmem:[%s9834_s5 + $0x278] sm:$0xff] }
 0x49a   : > { %3935 = vrot.lane.b32.xlu0 %v3797_v40, %s5829_s26  ;;  %3582 = vmatprep.subr.mxu0 %v3505_v12  ;;  %v4252_v40 = vpop.permute.xlu1 %4251  ;;  %v10200_v12 = vld [vmem:[#allocation33_spill] sm:$0xff] }
 0x49b   : > { %3583 = vmatpush1.msra.mxu0 %v3504_v26  ;;  %3140 = vmatmul.mubr.f32.gmra.mxu1 %v5682_v5  ;;  %v3781_v23 = vmul.f32 %v7957_v52, %v10200_v12  ;;  %v1526_v26 = vpop.f32.mrf.mxu1  ;;  %v5698_v52 = vld [vmem:[%s9834_s5 + $0x2b8] sm:$0xff] }
 0x49c   : > { %3584 = vmatprep.subr.mxu0 %v3503_v13  ;;  %3145 = vmatprep.mubr.f32.mxu1 %v10159_v0  ;;  %v8329_v13 = vpop.permute.xlu0 %4249 }
 0x49d   : > { %3937 = vrot.lane.b32.xlu1 %v7978_v22, %s5829_s26  ;;  %3585 = vmatpush1.msra.mxu0 %v3502_v53  ;;  %v10201_v53 = vld [vmem:[#allocation32_spill] sm:$0xff]  ;;  %v8342_v5 = vpop.f32.mrf.mxu1 }
 0x49e   : > { %3933 = vrot.lane.b32.xlu0 %v3796_v62, %s5829_s26  ;;  %3586 = vmatprep.subr.mxu0 %v3501_v6  ;;  %v3779_v62 = vmul.f32 %v7967_v24, %v10201_v53  ;;  %v8335_v6 = vsel %vm1395_vm4, %v8329_v13, %v4252_v40  ;;  %10202 = vst [vmem:[#allocation12_spill] sm:$0xff] %v8342_v5  ;;  %v1896_v24 = vpop.f32.mrf.mxu0 }
 0x49f   : > { %3587 = vmatpush1.msra.mxu0 %v3500_v44  ;;  %3146 = vmatmul.mubr.f32.gmra.mxu1 %v5683_v20  ;;  %v1532_v44 = vpop.f32.mrf.mxu1 }
 0x4a0   : > { %3588 = vmatprep.subr.mxu0 %v3499_v32  ;;  %3151 = vmatprep.mubr.f32.mxu1 %v10159_v0  ;;  %v8346_v32 = vadd.f32 %v1896_v24, %v1526_v26 }
 0x4a1   : > { %3929 = vrot.lane.b32.xlu1 %v3794_v36, %s5829_s26  ;;  %3589 = vmatpush1.msra.mxu0 %v3498_v8  ;;  %v10203_v36 = vld [vmem:[#allocation66_spill] sm:$0xff]  ;;  %v8350_v8 = vpop.f32.mrf.mxu0  ;;  %v8358_v1 = vpop.f32.mrf.mxu1 }
 0x4a2   : > { %3931 = vrot.lane.b32.xlu0 %v7978_v22, %s5829_s26  ;;  %3590 = vmatprep.subr.mxu0 %v3497_v37  ;;  %v4303_v57 = vmul.f32 %v8335_v6, %v10203_v36  ;;  %10204 = vst [vmem:[#allocation24_spill] sm:$0xff] %v8350_v8  ;;  %10205 = vst [vmem:[#allocation9_spill] sm:$0xff] %v8358_v1 }
 0x4a3   : > { %3591 = vmatpush1.msra.mxu0 %v3496_v4  ;;  %3152 = vmatmul.mubr.f32.gmra.mxu1 %v5684_v10  ;;  %v1902_v37 = vpop.f32.mrf.mxu0  ;;  %v1538_v20 = vpop.f32.mrf.mxu1  ;;  %v10206_v4 = vld [vmem:[#allocation63_spill] sm:$0xff]  ;;  %v10209_v10 = vld [vmem:[#allocation58_spill] sm:$0xff] }
 0x4a4   : > { %3625 = vmatmul.mubr.f32.vlgmr.msra.gmra.mxu0 %v5691_v49  ;;  %3157 = vmatprep.mubr.f32.mxu1 %v10159_v0  ;;  %v8361_v49 = vmul.f32 0.0, %v4252_v40  ;;  %v8363_v34 = vadd.f32 %v1902_v37, %v1532_v44  ;;  %v5703_v44 = vld [vmem:[%s9834_s5 + $0x2e0] sm:$0xff] }
 0x4a5   : > { %3927 = vrot.lane.b32.xlu1 %v3793_v59, %s5829_s26  ;;  %3630 = vmatprep.mubr.f32.mxu0 %v10159_v0  ;;  %v4302_v59 = vmul.f32 %v8329_v13, %v10206_v4 }
 0x4a6   : > { %3923 = vrot.lane.b32.xlu0 %v3791_v51, %s5829_s26  ;;  %v8373_v51 = vpop.f32.mrf.mxu1 }
 0x4a7   : > { %3158 = vmatmul.mubr.f32.gmra.mxu1 %v5685_v31  ;;  %10207 = vst [vmem:[#allocation21_spill] sm:$0xff] %v8373_v51 }
 0x4a8   : > { %3631 = vmatmul.mubr.f32.gmra.mxu0 %v5692_v25  ;;  %3163 = vmatprep.mubr.f32.mxu1 %v10159_v0  ;;  %v8375_v25 = vpop.f32.mrf.mxu0 }
 0x4a9   : > { %3925 = vrot.lane.b32.xlu1 %v7978_v22, %s5829_s26  ;;  %3636 = vmatprep.mubr.f32.mxu0 %v10159_v0  ;;  %10208 = vst [vmem:[#allocation10_spill] sm:$0xff] %v8375_v25 }
 0x4aa   : > { %3921 = vrot.lane.b32.xlu0 %v3790_v39, %s5829_s26  ;;  %v4300_v39 = vmul.f32 %v8335_v6, %v10209_v10  ;;  %v1908_v31 = vpop.f32.mrf.mxu0 }
 0x4ab   : > { %3164 = vmatmul.mubr.f32.gmra.mxu1 %v5686_v48 }
 0x4ac   : > { %3637 = vmatmul.mubr.f32.gmra.mxu0 %v5693_v17  ;;  %3169 = vmatprep.mubr.f32.mxu1 %v10159_v0  ;;  %v1544_v17 = vpop.f32.mrf.mxu1 }
 0x4ad   : > { %3917 = vrot.lane.b32.xlu1 %v3788_v54, %s5829_s26  ;;  %3642 = vmatprep.mubr.f32.mxu0 %v10159_v0  ;;  %v8380_v54 = vadd.f32 %v1908_v31, %v1538_v20  ;;  %v10219_v20 = vld [vmem:[#allocation52_spill] sm:$0xff] }
 0x4ae   : > { %3919 = vrot.lane.b32.xlu0 %v7978_v22, %s5829_s26  ;;  %v8387_v48 = vpop.f32.mrf.mxu1  ;;  %v5704_v31 = vld [vmem:[%s9834_s5 + $0x2e8] sm:$0xff] }
 0x4af   : > { %3170 = vmatmul.mubr.f32.gmra.mxu1 %v5687_v56  ;;  %10210 = vst [vmem:[#allocation22_spill] sm:$0xff] %v8387_v48 }
 0x4b0   : > { %3643 = vmatmul.mubr.f32.gmra.mxu0 %v5694_v41  ;;  %3175 = vmatprep.mubr.f32.mxu1 %v10159_v0  ;;  %v5701_v41 = vld [vmem:[%s9834_s5 + $0x2d0] sm:$0xff]  ;;  %v1550_v56 = vpop.f32.mrf.mxu1 }
 0x4b1   : > { %3915 = vrot.lane.b32.xlu1 %v3787_v30, %s5829_s26  ;;  %3648 = vmatprep.mubr.f32.mxu0 %v10159_v0  ;;  %v8389_v30 = vpop.f32.mrf.mxu0 }
 0x4b2   : > { %3911 = vrot.lane.b32.xlu0 %v3785_v60, %s5829_s26  ;;  %10211 = vst [vmem:[#allocation7_spill] sm:$0xff] %v8389_v30  ;;  %v10212_v60 = vld [vmem:[#allocation57_spill] sm:$0xff] }
 0x4b3   : > { %3176 = vmatmul.mubr.f32.gmra.mxu1 %v5688_v43 }
 0x4b4   : > { %3649 = vmatmul.mubr.f32.gmra.mxu0 %v5695_v3  ;;  %3181 = vmatprep.mubr.f32.mxu1 %v10159_v0  ;;  %v4299_v3 = vmul.f32 %v8329_v13, %v10212_v60 }
 0x4b5   : > { %3913 = vrot.lane.b32.xlu1 %v7978_v22, %s5829_s26  ;;  %3654 = vmatprep.mubr.f32.mxu0 %v10159_v0 }
 0x4b6   : > { %3909 = vrot.lane.b32.xlu0 %v3784_v63, %s5829_s26  ;;  %v1914_v63 = vpop.f32.mrf.mxu0 }
 0x4b7   : > { %3182 = vmatmul.mubr.f32.gmra.mxu1 %v5689_v9  ;;  %v8404_v9 = vpop.f32.mrf.mxu1 }
 0x4b8   : > { %3655 = vmatmul.mubr.f32.gmra.mxu0 %v5696_v58  ;;  %4109 = vmatprep.mubr.f32.mxu1 %v10159_v0  ;;  %v10213_v58 = vld [vmem:[#allocation54_spill] sm:$0xff]  ;;  %10214 = vst [vmem:[#allocation19_spill] sm:$0xff] %v8404_v9  ;;  %v8406_v40 = vpop.f32.mrf.mxu0 }
 0x4b9   : > { %3905 = vrot.lane.b32.xlu1 %v3782_v11, %s5829_s26  ;;  %3660 = vmatprep.mubr.f32.mxu0 %v10159_v0  ;;  %v4297_v43 = vmul.f32 %v8335_v6, %v10213_v58  ;;  %v8397_v11 = vadd.f32 %v1914_v63, %v1544_v17  ;;  %10215 = vst [vmem:[#allocation74_spill] sm:$0xff] %v8406_v40 }
 0x4ba   : > { %3907 = vrot.lane.b32.xlu0 %v7978_v22, %s5829_s26  ;;  %v1920_v26 = vpop.f32.mrf.mxu0 }
 0x4bb   : > { %v8413_v24 = vadd.f32 %v1920_v26, %v1550_v56 }
 0x4bc   : > { %3661 = vmatmul.mubr.f32.gmra.mxu0 %v5697_v38  ;;  %v5702_v38 = vld [vmem:[%s9834_s5 + $0x2d8] sm:$0xff] }
 0x4bd   : > { %3903 = vrot.lane.b32.xlu1 %v3781_v23, %s5829_s26  ;;  %3666 = vmatprep.mubr.f32.mxu0 %v10159_v0  ;;  %v1556_v23 = vpop.f32.mrf.mxu1 }
 0x4be   : > { %3899 = vrot.lane.b32.xlu0 %v3779_v62, %s5829_s26 }
 0x4c0   : > { %3667 = vmatmul.mubr.f32.gmra.mxu0 %v5698_v52  ;;  %v4296_v52 = vmul.f32 %v8329_v13, %v10177_v21 }
 0x4c1   : > { %3901 = vrot.lane.b32.xlu1 %v7978_v22, %s5829_s26  ;;  %3672 = vmatprep.mubr.f32.mxu0 %v10159_v0  ;;  %v5700_v22 = vld [vmem:[%s9834_s5 + $0x2c8] sm:$0xff] }
 0x4c2   : > { %4462 = vrot.lane.b32.xlu0 %v4303_v57, %s5826_s19  ;;  %v8421_v57 = vpop.f32.mrf.mxu1 }
 0x4c4   : > { %3673 = vmatmul.mubr.f32.gmra.mxu0 %v5699_v46  ;;  %v8423_v46 = vpop.f32.mrf.mxu0 }
 0x4c5   : > { %4464 = vrot.lane.b32.xlu1 %v8361_v49, %s5826_s19  ;;  %3678 = vmatprep.mubr.f32.mxu0 %v10159_v0  ;;  %10217 = vst [vmem:[#allocation80_spill] sm:$0xff] %v8423_v46 }
 0x4c6   : > { %4460 = vrot.lane.b32.xlu0 %v4302_v59, %s5826_s19  ;;  %v4294_v59 = vmul.f32 %v8335_v6, %v10219_v20  ;;  %v1926_v17 = vpop.f32.mrf.mxu0 }
 0x4c8   : > { %3679 = vmatmul.mubr.f32.gmra.mxu0 %v5700_v22  ;;  %v1562_v22 = vpop.f32.mrf.mxu1  ;;  %v8443_v56 = vpop.f32.mrf.mxu0 }
 0x4c9   : > { %4456 = vrot.lane.b32.xlu1 %v4300_v39, %s5826_s19  ;;  %3684 = vmatprep.mubr.f32.mxu0 %v10159_v0 }
 0x4ca   : > { %4458 = vrot.lane.b32.xlu0 %v8361_v49, %s5826_s19 }
 0x4cc   : > { %3685 = vmatmul.mubr.f32.gmra.mxu0 %v5701_v41  ;;  %v8437_v41 = vadd.f32 %v1926_v17, %v1556_v23  ;;  %v1932_v23 = vpop.f32.mrf.mxu0 }
 0x4cd   : > { %4454 = vrot.lane.b32.xlu1 %v4299_v3, %s5826_s19  ;;  %3690 = vmatprep.mubr.f32.mxu0 %v10159_v0  ;;  %v8439_v3 = vpop.f32.mrf.mxu1 }
 0x4ce   : > { %4450 = vrot.lane.b32.xlu0 %v4297_v43, %s5826_s19  ;;  %v4293_v43 = vmul.f32 %v8329_v13, %v10175_v18  ;;  %v8463_v46 = vpop.f32.mrf.mxu0 }
 0x4d0   : > { %v8409_v62 = vpop.permute.xlu0 %3885  ;;  %3691 = vmatmul.mubr.f32.gmra.mxu0 %v5702_v38  ;;  %v1568_v38 = vpop.f32.mrf.mxu1 }
 0x4d1   : > { %10216 = vst [vmem:[#allocation73_spill] sm:$0xff] %v8409_v62  ;;  %4452 = vrot.lane.b32.xlu1 %v8361_v49, %s5826_s19  ;;  %3696 = vmatprep.mubr.f32.mxu0 %v10159_v0  ;;  %v1938_v48 = vpop.f32.mrf.mxu0 }
 0x4d2   : > { %4448 = vrot.lane.b32.xlu0 %v4296_v52, %s5826_s19  ;;  %v4291_v52 = vmul.f32 %v8335_v6, %v10174_v19  ;;  %v8460_v17 = vpop.f32.mrf.mxu1 }
 0x4d3   : > { %v8426_v37 = vpop.permute.xlu1 %3887  ;;  %v8482_v30 = vpop.f32.mrf.mxu0 }
 0x4d4   : > { %10218 = vst [vmem:[#allocation79_spill] sm:$0xff] %v8426_v37  ;;  %v8430_v39 = vpop.permute.xlu0 %3889  ;;  %3697 = vmatmul.mubr.f32.gmra.mxu0 %v5703_v44  ;;  %v5705_v44 = vld [vmem:[%s9834_s5 + $0x2f0] sm:$0xff] }
 0x4d5   : > { %10220 = vst [vmem:[#allocation8_spill] sm:$0xff] %v8430_v39  ;;  %4444 = vrot.lane.b32.xlu1 %v4294_v59, %s5826_s19  ;;  %3702 = vmatprep.mubr.f32.mxu0 %v10159_v0  ;;  %v8458_v59 = vadd.f32 %v1932_v23, %v1562_v22  ;;  %v5706_v22 = vld [vmem:[%s9834_s5 + $0x2f8] sm:$0xff]  ;;  %v1944_v19 = vpop.f32.mrf.mxu0 }
 0x4d6   : > { %4446 = vrot.lane.b32.xlu0 %v8361_v49, %s5826_s19 }
 0x4d7   : > { %v8445_v63 = vpop.permute.xlu1 %3891 }
 0x4d8   : > { %10221 = vst [vmem:[#allocation20_spill] sm:$0xff] %v8445_v63  ;;  %v8449_v26 = vpop.permute.xlu0 %3893  ;;  %3703 = vmatmul.mubr.f32.gmra.mxu0 %v5704_v31  ;;  %v1574_v31 = vpop.f32.mrf.mxu1 }
 0x4d9   : > { %10222 = vst [vmem:[#allocation68_spill] sm:$0xff] %v8449_v26  ;;  %4442 = vrot.lane.b32.xlu1 %v4293_v43, %s5826_s19  ;;  %3708 = vmatprep.mubr.f32.mxu0 %v10159_v0  ;;  %v4290_v43 = vmul.f32 %v8329_v13, %v10173_v35 }
 0x4da   : > { %4438 = vrot.lane.b32.xlu0 %v4291_v52, %s5826_s19  ;;  %v8477_v52 = vadd.f32 %v1938_v48, %v1568_v38  ;;  %v8479_v23 = vpop.f32.mrf.mxu1  ;;  %v8488_v48 = vadd.f32 %v1944_v19, %v1574_v31  ;;  %v4285_v19 = vmul.f32 %v8335_v6, %v10168_v16 }
 0x4db   : > { %v8465_v9 = vpop.permute.xlu1 %3895 }
 0x4dc   : > { %10223 = vst [vmem:[#allocation67_spill] sm:$0xff] %v8465_v9  ;;  %v8467_v40 = vpop.permute.xlu0 %3897  ;;  %3709 = vmatmul.mubr.f32.gmra.mxu0 %v5705_v44  ;;  %v4288_v44 = vmul.f32 %v8335_v6, %v10172_v15  ;;  %v1580_v51 = vpop.f32.mrf.mxu1 }
 0x4dd   : > { %10224 = vst [vmem:[#allocation78_spill] sm:$0xff] %v8467_v40  ;;  %4440 = vrot.lane.b32.xlu1 %v8361_v49, %s5826_s19  ;;  %3714 = vmatprep.mubr.f32.mxu0 %v10159_v0 }
 0x4de   : > { %4436 = vrot.lane.b32.xlu0 %v4290_v43, %s5826_s19  ;;  %v8490_v38 = vpop.f32.mrf.mxu1  ;;  %v8495_v43 = vpop.f32.mrf.mxu0 }
 0x4df   : > { %v3978_v35 = vpop.permute.xlu1 %3977 }
 0x4e0   : > { %v3980_v62 = vpop.permute.xlu0 %3979  ;;  %3715 = vmatmul.mubr.f32.gmra.mxu0 %v5706_v22  ;;  %v4287_v22 = vmul.f32 %v8329_v13, %v10171_v33  ;;  %v1586_v39 = vpop.f32.mrf.mxu1 }
 0x4e1   : > { %4432 = vrot.lane.b32.xlu1 %v4288_v44, %s5826_s19  ;;  %v4012_v37 = vsel %vm2006_vm3, %v3978_v35, %v3980_v62  ;;  %4594 = vmatprep.mubr.f32.mxu0 %v10159_v0  ;;  %v1950_v31 = vpop.f32.mrf.mxu0 }
 0x4e2   : > { %4434 = vrot.lane.b32.xlu0 %v8361_v49, %s5826_s19  ;;  %4045 = vmatprep.subr.mxu1 %v4012_v37  ;;  %v8503_v0 = vadd.f32 %v1950_v31, %v1580_v51  ;;  %v8505_v37 = vpop.f32.mrf.mxu1  ;;  %v4282_v31 = vmul.f32 %v8335_v6, %v10166_v27  ;;  %v4279_v27 = vmul.f32 %v8335_v6, %v10187_v7 }
 0x4e3   : > { %v3976_v15 = vpop.permute.xlu1 %3975  ;;  %v8508_v18 = vpop.f32.mrf.mxu0  ;;  %v4278_v7 = vmul.f32 %v8329_v13, %v10192_v47 }
 0x4e4   : > { %v4011_v44 = vsel %vm2006_vm3, %v3976_v15, %v3978_v35  ;;  %v3972_v62 = vpop.permute.xlu0 %3971  ;;  %v1592_v63 = vpop.f32.mrf.mxu1  ;;  %v4284_v35 = vmul.f32 %v8329_v13, %v10167_v29 }
 0x4e5   : > { %4430 = vrot.lane.b32.xlu1 %v4287_v22, %s5826_s19  ;;  %4046 = vmatpush1.msra.mxu1 %v4011_v44  ;;  %v1956_v16 = vpop.f32.mrf.mxu0 }
 0x4e6   : > { %4426 = vrot.lane.b32.xlu0 %v4285_v19, %s5826_s19  ;;  %v8516_v51 = vadd.f32 %v1956_v16, %v1586_v39  ;;  %v8518_v44 = vpop.f32.mrf.mxu1 }
 0x4e7   : > { %v3974_v33 = vpop.permute.xlu1 %3973  ;;  %v8521_v19 = vpop.f32.mrf.mxu0 }
 0x4e8   : > { %v3970_v26 = vpop.permute.xlu0 %3969  ;;  %v4010_v15 = vsel %vm2006_vm3, %v3972_v62, %v3974_v33  ;;  %v1598_v29 = vpop.f32.mrf.mxu1 }
 0x4e9   : > { %v4009_v22 = vsel %vm2006_vm3, %v3970_v26, %v3972_v62  ;;  %4428 = vrot.lane.b32.xlu1 %v8361_v49, %s5826_s19  ;;  %4047 = vmatprep.subr.mxu1 %v4010_v15  ;;  %v1962_v62 = vpop.f32.mrf.mxu0 }
 0x4ea   : > { %4424 = vrot.lane.b32.xlu0 %v4284_v35, %s5826_s19  ;;  %4048 = vmatpush1.msra.mxu1 %v4009_v22  ;;  %v8530_v16 = vpop.f32.mrf.mxu1  ;;  %v4281_v35 = vmul.f32 %v8329_v13, %v10165_v55  ;;  %v8547_v5 = vadd.f32 %v1962_v62, %v1592_v63  ;;  %v4276_v62 = vmul.f32 %v8335_v6, %v10193_v28 }
 0x4eb   : > { %v8523_v33 = vpop.permute.xlu1 %4734  ;;  %v8534_v39 = vpop.f32.mrf.mxu0 }
 0x4ec   : > { %v8527_v26 = vpop.permute.xlu0 %4736  ;;  %v1604_v22 = vpop.f32.mrf.mxu1 }
 0x4ed   : > { %4420 = vrot.lane.b32.xlu1 %v4282_v31, %s5826_s19  ;;  %v1968_v25 = vpop.f32.mrf.mxu0 }
 0x4ee   : > { %4422 = vrot.lane.b32.xlu0 %v8361_v49, %s5826_s19  ;;  %v8542_v1 = vpop.f32.mrf.mxu1 }
 0x4ef   : > { %v3966_v15 = vpop.permute.xlu1 %3965  ;;  %10225 = vst [vmem:[#allocation77_spill] sm:$0xff] %v8542_v1  ;;  %v8545_v40 = vpop.f32.mrf.mxu0 }
 0x4f0   : > { %v3968_v9 = vpop.permute.xlu0 %3967  ;;  %v1610_v55 = vpop.f32.mrf.mxu1 }
 0x4f1   : > { %4418 = vrot.lane.b32.xlu1 %v4281_v35, %s5826_s19  ;;  %v4008_v31 = vsel %vm2006_vm3, %v3966_v15, %v3968_v9  ;;  %v8552_v35 = vadd.f32 %v1968_v25, %v1598_v29  ;;  %v1974_v9 = vpop.f32.mrf.mxu0 }
 0x4f2   : > { %4414 = vrot.lane.b32.xlu0 %v4279_v27, %s5826_s19  ;;  %4049 = vmatprep.subr.mxu1 %v4008_v31  ;;  %v8556_v27 = vadd.f32 %v1974_v9, %v1604_v22  ;;  %v8558_v31 = vpop.f32.mrf.mxu1 }
 0x4f3   : > { %v3964_v8 = vpop.permute.xlu1 %3963  ;;  %10226 = vst [vmem:[#allocation5_spill] sm:$0xff] %v8558_v31  ;;  %v8561_v63 = vpop.f32.mrf.mxu0 }
 0x4f4   : > { %v4007_v20 = vsel %vm2006_vm3, %v3964_v8, %v3966_v15  ;;  %v3960_v21 = vpop.permute.xlu0 %3959  ;;  %v1616_v15 = vpop.f32.mrf.mxu1 }
 0x4f5   : > { %4416 = vrot.lane.b32.xlu1 %v8361_v49, %s5826_s19  ;;  %4050 = vmatpush1.msra.mxu1 %v4007_v20  ;;  %v1980_v47 = vpop.f32.mrf.mxu0 }
 0x4f6   : > { %4412 = vrot.lane.b32.xlu0 %v4278_v7, %s5826_s19  ;;  %v8568_v20 = vadd.f32 %v1980_v47, %v1610_v55  ;;  %v8570_v22 = vpop.f32.mrf.mxu1 }
 0x4f7   : > { %v3962_v8 = vpop.permute.xlu1 %3961  ;;  %10228 = vst [vmem:[#allocation60_spill] sm:$0xff] %v8570_v22  ;;  %v8574_v7 = vpop.f32.mrf.mxu0 }
 0x4f8   : > { %v3958_v29 = vpop.permute.xlu0 %3957  ;;  %v4006_v25 = vsel %vm2006_vm3, %v3960_v21, %v3962_v8  ;;  %10227 = vst [vmem:[#allocation17_spill] sm:$0xff] %v8568_v20  ;;  %v4275_v8 = vmul.f32 %v8329_v13, %v10194_v42  ;;  %v2351_v28 = vpop.f32.mrf.mxu1 }
 0x4f9   : > { %v4005_v1 = vsel %vm2006_vm3, %v3958_v29, %v3960_v21  ;;  %4408 = vrot.lane.b32.xlu1 %v4276_v62, %s5826_s19  ;;  %4051 = vmatprep.subr.mxu1 %v4006_v25  ;;  %v4273_v21 = vmul.f32 %v8335_v6, %v10195_v50  ;;  %v1986_v62 = vpop.f32.mrf.mxu0  ;;  %v2446_v55 = vadd.f32 %v2351_v28, %v8346_v32 }
 0x4fa   : > { %4410 = vrot.lane.b32.xlu0 %v8361_v49, %s5826_s19  ;;  %4052 = vmatpush1.msra.mxu1 %v4005_v1  ;;  %v8583_v29 = vadd.f32 %v1986_v62, %v1616_v15  ;;  %v8585_v1 = vpop.f32.mrf.mxu1  ;;  %v4272_v28 = vmul.f32 %v8329_v13, %v10196_v61 }
 0x4fb   : > { %v3954_v9 = vpop.permute.xlu1 %3953  ;;  %v8588_v25 = vpop.f32.mrf.mxu0 }
 0x4fc   : > { %v3956_v31 = vpop.permute.xlu0 %3955  ;;  %v2357_v22 = vpop.f32.mrf.mxu1 }
 0x4fd   : > { %4406 = vrot.lane.b32.xlu1 %v4275_v8, %s5826_s19  ;;  %v4004_v47 = vsel %vm2006_vm3, %v3954_v9, %v3956_v31  ;;  %v2448_v32 = vadd.f32 %v2357_v22, %v8363_v34  ;;  %v2838_v31 = vpop.f32.mrf.mxu0 }
 0x4fe   : > { %4402 = vrot.lane.b32.xlu0 %v4273_v21, %s5826_s19  ;;  %4053 = vmatprep.subr.mxu1 %v4004_v47  ;;  %v8596_v15 = vadd.f32 %v2838_v31, %v2446_v55  ;;  %v8598_v8 = vpop.f32.mrf.mxu1 }
 0x4ff   : > { %v3952_v42 = vpop.permute.xlu1 %3951  ;;  %v8601_v21 = vpop.f32.mrf.mxu0 }
 0x500   : > { %v4003_v50 = vsel %vm2006_vm3, %v3952_v42, %v3954_v9  ;;  %v3948_v20 = vpop.permute.xlu0 %3947  ;;  %v4270_v9 = vmul.f32 %v8335_v6, %v10197_v45  ;;  %v2363_v62 = vpop.f32.mrf.mxu1 }
 0x501   : > { %4404 = vrot.lane.b32.xlu1 %v8361_v49, %s5826_s19  ;;  %4054 = vmatpush1.msra.mxu1 %v4003_v50  ;;  %v2450_v22 = vadd.f32 %v2363_v62, %v8380_v54  ;;  %v2844_v61 = vpop.f32.mrf.mxu0  ;;  %v4269_v54 = vmul.f32 %v8329_v13, %v10198_v2 }
 0x502   : > { %4400 = vrot.lane.b32.xlu0 %v4272_v28, %s5826_s19  ;;  %v8609_v55 = vadd.f32 %v2844_v61, %v2448_v32  ;;  %v8611_v28 = vpop.f32.mrf.mxu1 }
 0x503   : > { %v3950_v42 = vpop.permute.xlu1 %3949  ;;  %v8615_v31 = vpop.f32.mrf.mxu0 }
 0x504   : > { %v3946_v47 = vpop.permute.xlu0 %3945  ;;  %v4002_v34 = vsel %vm2006_vm3, %v3948_v20, %v3950_v42  ;;  %10229 = vst [vmem:[#allocation59_spill] sm:$0xff] %v8609_v55  ;;  %10230 = vst [vmem:[#allocation76_spill] sm:$0xff] %v8615_v31  ;;  %v2369_v42 = vpop.f32.mrf.mxu1 }
 0x505   : > { %v4001_v50 = vsel %vm2006_vm3, %v3946_v47, %v3948_v20  ;;  %4396 = vrot.lane.b32.xlu1 %v4270_v9, %s5826_s19  ;;  %4055 = vmatprep.subr.mxu1 %v4002_v34  ;;  %v4267_v20 = vmul.f32 %v8335_v6, %v10199_v14  ;;  %v2452_v61 = vadd.f32 %v2369_v42, %v8397_v11  ;;  %v2850_v32 = vpop.f32.mrf.mxu0 }
 0x506   : > { %4398 = vrot.lane.b32.xlu0 %v8361_v49, %s5826_s19  ;;  %4056 = vmatpush1.msra.mxu1 %v4001_v50  ;;  %v8625_v9 = vsel %vm1765_vm5, %v8523_v33, %v8527_v26  ;;  %v8629_v34 = vadd.f32 %v2850_v32, %v2450_v22  ;;  %v8631_v50 = vpop.f32.mrf.mxu1 }
 0x507   : > { %v3942_v45 = vpop.permute.xlu1 %3941  ;;  %v8634_v14 = vpop.f32.mrf.mxu0  ;;  %v4788_v31 = vmul.f32 %v8625_v9, %v10203_v36  ;;  %v1929_v36 = vadd.f32 %v8443_v56, %v8421_v57 }
 0x508   : > { %v3944_v62 = vpop.permute.xlu0 %3943  ;;  %v2375_v42 = vpop.f32.mrf.mxu1 }
 0x509   : > { %4394 = vrot.lane.b32.xlu1 %v4269_v54, %s5826_s19  ;;  %v4000_v47 = vsel %vm2006_vm3, %v3942_v45, %v3944_v62  ;;  %v2454_v54 = vadd.f32 %v2375_v42, %v8413_v24  ;;  %v2856_v62 = vpop.f32.mrf.mxu0 }
 0x50a   : > { %4390 = vrot.lane.b32.xlu0 %v4267_v20, %s5826_s19  ;;  %4057 = vmatprep.subr.mxu1 %v4000_v47  ;;  %v8642_v22 = vadd.f32 %v2856_v62, %v2452_v61  ;;  %v8644_v20 = vpop.f32.mrf.mxu1 }
 0x50b   : > { %v3940_v11 = vpop.permute.xlu1 %3939  ;;  %10231 = vst [vmem:[#allocation75_spill] sm:$0xff] %v8644_v20  ;;  %v8647_v32 = vpop.f32.mrf.mxu0 }
 0x50c   : > { %v3999_v2 = vsel %vm2006_vm3, %v3940_v11, %v3942_v45  ;;  %v3936_v55 = vpop.permute.xlu0 %3935  ;;  %v8650_v45 = vmul.f32 0.0, %v8527_v26  ;;  %v2381_v24 = vpop.f32.mrf.mxu1 }
 0x50d   : > { %4392 = vrot.lane.b32.xlu1 %v8361_v49, %s5826_s19  ;;  %4058 = vmatpush1.msra.mxu1 %v3999_v2  ;;  %v4266_v2 = vmul.f32 %v8329_v13, %v10200_v12  ;;  %v2456_v61 = vadd.f32 %v2381_v24, %v8437_v41  ;;  %v2862_v62 = vpop.f32.mrf.mxu0  ;;  %v1935_v41 = vadd.f32 %v8463_v46, %v8439_v3 }
 0x50e   : > { %4947 = vrot.lane.b32.xlu0 %v4788_v31, %s5825_s16  ;;  %v8661_v26 = vadd.f32 %v2862_v62, %v2454_v54  ;;  %v2383_v20 = vpop.f32.mrf.mxu1  ;;  %v4264_v54 = vmul.f32 %v8335_v6, %v10201_v53  ;;  %v1941_v3 = vadd.f32 %v8482_v30, %v8460_v17 }
 0x50f   : > { %v3938_v47 = vpop.permute.xlu1 %3937  ;;  %v8664_v57 = vpop.f32.mrf.mxu0 }
 0x510   : > { %v3934_v11 = vpop.permute.xlu0 %3933  ;;  %v3998_v42 = vsel %vm2006_vm3, %v3936_v55, %v3938_v47  ;;  %v4787_v47 = vmul.f32 %v8523_v33, %v10206_v4  ;;  %v2387_v24 = vpop.f32.mrf.mxu1 }
 0x511   : > { %v3997_v31 = vsel %vm2006_vm3, %v3934_v11, %v3936_v55  ;;  %4949 = vrot.lane.b32.xlu1 %v8650_v45, %s5825_s16  ;;  %4059 = vmatprep.subr.mxu1 %v3998_v42  ;;  %v2457_v55 = vadd.f32 %v2383_v20, %v1929_v36  ;;  %v2458_v42 = vadd.f32 %v2387_v24, %v8458_v59  ;;  %v2868_v62 = vpop.f32.mrf.mxu0 }
 0x512   : > { %4388 = vrot.lane.b32.xlu0 %v4266_v2, %s5826_s19  ;;  %4060 = vmatpush1.msra.mxu1 %v3997_v31  ;;  %v8675_v31 = vadd.f32 %v2868_v62, %v2456_v61  ;;  %v2389_v12 = vpop.f32.mrf.mxu1  ;;  %v4785_v61 = vmul.f32 %v8625_v9, %v10209_v10 }
 0x513   : > { %v3930_v56 = vpop.permute.xlu1 %3929  ;;  %v2870_v4 = vpop.f32.mrf.mxu0  ;;  %v2459_v20 = vadd.f32 %v2389_v12, %v1935_v41 }
 0x514   : > { %v3932_v11 = vpop.permute.xlu0 %3931  ;;  %v8680_v36 = vadd.f32 %v2870_v4, %v2457_v55  ;;  %v2393_v59 = vpop.f32.mrf.mxu1  ;;  %v10232_v4 = vld [vmem:[#allocation31_spill] sm:$0xff] }
 0x515   : > { %4945 = vrot.lane.b32.xlu1 %v4787_v47, %s5825_s16  ;;  %v3996_v2 = vsel %vm2006_vm3, %v3930_v56, %v3932_v11  ;;  %v2460_v11 = vadd.f32 %v2393_v59, %v8477_v52  ;;  %v2874_v62 = vpop.f32.mrf.mxu0 }
 0x516   : > { %4384 = vrot.lane.b32.xlu0 %v4264_v54, %s5826_s19  ;;  %4061 = vmatprep.subr.mxu1 %v3996_v2  ;;  %v8688_v54 = vadd.f32 %v2874_v62, %v2458_v42  ;;  %v2395_v30 = vpop.f32.mrf.mxu1 }
 0x517   : > { %v3928_v46 = vpop.permute.xlu1 %3927  ;;  %v2876_v12 = vpop.f32.mrf.mxu0  ;;  %v2461_v41 = vadd.f32 %v2395_v30, %v1941_v3 }
 0x518   : > { %v3995_v24 = vsel %vm2006_vm3, %v3928_v46, %v3930_v56  ;;  %v3924_v47 = vpop.permute.xlu0 %3923  ;;  %v1947_v56 = vadd.f32 %v8495_v43, %v8479_v23  ;;  %v8693_v55 = vadd.f32 %v2876_v12, %v2459_v20  ;;  %v2399_v10 = vpop.f32.mrf.mxu1  ;;  %v4263_v46 = vmul.f32 %v8329_v13, %v10232_v4 }
 0x519   : > { %4386 = vrot.lane.b32.xlu1 %v8361_v49, %s5826_s19  ;;  %4062 = vmatpush1.msra.mxu1 %v3995_v24  ;;  %v2462_v42 = vadd.f32 %v2399_v10, %v8488_v48  ;;  %v2880_v59 = vpop.f32.mrf.mxu0  ;;  %v1953_v48 = vadd.f32 %v8508_v18, %v8490_v38 }
 0x51a   : > { %4941 = vrot.lane.b32.xlu0 %v4785_v61, %s5825_s16  ;;  %v8702_v23 = vadd.f32 %v2880_v59, %v2460_v11  ;;  %v2401_v43 = vpop.f32.mrf.mxu1  ;;  %v4784_v61 = vmul.f32 %v8523_v33, %v10212_v60 }
 0x51b   : > { %v3926_v17 = vpop.permute.xlu1 %3925  ;;  %v2882_v3 = vpop.f32.mrf.mxu0  ;;  %v2463_v62 = vadd.f32 %v2401_v43, %v1947_v56  ;;  %v1959_v56 = vadd.f32 %v8521_v19, %v8505_v37  ;;  %v1965_v19 = vadd.f32 %v8534_v39, %v8518_v44 }
 0x51c   : > { %v3922_v52 = vpop.permute.xlu0 %3921  ;;  %v3994_v2 = vsel %vm2006_vm3, %v3924_v47, %v3926_v17  ;;  %v2405_v30 = vpop.f32.mrf.mxu1  ;;  %v10233_v17 = vld [vmem:[#allocation30_spill] sm:$0xff] }
 0x51d   : > { %v3993_v24 = vsel %vm2006_vm3, %v3922_v52, %v3924_v47  ;;  %4943 = vrot.lane.b32.xlu1 %v8650_v45, %s5825_s16  ;;  %4063 = vmatprep.subr.mxu1 %v3994_v2  ;;  %v8709_v47 = vadd.f32 %v2882_v3, %v2461_v41  ;;  %v4261_v11 = vmul.f32 %v8335_v6, %v10233_v17  ;;  %v2886_v52 = vpop.f32.mrf.mxu0 }
 0x51e   : > { %4382 = vrot.lane.b32.xlu0 %v4263_v46, %s5826_s19  ;;  %4064 = vmatpush1.msra.mxu1 %v3993_v24  ;;  %v2464_v10 = vadd.f32 %v2405_v30, %v8503_v0  ;;  %v8716_v46 = vadd.f32 %v2886_v52, %v2462_v42  ;;  %v2407_v60 = vpop.f32.mrf.mxu1  ;;  %v4782_v42 = vmul.f32 %v8625_v9, %v10213_v58  ;;  %v10234_v52 = vld [vmem:[#allocation29_spill] sm:$0xff] }
 0x51f   : > { %v3918_v20 = vpop.permute.xlu1 %3917  ;;  %v2888_v18 = vpop.f32.mrf.mxu0  ;;  %v2465_v41 = vadd.f32 %v2407_v60, %v1953_v48 }
 0x520   : > { %v3920_v12 = vpop.permute.xlu0 %3919  ;;  %v8721_v59 = vadd.f32 %v2888_v18, %v2463_v62  ;;  %v2411_v0 = vpop.f32.mrf.mxu1 }
 0x521   : > { %4939 = vrot.lane.b32.xlu1 %v4784_v61, %s5825_s16  ;;  %v3992_v2 = vsel %vm2006_vm3, %v3918_v20, %v3920_v12  ;;  %v2466_v3 = vadd.f32 %v2411_v0, %v8516_v51  ;;  %v2892_v61 = vpop.f32.mrf.mxu0 }
 0x522   : > { %4378 = vrot.lane.b32.xlu0 %v4261_v11, %s5826_s19  ;;  %4065 = vmatprep.subr.mxu1 %v3992_v2  ;;  %v8729_v30 = vadd.f32 %v2892_v61, %v2464_v10  ;;  %v2413_v37 = vpop.f32.mrf.mxu1  ;;  %v4260_v2 = vmul.f32 %v8329_v13, %v10234_v52 }
 0x523   : > { %v3916_v38 = vpop.permute.xlu1 %3915  ;;  %v2467_v62 = vadd.f32 %v2413_v37, %v1959_v56  ;;  %v10236_v37 = vld [vmem:[#allocation28_spill] sm:$0xff] }
 0x524   : > { %v3991_v24 = vsel %vm2006_vm3, %v3916_v38, %v3918_v20  ;;  %v3912_v43 = vpop.permute.xlu0 %3911  ;;  %v2894_v20 = vpop.f32.mrf.mxu0  ;;  %v1971_v38 = vadd.f32 %v8545_v40, %v8530_v16 }
 0x525   : > { %4380 = vrot.lane.b32.xlu1 %v8361_v49, %s5826_s19  ;;  %4066 = vmatpush1.msra.mxu1 %v3991_v24  ;;  %v8734_v12 = vadd.f32 %v2894_v20, %v2465_v41  ;;  %v2417_v58 = vpop.f32.mrf.mxu1 }
 0x526   : > { %4935 = vrot.lane.b32.xlu0 %v4782_v42, %s5825_s16  ;;  %v2468_v10 = vadd.f32 %v2417_v58, %v8547_v5  ;;  %v2898_v60 = vpop.f32.mrf.mxu0  ;;  %v10235_v5 = vld [vmem:[#allocation53_spill] sm:$0xff] }
 0x527   : > { %v3914_v48 = vpop.permute.xlu1 %3913  ;;  %v8743_v44 = vadd.f32 %v2898_v60, %v2466_v3  ;;  %v2419_v39 = vpop.f32.mrf.mxu1  ;;  %v4781_v24 = vmul.f32 %v8523_v33, %v10235_v5  ;;  %v4258_v3 = vmul.f32 %v8335_v6, %v10236_v37 }
 0x528   : > { %v3910_v51 = vpop.permute.xlu0 %3909  ;;  %v3990_v11 = vsel %vm2006_vm3, %v3912_v43, %v3914_v48  ;;  %v2469_v56 = vadd.f32 %v2419_v39, %v1965_v19  ;;  %v2900_v41 = vpop.f32.mrf.mxu0  ;;  %v10238_v39 = vld [vmem:[#allocation52_spill] sm:$0xff] }
 0x529   : > { %v3989_v18 = vsel %vm2006_vm3, %v3910_v51, %v3912_v43  ;;  %4937 = vrot.lane.b32.xlu1 %v8650_v45, %s5825_s16  ;;  %4067 = vmatprep.subr.mxu1 %v3990_v11  ;;  %v8750_v43 = vadd.f32 %v2900_v41, %v2467_v62  ;;  %v2423_v42 = vpop.f32.mrf.mxu1  ;;  %v10237_v62 = vld [vmem:[#allocation77_spill] sm:$0xff] }
 0x52a   : > { %4376 = vrot.lane.b32.xlu0 %v4260_v2, %s5826_s19  ;;  %4068 = vmatpush1.msra.mxu1 %v3989_v18  ;;  %v2470_v20 = vadd.f32 %v2423_v42, %v8552_v35  ;;  %v2904_v48 = vpop.f32.mrf.mxu0  ;;  %v1977_v58 = vadd.f32 %v8561_v63, %v10237_v62  ;;  %v10242_v62 = vld [vmem:[#allocation27_spill] sm:$0xff] }
 0x52b   : > { %v3906_v0 = vpop.permute.xlu1 %3905  ;;  %v8757_v16 = vadd.f32 %v2904_v48, %v2468_v10  ;;  %v2425_v19 = vpop.f32.mrf.mxu1  ;;  %v4779_v10 = vmul.f32 %v8625_v9, %v10238_v39  ;;  %v10241_v48 = vld [vmem:[#allocation5_spill] sm:$0xff] }
 0x52c   : > { %v3908_v61 = vpop.permute.xlu0 %3907  ;;  %v2471_v51 = vadd.f32 %v2425_v19, %v1971_v38  ;;  %v2906_v11 = vpop.f32.mrf.mxu0 }
 0x52d   : > { %4933 = vrot.lane.b32.xlu1 %v4781_v24, %s5825_s16  ;;  %v3988_v40 = vsel %vm2006_vm3, %v3906_v0, %v3908_v61  ;;  %v8762_v6 = vadd.f32 %v2906_v11, %v2469_v56  ;;  %v2429_v35 = vpop.f32.mrf.mxu1  ;;  %v10240_v61 = vld [vmem:[#allocation24_spill] sm:$0xff] }
 0x52e   : > { %4372 = vrot.lane.b32.xlu0 %v4258_v3, %s5826_s19  ;;  %4069 = vmatprep.subr.mxu1 %v3988_v40  ;;  %v2472_v41 = vadd.f32 %v2429_v35, %v8556_v27  ;;  %v2910_v5 = vpop.f32.mrf.mxu0  ;;  %v1983_v40 = vadd.f32 %v8574_v7, %v10241_v48  ;;  %v10244_v35 = vld [vmem:[#allocation9_spill] sm:$0xff]  ;;  %v10250_v48 = vld [vmem:[#allocation51_spill] sm:$0xff] }
 0x52f   : > { %v3904_v2 = vpop.permute.xlu1 %3903  ;;  %v8770_v63 = vadd.f32 %v2910_v5, %v2470_v20  ;;  %v2431_v38 = vpop.f32.mrf.mxu1  ;;  %v4257_v20 = vmul.f32 %v8329_v13, %v10242_v62  ;;  %v10246_v7 = vld [vmem:[#allocation17_spill] sm:$0xff]  ;;  %v10247_v5 = vld [vmem:[#allocation67_spill] sm:$0xff] }
 0x530   : > { %v3987_v60 = vsel %vm2006_vm3, %v3904_v2, %v3906_v0  ;;  %v3900_v18 = vpop.permute.xlu0 %3899  ;;  %v2473_v56 = vadd.f32 %v2431_v38, %v1977_v58  ;;  %v2912_v24 = vpop.f32.mrf.mxu0  ;;  %v10239_v0 = vld [vmem:[#allocation12_spill] sm:$0xff]  ;;  %v10243_v58 = vld [vmem:[#allocation78_spill] sm:$0xff] }
 0x531   : > { %4374 = vrot.lane.b32.xlu1 %v8361_v49, %s5826_s19  ;;  %4070 = vmatpush1.msra.mxu1 %v3987_v60  ;;  %v1899_v3 = vadd.f32 %v10240_v61, %v10239_v0  ;;  %v8777_v27 = vadd.f32 %v2912_v24, %v2471_v51  ;;  %v2435_v11 = vpop.f32.mrf.mxu1  ;;  %v3985_v2 = vsel %vm2006_vm3, %v10243_v58, %v3900_v18  ;;  %v10245_v60 = vld [vmem:[#allocation10_spill] sm:$0xff]  ;;  %v10248_v38 = vld [vmem:[#allocation68_spill] sm:$0xff] }
 0x532   : > { %4929 = vrot.lane.b32.xlu0 %v4779_v10, %s5825_s16  ;;  %v1905_v39 = vadd.f32 %v10245_v60, %v10244_v35  ;;  %v2474_v51 = vadd.f32 %v2435_v11, %v10246_v7  ;;  %v2916_v10 = vpop.f32.mrf.mxu0  ;;  %v3984_v13 = vsel %vm2006_vm3, %v10248_v38, %v10247_v5  ;;  %v10249_v24 = vld [vmem:[#allocation20_spill] sm:$0xff]  ;;  %v10253_v5 = vld [vmem:[#allocation79_spill] sm:$0xff] }
 0x533   : > { %v3902_v42 = vpop.permute.xlu1 %3901  ;;  %v8796_v0 = vadd.f32 %v2916_v10, %v2472_v41  ;;  %v10251_v11 = vld [vmem:[#allocation60_spill] sm:$0xff]  ;;  %v2447_v58 = vadd.f32 %v8585_v1, %v1899_v3  ;;  %v5708_v1 = vld [vmem:[%s9834_s5 + $0x300] sm:$0xff] }
 0x534   : > { %v4463_v19 = vpop.permute.xlu0 %4462  ;;  %v3986_v49 = vsel %vm2006_vm3, %v3900_v18, %v3902_v42  ;;  %v3983_v42 = vsel %vm2006_vm3, %v10249_v24, %v10248_v38  ;;  %v2437_v18 = vpop.f32.mrf.mxu1  ;;  %v10252_v7 = vld [vmem:[#allocation8_spill] sm:$0xff]  ;;  %v10254_v38 = vld [vmem:[#allocation50_spill] sm:$0xff] }
 0x535   : > { %4931 = vrot.lane.b32.xlu1 %v8650_v45, %s5825_s16  ;;  %4071 = vmatprep.subr.mxu1 %v3986_v49  ;;  %v4778_v49 = vmul.f32 %v8523_v33, %v10250_v48  ;;  %v2918_v35 = vpop.f32.mrf.mxu0  ;;  %v3982_v41 = vsel %vm2006_vm3, %v10253_v5, %v10252_v7 }
 0x536   : > { %4370 = vrot.lane.b32.xlu0 %v4257_v20, %s5826_s19  ;;  %4072 = vmatpush1.msra.mxu1 %v3985_v2  ;;  %v1989_v20 = vadd.f32 %v8588_v25, %v10251_v11  ;;  %v2475_v2 = vadd.f32 %v2437_v18, %v1983_v40  ;;  %v8809_v24 = vadd.f32 %v2918_v35, %v2473_v56  ;;  %v2441_v48 = vpop.f32.mrf.mxu1  ;;  %v10256_v18 = vld [vmem:[#allocation21_spill] sm:$0xff] }
 0x537   : > { %4073 = vmatprep.subr.mxu1 %v3984_v13  ;;  %v4465_v61 = vpop.permute.xlu1 %4464  ;;  %v4776_v13 = vmul.f32 %v8625_v9, %v10254_v38  ;;  %v2476_v3 = vadd.f32 %v2441_v48, %v8583_v29  ;;  %v2922_v40 = vpop.f32.mrf.mxu0  ;;  %v2934_v29 = vadd.f32 %v8601_v21, %v2447_v58  ;;  %v10258_v38 = vld [vmem:[#allocation49_spill] sm:$0xff]  ;;  %v10261_v58 = vld [vmem:[#allocation74_spill] sm:$0xff] }
 0x538   : > { %v4461_v60 = vpop.permute.xlu0 %4460  ;;  %4074 = vmatpush1.msra.mxu1 %v3983_v42  ;;  %v4497_v10 = vsel %vm1181_vm1, %v4463_v19, %v4465_v61  ;;  %v10255_v42 = vld [vmem:[#allocation73_spill] sm:$0xff]  ;;  %v10257_v61 = vld [vmem:[#allocation7_spill] sm:$0xff]  ;;  %v8823_v11 = vadd.f32 %v2922_v40, %v2474_v51  ;;  %v10259_v51 = vmov 0.0  }
 0x539   : > { %v4496_v25 = vsel %vm1181_vm1, %v4461_v60, %v4463_v19  ;;  %4927 = vrot.lane.b32.xlu1 %v4778_v49, %s5825_s16  ;;  %4075 = vmatprep.subr.mxu1 %v3982_v41  ;;  %v3981_v56 = vsel %vm2006_vm3, %v10255_v42, %v10253_v5  ;;  %v1911_v19 = vadd.f32 %v10257_v61, %v10256_v18  ;;  %v2443_v49 = vpop.f32.mrf.mxu1  ;;  %v2924_v41 = vpop.f32.mrf.mxu0 }
 0x53a   : > { %4530 = vmatprep.subr.mxu0 %v4497_v10  ;;  %4923 = vrot.lane.b32.xlu0 %v4776_v13, %s5825_s16  ;;  %v2449_v60 = vadd.f32 %v8598_v8, %v1905_v39  ;;  %v2477_v7 = vadd.f32 %v2443_v49, %v1989_v20  ;;  %v4775_v5 = vmul.f32 %v8523_v33, %v10258_v38  ;;  %v5709_v8 = vld [vmem:[%s9834_s5 + $0x308] sm:$0xff]  ;;  %v10260_v20 = vld [vmem:[#allocation22_spill] sm:$0xff] }
 0x53b   : > { %4076 = vmatpush1.msra.mxu1 %v3981_v56  ;;  %4531 = vmatpush1.msra.mxu0 %v4496_v25  ;;  %v4457_v35 = vpop.permute.xlu1 %4456  ;;  %v8829_v13 = vadd.f32 %v2924_v41, %v2475_v2  ;;  %v3093_v48 = vpop.f32.mrf.mxu1  ;;  %v1917_v2 = vadd.f32 %v10261_v58, %v10260_v20  ;;  %v10262_v56 = vld [vmem:[#allocation48_spill] sm:$0xff]  ;;  %v2451_v61 = vadd.f32 %v8611_v28, %v1911_v19  ;;  %v10265_v28 = vld [vmem:[#allocation59_spill] sm:$0xff] }
 0x53c   : > { %4110 = vmatmul.mubr.f32.vlgmr.msra.gmra.mxu1 %v5708_v1  ;;  %v4459_v10 = vpop.permute.xlu0 %4458  ;;  %v2928_v21 = vpop.f32.mrf.mxu0  ;;  %v8839_v39 = vadd.f32 %v3093_v48, %v8596_v15  ;;  %v4773_v18 = vmul.f32 %v8625_v9, %v10262_v56  ;;  %v10263_v49 = vld [vmem:[#allocation76_spill] sm:$0xff] }
 0x53d   : > { %4925 = vrot.lane.b32.xlu1 %v8650_v45, %s5825_s16  ;;  %4115 = vmatprep.mubr.f32.mxu1 %v10259_v51  ;;  %v4495_v25 = vsel %vm1181_vm1, %v4457_v35, %v4459_v10  ;;  %v8844_v1 = vadd.f32 %v2928_v21, %v2476_v3  ;;  %v3095_v40 = vpop.f32.mrf.mxu1  ;;  %v2936_v41 = vadd.f32 %v10263_v49, %v2449_v60 }
 0x53e   : > { %4921 = vrot.lane.b32.xlu0 %v4775_v5, %s5825_s16  ;;  %4532 = vmatprep.subr.mxu0 %v4495_v25  ;;  %v2930_v10 = vpop.f32.mrf.mxu0  ;;  %v8850_v15 = vadd.f32 %v3095_v40, %v2934_v29  ;;  %v5710_v25 = vld [vmem:[%s9834_s5 + $0x310] sm:$0xff]  ;;  %v10266_v29 = vld [vmem:[#allocation47_spill] sm:$0xff]  ;;  %v2938_v21 = vadd.f32 %v8634_v14, %v2451_v61 }
 0x53f   : > { %v4455_v42 = vpop.permute.xlu1 %4454  ;;  %v8853_v48 = vadd.f32 %v2930_v10, %v2477_v7  ;;  %v3099_v3 = vpop.f32.mrf.mxu1  ;;  %v4772_v7 = vmul.f32 %v8523_v33, %v10266_v29  ;;  %v10269_v10 = vld [vmem:[#allocation80_spill] sm:$0xff]  ;;  %v5712_v29 = vld [vmem:[%s9834_s5 + $0x320] sm:$0xff] }
 0x540   : > { %4116 = vmatmul.mubr.f32.gmra.mxu1 %v5709_v8  ;;  %v4494_v38 = vsel %vm1181_vm1, %v4455_v42, %v4457_v35  ;;  %v4451_v5 = vpop.permute.xlu0 %4450  ;;  %v8860_v19 = vadd.f32 %v3099_v3, %v10265_v28  ;;  %v2453_v8 = vadd.f32 %v8631_v50, %v1917_v2  ;;  %v10267_v42 = vld [vmem:[#allocation46_spill] sm:$0xff]  ;;  %v10270_v28 = vld [vmem:[#allocation45_spill] sm:$0xff] }
 0x541   : > { %10264 = vst [vmem:[#allocation6_spill] sm:$0xff] %v8853_v48  ;;  %4917 = vrot.lane.b32.xlu1 %v4773_v18, %s5825_s16  ;;  %4533 = vmatpush1.msra.mxu0 %v4494_v38  ;;  %v3101_v35 = vpop.f32.mrf.mxu1  ;;  %v4770_v56 = vmul.f32 %v8625_v9, %v10267_v42  ;;  %v5711_v50 = vld [vmem:[%s9834_s5 + $0x318] sm:$0xff] }
 0x542   : > { %4919 = vrot.lane.b32.xlu0 %v8650_v45, %s5825_s16  ;;  %4121 = vmatprep.mubr.f32.mxu1 %v10259_v51  ;;  %v8869_v20 = vadd.f32 %v3101_v35, %v2936_v41  ;;  %v10268_v41 = vld [vmem:[#allocation19_spill] sm:$0xff] }
 0x543   : > { %v4453_v60 = vpop.permute.xlu1 %4452  ;;  %v3105_v18 = vpop.f32.mrf.mxu1  ;;  %v1923_v38 = vadd.f32 %v10269_v10, %v10268_v41 }
 0x544   : > { %4122 = vmatmul.mubr.f32.gmra.mxu1 %v5710_v25  ;;  %v4449_v58 = vpop.permute.xlu0 %4448  ;;  %v4493_v40 = vsel %vm1181_vm1, %v4451_v5, %v4453_v60  ;;  %v8880_v14 = vadd.f32 %v3105_v18, %v8629_v34  ;;  %v4769_v34 = vmul.f32 %v8523_v33, %v10270_v28 }
 0x545   : > { %v4492_v49 = vsel %vm1181_vm1, %v4449_v58, %v4451_v5  ;;  %4915 = vrot.lane.b32.xlu1 %v4772_v7, %s5825_s16  ;;  %4534 = vmatprep.subr.mxu0 %v4493_v40  ;;  %v3107_v2 = vpop.f32.mrf.mxu1  ;;  %v2940_v5 = vadd.f32 %v8647_v32, %v2453_v8  ;;  %v10272_v40 = vld [vmem:[#allocation75_spill] sm:$0xff] }
 0x546   : > { %4911 = vrot.lane.b32.xlu0 %v4770_v56, %s5825_s16  ;;  %4127 = vmatprep.mubr.f32.mxu1 %v10259_v51  ;;  %v8887_v3 = vadd.f32 %v3107_v2, %v2938_v21  ;;  %v10271_v21 = vld [vmem:[#allocation44_spill] sm:$0xff]  ;;  %v2455_v42 = vadd.f32 %v10272_v40, %v1923_v38  ;;  %v10273_v2 = vld [vmem:[#allocation43_spill] sm:$0xff] }
 0x547   : > { %4535 = vmatpush1.msra.mxu0 %v4492_v49  ;;  %v4445_v61 = vpop.permute.xlu1 %4444  ;;  %v3111_v35 = vpop.f32.mrf.mxu1  ;;  %v4767_v58 = vmul.f32 %v8625_v9, %v10271_v21  ;;  %v4766_v41 = vmul.f32 %v8523_v33, %v10273_v2  ;;  %v10275_v21 = vld [vmem:[#allocation41_spill] sm:$0xff] }
 0x548   : > { %4128 = vmatmul.mubr.f32.gmra.mxu1 %v5711_v50  ;;  %v4447_v25 = vpop.permute.xlu0 %4446  ;;  %v8899_v32 = vadd.f32 %v3111_v35, %v8642_v22  ;;  %v5713_v22 = vld [vmem:[%s9834_s5 + $0x328] sm:$0xff]  ;;  %v2942_v10 = vadd.f32 %v8664_v57, %v2455_v42  ;;  %v5714_v35 = vld [vmem:[%s9834_s5 + $0x330] sm:$0xff]  ;;  %v5715_v42 = vld [vmem:[%s9834_s5 + $0x338] sm:$0xff] }
 0x549   : > { %4913 = vrot.lane.b32.xlu1 %v8650_v45, %s5825_s16  ;;  %4133 = vmatprep.mubr.f32.mxu1 %v10259_v51  ;;  %v4491_v60 = vsel %vm1181_vm1, %v4445_v61, %v4447_v25  ;;  %v3113_v7 = vpop.f32.mrf.mxu1 }
 0x54a   : > { %4909 = vrot.lane.b32.xlu0 %v4769_v34, %s5825_s16  ;;  %4536 = vmatprep.subr.mxu0 %v4491_v60  ;;  %v8905_v56 = vadd.f32 %v3113_v7, %v2940_v5  ;;  %v10274_v5 = vld [vmem:[#allocation42_spill] sm:$0xff] }
 0x54b   : > { %v4443_v8 = vpop.permute.xlu1 %4442  ;;  %v4764_v25 = vmul.f32 %v8625_v9, %v10274_v5  ;;  %v3117_v28 = vpop.f32.mrf.mxu1 }
 0x54c   : > { %4134 = vmatmul.mubr.f32.gmra.mxu1 %v5712_v29  ;;  %v4490_v18 = vsel %vm1181_vm1, %v4443_v8, %v4445_v61  ;;  %v4439_v49 = vpop.permute.xlu0 %4438  ;;  %v8927_v60 = vadd.f32 %v3117_v28, %v8661_v26  ;;  %v10277_v28 = vld [vmem:[#allocation39_spill] sm:$0xff] }
 0x54d   : > { %4905 = vrot.lane.b32.xlu1 %v4767_v58, %s5825_s16  ;;  %4537 = vmatpush1.msra.mxu0 %v4490_v18  ;;  %v3119_v57 = vpop.f32.mrf.mxu1  ;;  %v4763_v58 = vmul.f32 %v8523_v33, %v10275_v21 }
 0x54e   : > { %4907 = vrot.lane.b32.xlu0 %v8650_v45, %s5825_s16  ;;  %4139 = vmatprep.mubr.f32.mxu1 %v10259_v51  ;;  %v8931_v7 = vadd.f32 %v3119_v57, %v2942_v10 }
 0x54f   : > { %v4441_v50 = vpop.permute.xlu1 %4440  ;;  %v3123_v40 = vpop.f32.mrf.mxu1 }
 0x550   : > { %4140 = vmatmul.mubr.f32.gmra.mxu1 %v5713_v22  ;;  %v4437_v61 = vpop.permute.xlu0 %4436  ;;  %v4489_v38 = vsel %vm1181_vm1, %v4439_v49, %v4441_v50  ;;  %v8943_v18 = vadd.f32 %v3123_v40, %v8675_v31  ;;  %v10276_v50 = vld [vmem:[#allocation40_spill] sm:$0xff]  ;;  %v5716_v31 = vld [vmem:[%s9834_s5 + $0x340] sm:$0xff] }
 0x551   : > { %v4488_v34 = vsel %vm1181_vm1, %v4437_v61, %v4439_v49  ;;  %4903 = vrot.lane.b32.xlu1 %v4766_v41, %s5825_s16  ;;  %4538 = vmatprep.subr.mxu0 %v4489_v38  ;;  %v3125_v49 = vpop.f32.mrf.mxu1  ;;  %v4761_v2 = vmul.f32 %v8625_v9, %v10276_v50  ;;  %v5717_v40 = vld [vmem:[%s9834_s5 + $0x348] sm:$0xff]  ;;  %v10279_v50 = vld [vmem:[#allocation37_spill] sm:$0xff] }
 0x552   : > { %4899 = vrot.lane.b32.xlu0 %v4764_v25, %s5825_s16  ;;  %4145 = vmatprep.mubr.f32.mxu1 %v10259_v51  ;;  %v8949_v41 = vadd.f32 %v3125_v49, %v8680_v36 }
 0x553   : > { %4539 = vmatpush1.msra.mxu0 %v4488_v34  ;;  %v4433_v29 = vpop.permute.xlu1 %4432  ;;  %v3129_v38 = vpop.f32.mrf.mxu1  ;;  %v4760_v34 = vmul.f32 %v8523_v33, %v10277_v28 }
 0x554   : > { %4146 = vmatmul.mubr.f32.gmra.mxu1 %v5714_v35  ;;  %v4435_v8 = vpop.permute.xlu0 %4434  ;;  %v8957_v5 = vadd.f32 %v3129_v38, %v8688_v54 }
 0x555   : > { %4901 = vrot.lane.b32.xlu1 %v8650_v45, %s5825_s16  ;;  %4151 = vmatprep.mubr.f32.mxu1 %v10259_v51  ;;  %v4487_v26 = vsel %vm1181_vm1, %v4433_v29, %v4435_v8  ;;  %v3131_v36 = vpop.f32.mrf.mxu1  ;;  %v10278_v8 = vld [vmem:[#allocation38_spill] sm:$0xff] }
 0x556   : > { %4897 = vrot.lane.b32.xlu0 %v4763_v58, %s5825_s16  ;;  %4540 = vmatprep.subr.mxu0 %v4487_v26  ;;  %v8965_v35 = vadd.f32 %v3131_v36, %v8693_v55  ;;  %v4758_v54 = vmul.f32 %v8625_v9, %v10278_v8  ;;  %v10280_v36 = vld [vmem:[#allocation36_spill] sm:$0xff] }
 0x557   : > { %v4431_v22 = vpop.permute.xlu1 %4430  ;;  %v3135_v21 = vpop.f32.mrf.mxu1 }
 0x558   : > { %4152 = vmatmul.mubr.f32.gmra.mxu1 %v5715_v42  ;;  %v4486_v10 = vsel %vm1181_vm1, %v4431_v22, %v4433_v29  ;;  %v4427_v61 = vpop.permute.xlu0 %4426  ;;  %v8976_v55 = vadd.f32 %v3135_v21, %v8702_v23 }
 0x559   : > { %4893 = vrot.lane.b32.xlu1 %v4761_v2, %s5825_s16  ;;  %4541 = vmatpush1.msra.mxu0 %v4486_v10  ;;  %v3137_v26 = vpop.f32.mrf.mxu1  ;;  %v4757_v2 = vmul.f32 %v8523_v33, %v10279_v50 }
 0x55a   : > { %4895 = vrot.lane.b32.xlu0 %v8650_v45, %s5825_s16  ;;  %4157 = vmatprep.mubr.f32.mxu1 %v10259_v51  ;;  %v8981_v49 = vadd.f32 %v3137_v26, %v8709_v47 }
 0x55b   : > { %v4429_v25 = vpop.permute.xlu1 %4428  ;;  %v3141_v10 = vpop.f32.mrf.mxu1 }
 0x55c   : > { %4158 = vmatmul.mubr.f32.gmra.mxu1 %v5716_v31  ;;  %v4425_v57 = vpop.permute.xlu0 %4424  ;;  %v4485_v29 = vsel %vm1181_vm1, %v4427_v61, %v4429_v25  ;;  %v8993_v47 = vadd.f32 %v3141_v10, %v8716_v46  ;;  %v4755_v25 = vmul.f32 %v8625_v9, %v10280_v36  ;;  %v5719_v46 = vld [vmem:[%s9834_s5 + $0x358] sm:$0xff] }
 0x55d   : > { %v4484_v58 = vsel %vm1181_vm1, %v4425_v57, %v4427_v61  ;;  %4891 = vrot.lane.b32.xlu1 %v4760_v34, %s5825_s16  ;;  %4542 = vmatprep.subr.mxu0 %v4485_v29  ;;  %v5718_v61 = vld [vmem:[%s9834_s5 + $0x350] sm:$0xff]  ;;  %v3143_v38 = vpop.f32.mrf.mxu1 }
 0x55e   : > { %4887 = vrot.lane.b32.xlu0 %v4758_v54, %s5825_s16  ;;  %4163 = vmatprep.mubr.f32.mxu1 %v10259_v51  ;;  %v8999_v28 = vadd.f32 %v3143_v38, %v8721_v59 }
 0x55f   : > { %4543 = vmatpush1.msra.mxu0 %v4484_v58  ;;  %v4421_v42 = vpop.permute.xlu1 %4420  ;;  %v3147_v54 = vpop.f32.mrf.mxu1 }
 0x560   : > { %4164 = vmatmul.mubr.f32.gmra.mxu1 %v5717_v40  ;;  %v4423_v22 = vpop.permute.xlu0 %4422  ;;  %v9013_v21 = vadd.f32 %v3147_v54, %v8729_v30  ;;  %v10281_v40 = vld [vmem:[#allocation35_spill] sm:$0xff] }
 0x561   : > { %4889 = vrot.lane.b32.xlu1 %v8650_v45, %s5825_s16  ;;  %4169 = vmatprep.mubr.f32.mxu1 %v10259_v51  ;;  %v4483_v23 = vsel %vm1181_vm1, %v4421_v42, %v4423_v22  ;;  %v4754_v26 = vmul.f32 %v8523_v33, %v10281_v40  ;;  %v3149_v22 = vpop.f32.mrf.mxu1 }
 0x562   : > { %4885 = vrot.lane.b32.xlu0 %v4757_v2, %s5825_s16  ;;  %4544 = vmatprep.subr.mxu0 %v4483_v23  ;;  %v10282_v2 = vld [vmem:[#allocation34_spill] sm:$0xff] }
 0x563   : > { %v4419_v31 = vpop.permute.xlu1 %4418  ;;  %v4752_v10 = vmul.f32 %v8625_v9, %v10282_v2 }
 0x564   : > { %4170 = vmatmul.mubr.f32.gmra.mxu1 %v5718_v61  ;;  %v4482_v34 = vsel %vm1181_vm1, %v4419_v31, %v4421_v42  ;;  %v4415_v57 = vpop.permute.xlu0 %4414  ;;  %v3626_v29 = vpop.f32.mrf.mxu0  ;;  %v9024_v61 = vadd.f32 %v3149_v22, %v8734_v12 }
 0x565   : > { %4881 = vrot.lane.b32.xlu1 %v4755_v25, %s5825_s16  ;;  %4545 = vmatpush1.msra.mxu0 %v4482_v34  ;;  %v9007_v8 = vadd.f32 %v3626_v29, %v8839_v39  ;;  %v3153_v31 = vpop.f32.mrf.mxu1 }
 0x566   : > { %4883 = vrot.lane.b32.xlu0 %v8650_v45, %s5825_s16  ;;  %4175 = vmatprep.mubr.f32.mxu1 %v10259_v51  ;;  %v3628_v59 = vpop.f32.mrf.mxu0  ;;  %v9037_v12 = vadd.f32 %v3153_v31, %v8743_v44 }
 0x567   : > { %v4417_v58 = vpop.permute.xlu1 %4416  ;;  %v9018_v42 = vadd.f32 %v3628_v59, %v8850_v15  ;;  %v5720_v15 = vld [vmem:[%s9834_s5 + $0x360] sm:$0xff] }
 0x568   : > { %4176 = vmatmul.mubr.f32.gmra.mxu1 %v5719_v46  ;;  %v4413_v39 = vpop.permute.xlu0 %4412  ;;  %v4481_v50 = vsel %vm1181_vm1, %v4415_v57, %v4417_v58  ;;  %v3632_v23 = vpop.f32.mrf.mxu0  ;;  %v10283_v46 = vld [vmem:[#allocation33_spill] sm:$0xff] }
 0x569   : > { %v4480_v30 = vsel %vm1181_vm1, %v4413_v39, %v4415_v57  ;;  %4879 = vrot.lane.b32.xlu1 %v4754_v26, %s5825_s16  ;;  %4546 = vmatprep.subr.mxu0 %v4481_v50  ;;  %v9032_v38 = vadd.f32 %v3632_v23, %v8860_v19  ;;  %v3155_v57 = vpop.f32.mrf.mxu1  ;;  %v4751_v19 = vmul.f32 %v8523_v33, %v10283_v46 }
 0x56a   : > { %4875 = vrot.lane.b32.xlu0 %v4752_v10, %s5825_s16  ;;  %4181 = vmatprep.mubr.f32.mxu1 %v10259_v51  ;;  %v3634_v36 = vpop.f32.mrf.mxu0  ;;  %v9045_v59 = vadd.f32 %v3155_v57, %v8750_v43  ;;  %v4749_v39 = vmul.f32 %v8625_v9, %v10201_v53  ;;  %v4746_v46 = vmul.f32 %v8625_v9, %v10233_v17 }
 0x56b   : > { %4547 = vmatpush1.msra.mxu0 %v4480_v30  ;;  %v4409_v25 = vpop.permute.xlu1 %4408  ;;  %v9040_v34 = vadd.f32 %v3634_v36, %v8869_v20  ;;  %v5721_v20 = vld [vmem:[%s9834_s5 + $0x368] sm:$0xff]  ;;  %v3159_v40 = vpop.f32.mrf.mxu1  ;;  %v4748_v36 = vmul.f32 %v8523_v33, %v10232_v4  ;;  %v5723_v4 = vld [vmem:[%s9834_s5 + $0x378] sm:$0xff] }
 0x56c   : > { %4182 = vmatmul.mubr.f32.gmra.mxu1 %v5720_v15  ;;  %v4411_v29 = vpop.permute.xlu0 %4410  ;;  %v3638_v54 = vpop.f32.mrf.mxu0  ;;  %v9059_v26 = vadd.f32 %v3159_v40, %v8757_v16  ;;  %v5722_v16 = vld [vmem:[%s9834_s5 + $0x370] sm:$0xff] }
 0x56d   : > { %4877 = vrot.lane.b32.xlu1 %v8650_v45, %s5825_s16  ;;  %4187 = vmatprep.mubr.f32.mxu1 %v10259_v51  ;;  %v4479_v44 = vsel %vm1181_vm1, %v4409_v25, %v4411_v29  ;;  %v9055_v58 = vadd.f32 %v3638_v54, %v8880_v14  ;;  %v3161_v2 = vpop.f32.mrf.mxu1 }
 0x56e   : > { %4873 = vrot.lane.b32.xlu0 %v4751_v19, %s5825_s16  ;;  %4548 = vmatprep.subr.mxu0 %v4479_v44  ;;  %v3640_v43 = vpop.f32.mrf.mxu0  ;;  %v9068_v30 = vadd.f32 %v3161_v2, %v8762_v6 }
 0x56f   : > { %v4407_v22 = vpop.permute.xlu1 %4406  ;;  %v9064_v50 = vadd.f32 %v3640_v43, %v8887_v3  ;;  %v3165_v3 = vpop.f32.mrf.mxu1 }
 0x570   : > { %4188 = vmatmul.mubr.f32.gmra.mxu1 %v5721_v20  ;;  %v4478_v14 = vsel %vm1181_vm1, %v4407_v22, %v4409_v25  ;;  %v4403_v10 = vpop.permute.xlu0 %4402  ;;  %v3644_v23 = vpop.f32.mrf.mxu0  ;;  %v9081_v6 = vadd.f32 %v3165_v3, %v8770_v63 }
 0x571   : > { %4869 = vrot.lane.b32.xlu1 %v4749_v39, %s5825_s16  ;;  %4549 = vmatpush1.msra.mxu0 %v4478_v14  ;;  %v9075_v53 = vadd.f32 %v3644_v23, %v8899_v32  ;;  %v3167_v57 = vpop.f32.mrf.mxu1  ;;  %v4743_v23 = vmul.f32 %v8625_v9, %v10236_v37 }
 0x572   : > { %4871 = vrot.lane.b32.xlu0 %v8650_v45, %s5825_s16  ;;  %4193 = vmatprep.mubr.f32.mxu1 %v10259_v51  ;;  %v3646_v15 = vpop.f32.mrf.mxu0  ;;  %v9092_v54 = vadd.f32 %v3167_v57, %v8777_v27 }
 0x573   : > { %v4405_v31 = vpop.permute.xlu1 %4404  ;;  %v9086_v25 = vadd.f32 %v3646_v15, %v8905_v56  ;;  %v3171_v44 = vpop.f32.mrf.mxu1 }
 0x574   : > { %4194 = vmatmul.mubr.f32.gmra.mxu1 %v5722_v16  ;;  %v4401_v32 = vpop.permute.xlu0 %4400  ;;  %v4477_v29 = vsel %vm1181_vm1, %v4403_v10, %v4405_v31  ;;  %v3650_v19 = vpop.f32.mrf.mxu0  ;;  %v9105_v27 = vadd.f32 %v3171_v44, %v8796_v0 }
 0x575   : > { %v4476_v63 = vsel %vm1181_vm1, %v4401_v32, %v4403_v10  ;;  %4867 = vrot.lane.b32.xlu1 %v4748_v36, %s5825_s16  ;;  %4550 = vmatprep.subr.mxu0 %v4477_v29  ;;  %v9100_v56 = vadd.f32 %v3650_v19, %v8927_v60  ;;  %v3173_v43 = vpop.f32.mrf.mxu1  ;;  %v4745_v60 = vmul.f32 %v8523_v33, %v10234_v52 }
 0x576   : > { %4863 = vrot.lane.b32.xlu0 %v4746_v46, %s5825_s16  ;;  %4199 = vmatprep.mubr.f32.mxu1 %v10259_v51  ;;  %v3652_v17 = vpop.f32.mrf.mxu0  ;;  %v9113_v2 = vadd.f32 %v3173_v43, %v8809_v24  ;;  %v4742_v32 = vmul.f32 %v8523_v33, %v10242_v62  ;;  %v5209_v33 = vld [vmem:[%s9835_s6 + $0x8] sm:$0xff] }
 0x577   : > { %4551 = vmatpush1.msra.mxu0 %v4476_v63  ;;  %v4397_v20 = vpop.permute.xlu1 %4396  ;;  %v9108_v40 = vadd.f32 %v3652_v17, %v8931_v7  ;;  %v3177_v7 = vpop.f32.mrf.mxu1 }
 0x578   : > { %4200 = vmatmul.mubr.f32.gmra.mxu1 %v5723_v4  ;;  %v4399_v22 = vpop.permute.xlu0 %4398  ;;  %v3656_v39 = vpop.f32.mrf.mxu0  ;;  %v9124_v52 = vadd.f32 %v3177_v7, %v8823_v11 }
 0x579   : > { %4865 = vrot.lane.b32.xlu1 %v8650_v45, %s5825_s16  ;;  %v4475_v0 = vsel %vm1181_vm1, %v4397_v20, %v4399_v22  ;;  %v9119_v14 = vadd.f32 %v3656_v39, %v8943_v18  ;;  %5097 = vmatprep.mubr.f32.mxu1 %v10259_v51  ;;  %v3179_v3 = vpop.f32.mrf.mxu1 }
 0x57a   : > { %4861 = vrot.lane.b32.xlu0 %v4745_v60, %s5825_s16  ;;  %4552 = vmatprep.subr.mxu0 %v4475_v0  ;;  %v3658_v10 = vpop.f32.mrf.mxu0  ;;  %v9133_v36 = vadd.f32 %v3179_v3, %v8829_v13  ;;  %v5208_v13 = vld [vmem:[%s9835_s6] sm:$0xff] }
 0x57b   : > { %v4395_v24 = vpop.permute.xlu1 %4394  ;;  %v9129_v16 = vadd.f32 %v3658_v10, %v8949_v41  ;;  %v3183_v57 = vpop.f32.mrf.mxu1  ;;  %v5212_v60 = vld [vmem:[%s9835_s6 + $0x20] sm:$0xff] }
 0x57c   : > { %v4474_v18 = vsel %vm1181_vm1, %v4395_v24, %v4397_v20  ;;  %v4391_v15 = vpop.permute.xlu0 %4390  ;;  %v3662_v31 = vpop.f32.mrf.mxu0  ;;  %v9142_v37 = vadd.f32 %v3183_v57, %v8844_v1  ;;  %v5213_v24 = vld [vmem:[%s9835_s6 + $0x28] sm:$0xff] }
 0x57d   : > { %4857 = vrot.lane.b32.xlu1 %v4743_v23, %s5825_s16  ;;  %4553 = vmatpush1.msra.mxu0 %v4474_v18  ;;  %v9137_v11 = vadd.f32 %v3662_v31, %v8957_v5 }
 0x57e   : > { %4859 = vrot.lane.b32.xlu0 %v8650_v45, %s5825_s16  ;;  %v3664_v9 = vpop.f32.mrf.mxu0 }
 0x57f   : > { %v4393_v41 = vpop.permute.xlu1 %4392  ;;  %v9150_v29 = vadd.f32 %v3664_v9, %v8965_v35  ;;  %v5210_v35 = vld [vmem:[%s9835_s6 + $0x10] sm:$0xff]  ;;  %v5215_v9 = vld [vmem:[%s9835_s6 + $0x38] sm:$0xff] }
 0x580   : > { %v4948_v5 = vpop.permute.xlu0 %4947  ;;  %v4473_v46 = vsel %vm1181_vm1, %v4391_v15, %v4393_v41  ;;  %v3668_v19 = vpop.f32.mrf.mxu0 }
 0x581   : > { %4855 = vrot.lane.b32.xlu1 %v4742_v32, %s5825_s16  ;;  %4554 = vmatprep.subr.mxu0 %v4473_v46  ;;  %v9155_v45 = vadd.f32 %v3668_v19, %v8976_v55 }
 0x582   : > { %5226 = vperm.xlu0 %5813, %v5208_v13   ;;  %v3670_v62 = vpop.f32.mrf.mxu0 }
 0x583   : > { %v4950_v1 = vpop.permute.xlu1 %4949  ;;  %v9164_v63 = vadd.f32 %v3670_v62, %v8981_v49  ;;  %v5211_v49 = vld [vmem:[%s9835_s6 + $0x18] sm:$0xff] }
 0x584   : > { %v4389_v4 = vpop.permute.xlu0 %4388  ;;  %v9167_v44 = vsel %vm1097_vm2, %v4948_v5, %v4950_v1  ;;  %v3674_v55 = vpop.f32.mrf.mxu0 }
 0x585   : > { %v4472_v17 = vsel %vm1181_vm1, %v4389_v4, %v4391_v15  ;;  %5231 = vperm.xlu1 %5814, %v5209_v33   ;;  %5763 = vmatprep.subr.mxu1 %v9167_v44  ;;  %v9172_v20 = vadd.f32 %v3674_v55, %v8993_v47 }
 0x586   : > { %5236 = vperm.xlu0 %5813, %v5210_v35   ;;  %4555 = vmatpush1.msra.mxu0 %v4472_v17  ;;  %v3676_v43 = vpop.f32.mrf.mxu0  ;;  %v5218_v35 = vld [vmem:[%s9835_s6 + $0x50] sm:$0xff] }
 0x587   : > { %10284 = vst [vmem:[#allocation18_spill] sm:$0xff] %v9172_v20  ;;  %v4946_v22 = vpop.permute.xlu1 %4945  ;;  %v9181_v39 = vadd.f32 %v3676_v43, %v8999_v28  ;;  %v5214_v28 = vld [vmem:[%s9835_s6 + $0x30] sm:$0xff]  ;;  %v5219_v43 = vld [vmem:[%s9835_s6 + $0x58] sm:$0xff] }
 0x588   : > { %v9184_v0 = vsel %vm1097_vm2, %v4946_v22, %v4948_v5  ;;  %v4385_v47 = vpop.permute.xlu0 %4384  ;;  %v3680_v7 = vpop.f32.mrf.mxu0 }
 0x589   : > { %10285 = vst [vmem:[#allocation70_spill] sm:$0xff] %v9181_v39  ;;  %5241 = vperm.xlu1 %5814, %v5211_v49   ;;  %5779 = vmatpush1.msra.mxu1 %v9184_v0  ;;  %v9188_v10 = vadd.f32 %v3680_v7, %v9013_v21 }
 0x58a   : > { %5246 = vperm.xlu0 %5813, %v5212_v60   ;;  %v3682_v23 = vpop.f32.mrf.mxu0 }
 0x58b   : > { %10286 = vst [vmem:[#allocation69_spill] sm:$0xff] %v9188_v10  ;;  %v4387_v3 = vpop.permute.xlu1 %4386  ;;  %v9197_v18 = vadd.f32 %v3682_v23, %v9024_v61  ;;  %v5216_v61 = vld [vmem:[%s9835_s6 + $0x40] sm:$0xff] }
 0x58c   : > { %v4942_v15 = vpop.permute.xlu0 %4941  ;;  %v4471_v31 = vsel %vm1181_vm1, %v4385_v47, %v4387_v3  ;;  %v3686_v57 = vpop.f32.mrf.mxu0  ;;  %v5221_v3 = vld [vmem:[%s9835_s6 + $0x68] sm:$0xff] }
 0x58d   : > { %10287 = vst [vmem:[#allocation15_spill] sm:$0xff] %v9197_v18  ;;  %5251 = vperm.xlu1 %5814, %v5213_v24   ;;  %4556 = vmatprep.subr.mxu0 %v4471_v31  ;;  %v9201_v21 = vadd.f32 %v3686_v57, %v9037_v12 }
 0x58e   : > { %5256 = vperm.xlu0 %5813, %v5214_v28   ;;  %v3688_v41 = vpop.f32.mrf.mxu0 }
 0x58f   : > { %10288 = vst [vmem:[#allocation62_spill] sm:$0xff] %v9201_v21  ;;  %v4944_v32 = vpop.permute.xlu1 %4943  ;;  %v9210_v13 = vadd.f32 %v3688_v41, %v9045_v59  ;;  %v5217_v59 = vld [vmem:[%s9835_s6 + $0x48] sm:$0xff] }
 0x590   : > { %v4383_v5 = vpop.permute.xlu0 %4382  ;;  %v9213_v46 = vsel %vm1097_vm2, %v4942_v15, %v4944_v32  ;;  %v3692_v12 = vpop.f32.mrf.mxu0 }
 0x591   : > { %10289 = vst [vmem:[#allocation61_spill] sm:$0xff] %v9210_v13  ;;  %v4470_v19 = vsel %vm1181_vm1, %v4383_v5, %v4385_v47  ;;  %5261 = vperm.xlu1 %5814, %v5215_v9   ;;  %5764 = vmatprep.subr.mxu1 %v9213_v46  ;;  %v9218_v33 = vadd.f32 %v3692_v12, %v9059_v26  ;;  %v5336_v12 = vld [vmem:[%s9836_s7] sm:$0xff] }
 0x592   : > { %5266 = vperm.xlu0 %5813, %v5216_v61   ;;  %4557 = vmatpush1.msra.mxu0 %v4470_v19  ;;  %v3694_v62 = vpop.f32.mrf.mxu0  ;;  %v5223_v61 = vld [vmem:[%s9835_s6 + $0x78] sm:$0xff] }
 0x593   : > { %10290 = vst [vmem:[#allocation16_spill] sm:$0xff] %v9218_v33  ;;  %v4940_v1 = vpop.permute.xlu1 %4939  ;;  %v9227_v4 = vadd.f32 %v3694_v62, %v9068_v30  ;;  %v5220_v30 = vld [vmem:[%s9835_s6 + $0x60] sm:$0xff] }
 0x594   : > { %v9230_v55 = vsel %vm1097_vm2, %v4940_v1, %v4942_v15  ;;  %v4379_v26 = vpop.permute.xlu0 %4378  ;;  %v3698_v17 = vpop.f32.mrf.mxu0 }
 0x595   : > { %10291 = vst [vmem:[#allocation81_spill] sm:$0xff] %v9227_v4  ;;  %5271 = vperm.xlu1 %5814, %v5217_v59   ;;  %5780 = vmatpush1.msra.mxu1 %v9230_v55  ;;  %v9234_v49 = vadd.f32 %v3698_v17, %v9081_v6 }
 0x596   : > { %5276 = vperm.xlu0 %5813, %v5218_v35   ;;  %v3700_v22 = vpop.f32.mrf.mxu0  ;;  %v5337_v35 = vld [vmem:[%s9836_s7 + $0x8] sm:$0xff] }
 0x597   : > { %10292 = vst [vmem:[#allocation72_spill] sm:$0xff] %v9234_v49  ;;  %v4381_v60 = vpop.permute.xlu1 %4380  ;;  %v9243_v47 = vadd.f32 %v3700_v22, %v9092_v54  ;;  %v5222_v54 = vld [vmem:[%s9835_s6 + $0x70] sm:$0xff] }
 0x598   : > { %v4936_v7 = vpop.permute.xlu0 %4935  ;;  %v4469_v24 = vsel %vm1181_vm1, %v4379_v26, %v4381_v60  ;;  %v3704_v23 = vpop.f32.mrf.mxu0  ;;  %v5340_v60 = vld [vmem:[%s9836_s7 + $0x20] sm:$0xff] }
 0x599   : > { %10293 = vst [vmem:[#allocation71_spill] sm:$0xff] %v9243_v47  ;;  %5281 = vperm.xlu1 %5814, %v5219_v43   ;;  %4558 = vmatprep.subr.mxu0 %v4469_v24  ;;  %v9247_v6 = vadd.f32 %v3704_v23, %v9105_v27  ;;  %v5725_v24 = vld [vmem:[%s9834_s5 + $0x380] sm:$0xff] }
 0x59a   : > { %5286 = vperm.xlu0 %5813, %v5220_v30   ;;  %v3706_v28 = vpop.f32.mrf.mxu0 }
 0x59b   : > { %10294 = vst [vmem:[#allocation55_spill] sm:$0xff] %v9247_v6  ;;  %v4938_v15 = vpop.permute.xlu1 %4937  ;;  %v9256_v31 = vadd.f32 %v3706_v28, %v9113_v2 }
 0x59c   : > { %v4377_v57 = vpop.permute.xlu0 %4376  ;;  %v4978_v9 = vsel %vm1097_vm2, %v4936_v7, %v4938_v15  ;;  %v3710_v41 = vpop.f32.mrf.mxu0  ;;  %v5342_v15 = vld [vmem:[%s9836_s7 + $0x30] sm:$0xff] }
 0x59d   : > { %10295 = vst [vmem:[#allocation65_spill] sm:$0xff] %v9256_v31  ;;  %v4468_v27 = vsel %vm1181_vm1, %v4377_v57, %v4379_v26  ;;  %5291 = vperm.xlu1 %5814, %v5221_v3   ;;  %5765 = vmatprep.subr.mxu1 %v4978_v9  ;;  %v9261_v32 = vadd.f32 %v3710_v41, %v9124_v52  ;;  %v5341_v3 = vld [vmem:[%s9836_s7 + $0x28] sm:$0xff] }
 0x59e   : > { %5296 = vperm.xlu0 %5813, %v5222_v54   ;;  %4559 = vmatpush1.msra.mxu0 %v4468_v27  ;;  %v3712_v5 = vpop.f32.mrf.mxu0  ;;  %v5726_v41 = vld [vmem:[%s9834_s5 + $0x388] sm:$0xff] }
 0x59f   : > { %10296 = vst [vmem:[#allocation64_spill] sm:$0xff] %v9261_v32  ;;  %v4934_v2 = vpop.permute.xlu1 %4933  ;;  %v9270_v19 = vadd.f32 %v3712_v5, %v9133_v36  ;;  %v5338_v36 = vld [vmem:[%s9836_s7 + $0x10] sm:$0xff] }
 0x5a0   : > { %v4977_v59 = vsel %vm1097_vm2, %v4934_v2, %v4936_v7  ;;  %v4373_v62 = vpop.permute.xlu0 %4372  ;;  %v3716_v52 = vpop.f32.mrf.mxu0  ;;  %v5345_v2 = vld [vmem:[%s9836_s7 + $0x48] sm:$0xff] }
 0x5a1   : > { %10297 = vst [vmem:[#allocation56_spill] sm:$0xff] %v9270_v19  ;;  %5301 = vperm.xlu1 %5814, %v5223_v61   ;;  %5781 = vmatpush1.msra.mxu1 %v4977_v59  ;;  %v9274_v1 = vadd.f32 %v3716_v52, %v9142_v37  ;;  %v5339_v37 = vld [vmem:[%s9836_s7 + $0x18] sm:$0xff] }
 0x5a2   : > { %5354 = vperm.xlu0 %5813, %v5336_v12   ;;  %v5728_v52 = vld [vmem:[%s9834_s5 + $0x398] sm:$0xff] }
 0x5a3   : > { %10298 = vst [vmem:[#allocation26_spill] sm:$0xff] %v9274_v1  ;;  %v4375_v26 = vpop.permute.xlu1 %4374 }
 0x5a4   : > { %v4930_v17 = vpop.permute.xlu0 %4929  ;;  %v4467_v43 = vsel %vm1181_vm1, %v4373_v62, %v4375_v26  ;;  %v5347_v26 = vld [vmem:[%s9836_s7 + $0x58] sm:$0xff] }
 0x5a5   : > { %5359 = vperm.xlu1 %5814, %v5337_v35   ;;  %4560 = vmatprep.subr.mxu0 %v4467_v43  ;;  %v5348_v43 = vld [vmem:[%s9836_s7 + $0x60] sm:$0xff] }
 0x5a6   : > { %5364 = vperm.xlu0 %5813, %v5338_v36  }
 0x5a7   : > { %v4932_v22 = vpop.permute.xlu1 %4931 }
 0x5a8   : > { %v4371_v30 = vpop.permute.xlu0 %4370  ;;  %v4976_v7 = vsel %vm1097_vm2, %v4930_v17, %v4932_v22 }
 0x5a9   : > { %v4466_v23 = vsel %vm1181_vm1, %v4371_v30, %v4373_v62  ;;  %5369 = vperm.xlu1 %5814, %v5339_v37   ;;  %5766 = vmatprep.subr.mxu1 %v4976_v7  ;;  %v5729_v37 = vld [vmem:[%s9834_s5 + $0x3a0] sm:$0xff] }
 0x5aa   : > { %5374 = vperm.xlu0 %5813, %v5340_v60   ;;  %4561 = vmatpush1.msra.mxu0 %v4466_v23  ;;  %v5349_v60 = vld [vmem:[%s9836_s7 + $0x68] sm:$0xff] }
 0x5ab   : > { %4595 = vmatmul.mubr.f32.vlgmr.msra.gmra.mxu0 %v5725_v24  ;;  %5015 = vmatprep.subr.mxu0 %v9167_v44  ;;  %v4928_v28 = vpop.permute.xlu1 %4927  ;;  %v5343_v44 = vld [vmem:[%s9836_s7 + $0x38] sm:$0xff]  ;;  %v5350_v24 = vld [vmem:[%s9836_s7 + $0x70] sm:$0xff] }
 0x5ac   : > { %v4975_v54 = vsel %vm1097_vm2, %v4928_v28, %v4930_v17  ;;  %v4924_v57 = vpop.permute.xlu0 %4923  ;;  %5016 = vmatpush1.msra.mxu0 %v9184_v0  ;;  %4600 = vmatprep.mubr.f32.mxu0 %v10259_v51 }
 0x5ad   : > { %5379 = vperm.xlu1 %5814, %v5341_v3   ;;  %5017 = vmatprep.subr.mxu0 %v9213_v46  ;;  %v5344_v46 = vld [vmem:[%s9836_s7 + $0x40] sm:$0xff]  ;;  %v5730_v3 = vld [vmem:[%s9834_s5 + $0x3a8] sm:$0xff] }
 0x5ae   : > { %5782 = vmatpush1.msra.mxu1 %v4975_v54  ;;  %5384 = vperm.xlu0 %5813, %v5342_v15   ;;  %v5351_v15 = vld [vmem:[%s9836_s7 + $0x78] sm:$0xff] }
 0x5af   : > { %5018 = vmatpush1.msra.mxu0 %v9230_v55  ;;  %v4926_v27 = vpop.permute.xlu1 %4925  ;;  %v5727_v55 = vld [vmem:[%s9834_s5 + $0x390] sm:$0xff] }
 0x5b0   : > { %4601 = vmatmul.mubr.f32.gmra.mxu0 %v5726_v41  ;;  %5019 = vmatprep.subr.mxu0 %v4978_v9  ;;  %v4922_v0 = vpop.permute.xlu0 %4921  ;;  %v4974_v61 = vsel %vm1097_vm2, %v4924_v57, %v4926_v27  ;;  %v5731_v41 = vld [vmem:[%s9834_s5 + $0x3b0] sm:$0xff] }
 0x5b1   : > { %v4973_v5 = vsel %vm1097_vm2, %v4922_v0, %v4924_v57  ;;  %5020 = vmatpush1.msra.mxu0 %v4977_v59  ;;  %5389 = vperm.xlu1 %5814, %v5343_v44   ;;  %v5346_v59 = vld [vmem:[%s9836_s7 + $0x50] sm:$0xff] }
 0x5b2   : > { %5021 = vmatprep.subr.mxu0 %v4976_v7  ;;  %5767 = vmatprep.subr.mxu1 %v4974_v61 }
 0x5b3   : > { %5394 = vperm.xlu0 %5813, %v5344_v46   ;;  %4606 = vmatprep.mubr.f32.mxu0 %v10259_v51  ;;  %v4918_v9 = vpop.permute.xlu1 %4917 }
 0x5b4   : > { %5022 = vmatpush1.msra.mxu0 %v4975_v54  ;;  %5783 = vmatpush1.msra.mxu1 %v4973_v5  ;;  %v4920_v12 = vpop.permute.xlu0 %4919 }
 0x5b5   : > { %4607 = vmatmul.mubr.f32.gmra.mxu0 %v5727_v55  ;;  %5023 = vmatprep.subr.mxu0 %v4974_v61  ;;  %v4972_v62 = vsel %vm1097_vm2, %v4918_v9, %v4920_v12  ;;  %v5732_v61 = vld [vmem:[%s9834_s5 + $0x3b8] sm:$0xff] }
 0x5b6   : > { %5024 = vmatpush1.msra.mxu0 %v4973_v5  ;;  %5399 = vperm.xlu1 %5814, %v5345_v2   ;;  %v5733_v2 = vld [vmem:[%s9834_s5 + $0x3c0] sm:$0xff] }
 0x5b7   : > { %5404 = vperm.xlu0 %5813, %v5346_v59   ;;  %4612 = vmatprep.mubr.f32.mxu0 %v10259_v51  ;;  %v4916_v35 = vpop.permute.xlu1 %4915 }
 0x5b8   : > { %5025 = vmatprep.subr.mxu0 %v4972_v62  ;;  %5768 = vmatprep.subr.mxu1 %v4972_v62  ;;  %v4971_v36 = vsel %vm1097_vm2, %v4916_v35, %v4918_v9  ;;  %v4912_v17 = vpop.permute.xlu0 %4911 }
 0x5b9   : > { %4613 = vmatmul.mubr.f32.gmra.mxu0 %v5728_v52  ;;  %5784 = vmatpush1.msra.mxu1 %v4971_v36  ;;  %v5734_v52 = vld [vmem:[%s9834_s5 + $0x3c8] sm:$0xff] }
 0x5ba   : > { %5409 = vperm.xlu1 %5814, %v5347_v26   ;;  %5026 = vmatpush1.msra.mxu0 %v4971_v36 }
 0x5bb   : > { %5414 = vperm.xlu0 %5813, %v5348_v43   ;;  %4618 = vmatprep.mubr.f32.mxu0 %v10259_v51  ;;  %v4914_v22 = vpop.permute.xlu1 %4913 }
 0x5bc   : > { %v4910_v30 = vpop.permute.xlu0 %4909  ;;  %v4970_v7 = vsel %vm1097_vm2, %v4912_v17, %v4914_v22 }
 0x5bd   : > { %4619 = vmatmul.mubr.f32.gmra.mxu0 %v5729_v37  ;;  %v4969_v23 = vsel %vm1097_vm2, %v4910_v30, %v4912_v17  ;;  %5027 = vmatprep.subr.mxu0 %v4970_v7  ;;  %v5735_v17 = vld [vmem:[%s9834_s5 + $0x3d0] sm:$0xff]  ;;  %v5736_v30 = vld [vmem:[%s9834_s5 + $0x3d8] sm:$0xff] }
 0x5be   : > { %5419 = vperm.xlu1 %5814, %v5349_v60   ;;  %5769 = vmatprep.subr.mxu1 %v4970_v7 }
 0x5bf   : > { %5424 = vperm.xlu0 %5813, %v5350_v24   ;;  %4624 = vmatprep.mubr.f32.mxu0 %v10259_v51  ;;  %v4906_v28 = vpop.permute.xlu1 %4905 }
 0x5c0   : > { %5028 = vmatpush1.msra.mxu0 %v4969_v23  ;;  %5785 = vmatpush1.msra.mxu1 %v4969_v23  ;;  %v4908_v54 = vpop.permute.xlu0 %4907 }
 0x5c1   : > { %4625 = vmatmul.mubr.f32.gmra.mxu0 %v5730_v3  ;;  %v4968_v57 = vsel %vm1097_vm2, %v4906_v28, %v4908_v54  ;;  %v5737_v3 = vld [vmem:[%s9834_s5 + $0x3e0] sm:$0xff] }
 0x5c2   : > { %5429 = vperm.xlu1 %5814, %v5351_v15   ;;  %4630 = vmatprep.mubr.f32.mxu0 %v10259_v51 }
 0x5c3   : > { %5029 = vmatprep.subr.mxu0 %v4968_v57  ;;  %5770 = vmatprep.subr.mxu1 %v4968_v57  ;;  %v4904_v44 = vpop.permute.xlu1 %4903  ;;  %v5738_v57 = vld [vmem:[%s9834_s5 + $0x3e8] sm:$0xff] }
 0x5c4   : > { %v4967_v27 = vsel %vm1097_vm2, %v4904_v44, %v4906_v28  ;;  %v4900_v0 = vpop.permute.xlu0 %4899 }
 0x5c5   : > { %4631 = vmatmul.mubr.f32.gmra.mxu0 %v5731_v41  ;;  %5786 = vmatpush1.msra.mxu1 %v4967_v27 }
 0x5c6   : > { %5030 = vmatpush1.msra.mxu0 %v4967_v27  ;;  %4636 = vmatprep.mubr.f32.mxu0 %v10259_v51 }
 0x5c7   : > { %v4902_v46 = vpop.permute.xlu1 %4901 }
 0x5c8   : > { %v4898_v5 = vpop.permute.xlu0 %4897  ;;  %v4966_v55 = vsel %vm1097_vm2, %v4900_v0, %v4902_v46 }
 0x5c9   : > { %4637 = vmatmul.mubr.f32.gmra.mxu0 %v5732_v61  ;;  %v4965_v9 = vsel %vm1097_vm2, %v4898_v5, %v4900_v0  ;;  %5031 = vmatprep.subr.mxu0 %v4966_v55  ;;  %v5739_v61 = vld [vmem:[%s9834_s5 + $0x3f0] sm:$0xff] }
 0x5ca   : > { %5771 = vmatprep.subr.mxu1 %v4966_v55  ;;  %4642 = vmatprep.mubr.f32.mxu0 %v10259_v51 }
 0x5cb   : > { %5032 = vmatpush1.msra.mxu0 %v4965_v9  ;;  %5787 = vmatpush1.msra.mxu1 %v4965_v9  ;;  %v4894_v12 = vpop.permute.xlu1 %4893  ;;  %v5740_v9 = vld [vmem:[%s9834_s5 + $0x3f8] sm:$0xff] }
 0x5cc   : > { %v4896_v59 = vpop.permute.xlu0 %4895 }
 0x5cd   : > { %4643 = vmatmul.mubr.f32.gmra.mxu0 %v5733_v2  ;;  %v4964_v62 = vsel %vm1097_vm2, %v4894_v12, %v4896_v59 }
 0x5ce   : > { %4648 = vmatprep.mubr.f32.mxu0 %v10259_v51  ;;  %5033 = vmatprep.subr.mxu0 %v4964_v62 }
 0x5cf   : > { %5772 = vmatprep.subr.mxu1 %v4964_v62  ;;  %v4892_v35 = vpop.permute.xlu1 %4891 }
 0x5d0   : > { %v4963_v26 = vsel %vm1097_vm2, %v4892_v35, %v4894_v12  ;;  %v4888_v36 = vpop.permute.xlu0 %4887 }
 0x5d1   : > { %4649 = vmatmul.mubr.f32.gmra.mxu0 %v5734_v52  ;;  %5788 = vmatpush1.msra.mxu1 %v4963_v26 }
 0x5d2   : > { %5034 = vmatpush1.msra.mxu0 %v4963_v26  ;;  %4654 = vmatprep.mubr.f32.mxu0 %v10259_v51 }
 0x5d3   : > { %v4890_v43 = vpop.permute.xlu1 %4889 }
 0x5d4   : > { %v4886_v37 = vpop.permute.xlu0 %4885  ;;  %v4962_v22 = vsel %vm1097_vm2, %v4888_v36, %v4890_v43 }
 0x5d5   : > { %4655 = vmatmul.mubr.f32.gmra.mxu0 %v5735_v17  ;;  %v4961_v60 = vsel %vm1097_vm2, %v4886_v37, %v4888_v36  ;;  %5035 = vmatprep.subr.mxu0 %v4962_v22 }
 0x5d6   : > { %5773 = vmatprep.subr.mxu1 %v4962_v22  ;;  %4660 = vmatprep.mubr.f32.mxu0 %v10259_v51  ;;  %v5742_v22 = vld [vmem:[%s9834_s5 + $0x400] sm:$0xff] }
 0x5d7   : > { %5036 = vmatpush1.msra.mxu0 %v4961_v60  ;;  %5789 = vmatpush1.msra.mxu1 %v4961_v60  ;;  %v4882_v7 = vpop.permute.xlu1 %4881  ;;  %v5745_v60 = vld [vmem:[%s9834_s5 + $0x418] sm:$0xff] }
 0x5d8   : > { %v4884_v24 = vpop.permute.xlu0 %4883 }
 0x5d9   : > { %4661 = vmatmul.mubr.f32.gmra.mxu0 %v5736_v30  ;;  %v4960_v23 = vsel %vm1097_vm2, %v4882_v7, %v4884_v24  ;;  %v5746_v24 = vld [vmem:[%s9834_s5 + $0x420] sm:$0xff] }
 0x5da   : > { %4666 = vmatprep.mubr.f32.mxu0 %v10259_v51  ;;  %5037 = vmatprep.subr.mxu0 %v4960_v23 }
 0x5db   : > { %5774 = vmatprep.subr.mxu1 %v4960_v23  ;;  %v4880_v28 = vpop.permute.xlu1 %4879  ;;  %v5744_v23 = vld [vmem:[%s9834_s5 + $0x410] sm:$0xff] }
 0x5dc   : > { %v4959_v15 = vsel %vm1097_vm2, %v4880_v28, %v4882_v7  ;;  %v4876_v54 = vpop.permute.xlu0 %4875  ;;  %v5743_v7 = vld [vmem:[%s9834_s5 + $0x408] sm:$0xff]  ;;  %v5748_v28 = vld [vmem:[%s9834_s5 + $0x430] sm:$0xff] }
 0x5dd   : > { %4667 = vmatmul.mubr.f32.gmra.mxu0 %v5737_v3  ;;  %5790 = vmatpush1.msra.mxu1 %v4959_v15  ;;  %v5747_v3 = vld [vmem:[%s9834_s5 + $0x428] sm:$0xff] }
 0x5de   : > { %5038 = vmatpush1.msra.mxu0 %v4959_v15  ;;  %4672 = vmatprep.mubr.f32.mxu0 %v10259_v51  ;;  %v5749_v15 = vld [vmem:[%s9834_s5 + $0x438] sm:$0xff] }
 0x5df   : > { %v4878_v41 = vpop.permute.xlu1 %4877 }
 0x5e0   : > { %v4874_v44 = vpop.permute.xlu0 %4873  ;;  %v4958_v27 = vsel %vm1097_vm2, %v4876_v54, %v4878_v41  ;;  %v5752_v41 = vld [vmem:[%s9834_s5 + $0x450] sm:$0xff] }
 0x5e1   : > { %4673 = vmatmul.mubr.f32.gmra.mxu0 %v5738_v57  ;;  %v4957_v0 = vsel %vm1097_vm2, %v4874_v44, %v4876_v54  ;;  %5039 = vmatprep.subr.mxu0 %v4958_v27  ;;  %v5750_v54 = vld [vmem:[%s9834_s5 + $0x440] sm:$0xff]  ;;  %v5751_v57 = vld [vmem:[%s9834_s5 + $0x448] sm:$0xff]  ;;  %v5753_v44 = vld [vmem:[%s9834_s5 + $0x458] sm:$0xff] }
 0x5e2   : > { %5775 = vmatprep.subr.mxu1 %v4958_v27  ;;  %4678 = vmatprep.mubr.f32.mxu0 %v10259_v51  ;;  %v5754_v27 = vld [vmem:[%s9834_s5 + $0x460] sm:$0xff] }
 0x5e3   : > { %5040 = vmatpush1.msra.mxu0 %v4957_v0  ;;  %5791 = vmatpush1.msra.mxu1 %v4957_v0  ;;  %v4870_v46 = vpop.permute.xlu1 %4869  ;;  %v5755_v0 = vld [vmem:[%s9834_s5 + $0x468] sm:$0xff] }
 0x5e4   : > { %v4872_v5 = vpop.permute.xlu0 %4871 }
 0x5e5   : > { %4679 = vmatmul.mubr.f32.gmra.mxu0 %v5739_v61  ;;  %v4956_v55 = vsel %vm1097_vm2, %v4870_v46, %v4872_v5  ;;  %v5756_v61 = vld [vmem:[%s9834_s5 + $0x470] sm:$0xff]  ;;  %v9479_v5 = vpop.f32.mrf.mxu1 }
 0x5e6   : > { %4684 = vmatprep.mubr.f32.mxu0 %v10259_v51  ;;  %5041 = vmatprep.subr.mxu0 %v4956_v55  ;;  %10299 = vst [vmem:[#allocation13_spill] sm:$0xff] %v9479_v5 }
 0x5e7   : > { %5776 = vmatprep.subr.mxu1 %v4956_v55  ;;  %v4868_v2 = vpop.permute.xlu1 %4867 }
 0x5e8   : > { %v4955_v12 = vsel %vm1097_vm2, %v4868_v2, %v4870_v46  ;;  %v4864_v59 = vpop.permute.xlu0 %4863  ;;  %v5757_v46 = vld [vmem:[%s9834_s5 + $0x478] sm:$0xff] }
 0x5e9   : > { %4685 = vmatmul.mubr.f32.gmra.mxu0 %v5740_v9  ;;  %5792 = vmatpush1.msra.mxu1 %v4955_v12 }
 0x5ea   : > { %5042 = vmatpush1.msra.mxu0 %v4955_v12  ;;  %5079 = vmatprep.mubr.f32.mxu0 %v10259_v51 }
 0x5eb   : > { %v4866_v62 = vpop.permute.xlu1 %4865 }
 0x5ec   : > { %v4862_v52 = vpop.permute.xlu0 %4861  ;;  %v4954_v35 = vsel %vm1097_vm2, %v4864_v59, %v4866_v62 }
 0x5ed   : > { %v4953_v26 = vsel %vm1097_vm2, %v4862_v52, %v4864_v59  ;;  %5043 = vmatprep.subr.mxu0 %v4954_v35  ;;  %5777 = vmatprep.subr.mxu1 %v4954_v35 }
 0x5ee   : > { %5044 = vmatpush1.msra.mxu0 %v4953_v26  ;;  %5793 = vmatpush1.msra.mxu1 %v4953_v26 }
 0x5ef   : > { %v4858_v36 = vpop.permute.xlu1 %4857 }
 0x5f0   : > { %v4860_v17 = vpop.permute.xlu0 %4859 }
 0x5f1   : > { %v4952_v43 = vsel %vm1097_vm2, %v4858_v36, %v4860_v17 }
 0x5f2   : > { %5045 = vmatprep.subr.mxu0 %v4952_v43  ;;  %5778 = vmatprep.subr.mxu1 %v4952_v43 }
 0x5f3   : > { %v4856_v37 = vpop.permute.xlu1 %4855 }
 0x5f4   : > { %v4951_v30 = vsel %vm1097_vm2, %v4856_v37, %v4858_v36  ;;  %v9507_v37 = vpop.f32.mrf.mxu0 }
 0x5f5   : > { %5046 = vmatpush1.msra.mxu0 %v4951_v30  ;;  %5794 = vmatpush1.msra.mxu1 %v4951_v30  ;;  %10300 = vst [vmem:[#allocation4_spill] sm:$0xff] %v9507_v37 }
 0x5f6   : > { %5080 = vmatmul.mubr.f32.vlgmr.msra.gmra.mxu0 %v5742_v22  ;;  %5098 = vmatmul.mubr.f32.vlgmr.msra.gmra.mxu1 %v5745_v60 }
 0x5f7   : > { %5085 = vmatprep.mubr.f32.mxu0 %v10259_v51  ;;  %5103 = vmatprep.mubr.f32.mxu1 %v10259_v51 }
 0x5fa   : > { %5086 = vmatmul.mubr.f32.gmra.mxu0 %v5743_v7  ;;  %5104 = vmatmul.mubr.f32.gmra.mxu1 %v5746_v24 }
 0x5fb   : > { %5091 = vmatprep.mubr.f32.mxu0 %v10259_v51  ;;  %5109 = vmatprep.mubr.f32.mxu1 %v10259_v51 }
 0x5fc   : > { %v9481_v55 = vpop.f32.mrf.mxu1 }
 0x5fd   : > { %v9543_v1 = vpop.permute.xlu0 %5226 }
 0x5fe   : > { %5092 = vmatmul.mubr.f32.gmra.mxu0 %v5744_v23  ;;  %5110 = vmatmul.mubr.f32.gmra.mxu1 %v5747_v3  ;;  %v9483_v9 = vpop.f32.mrf.mxu1 }
 0x5ff   : > { %5115 = vmatprep.mubr.f32.mxu1 %v10259_v51 }
 0x600   : > { %v9485_v2 = vpop.f32.mrf.mxu1  ;;  %v9545_v37 = vpop.permute.xlu1 %5231 }
 0x601   : > { %v9555_v31 = vpop.permute.xlu0 %5236 }
 0x602   : > { %5116 = vmatmul.mubr.f32.gmra.mxu1 %v5748_v28  ;;  %v9487_v12 = vpop.f32.mrf.mxu1 }
 0x603   : > { %5121 = vmatprep.mubr.f32.mxu1 %v10259_v51 }
 0x604   : > { %v9489_v59 = vpop.f32.mrf.mxu1  ;;  %v9559_v47 = vpop.permute.xlu1 %5241 }
 0x605   : > { %v9569_v21 = vpop.permute.xlu0 %5246 }
 0x606   : > { %5122 = vmatmul.mubr.f32.gmra.mxu1 %v5749_v15  ;;  %v9491_v62 = vpop.f32.mrf.mxu1 }
 0x607   : > { %5127 = vmatprep.mubr.f32.mxu1 %v10259_v51 }
 0x60a   : > { %5128 = vmatmul.mubr.f32.gmra.mxu1 %v5750_v54 }
 0x60b   : > { %5133 = vmatprep.mubr.f32.mxu1 %v10259_v51 }
 0x60e   : > { %5134 = vmatmul.mubr.f32.gmra.mxu1 %v5751_v57 }
 0x60f   : > { %5139 = vmatprep.mubr.f32.mxu1 %v10259_v51 }
 0x612   : > { %5140 = vmatmul.mubr.f32.gmra.mxu1 %v5752_v41 }
 0x613   : > { %5145 = vmatprep.mubr.f32.mxu1 %v10259_v51 }
 0x616   : > { %5146 = vmatmul.mubr.f32.gmra.mxu1 %v5753_v44 }
 0x617   : > { %5151 = vmatprep.mubr.f32.mxu1 %v10259_v51 }
 0x61a   : > { %5152 = vmatmul.mubr.f32.gmra.mxu1 %v5754_v27 }
 0x61b   : > { %5157 = vmatprep.mubr.f32.mxu1 %v10259_v51 }
 0x61e   : > { %5158 = vmatmul.mubr.f32.gmra.mxu1 %v5755_v0 }
 0x61f   : > { %5163 = vmatprep.mubr.f32.mxu1 %v10259_v51 }
 0x622   : > { %5164 = vmatmul.mubr.f32.gmra.mxu1 %v5756_v61 }
 0x623   : > { %5169 = vmatprep.mubr.f32.mxu1 %v10259_v51  ;;  %v9493_v51 = vpop.f32.mrf.mxu1 }
 0x625   : > { %v9495_v52 = vpop.f32.mrf.mxu1 }
 0x626   : > { %5170 = vmatmul.mubr.f32.gmra.mxu1 %v5757_v46 }
 0x627   : > { %v9497_v35 = vpop.f32.mrf.mxu1 }
 0x629   : > { %v9499_v26 = vpop.f32.mrf.mxu1 }
 0x62b   : > { %v9501_v36 = vpop.f32.mrf.mxu1 }
 0x62d   : > { %v9503_v17 = vpop.f32.mrf.mxu1 }
 0x62f   : > { %v9505_v43 = vpop.f32.mrf.mxu1 }
 0x631   : > { %v9511_v60 = vpop.f32.mrf.mxu1 }
 0x633   : > { %v9515_v7 = vpop.f32.mrf.mxu1 }
 0x635   : > { %v9521_v3 = vpop.f32.mrf.mxu1 }
 0x637   : > { %v9527_v54 = vpop.f32.mrf.mxu1 }
 0x638   : > { %10301 = vst [vmem:[#allocation3_spill] sm:$0xff] %v9527_v54 }
 0x639   : > { %v9533_v44 = vpop.f32.mrf.mxu1 }
 0x63a   : > { %10302 = vst [vmem:[#allocation23_spill] sm:$0xff] %v9533_v44  ;;  %v9581_v44 = vpop.permute.xlu0 %5256 }
 0x63b   : > { %v9539_v61 = vpop.f32.mrf.mxu1  ;;  %10313 = vst [vmem:[#allocation30_spill] sm:$0xff] %v9581_v44 }
 0x63c   : > { %10303 = vst [vmem:[#allocation11_spill] sm:$0xff] %v9539_v61 }
 0x63d   : > { %v9549_v32 = vpop.f32.mrf.mxu1 }
 0x63e   : > { %10304 = vst [vmem:[#allocation25_spill] sm:$0xff] %v9549_v32  ;;  %v9571_v32 = vpop.permute.xlu1 %5251 }
 0x63f   : > { %v9557_v6 = vpop.f32.mrf.mxu1 }
 0x640   : > { %10305 = vst [vmem:[#allocation14_spill] sm:$0xff] %v9557_v6 }
 0x641   : > { %v9565_v33 = vpop.f32.mrf.mxu1 }
 0x642   : > { %10307 = vst [vmem:[#allocation66_spill] sm:$0xff] %v9565_v33 }
 0x643   : > { %v9575_v61 = vpop.f32.mrf.mxu1 }
 0x644   : > { %10310 = vst [vmem:[#allocation57_spill] sm:$0xff] %v9575_v61 }
 0x645   : > { %v9583_v39 = vpop.f32.mrf.mxu1 }
 0x646   : > { %10314 = vst [vmem:[#allocation29_spill] sm:$0xff] %v9583_v39 }
 0x647   : > { %v9591_v54 = vpop.f32.mrf.mxu1 }
 0x648   : > { %10318 = vst [vmem:[#allocation52_spill] sm:$0xff] %v9591_v54 }
 0x66b   : > { %v9509_v22 = vpop.f32.mrf.mxu0 }
 0x66d   : > { %v9513_v30 = vpop.f32.mrf.mxu0 }
 0x670   : > { %v9517_v24 = vpop.f32.mrf.mxu0 }
 0x672   : > { %v9519_v23 = vpop.f32.mrf.mxu0 }
 0x675   : > { %v9523_v28 = vpop.f32.mrf.mxu0 }
 0x677   : > { %v9525_v15 = vpop.f32.mrf.mxu0 }
 0x679   : > { %v9529_v57 = vpop.f32.mrf.mxu0 }
 0x67b   : > { %v9531_v41 = vpop.f32.mrf.mxu0 }
 0x67d   : > { %v9535_v27 = vpop.f32.mrf.mxu0 }
 0x67f   : > { %v9537_v0 = vpop.f32.mrf.mxu0 }
 0x681   : > { %v9541_v46 = vpop.f32.mrf.mxu0 }
 0x683   : > { %v9547_v19 = vpop.f32.mrf.mxu0 }
 0x685   : > { %v9551_v5 = vpop.f32.mrf.mxu0 }
 0x687   : > { %v9553_v48 = vpop.f32.mrf.mxu0 }
 0x689   : > { %v9561_v49 = vpop.f32.mrf.mxu0 }
 0x68b   : > { %v9563_v4 = vpop.f32.mrf.mxu0 }
 0x68c   : > { %10306 = vst [vmem:[#allocation32_spill] sm:$0xff] %v9563_v4  ;;  %v9585_v4 = vpop.permute.xlu1 %5261 }
 0x68d   : > { %v9567_v13 = vpop.f32.mrf.mxu0  ;;  %10315 = vst [vmem:[#allocation53_spill] sm:$0xff] %v9585_v4 }
 0x68e   : > { %10308 = vst [vmem:[#allocation63_spill] sm:$0xff] %v9567_v13 }
 0x68f   : > { %v9573_v18 = vpop.f32.mrf.mxu0 }
 0x690   : > { %10309 = vst [vmem:[#allocation58_spill] sm:$0xff] %v9573_v18  ;;  %v9595_v18 = vpop.permute.xlu0 %5266  ;;  %v9597_v61 = vpop.permute.xlu1 %5271 }
 0x691   : > { %v9577_v10 = vpop.f32.mrf.mxu0  ;;  %10320 = vst [vmem:[#allocation24_spill] sm:$0xff] %v9595_v18  ;;  %10321 = vst [vmem:[#allocation5_spill] sm:$0xff] %v9597_v61 }
 0x692   : > { %10311 = vst [vmem:[#allocation54_spill] sm:$0xff] %v9577_v10 }
 0x693   : > { %v9579_v6 = vpop.f32.mrf.mxu0 }
 0x694   : > { %10312 = vst [vmem:[#allocation31_spill] sm:$0xff] %v9579_v6  ;;  %v9601_v6 = vpop.f32.mrf.mxu1  ;;  %v9607_v4 = vpop.permute.xlu0 %5276 }
 0x695   : > { %v9587_v33 = vpop.f32.mrf.mxu0  ;;  %10323 = vst [vmem:[#allocation78_spill] sm:$0xff] %v9601_v6  ;;  %10326 = vst [vmem:[#allocation17_spill] sm:$0xff] %v9607_v4 }
 0x696   : > { %10316 = vst [vmem:[#allocation28_spill] sm:$0xff] %v9587_v33  ;;  %v9609_v33 = vpop.f32.mrf.mxu1 }
 0x697   : > { %v9589_v13 = vpop.f32.mrf.mxu0  ;;  %10327 = vst [vmem:[#allocation67_spill] sm:$0xff] %v9609_v33 }
 0x698   : > { %10317 = vst [vmem:[#allocation77_spill] sm:$0xff] %v9589_v13  ;;  %v9611_v13 = vpop.permute.xlu1 %5281  ;;  %v9619_v61 = vpop.permute.xlu0 %5286 }
 0x699   : > { %v9593_v20 = vpop.f32.mrf.mxu0  ;;  %10328 = vst [vmem:[#allocation68_spill] sm:$0xff] %v9611_v13 }
 0x69a   : > { %10319 = vst [vmem:[#allocation12_spill] sm:$0xff] %v9593_v20  ;;  %v9615_v20 = vpop.f32.mrf.mxu1 }
 0x69b   : > { %v9599_v10 = vpop.f32.mrf.mxu0  ;;  %10330 = vst [vmem:[#allocation51_spill] sm:$0xff] %v9615_v20 }
 0x69c   : > { %10322 = vst [vmem:[#allocation27_spill] sm:$0xff] %v9599_v10  ;;  %v9621_v10 = vpop.permute.xlu1 %5291  ;;  %v9623_v6 = vpop.f32.mrf.mxu1 }
 0x69d   : > { %v9603_v44 = vpop.f32.mrf.mxu0  ;;  %10332 = vst [vmem:[#allocation8_spill] sm:$0xff] %v9621_v10  ;;  %v9631_v33 = vpop.permute.xlu0 %5296  ;;  %v4207_v10 = vadd.f32 %v9483_v9, %v9018_v42  ;;  %v4213_v42 = vadd.f32 %v9495_v52, %v9086_v25  ;;  %v4217_v9 = vadd.f32 %v9503_v17, %v9129_v16 }
 0x69e   : > { %10324 = vst [vmem:[#allocation9_spill] sm:$0xff] %v9603_v44  ;;  %10335 = vst [vmem:[#allocation73_spill] sm:$0xff] %v9631_v33  ;;  %v4210_v33 = vadd.f32 %v9489_v59, %v9055_v58 }
 0x69f   : > { %v9605_v39 = vpop.f32.mrf.mxu0 }
 0x6a0   : > { %10325 = vst [vmem:[#allocation10_spill] sm:$0xff] %v9605_v39  ;;  %v9627_v39 = vpop.f32.mrf.mxu1  ;;  %v9633_v13 = vpop.permute.xlu1 %5301 }
 0x6a1   : > { %v9613_v54 = vpop.f32.mrf.mxu0  ;;  %10336 = vst [vmem:[#allocation21_spill] sm:$0xff] %v9633_v13  ;;  %v4212_v13 = vadd.f32 %v9493_v51, %v9075_v53  ;;  %v4216_v53 = vadd.f32 %v9501_v36, %v9119_v14  ;;  %v9681_v14 = vadd.f32 %v9521_v3, %v9164_v63  ;;  %v4695_v51 = vadd.f32 %v9523_v28, %v4210_v33 }
 0x6a2   : > { %10329 = vst [vmem:[#allocation20_spill] sm:$0xff] %v9613_v54  ;;  %v9635_v54 = vpop.f32.mrf.mxu1 }
 0x6a3   : > { %v9617_v18 = vpop.f32.mrf.mxu0  ;;  %10337 = vst [vmem:[#allocation7_spill] sm:$0xff] %v9635_v54  ;;  %v5355_v54 = vpop.permute.xlu0 %5354  ;;  %v4697_v25 = vadd.f32 %v9529_v57, %v4212_v13  ;;  %v4698_v13 = vadd.f32 %v9531_v41, %v4213_v42  ;;  %v4701_v33 = vadd.f32 %v9541_v46, %v4216_v53 }
 0x6a4   : > { %10331 = vst [vmem:[#allocation60_spill] sm:$0xff] %v9617_v18  ;;  %v4206_v18 = vadd.f32 %v9481_v55, %v9007_v8  ;;  %v4211_v8 = vadd.f32 %v9491_v62, %v9064_v50  ;;  %v9661_v55 = vpop.f32.mrf.mxu1 }
 0x6a5   : > { %v9625_v44 = vpop.f32.mrf.mxu0 }
 0x6a6   : > { %10333 = vst [vmem:[#allocation79_spill] sm:$0xff] %v9625_v44  ;;  %v4208_v44 = vadd.f32 %v9485_v2, %v9032_v38  ;;  %v4214_v38 = vadd.f32 %v9497_v35, %v9100_v56  ;;  %v4691_v50 = vadd.f32 %v9509_v22, %v4206_v18  ;;  %v4218_v56 = vadd.f32 %v9505_v43, %v9137_v11 }
 0x6a7   : > { %v9629_v4 = vpop.f32.mrf.mxu0  ;;  %v9677_v2 = vadd.f32 %v9515_v7, %v9155_v45  ;;  %v4692_v18 = vadd.f32 %v9513_v30, %v4207_v10  ;;  %v4696_v45 = vadd.f32 %v9525_v15, %v4211_v8  ;;  %v9689_v63 = vpop.permute.xlu0 %5364 }
 0x6a8   : > { %10334 = vst [vmem:[#allocation50_spill] sm:$0xff] %v9629_v4  ;;  %v4209_v4 = vadd.f32 %v9487_v12, %v9040_v34  ;;  %v4215_v34 = vadd.f32 %v9499_v26, %v9108_v40  ;;  %v4219_v40 = vadd.f32 %v9511_v60, %v9150_v29  ;;  %v4693_v11 = vadd.f32 %v9517_v24, %v4208_v44 }
 0x6a9   : > { %v9637_v20 = vpop.f32.mrf.mxu0  ;;  %v4699_v22 = vadd.f32 %v9535_v27, %v4214_v38  ;;  %v4702_v60 = vadd.f32 %v9547_v19, %v4217_v9  ;;  %v4703_v15 = vadd.f32 %v9551_v5, %v4218_v56 }
 0x6aa   : > { %10338 = vst [vmem:[#allocation49_spill] sm:$0xff] %v9637_v20  ;;  %v9651_v20 = vpop.permute.xlu1 %5359  ;;  %v4694_v29 = vadd.f32 %v9519_v23, %v4209_v4  ;;  %v4700_v4 = vadd.f32 %v9537_v0, %v4215_v34  ;;  %v4704_v57 = vadd.f32 %v9553_v48, %v4219_v40 }
 0x6ab   : > { %v9663_v58 = vpop.f32.mrf.mxu0  ;;  %v5375_v53 = vpop.permute.xlu0 %5374 }
 0x6ae   : > { %v5370_v26 = vpop.permute.xlu1 %5369 }
 0x6b6   : > { %v5081_v12 = vpop.f32.mrf.mxu0  ;;  %v5099_v16 = vpop.f32.mrf.mxu1 }
 0x6b7   : > { %v5176_v59 = vadd.f32 %v5081_v12, %v4691_v50  ;;  %v5182_v62 = vadd.f32 %v5099_v16, %v4697_v25 }
 0x6b8   : > { %v5083_v52 = vpop.f32.mrf.mxu0  ;;  %v5101_v35 = vpop.f32.mrf.mxu1 }
 0x6b9   : > { %v5304_v10 = vmul.f32 %v9543_v1, %v5176_v59  ;;  %v5310_v36 = vmul.f32 %v9559_v47, %v5182_v62  ;;  %v5177_v17 = vadd.f32 %v5083_v52, %v4692_v18  ;;  %v5183_v43 = vadd.f32 %v5101_v35, %v4698_v13 }
 0x6ba   : > { %v5087_v30 = vpop.f32.mrf.mxu0  ;;  %v5105_v7 = vpop.f32.mrf.mxu1 }
 0x6bb   : > { %v5432_v24 = vadd.f32 %v5355_v54, %v5304_v10  ;;  %v5438_v23 = vadd.f32 %v5370_v26, %v5310_v36  ;;  %v5305_v3 = vmul.f32 %v9543_v1, %v5177_v17  ;;  %v5311_v28 = vmul.f32 %v9559_v47, %v5183_v43 }
 0x6bc   : > { %v5178_v19 = vadd.f32 %v5087_v30, %v4693_v11  ;;  %v5184_v41 = vadd.f32 %v5105_v7, %v4699_v22  ;;  %v5089_v44 = vpop.f32.mrf.mxu0  ;;  %v5107_v27 = vpop.f32.mrf.mxu1 }
 0x6bd   : > { %v5464_v0 = vmax.f32 %v5432_v24, 0.0  ;;  %v5470_v1 = vmax.f32 %v5438_v23, 0.0  ;;  %v5433_v46 = vadd.f32 %v5355_v54, %v5305_v3  ;;  %v5439_v47 = vadd.f32 %v5370_v26, %v5311_v28  ;;  %v10339_v23 = vld [vmem:[#allocation18_spill] sm:$0xff] }
 0x6be   : > { %v5306_v8 = vmul.f32 %v9545_v37, %v5178_v19  ;;  %v5312_v42 = vmul.f32 %v9569_v21, %v5184_v41  ;;  %v5179_v38 = vadd.f32 %v5089_v44, %v4694_v29  ;;  %v5185_v34 = vadd.f32 %v5107_v27, %v4700_v4  ;;  %v5093_v5 = vpop.f32.mrf.mxu0  ;;  %v5111_v48 = vpop.f32.mrf.mxu1 }
 0x6bf   : > { %5496 = vst [vmem:[%s9704_s23] sm:$0xff] %v5464_v0  ;;  %5502 = vst [vmem:[%s9704_s23 + $0x30] sm:$0xff] %v5470_v1  ;;  %v5465_v9 = vmax.f32 %v5433_v46, 0.0  ;;  %v5471_v50 = vmax.f32 %v5439_v47, 0.0  ;;  %v5180_v25 = vadd.f32 %v5093_v5, %v4695_v51  ;;  %v5186_v56 = vadd.f32 %v5111_v48, %v4701_v33  ;;  %v5380_v51 = vpop.permute.xlu1 %5379  ;;  %v5385_v19 = vpop.permute.xlu0 %5384  ;;  %v10343_v47 = vld [vmem:[#allocation70_spill] sm:$0xff]  ;;  %v10347_v48 = vld [vmem:[#allocation69_spill] sm:$0xff] }
 0x6c0   : > { %v5434_v54 = vadd.f32 %v9651_v20, %v5306_v8  ;;  %v5440_v40 = vadd.f32 %v5375_v53, %v5312_v42  ;;  %v5307_v12 = vmul.f32 %v9545_v37, %v5179_v38  ;;  %v5313_v16 = vmul.f32 %v9569_v21, %v5185_v34  ;;  %v5095_v18 = vpop.f32.mrf.mxu0  ;;  %v5113_v13 = vpop.f32.mrf.mxu1  ;;  %v10344_v8 = vld [vmem:[#allocation23_spill] sm:$0xff] }
 0x6c1   : > { %5497 = vst [vmem:[%s9704_s23 + $0x8] sm:$0xff] %v5465_v9  ;;  %5503 = vst [vmem:[%s9704_s23 + $0x38] sm:$0xff] %v5471_v50  ;;  %v5308_v59 = vmul.f32 %v9555_v31, %v5180_v25  ;;  %v5314_v62 = vmul.f32 %v9571_v32, %v5186_v56  ;;  %v5181_v11 = vadd.f32 %v5095_v18, %v4696_v45  ;;  %v10345_v38 = vld [vmem:[#allocation63_spill] sm:$0xff] }
 0x6c2   : > { %v5187_v29 = vadd.f32 %v5113_v13, %v4702_v60  ;;  %v5466_v52 = vmax.f32 %v5434_v54, 0.0  ;;  %v5472_v35 = vmax.f32 %v5440_v40, 0.0  ;;  %v5435_v26 = vadd.f32 %v9651_v20, %v5307_v12  ;;  %v5117_v10 = vpop.f32.mrf.mxu1  ;;  %v10349_v40 = vld [vmem:[#allocation58_spill] sm:$0xff] }
 0x6c3   : > { %v5441_v37 = vadd.f32 %v5375_v53, %v5313_v16  ;;  %v5436_v21 = vadd.f32 %v9689_v63, %v5308_v59  ;;  %v5442_v36 = vadd.f32 %v5380_v51, %v5314_v62  ;;  %v5309_v17 = vmul.f32 %v9555_v31, %v5181_v11  ;;  %v10340_v31 = vld [vmem:[#allocation3_spill] sm:$0xff]  ;;  %v5390_v50 = vpop.permute.xlu1 %5389  ;;  %v10351_v62 = vld [vmem:[#allocation25_spill] sm:$0xff] }
 0x6c4   : > { %v5315_v43 = vmul.f32 %v9571_v32, %v5187_v29  ;;  %v4705_v45 = vadd.f32 %v9561_v49, %v9677_v2  ;;  %5498 = vst [vmem:[%s9704_s23 + $0x10] sm:$0xff] %v5466_v52  ;;  %5504 = vst [vmem:[%s9704_s23 + $0x40] sm:$0xff] %v5472_v35  ;;  %v5467_v22 = vmax.f32 %v5435_v26, 0.0  ;;  %v5188_v20 = vadd.f32 %v5117_v10, %v4703_v15  ;;  %v5119_v33 = vpop.f32.mrf.mxu1  ;;  %v10341_v32 = vld [vmem:[#allocation30_spill] sm:$0xff]  ;;  %v10342_v15 = vld [vmem:[#allocation32_spill] sm:$0xff] }
 0x6c5   : > { %v5473_v4 = vmax.f32 %v5441_v37, 0.0  ;;  %v5468_v60 = vmax.f32 %v5436_v21, 0.0  ;;  %v5474_v30 = vmax.f32 %v5442_v36, 0.0  ;;  %v5437_v7 = vadd.f32 %v9689_v63, %v5309_v17  ;;  %v10348_v53 = vld [vmem:[#allocation11_spill] sm:$0xff]  ;;  %v10352_v29 = vld [vmem:[#allocation54_spill] sm:$0xff]  ;;  %v10353_v10 = vld [vmem:[#allocation24_spill] sm:$0xff] }
 0x6c6   : > { %v5443_v24 = vadd.f32 %v5380_v51, %v5315_v43  ;;  %v4222_v3 = vadd.f32 %v10340_v31, %v10339_v23  ;;  %5499 = vst [vmem:[%s9704_s23 + $0x18] sm:$0xff] %v5467_v22  ;;  %v5316_v49 = vmul.f32 %v10341_v32, %v5188_v20  ;;  %v5189_v2 = vadd.f32 %v5119_v33, %v4704_v57  ;;  %v5123_v28 = vpop.f32.mrf.mxu1  ;;  %v10346_v57 = vld [vmem:[#allocation53_spill] sm:$0xff]  ;;  %v10350_v59 = vld [vmem:[#allocation15_spill] sm:$0xff]  ;;  %v10354_v17 = vld [vmem:[#allocation62_spill] sm:$0xff]  ;;  %v5395_v22 = vpop.permute.xlu0 %5394 }
 0x6c7   : > { %5505 = vst [vmem:[%s9704_s23 + $0x48] sm:$0xff] %v5473_v4  ;;  %v4706_v41 = vadd.f32 %v10342_v15, %v9681_v14  ;;  %5500 = vst [vmem:[%s9704_s23 + $0x20] sm:$0xff] %v5468_v60  ;;  %v5469_v44 = vmax.f32 %v5437_v7, 0.0  ;;  %v5190_v27 = vadd.f32 %v5123_v28, %v4705_v45  ;;  %v4223_v42 = vadd.f32 %v10344_v8, %v10343_v47  ;;  %v10355_v43 = vld [vmem:[#allocation14_spill] sm:$0xff]  ;;  %v10356_v4 = vld [vmem:[#allocation31_spill] sm:$0xff] }
 0x6c8   : > { %5506 = vst [vmem:[%s9704_s23 + $0x50] sm:$0xff] %v5474_v30  ;;  %v5475_v63 = vmax.f32 %v5443_v24, 0.0  ;;  %v5444_v0 = vadd.f32 %v5385_v19, %v5316_v49  ;;  %v5317_v1 = vmul.f32 %v10341_v32, %v5189_v2  ;;  %v5125_v46 = vpop.f32.mrf.mxu1  ;;  %v4707_v34 = vadd.f32 %v10345_v38, %v4222_v3  ;;  %v10357_v23 = vld [vmem:[#allocation61_spill] sm:$0xff]  ;;  %v10358_v31 = vld [vmem:[#allocation66_spill] sm:$0xff]  ;;  %v10359_v32 = vld [vmem:[#allocation28_spill] sm:$0xff] }
 0x6c9   : > { %5501 = vst [vmem:[%s9704_s23 + $0x28] sm:$0xff] %v5469_v44  ;;  %v5318_v5 = vmul.f32 %v10346_v57, %v5190_v27  ;;  %v5191_v14 = vadd.f32 %v5125_v46, %v4706_v41  ;;  %v4224_v9 = vadd.f32 %v10348_v53, %v10347_v48  ;;  %v4708_v12 = vadd.f32 %v10349_v40, %v4223_v42  ;;  %v10360_v15 = vld [vmem:[#allocation5_spill] sm:$0xff]  ;;  %v10366_v53 = vld [vmem:[#allocation12_spill] sm:$0xff] }
 0x6ca   : > { %5507 = vst [vmem:[%s9704_s23 + $0x58] sm:$0xff] %v5475_v63  ;;  %v5476_v25 = vmax.f32 %v5444_v0, 0.0  ;;  %v5445_v56 = vadd.f32 %v5385_v19, %v5317_v1  ;;  %v5129_v54 = vpop.f32.mrf.mxu1  ;;  %v4225_v11 = vadd.f32 %v10351_v62, %v10350_v59  ;;  %v4226_v45 = vadd.f32 %v10355_v43, %v10354_v17  ;;  %v10361_v63 = vld [vmem:[#allocation16_spill] sm:$0xff]  ;;  %v10362_v27 = vld [vmem:[#allocation57_spill] sm:$0xff]  ;;  %v5400_v1 = vpop.permute.xlu1 %5399  ;;  %v10370_v62 = vld [vmem:[#allocation27_spill] sm:$0xff] }
 0x6cb   : > { %v5446_v16 = vadd.f32 %v5390_v50, %v5318_v5  ;;  %v5319_v18 = vmul.f32 %v10346_v57, %v5191_v14  ;;  %v5192_v13 = vadd.f32 %v5129_v54, %v4707_v34  ;;  %v4709_v51 = vadd.f32 %v10352_v29, %v4224_v9  ;;  %v10363_v46 = vld [vmem:[#allocation77_spill] sm:$0xff]  ;;  %v5405_v59 = vpop.permute.xlu0 %5404 }
 0x6cc   : > { %5508 = vst [vmem:[%s9704_s23 + $0x60] sm:$0xff] %v5476_v25  ;;  %v5477_v52 = vmax.f32 %v5445_v56, 0.0  ;;  %v5131_v35 = vpop.f32.mrf.mxu1  ;;  %v4710_v20 = vadd.f32 %v10356_v4, %v4225_v11  ;;  %v4227_v3 = vadd.f32 %v10358_v31, %v10357_v23  ;;  %v4711_v49 = vadd.f32 %v10359_v32, %v4226_v45  ;;  %v10364_v5 = vld [vmem:[#allocation81_spill] sm:$0xff]  ;;  %v10374_v4 = vld [vmem:[#allocation68_spill] sm:$0xff]  ;;  %v10377_v23 = vld [vmem:[#allocation10_spill] sm:$0xff] }
 0x6cd   : > { %v5478_v26 = vmax.f32 %v5446_v16, 0.0  ;;  %v5447_v37 = vadd.f32 %v5390_v50, %v5319_v18  ;;  %v5320_v21 = vmul.f32 %v10353_v10, %v5192_v13  ;;  %v5193_v36 = vadd.f32 %v5131_v35, %v4708_v12  ;;  %v10365_v14 = vld [vmem:[#allocation29_spill] sm:$0xff]  ;;  %v10368_v16 = vld [vmem:[#allocation72_spill] sm:$0xff] }
 0x6ce   : > { %5509 = vst [vmem:[%s9704_s23 + $0x68] sm:$0xff] %v5477_v52  ;;  %v5135_v33 = vpop.f32.mrf.mxu1  ;;  %v4228_v0 = vadd.f32 %v10362_v27, %v10361_v63  ;;  %v4712_v47 = vadd.f32 %v10363_v46, %v4227_v3  ;;  %v4229_v48 = vadd.f32 %v10365_v14, %v10364_v5  ;;  %v10367_v54 = vld [vmem:[#allocation17_spill] sm:$0xff]  ;;  %v10369_v18 = vld [vmem:[#allocation52_spill] sm:$0xff] }
 0x6cf   : > { %5510 = vst [vmem:[%s9704_s23 + $0x70] sm:$0xff] %v5478_v26  ;;  %v5479_v60 = vmax.f32 %v5447_v37, 0.0  ;;  %v5448_v30 = vadd.f32 %v5395_v22, %v5320_v21  ;;  %v5321_v7 = vmul.f32 %v10353_v10, %v5193_v36  ;;  %v5194_v24 = vadd.f32 %v5135_v33, %v4709_v51  ;;  %v10371_v37 = vld [vmem:[#allocation71_spill] sm:$0xff]  ;;  %v10372_v10 = vld [vmem:[#allocation78_spill] sm:$0xff]  ;;  %v10373_v36 = vld [vmem:[#allocation9_spill] sm:$0xff]  ;;  %v5415_v5 = vpop.permute.xlu0 %5414 }
 0x6d0   : > { %v5137_v2 = vpop.f32.mrf.mxu1  ;;  %v4713_v9 = vadd.f32 %v10366_v53, %v4228_v0  ;;  %v4230_v13 = vadd.f32 %v10369_v18, %v10368_v16  ;;  %v4714_v11 = vadd.f32 %v10370_v62, %v4229_v48  ;;  %v4231_v21 = vadd.f32 %v10372_v10, %v10371_v37  ;;  %v10384_v14 = vld [vmem:[#allocation60_spill] sm:$0xff]  ;;  %v10391_v37 = vld [vmem:[#allocation50_spill] sm:$0xff] }
 0x6d1   : > { %5511 = vst [vmem:[%s9704_s23 + $0x78] sm:$0xff] %v5479_v60  ;;  %v5480_v28 = vmax.f32 %v5448_v30, 0.0  ;;  %v5449_v19 = vadd.f32 %v5395_v22, %v5321_v7  ;;  %v5322_v41 = vmul.f32 %v10360_v15, %v5194_v24  ;;  %v5195_v44 = vadd.f32 %v5137_v2, %v4710_v20  ;;  %v10375_v60 = vld [vmem:[#allocation55_spill] sm:$0xff]  ;;  %v5410_v24 = vpop.permute.xlu1 %5409 }
 0x6d2   : > { %v5141_v8 = vpop.f32.mrf.mxu1  ;;  %v4715_v17 = vadd.f32 %v10373_v36, %v4230_v13  ;;  %v10376_v30 = vld [vmem:[#allocation67_spill] sm:$0xff]  ;;  %v4716_v31 = vadd.f32 %v10377_v23, %v4231_v21 }
 0x6d3   : > { %5512 = vst [vmem:[%s9704_s23 + $0x80] sm:$0xff] %v5480_v28  ;;  %v5481_v42 = vmax.f32 %v5449_v19, 0.0  ;;  %v5450_v38 = vadd.f32 %v5400_v1, %v5322_v41  ;;  %v5323_v34 = vmul.f32 %v10360_v15, %v5195_v44  ;;  %v5196_v57 = vadd.f32 %v5141_v8, %v4711_v49  ;;  %v10378_v19 = vld [vmem:[#allocation65_spill] sm:$0xff]  ;;  %v10379_v15 = vld [vmem:[#allocation51_spill] sm:$0xff]  ;;  %v10380_v44 = vld [vmem:[#allocation20_spill] sm:$0xff]  ;;  %v5425_v23 = vpop.permute.xlu0 %5424 }
 0x6d4   : > { %v5143_v50 = vpop.f32.mrf.mxu1  ;;  %v4232_v7 = vadd.f32 %v10376_v30, %v10375_v60  ;;  %v4233_v41 = vadd.f32 %v10379_v15, %v10378_v19  ;;  %v10381_v8 = vld [vmem:[#allocation6_spill] sm:$0xff]  ;;  %v10393_v30 = vld [vmem:[#allocation73_spill] sm:$0xff] }
 0x6d5   : > { %5513 = vst [vmem:[%s9704_s23 + $0x88] sm:$0xff] %v5481_v42  ;;  %v5482_v25 = vmax.f32 %v5450_v38, 0.0  ;;  %v5451_v56 = vadd.f32 %v5400_v1, %v5323_v34  ;;  %v5324_v40 = vmul.f32 %v10367_v54, %v5196_v57  ;;  %v5197_v12 = vadd.f32 %v5143_v50, %v4712_v47  ;;  %v10382_v42 = vld [vmem:[#allocation13_spill] sm:$0xff]  ;;  %v10383_v34 = vld [vmem:[#allocation64_spill] sm:$0xff] }
 0x6d6   : > { %v5147_v29 = vpop.f32.mrf.mxu1  ;;  %v4717_v63 = vadd.f32 %v10380_v44, %v4232_v7  ;;  %v3219_v38 = vadd.f32 %v10382_v42, %v10381_v8  ;;  %v4234_v57 = vadd.f32 %v9623_v6, %v10383_v34  ;;  %v4718_v48 = vadd.f32 %v10384_v14, %v4233_v41  ;;  %v10394_v41 = vld [vmem:[#allocation21_spill] sm:$0xff] }
 0x6d7   : > { %5514 = vst [vmem:[%s9704_s23 + $0x90] sm:$0xff] %v5482_v25  ;;  %v5483_v51 = vmax.f32 %v5451_v56, 0.0  ;;  %v5452_v52 = vadd.f32 %v5405_v59, %v5324_v40  ;;  %v5325_v35 = vmul.f32 %v10367_v54, %v5197_v12  ;;  %v5198_v26 = vadd.f32 %v5147_v29, %v4713_v9  ;;  %v10385_v54 = vld [vmem:[#allocation56_spill] sm:$0xff]  ;;  %v10386_v12 = vld [vmem:[#allocation79_spill] sm:$0xff] }
 0x6d8   : > { %v5149_v43 = vpop.f32.mrf.mxu1  ;;  %v4235_v40 = vadd.f32 %v9627_v39, %v10385_v54  ;;  %v4719_v16 = vadd.f32 %v10386_v12, %v4234_v57  ;;  %v10388_v29 = vld [vmem:[#allocation4_spill] sm:$0xff] }
 0x6d9   : > { %5515 = vst [vmem:[%s9704_s23 + $0x98] sm:$0xff] %v5483_v51  ;;  %v5484_v45 = vmax.f32 %v5452_v52, 0.0  ;;  %v5453_v22 = vadd.f32 %v5405_v59, %v5325_v35  ;;  %v5326_v20 = vmul.f32 %v10374_v4, %v5198_v26  ;;  %v5199_v33 = vadd.f32 %v5149_v43, %v4714_v11  ;;  %v10387_v59 = vld [vmem:[#allocation8_spill] sm:$0xff]  ;;  %v10389_v52 = vld [vmem:[#allocation26_spill] sm:$0xff]  ;;  %v10390_v35 = vld [vmem:[#allocation7_spill] sm:$0xff] }
 0x6da   : > { %v5153_v3 = vpop.f32.mrf.mxu1  ;;  %v3752_v51 = vadd.f32 %v10388_v29, %v3219_v38  ;;  %v4236_v26 = vadd.f32 %v10390_v35, %v10389_v52  ;;  %v4720_v10 = vadd.f32 %v10391_v37, %v4235_v40 }
 0x6db   : > { %5516 = vst [vmem:[%s9704_s23 + $0xa0] sm:$0xff] %v5484_v45  ;;  %v5485_v32 = vmax.f32 %v5453_v22, 0.0  ;;  %v5454_v49 = vadd.f32 %v5410_v24, %v5326_v20  ;;  %v5327_v2 = vmul.f32 %v10374_v4, %v5199_v33  ;;  %v5200_v28 = vadd.f32 %v5153_v3, %v4715_v17  ;;  %v10392_v22 = vld [vmem:[#allocation49_spill] sm:$0xff] }
 0x6dc   : > { %v5155_v27 = vpop.f32.mrf.mxu1  ;;  %v4237_v45 = vadd.f32 %v9661_v55, %v3752_v51  ;;  %v4721_v4 = vadd.f32 %v10392_v22, %v4236_v26 }
 0x6dd   : > { %5517 = vst [vmem:[%s9704_s23 + $0xa8] sm:$0xff] %v5485_v32  ;;  %v5486_v0 = vmax.f32 %v5454_v49, 0.0  ;;  %v5455_v1 = vadd.f32 %v5410_v24, %v5327_v2  ;;  %v5328_v46 = vmul.f32 %v9619_v61, %v5200_v28  ;;  %v5201_v47 = vadd.f32 %v5155_v27, %v4716_v31 }
 0x6de   : > { %v5159_v53 = vpop.f32.mrf.mxu1  ;;  %v4722_v31 = vadd.f32 %v9663_v58, %v4237_v45 }
 0x6df   : > { %5518 = vst [vmem:[%s9704_s23 + $0xb0] sm:$0xff] %v5486_v0  ;;  %v5487_v9 = vmax.f32 %v5455_v1, 0.0  ;;  %v5456_v50 = vadd.f32 %v5415_v5, %v5328_v46  ;;  %v5329_v25 = vmul.f32 %v9619_v61, %v5201_v47  ;;  %v5202_v56 = vadd.f32 %v5159_v53, %v4717_v63  ;;  %v5420_v61 = vpop.permute.xlu1 %5419 }
 0x6e0   : > { %v5161_v18 = vpop.f32.mrf.mxu1 }
 0x6e1   : > { %5519 = vst [vmem:[%s9704_s23 + $0xb8] sm:$0xff] %v5487_v9  ;;  %v5488_v13 = vmax.f32 %v5456_v50, 0.0  ;;  %v5457_v6 = vadd.f32 %v5415_v5, %v5329_v25  ;;  %v5330_v62 = vmul.f32 %v10387_v59, %v5202_v56  ;;  %v5203_v11 = vadd.f32 %v5161_v18, %v4718_v48 }
 0x6e2   : > { %v5165_v21 = vpop.f32.mrf.mxu1 }
 0x6e3   : > { %5520 = vst [vmem:[%s9704_s23 + $0xc0] sm:$0xff] %v5488_v13  ;;  %v5489_v39 = vmax.f32 %v5457_v6, 0.0  ;;  %v5458_v36 = vadd.f32 %v5420_v61, %v5330_v62  ;;  %v5331_v17 = vmul.f32 %v10387_v59, %v5203_v11  ;;  %v5204_v43 = vadd.f32 %v5165_v21, %v4719_v16  ;;  %v5430_v27 = vpop.permute.xlu1 %5429 }
 0x6e4   : > { %v5167_v20 = vpop.f32.mrf.mxu1 }
 0x6e5   : > { %5521 = vst [vmem:[%s9704_s23 + $0xc8] sm:$0xff] %v5489_v39  ;;  %v5490_v33 = vmax.f32 %v5458_v36, 0.0  ;;  %v5459_v60 = vadd.f32 %v5420_v61, %v5331_v17  ;;  %v5332_v7 = vmul.f32 %v10393_v30, %v5204_v43  ;;  %v5205_v24 = vadd.f32 %v5167_v20, %v4720_v10 }
 0x6e6   : > { %v5171_v3 = vpop.f32.mrf.mxu1 }
 0x6e7   : > { %5522 = vst [vmem:[%s9704_s23 + $0xd0] sm:$0xff] %v5490_v33  ;;  %v5491_v32 = vmax.f32 %v5459_v60, 0.0  ;;  %v5460_v49 = vadd.f32 %v5425_v23, %v5332_v7  ;;  %v5333_v55 = vmul.f32 %v10393_v30, %v5205_v24  ;;  %v5206_v2 = vadd.f32 %v5171_v3, %v4721_v4 }
 0x6e8   : > { %v5173_v28 = vpop.f32.mrf.mxu1 }
 0x6e9   : > { %5523 = vst [vmem:[%s9704_s23 + $0xd8] sm:$0xff] %v5491_v32  ;;  %v5492_v19 = vmax.f32 %v5460_v49, 0.0  ;;  %v5461_v15 = vadd.f32 %v5425_v23, %v5333_v55  ;;  %v5334_v44 = vmul.f32 %v10394_v41, %v5206_v2  ;;  %v5207_v63 = vadd.f32 %v5173_v28, %v4722_v31 }
 0x6eb   : > { %5524 = vst [vmem:[%s9704_s23 + $0xe0] sm:$0xff] %v5492_v19  ;;  %v5493_v58 = vmax.f32 %v5461_v15, 0.0  ;;  %v5462_v0 = vadd.f32 %v5430_v27, %v5334_v44  ;;  %v5335_v1 = vmul.f32 %v10394_v41, %v5207_v63 }
 0x6ed   : > { %5525 = vst [vmem:[%s9704_s23 + $0xe8] sm:$0xff] %v5493_v58  ;;  %v5494_v46 = vmax.f32 %v5462_v0, 0.0  ;;  %v5463_v47 = vadd.f32 %v5430_v27, %v5335_v1 }
 0x6ef   : > { %5526 = vst [vmem:[%s9704_s23 + $0xf0] sm:$0xff] %v5494_v46  ;;  %v5495_v8 = vmax.f32 %v5463_v47, 0.0 }
 0x6f1   : > { %5527 = vst [vmem:[%s9704_s23 + $0xf8] sm:$0xff] %v5495_v8 }
 0x6f2 PF: > { %s19_s30 = sadd.s32 1, %s5821_s30  }
 0x6f3   : > { %p16_p4 = scmp.ge.s32.totalorder %s19_s30, 4  }
 0x6f5   :  { %18 = sbr.rel (!%p16_p4) target bundleno = 1 (0x1), region = 105 }

</bundles_post_ra>
